<compile_context>
chip_gen: v7x
topology: tpu7x:2x2x1
jax: 0.10.0
libtpu: 0.0.40
codegen_flags: <defaults>
</compile_context>

<pallas_src>
import functools

import jax
import jax.numpy as jnp
from jax import lax
from jax.experimental import pallas as pl
from jax.experimental.pallas import tpu as pltpu


LN_EPS = 1e-6   # nn.TransformerEncoderLayer(..., layer_norm_eps=1e-06)


# ----------------------------------------------------------------------------
# In-kernel helpers
# ----------------------------------------------------------------------------
def _layer_norm(z, gamma, beta):
    mu = jnp.mean(z, axis=-1, keepdims=True)
    var = jnp.mean((z - mu) ** 2, axis=-1, keepdims=True)
    return (z - mu) * lax.rsqrt(var + LN_EPS) * gamma + beta


def _gelu_exact(x):
    # exact (erf-based) GELU, matching PyTorch activation='gelu'
    return 0.5 * x * (1.0 + lax.erf(x * 0.7071067811865476))


# ----------------------------------------------------------------------------
# Fused VIT kernel (one batch element per grid step, everything resident in VMEM)
# ----------------------------------------------------------------------------
def _vit_fused_kernel(patches_ref, projw_ref, posb_ref, wqkvo_ref, bq_ref,
                      vecs_ref, w1_ref, w2_ref, headw_ref, o_ref,
                      *, nhead, depth, fsteps):
    N = patches_ref.shape[0]
    D = posb_ref.shape[1]
    hd = D // nhead
    scale = jnp.float32(1.0 / (hd ** 0.5))

    # ---- patch embedding: (N, K) @ (K, D) + (pos + conv-bias pre-folded) -------
    x = (jnp.dot(patches_ref[...], projw_ref[...],
                 preferred_element_type=jnp.float32) + posb_ref[...])

    # ---- encoder rollout (post-norm TransformerEncoderLayer) -------------------
    # depth * fsteps = 6 here -> full static unroll is fine; convert these two
    # Python loops into lax.fori_loop with dynamic leading-axis ref indexing once
    # depth * fsteps grows past ~8 applications.
    for f in range(fsteps):
        for l in range(depth):
            vecs = vecs_ref[l]                                   # (8, D) f32
            bo, g1, be1 = vecs[0:1], vecs[1:2], vecs[2:3]
            bf1, bf2 = vecs[3:4], vecs[4:5]
            g2, be2 = vecs[5:6], vecs[6:7]

            xb = x.astype(jnp.bfloat16)
            attn = jnp.zeros((N, D), jnp.float32)
            for h in range(nhead):                               # static unroll
                wq = wqkvo_ref[l, 0, h]                          # (D, hd) bf16
                wk = wqkvo_ref[l, 1, h]
                wv = wqkvo_ref[l, 2, h]
                woT = wqkvo_ref[l, 3, h]                         # Wo_h^T: (D, hd)
                qh = (jnp.dot(xb, wq, preferred_element_type=jnp.float32)
                      + bq_ref[l, h])                            # (N, hd) f32
                kh = jnp.dot(xb, wk, preferred_element_type=jnp.float32)
                vh = jnp.dot(xb, wv, preferred_element_type=jnp.float32)
                # scores contract the hd axis directly (no kh.T relayout)
                s = lax.dot_general(qh, kh,
                                    dimension_numbers=(((1,), (1,)), ((), ())),
                                    preferred_element_type=jnp.float32) * scale
                s = s - jnp.max(s, axis=-1, keepdims=True)
                e = jnp.exp(s)
                a = e / jnp.sum(e, axis=-1, keepdims=True)       # exact softmax
                ctx = jnp.dot(a.astype(jnp.bfloat16), vh.astype(jnp.bfloat16),
                              preferred_element_type=jnp.float32)
                # fold the head straight into the output projection (no concat);
                # on v7x the 4 head projections can accumulate in-place in the MRB
                attn = attn + lax.dot_general(
                    ctx.astype(jnp.bfloat16), woT,
                    dimension_numbers=(((1,), (1,)), ((), ())),
                    preferred_element_type=jnp.float32)
            attn = attn + bo                                     # bo folds bv @ Wo

            h1 = _layer_norm(x + attn, g1, be1)
            h1b = h1.astype(jnp.bfloat16)
            ff = _gelu_exact(jnp.dot(h1b, w1_ref[l],
                                     preferred_element_type=jnp.float32) + bf1)
            ff = (jnp.dot(ff.astype(jnp.bfloat16), w2_ref[l],
                          preferred_element_type=jnp.float32) + bf2)
            x = _layer_norm(h1 + ff, g2, be2)

        # ---- prediction head for this forecast step (latents never hit HBM) ----
        y = jnp.dot(x.astype(jnp.bfloat16), headw_ref[...],
                    preferred_element_type=jnp.float32)
        o_ref[f] = jax.nn.sigmoid(y)                             # (N, P)


def vit_fused_pallas(patches, projw, posb, wqkvo, bq, vecs, w1s, w2s, headw,
                     *, nhead, depth, fsteps):
    B, N, K = patches.shape
    D = posb.shape[1]
    P = headw.shape[1]
    kernel = functools.partial(_vit_fused_kernel, nhead=nhead, depth=depth,
                               fsteps=fsteps)

    def whole(arr):
        nd = arr.ndim
        return pl.BlockSpec(arr.shape, lambda b, _n=nd: (0,) * _n)  # resident weights

    grid_spec = pltpu.PrefetchScalarGridSpec(
        num_scalar_prefetch=0,
        grid=(B,),
        in_specs=[
            pl.BlockSpec((None, N, K), lambda b: (b, 0, 0)),     # per-batch patches
            whole(projw), whole(posb), whole(wqkvo), whole(bq),
            whole(vecs), whole(w1s), whole(w2s), whole(headw),
        ],
        out_specs=pl.BlockSpec((None, fsteps, N, P), lambda b: (b, 0, 0, 0)),
    )
    return pl.pallas_call(
        kernel,
        out_shape=jax.ShapeDtypeStruct((B, fsteps, N, P), jnp.float32),
        grid_spec=grid_spec,
        compiler_params=pltpu.CompilerParams(
            dimension_semantics=("parallel",)),                  # both TCs on v7x
    )(patches, projw, posb, wqkvo, bq, vecs, w1s, w2s, headw)


# ----------------------------------------------------------------------------
# Host-side weight packing (bf16 MXU operands, per-head split, bias folding)
# ----------------------------------------------------------------------------
def _prep_pallas_params(params, nhead):
    D = params['proj_w'].shape[1]
    hd = D // nhead
    wqkvo, bq, vecs, w1s, w2s = [], [], [], [], []
    for lp in params['layers']:
        (wqkv, bqkv, wo, bo, g1, be1, w1, bf1, w2, bf2, g2, be2) = lp
        wq = wqkv[:, :D].reshape(D, nhead, hd).transpose(1, 0, 2)       # (H, D, hd)
        wk = wqkv[:, D:2 * D].reshape(D, nhead, hd).transpose(1, 0, 2)
        wv = wqkv[:, 2 * D:].reshape(D, nhead, hd).transpose(1, 0, 2)
        woT = wo.reshape(nhead, hd, D).transpose(0, 2, 1)               # Wo_h^T
        wqkvo.append(jnp.stack([wq, wk, wv, woT], axis=0))              # (4, H, D, hd)
        bq.append(bqkv[0, :D].reshape(nhead, 1, hd))                    # (H, 1, hd)
        # bk dropped (softmax row-constant); bv folded into bo: bo_eff = bo + bv @ Wo
        bv = bqkv[:, 2 * D:]
        bo_eff = bo + bv @ wo
        vecs.append(jnp.concatenate(
            [bo_eff, g1, be1, bf1, bf2, g2, be2,
             jnp.zeros((1, D), jnp.float32)], axis=0))                  # (8, D)
        w1s.append(w1)
        w2s.append(w2)
    return (jnp.stack(wqkvo).astype(jnp.bfloat16),
            jnp.stack(bq).astype(jnp.float32),
            jnp.stack(vecs).astype(jnp.float32),
            jnp.stack(w1s).astype(jnp.bfloat16),
            jnp.stack(w2s).astype(jnp.bfloat16))


# ----------------------------------------------------------------------------
# Pure-JAX reference (same math, f32) for self-checking
# ----------------------------------------------------------------------------
def encoder_layer_ref(x, p, nhead):
    wqkv, bqkv, wo, bo, g1, be1, w1, bf1, w2, bf2, g2, be2 = p
    B, N, D = x.shape
    hd = D // nhead
    qkv = x @ wqkv + bqkv
    q, k, v = qkv[..., :D], qkv[..., D:2 * D], qkv[..., 2 * D:]

    def split(t):
        return t.reshape(B, N, nhead, hd).transpose(0, 2, 1, 3)

    q, k, v = split(q), split(k), split(v)
    s = jnp.einsum('bhqd,bhkd->bhqk', q, k) / jnp.sqrt(jnp.float32(hd))
    a = jax.nn.softmax(s, axis=-1)
    ctx = jnp.einsum('bhqk,bhkd->bhqd', a, v).transpose(0, 2, 1, 3).reshape(B, N, D)
    attn = ctx @ wo + bo

    def ln(z, g, b):
        mu = jnp.mean(z, axis=-1, keepdims=True)
        var = jnp.mean((z - mu) ** 2, axis=-1, keepdims=True)
        return (z - mu) / jnp.sqrt(var + LN_EPS) * g + b

    h1 = ln(x + attn, g1, be1)
    f = jax.nn.gelu(h1 @ w1 + bf1, approximate=False) @ w2 + bf2
    return ln(h1 + f, g2, be2)


# ----------------------------------------------------------------------------
# Full VIT forward
# ----------------------------------------------------------------------------
def vit_forward(x, grid_in, params, config, img_size, use_pallas=True):
    xin = jnp.concatenate([x, grid_in], axis=-1)                     # (B, H, W, C)
    B, H, W, C = xin.shape
    p1, p2 = config['PATCH_SIZE']
    ph, pw = H // p1, W // p2
    N = ph * pw
    Fsteps = config['TIME_STEPS_OUT']
    nhead = config['NHEAD']
    depth = config['DEPTH']

    # b h w c -> b c h w, then patchify (== Conv2d with kernel==stride==patch)
    xc = jnp.transpose(xin, (0, 3, 1, 2))
    patches = xc.reshape(B, C, ph, p1, pw, p2)
    patches = jnp.transpose(patches, (0, 2, 4, 1, 3, 5)).reshape(B, N, C * p1 * p2)

    if use_pallas:
        posb = (params['pos'] + params['proj_b']).astype(jnp.float32)  # (N, D)
        wqkvo, bq, vecs, w1s, w2s = _prep_pallas_params(params, nhead)
        y = vit_fused_pallas(
            patches.astype(jnp.bfloat16),
            params['proj_w'].astype(jnp.bfloat16),
            posb, wqkvo, bq, vecs, w1s, w2s,
            params['head_w'].astype(jnp.bfloat16),
            nhead=nhead, depth=depth, fsteps=Fsteps)                  # (B, F, N, P)
        # b f (h w) (p1 p2) -> b (h p1) (w p2) f
        y = y.reshape(B, Fsteps, ph, pw, p1, p2)
        y = jnp.transpose(y, (0, 2, 4, 3, 5, 1))
        return y.reshape(B, ph * p1, pw * p2, Fsteps)

    # ---------------- pure-JAX reference path ----------------
    D = config['LATENT_DIMS']
    tokens = patches @ params['proj_w'] + params['proj_b'] + params['pos']
    latents = []
    for _ in range(Fsteps):
        for lp in params['layers']:
            tokens = encoder_layer_ref(tokens, lp, nhead)
        latents.append(tokens)
    latent_states = jnp.stack(latents, axis=1)                        # (B, F, N, D)
    yr = jax.nn.sigmoid(latent_states.reshape(B * Fsteps * N, D) @ params['head_w'])
    yr = yr.reshape(B, Fsteps, ph, pw, p1, p2, 1)
    yr = jnp.transpose(yr, (0, 2, 4, 3, 5, 1, 6)).reshape(B, ph * p1, pw * p2, Fsteps)
    return yr


# ----------------------------------------------------------------------------
# Deterministic parameter init (shapes from the module __init__)
# ----------------------------------------------------------------------------
def init_params(key, config, img_size):
    D = config['LATENT_DIMS']
    p1, p2 = config['PATCH_SIZE']
    C = config['TIME_STEPS_IN'] + 2
    ph, pw = img_size[0] // p1, img_size[1] // p2
    N = ph * pw
    K = C * p1 * p2
    Dff = D                      # dim_feedforward == latent_dims in the module ctor
    P = p1 * p2                  # out_dims(=1) * p1 * p2

    keys = iter(jax.random.split(key, 128))

    def rand(shape, scale=0.1):
        return (scale * jax.random.normal(next(keys), shape)).astype(jnp.float32)

    params = {
        'proj_w': rand((K, D)),          # conv weight (D, C, p1, p2) flattened & transposed
        'proj_b': rand((1, D)),
        'pos': rand((N, D), 0.02),
        'head_w': rand((D, P)),          # nn.Linear(D, P, bias=False)
        'layers': [],
    }
    for _ in range(config['DEPTH']):
        params['layers'].append((
            rand((D, 3 * D)), rand((1, 3 * D)),              # in-proj qkv
            rand((D, D)), rand((1, D)),                      # attn out-proj
            jnp.ones((1, D), jnp.float32), jnp.zeros((1, D), jnp.float32),   # LN1
            rand((D, Dff)), rand((1, Dff)),                  # FF linear1
            rand((Dff, D)), rand((1, D)),                    # FF linear2
            jnp.ones((1, D), jnp.float32), jnp.zeros((1, D), jnp.float32),   # LN2
        ))
    return params


# ----------------------------------------------------------------------------
if __name__ == "__main__":
    config = dict(LATENT_DIMS=32, TIME_STEPS_OUT=3, PATCH_SIZE=(4, 4),
                  TIME_STEPS_IN=2, DEPTH=2, NHEAD=4, DROPOUT=0.0)
    img_size = (16, 16)
    B = 2

    key = jax.random.PRNGKey(0)
    kx, kg, kp = jax.random.split(key, 3)
    x = jax.random.normal(kx, (B, img_size[0], img_size[1], config['TIME_STEPS_IN']),
                          dtype=jnp.float32)
    grid_coords = jax.random.normal(kg, (B, img_size[0], img_size[1], 2),
                                    dtype=jnp.float32)
    params = init_params(kp, config, img_size)

    out = vit_forward(x, grid_coords, params, config, img_size, use_pallas=True)
    out = jax.block_until_ready(out)

    ref = vit_forward(x, grid_coords, params, config, img_size, use_pallas=False)
    ref = jax.block_until_ready(ref)

    assert out.shape == (B, img_size[0], img_size[1], config['TIME_STEPS_OUT']), out.shape
    # tolerance covers bf16 MXU operands across the depth*fsteps = 6 rollout steps
    # (softmax / LayerNorm / residual math stays f32; softmax reciprocal is exact)
    assert jnp.allclose(out, ref, atol=3e-2, rtol=3e-2), "Pallas output mismatch vs reference"
    print("KERNEL_OK")
</pallas_src>

<mosaic_0001>
module attributes {stable_mosaic.version = 11 : i64} {
  func.func @_vit_fused_kernel(%arg0: i32, %arg1: memref<1x16x64xbf16, #tpu.memory_space<vmem>>, %arg2: memref<64x32xbf16, #tpu.memory_space<vmem>>, %arg3: memref<16x32xf32, #tpu.memory_space<vmem>>, %arg4: memref<2x4x4x32x8xbf16, #tpu.memory_space<vmem>>, %arg5: memref<2x4x1x8xf32, #tpu.memory_space<vmem>>, %arg6: memref<2x8x32xf32, #tpu.memory_space<vmem>>, %arg7: memref<2x32x32xbf16, #tpu.memory_space<vmem>>, %arg8: memref<2x32x32xbf16, #tpu.memory_space<vmem>>, %arg9: memref<32x16xbf16, #tpu.memory_space<vmem>>, %arg10: memref<1x3x16x16xf32, #tpu.memory_space<vmem>>) attributes {dimension_semantics = [#tpu.dimension_semantics<parallel>], iteration_bounds = array<i64: 2>, scalar_prefetch = 0 : i64, scratch_operands = 0 : i64, tpu.core_type = #tpu.core_type<tc>, window_params = [{transform_indices = @transform_0, window_bounds = array<i64: 1, 16, 64>}, {pipeline_mode = #tpu.pipeline_mode<synchronous>, transform_indices = @transform_1, window_bounds = array<i64: 64, 32>}, {pipeline_mode = #tpu.pipeline_mode<synchronous>, transform_indices = @transform_2, window_bounds = array<i64: 16, 32>}, {pipeline_mode = #tpu.pipeline_mode<synchronous>, transform_indices = @transform_3, window_bounds = array<i64: 2, 4, 4, 32, 8>}, {pipeline_mode = #tpu.pipeline_mode<synchronous>, transform_indices = @transform_4, window_bounds = array<i64: 2, 4, 1, 8>}, {pipeline_mode = #tpu.pipeline_mode<synchronous>, transform_indices = @transform_5, window_bounds = array<i64: 2, 8, 32>}, {pipeline_mode = #tpu.pipeline_mode<synchronous>, transform_indices = @transform_6, window_bounds = array<i64: 2, 32, 32>}, {pipeline_mode = #tpu.pipeline_mode<synchronous>, transform_indices = @transform_7, window_bounds = array<i64: 2, 32, 32>}, {pipeline_mode = #tpu.pipeline_mode<synchronous>, transform_indices = @transform_8, window_bounds = array<i64: 32, 16>}, {transform_indices = @transform_9, window_bounds = array<i64: 1, 3, 16, 16>}]} {
    %c0 = arith.constant 0 : index
    %c0_0 = arith.constant 0 : index
    %c0_1 = arith.constant 0 : index
    %0 = vector.load %arg1[%c0, %c0_0, %c0_1] : memref<1x16x64xbf16, #tpu.memory_space<vmem>>, vector<1x16x64xbf16>
    %1 = vector.shape_cast %0 : vector<1x16x64xbf16> to vector<16x64xbf16>
    %c0_2 = arith.constant 0 : index
    %c0_3 = arith.constant 0 : index
    %2 = vector.load %arg2[%c0_2, %c0_3] : memref<64x32xbf16, #tpu.memory_space<vmem>>, vector<64x32xbf16>
    %cst = arith.constant dense<0.000000e+00> : vector<16x32xf32>
    %3 = tpu.matmul %1, %2, %cst {dimension_numbers = #tpu.dot_dimension_numbers<[1], [0], [0], [1], [0, 0, 1, 1], [], []>} : vector<16x64xbf16>, vector<64x32xbf16>, vector<16x32xf32> -> vector<16x32xf32>
    %c0_4 = arith.constant 0 : index
    %c0_5 = arith.constant 0 : index
    %4 = vector.load %arg3[%c0_4, %c0_5] : memref<16x32xf32, #tpu.memory_space<vmem>>, vector<16x32xf32>
    %5 = arith.addf %3, %4 : vector<16x32xf32>
    %c0_6 = arith.constant 0 : index
    %c0_7 = arith.constant 0 : index
    %c0_8 = arith.constant 0 : index
    %6 = vector.load %arg6[%c0_6, %c0_7, %c0_8] : memref<2x8x32xf32, #tpu.memory_space<vmem>>, vector<1x8x32xf32>
    %7 = vector.shape_cast %6 : vector<1x8x32xf32> to vector<8x32xf32>
    %8 = vector.extract_strided_slice %7 {offsets = [0, 0], sizes = [1, 32], strides = [1, 1]} : vector<8x32xf32> to vector<1x32xf32>
    %9 = vector.extract_strided_slice %7 {offsets = [1, 0], sizes = [1, 32], strides = [1, 1]} : vector<8x32xf32> to vector<1x32xf32>
    %10 = vector.extract_strided_slice %7 {offsets = [2, 0], sizes = [1, 32], strides = [1, 1]} : vector<8x32xf32> to vector<1x32xf32>
    %11 = vector.extract_strided_slice %7 {offsets = [3, 0], sizes = [1, 32], strides = [1, 1]} : vector<8x32xf32> to vector<1x32xf32>
    %12 = vector.extract_strided_slice %7 {offsets = [4, 0], sizes = [1, 32], strides = [1, 1]} : vector<8x32xf32> to vector<1x32xf32>
    %13 = vector.extract_strided_slice %7 {offsets = [5, 0], sizes = [1, 32], strides = [1, 1]} : vector<8x32xf32> to vector<1x32xf32>
    %14 = vector.extract_strided_slice %7 {offsets = [6, 0], sizes = [1, 32], strides = [1, 1]} : vector<8x32xf32> to vector<1x32xf32>
    %15 = arith.truncf %5 : vector<16x32xf32> to vector<16x32xbf16>
    %cst_9 = arith.constant 0.000000e+00 : f32
    %16 = vector.broadcast %cst_9 : f32 to vector<16x32xf32>
    %c0_10 = arith.constant 0 : index
    %c0_11 = arith.constant 0 : index
    %c0_12 = arith.constant 0 : index
    %c0_13 = arith.constant 0 : index
    %c0_14 = arith.constant 0 : index
    %17 = vector.load %arg4[%c0_10, %c0_11, %c0_12, %c0_13, %c0_14] : memref<2x4x4x32x8xbf16, #tpu.memory_space<vmem>>, vector<1x1x1x32x8xbf16>
    %18 = vector.shape_cast %17 : vector<1x1x1x32x8xbf16> to vector<32x8xbf16>
    %c0_15 = arith.constant 0 : index
    %c1 = arith.constant 1 : index
    %c0_16 = arith.constant 0 : index
    %c0_17 = arith.constant 0 : index
    %c0_18 = arith.constant 0 : index
    %19 = vector.load %arg4[%c0_15, %c1, %c0_16, %c0_17, %c0_18] : memref<2x4x4x32x8xbf16, #tpu.memory_space<vmem>>, vector<1x1x1x32x8xbf16>
    %20 = vector.shape_cast %19 : vector<1x1x1x32x8xbf16> to vector<32x8xbf16>
    %c0_19 = arith.constant 0 : index
    %c2 = arith.constant 2 : index
    %c0_20 = arith.constant 0 : index
    %c0_21 = arith.constant 0 : index
    %c0_22 = arith.constant 0 : index
    %21 = vector.load %arg4[%c0_19, %c2, %c0_20, %c0_21, %c0_22] : memref<2x4x4x32x8xbf16, #tpu.memory_space<vmem>>, vector<1x1x1x32x8xbf16>
    %22 = vector.shape_cast %21 : vector<1x1x1x32x8xbf16> to vector<32x8xbf16>
    %c0_23 = arith.constant 0 : index
    %c3 = arith.constant 3 : index
    %c0_24 = arith.constant 0 : index
    %c0_25 = arith.constant 0 : index
    %c0_26 = arith.constant 0 : index
    %23 = vector.load %arg4[%c0_23, %c3, %c0_24, %c0_25, %c0_26] : memref<2x4x4x32x8xbf16, #tpu.memory_space<vmem>>, vector<1x1x1x32x8xbf16>
    %24 = vector.shape_cast %23 : vector<1x1x1x32x8xbf16> to vector<32x8xbf16>
    %cst_27 = arith.constant dense<0.000000e+00> : vector<16x8xf32>
    %25 = tpu.matmul %15, %18, %cst_27 {dimension_numbers = #tpu.dot_dimension_numbers<[1], [0], [0], [1], [0, 0, 1, 1], [], []>} : vector<16x32xbf16>, vector<32x8xbf16>, vector<16x8xf32> -> vector<16x8xf32>
    %c0_28 = arith.constant 0 : index
    %c0_29 = arith.constant 0 : index
    %c0_30 = arith.constant 0 : index
    %c0_31 = arith.constant 0 : index
    %26 = vector.load %arg5[%c0_28, %c0_29, %c0_30, %c0_31] : memref<2x4x1x8xf32, #tpu.memory_space<vmem>>, vector<1x1x1x8xf32>
    %27 = vector.shape_cast %26 : vector<1x1x1x8xf32> to vector<1x8xf32>
    %28 = vector.broadcast %27 : vector<1x8xf32> to vector<16x8xf32>
    %29 = arith.addf %25, %28 : vector<16x8xf32>
    %cst_32 = arith.constant dense<0.000000e+00> : vector<16x8xf32>
    %30 = tpu.matmul %15, %20, %cst_32 {dimension_numbers = #tpu.dot_dimension_numbers<[1], [0], [0], [1], [0, 0, 1, 1], [], []>} : vector<16x32xbf16>, vector<32x8xbf16>, vector<16x8xf32> -> vector<16x8xf32>
    %cst_33 = arith.constant dense<0.000000e+00> : vector<16x8xf32>
    %31 = tpu.matmul %15, %22, %cst_33 {dimension_numbers = #tpu.dot_dimension_numbers<[1], [0], [0], [1], [0, 0, 1, 1], [], []>} : vector<16x32xbf16>, vector<32x8xbf16>, vector<16x8xf32> -> vector<16x8xf32>
    %cst_34 = arith.constant dense<0.000000e+00> : vector<16x16xf32>
    %32 = tpu.matmul %29, %30, %cst_34 {dimension_numbers = #tpu.dot_dimension_numbers<[1], [1], [0], [0], [0, 0, 1, 0], [], []>} : vector<16x8xf32>, vector<16x8xf32>, vector<16x16xf32> -> vector<16x16xf32>
    %cst_35 = arith.constant 0.353553385 : f32
    %33 = vector.broadcast %cst_35 : f32 to vector<16x16xf32>
    %34 = arith.mulf %32, %33 : vector<16x16xf32>
    %cst_36 = arith.constant dense<0xFF800000> : vector<16xf32>
    %35 = vector.multi_reduction <maximumf>, %34, %cst_36 [1] : vector<16x16xf32> to vector<16xf32>
    %36 = vector.shape_cast %35 : vector<16xf32> to vector<16x1xf32>
    %37 = vector.broadcast %36 : vector<16x1xf32> to vector<16x16xf32>
    %38 = arith.subf %34, %37 : vector<16x16xf32>
    %39 = math.exp %38 : vector<16x16xf32>
    %cst_37 = arith.constant dense<0.000000e+00> : vector<16xf32>
    %40 = vector.multi_reduction <add>, %39, %cst_37 [1] : vector<16x16xf32> to vector<16xf32>
    %41 = vector.shape_cast %40 : vector<16xf32> to vector<16x1xf32>
    %42 = vector.broadcast %41 : vector<16x1xf32> to vector<16x16xf32>
    %43 = arith.divf %39, %42 : vector<16x16xf32>
    %44 = arith.truncf %43 : vector<16x16xf32> to vector<16x16xbf16>
    %45 = arith.truncf %31 : vector<16x8xf32> to vector<16x8xbf16>
    %cst_38 = arith.constant dense<0.000000e+00> : vector<16x8xf32>
    %46 = tpu.matmul %44, %45, %cst_38 {dimension_numbers = #tpu.dot_dimension_numbers<[1], [0], [0], [1], [0, 0, 1, 1], [], []>} : vector<16x16xbf16>, vector<16x8xbf16>, vector<16x8xf32> -> vector<16x8xf32>
    %47 = arith.truncf %46 : vector<16x8xf32> to vector<16x8xbf16>
    %cst_39 = arith.constant dense<0.000000e+00> : vector<16x32xf32>
    %48 = tpu.matmul %47, %24, %cst_39 {dimension_numbers = #tpu.dot_dimension_numbers<[1], [1], [0], [0], [0, 0, 1, 0], [], []>} : vector<16x8xbf16>, vector<32x8xbf16>, vector<16x32xf32> -> vector<16x32xf32>
    %49 = arith.addf %16, %48 : vector<16x32xf32>
    %c0_40 = arith.constant 0 : index
    %c0_41 = arith.constant 0 : index
    %c1_42 = arith.constant 1 : index
    %c0_43 = arith.constant 0 : index
    %c0_44 = arith.constant 0 : index
    %50 = vector.load %arg4[%c0_40, %c0_41, %c1_42, %c0_43, %c0_44] : memref<2x4x4x32x8xbf16, #tpu.memory_space<vmem>>, vector<1x1x1x32x8xbf16>
    %51 = vector.shape_cast %50 : vector<1x1x1x32x8xbf16> to vector<32x8xbf16>
    %c0_45 = arith.constant 0 : index
    %c1_46 = arith.constant 1 : index
    %c1_47 = arith.constant 1 : index
    %c0_48 = arith.constant 0 : index
    %c0_49 = arith.constant 0 : index
    %52 = vector.load %arg4[%c0_45, %c1_46, %c1_47, %c0_48, %c0_49] : memref<2x4x4x32x8xbf16, #tpu.memory_space<vmem>>, vector<1x1x1x32x8xbf16>
    %53 = vector.shape_cast %52 : vector<1x1x1x32x8xbf16> to vector<32x8xbf16>
    %c0_50 = arith.constant 0 : index
    %c2_51 = arith.constant 2 : index
    %c1_52 = arith.constant 1 : index
    %c0_53 = arith.constant 0 : index
    %c0_54 = arith.constant 0 : index
    %54 = vector.load %arg4[%c0_50, %c2_51, %c1_52, %c0_53, %c0_54] : memref<2x4x4x32x8xbf16, #tpu.memory_space<vmem>>, vector<1x1x1x32x8xbf16>
    %55 = vector.shape_cast %54 : vector<1x1x1x32x8xbf16> to vector<32x8xbf16>
    %c0_55 = arith.constant 0 : index
    %c3_56 = arith.constant 3 : index
    %c1_57 = arith.constant 1 : index
    %c0_58 = arith.constant 0 : index
    %c0_59 = arith.constant 0 : index
    %56 = vector.load %arg4[%c0_55, %c3_56, %c1_57, %c0_58, %c0_59] : memref<2x4x4x32x8xbf16, #tpu.memory_space<vmem>>, vector<1x1x1x32x8xbf16>
    %57 = vector.shape_cast %56 : vector<1x1x1x32x8xbf16> to vector<32x8xbf16>
    %cst_60 = arith.constant dense<0.000000e+00> : vector<16x8xf32>
    %58 = tpu.matmul %15, %51, %cst_60 {dimension_numbers = #tpu.dot_dimension_numbers<[1], [0], [0], [1], [0, 0, 1, 1], [], []>} : vector<16x32xbf16>, vector<32x8xbf16>, vector<16x8xf32> -> vector<16x8xf32>
    %c0_61 = arith.constant 0 : index
    %c1_62 = arith.constant 1 : index
    %c0_63 = arith.constant 0 : index
    %c0_64 = arith.constant 0 : index
    %59 = vector.load %arg5[%c0_61, %c1_62, %c0_63, %c0_64] : memref<2x4x1x8xf32, #tpu.memory_space<vmem>>, vector<1x1x1x8xf32>
    %60 = vector.shape_cast %59 : vector<1x1x1x8xf32> to vector<1x8xf32>
    %61 = vector.broadcast %60 : vector<1x8xf32> to vector<16x8xf32>
    %62 = arith.addf %58, %61 : vector<16x8xf32>
    %cst_65 = arith.constant dense<0.000000e+00> : vector<16x8xf32>
    %63 = tpu.matmul %15, %53, %cst_65 {dimension_numbers = #tpu.dot_dimension_numbers<[1], [0], [0], [1], [0, 0, 1, 1], [], []>} : vector<16x32xbf16>, vector<32x8xbf16>, vector<16x8xf32> -> vector<16x8xf32>
    %cst_66 = arith.constant dense<0.000000e+00> : vector<16x8xf32>
    %64 = tpu.matmul %15, %55, %cst_66 {dimension_numbers = #tpu.dot_dimension_numbers<[1], [0], [0], [1], [0, 0, 1, 1], [], []>} : vector<16x32xbf16>, vector<32x8xbf16>, vector<16x8xf32> -> vector<16x8xf32>
    %cst_67 = arith.constant dense<0.000000e+00> : vector<16x16xf32>
    %65 = tpu.matmul %62, %63, %cst_67 {dimension_numbers = #tpu.dot_dimension_numbers<[1], [1], [0], [0], [0, 0, 1, 0], [], []>} : vector<16x8xf32>, vector<16x8xf32>, vector<16x16xf32> -> vector<16x16xf32>
    %cst_68 = arith.constant 0.353553385 : f32
    %66 = vector.broadcast %cst_68 : f32 to vector<16x16xf32>
    %67 = arith.mulf %65, %66 : vector<16x16xf32>
    %cst_69 = arith.constant dense<0xFF800000> : vector<16xf32>
    %68 = vector.multi_reduction <maximumf>, %67, %cst_69 [1] : vector<16x16xf32> to vector<16xf32>
    %69 = vector.shape_cast %68 : vector<16xf32> to vector<16x1xf32>
    %70 = vector.broadcast %69 : vector<16x1xf32> to vector<16x16xf32>
    %71 = arith.subf %67, %70 : vector<16x16xf32>
    %72 = math.exp %71 : vector<16x16xf32>
    %cst_70 = arith.constant dense<0.000000e+00> : vector<16xf32>
    %73 = vector.multi_reduction <add>, %72, %cst_70 [1] : vector<16x16xf32> to vector<16xf32>
    %74 = vector.shape_cast %73 : vector<16xf32> to vector<16x1xf32>
    %75 = vector.broadcast %74 : vector<16x1xf32> to vector<16x16xf32>
    %76 = arith.divf %72, %75 : vector<16x16xf32>
    %77 = arith.truncf %76 : vector<16x16xf32> to vector<16x16xbf16>
    %78 = arith.truncf %64 : vector<16x8xf32> to vector<16x8xbf16>
    %cst_71 = arith.constant dense<0.000000e+00> : vector<16x8xf32>
    %79 = tpu.matmul %77, %78, %cst_71 {dimension_numbers = #tpu.dot_dimension_numbers<[1], [0], [0], [1], [0, 0, 1, 1], [], []>} : vector<16x16xbf16>, vector<16x8xbf16>, vector<16x8xf32> -> vector<16x8xf32>
    %80 = arith.truncf %79 : vector<16x8xf32> to vector<16x8xbf16>
    %cst_72 = arith.constant dense<0.000000e+00> : vector<16x32xf32>
    %81 = tpu.matmul %80, %57, %cst_72 {dimension_numbers = #tpu.dot_dimension_numbers<[1], [1], [0], [0], [0, 0, 1, 0], [], []>} : vector<16x8xbf16>, vector<32x8xbf16>, vector<16x32xf32> -> vector<16x32xf32>
    %82 = arith.addf %49, %81 : vector<16x32xf32>
    %c0_73 = arith.constant 0 : index
    %c0_74 = arith.constant 0 : index
    %c2_75 = arith.constant 2 : index
    %c0_76 = arith.constant 0 : index
    %c0_77 = arith.constant 0 : index
    %83 = vector.load %arg4[%c0_73, %c0_74, %c2_75, %c0_76, %c0_77] : memref<2x4x4x32x8xbf16, #tpu.memory_space<vmem>>, vector<1x1x1x32x8xbf16>
    %84 = vector.shape_cast %83 : vector<1x1x1x32x8xbf16> to vector<32x8xbf16>
    %c0_78 = arith.constant 0 : index
    %c1_79 = arith.constant 1 : index
    %c2_80 = arith.constant 2 : index
    %c0_81 = arith.constant 0 : index
    %c0_82 = arith.constant 0 : index
    %85 = vector.load %arg4[%c0_78, %c1_79, %c2_80, %c0_81, %c0_82] : memref<2x4x4x32x8xbf16, #tpu.memory_space<vmem>>, vector<1x1x1x32x8xbf16>
    %86 = vector.shape_cast %85 : vector<1x1x1x32x8xbf16> to vector<32x8xbf16>
    %c0_83 = arith.constant 0 : index
    %c2_84 = arith.constant 2 : index
    %c2_85 = arith.constant 2 : index
    %c0_86 = arith.constant 0 : index
    %c0_87 = arith.constant 0 : index
    %87 = vector.load %arg4[%c0_83, %c2_84, %c2_85, %c0_86, %c0_87] : memref<2x4x4x32x8xbf16, #tpu.memory_space<vmem>>, vector<1x1x1x32x8xbf16>
    %88 = vector.shape_cast %87 : vector<1x1x1x32x8xbf16> to vector<32x8xbf16>
    %c0_88 = arith.constant 0 : index
    %c3_89 = arith.constant 3 : index
    %c2_90 = arith.constant 2 : index
    %c0_91 = arith.constant 0 : index
    %c0_92 = arith.constant 0 : index
    %89 = vector.load %arg4[%c0_88, %c3_89, %c2_90, %c0_91, %c0_92] : memref<2x4x4x32x8xbf16, #tpu.memory_space<vmem>>, vector<1x1x1x32x8xbf16>
    %90 = vector.shape_cast %89 : vector<1x1x1x32x8xbf16> to vector<32x8xbf16>
    %cst_93 = arith.constant dense<0.000000e+00> : vector<16x8xf32>
    %91 = tpu.matmul %15, %84, %cst_93 {dimension_numbers = #tpu.dot_dimension_numbers<[1], [0], [0], [1], [0, 0, 1, 1], [], []>} : vector<16x32xbf16>, vector<32x8xbf16>, vector<16x8xf32> -> vector<16x8xf32>
    %c0_94 = arith.constant 0 : index
    %c2_95 = arith.constant 2 : index
    %c0_96 = arith.constant 0 : index
    %c0_97 = arith.constant 0 : index
    %92 = vector.load %arg5[%c0_94, %c2_95, %c0_96, %c0_97] : memref<2x4x1x8xf32, #tpu.memory_space<vmem>>, vector<1x1x1x8xf32>
    %93 = vector.shape_cast %92 : vector<1x1x1x8xf32> to vector<1x8xf32>
    %94 = vector.broadcast %93 : vector<1x8xf32> to vector<16x8xf32>
    %95 = arith.addf %91, %94 : vector<16x8xf32>
    %cst_98 = arith.constant dense<0.000000e+00> : vector<16x8xf32>
    %96 = tpu.matmul %15, %86, %cst_98 {dimension_numbers = #tpu.dot_dimension_numbers<[1], [0], [0], [1], [0, 0, 1, 1], [], []>} : vector<16x32xbf16>, vector<32x8xbf16>, vector<16x8xf32> -> vector<16x8xf32>
    %cst_99 = arith.constant dense<0.000000e+00> : vector<16x8xf32>
    %97 = tpu.matmul %15, %88, %cst_99 {dimension_numbers = #tpu.dot_dimension_numbers<[1], [0], [0], [1], [0, 0, 1, 1], [], []>} : vector<16x32xbf16>, vector<32x8xbf16>, vector<16x8xf32> -> vector<16x8xf32>
    %cst_100 = arith.constant dense<0.000000e+00> : vector<16x16xf32>
    %98 = tpu.matmul %95, %96, %cst_100 {dimension_numbers = #tpu.dot_dimension_numbers<[1], [1], [0], [0], [0, 0, 1, 0], [], []>} : vector<16x8xf32>, vector<16x8xf32>, vector<16x16xf32> -> vector<16x16xf32>
    %cst_101 = arith.constant 0.353553385 : f32
    %99 = vector.broadcast %cst_101 : f32 to vector<16x16xf32>
    %100 = arith.mulf %98, %99 : vector<16x16xf32>
    %cst_102 = arith.constant dense<0xFF800000> : vector<16xf32>
    %101 = vector.multi_reduction <maximumf>, %100, %cst_102 [1] : vector<16x16xf32> to vector<16xf32>
    %102 = vector.shape_cast %101 : vector<16xf32> to vector<16x1xf32>
    %103 = vector.broadcast %102 : vector<16x1xf32> to vector<16x16xf32>
    %104 = arith.subf %100, %103 : vector<16x16xf32>
    %105 = math.exp %104 : vector<16x16xf32>
    %cst_103 = arith.constant dense<0.000000e+00> : vector<16xf32>
    %106 = vector.multi_reduction <add>, %105, %cst_103 [1] : vector<16x16xf32> to vector<16xf32>
    %107 = vector.shape_cast %106 : vector<16xf32> to vector<16x1xf32>
    %108 = vector.broadcast %107 : vector<16x1xf32> to vector<16x16xf32>
    %109 = arith.divf %105, %108 : vector<16x16xf32>
    %110 = arith.truncf %109 : vector<16x16xf32> to vector<16x16xbf16>
    %111 = arith.truncf %97 : vector<16x8xf32> to vector<16x8xbf16>
    %cst_104 = arith.constant dense<0.000000e+00> : vector<16x8xf32>
    %112 = tpu.matmul %110, %111, %cst_104 {dimension_numbers = #tpu.dot_dimension_numbers<[1], [0], [0], [1], [0, 0, 1, 1], [], []>} : vector<16x16xbf16>, vector<16x8xbf16>, vector<16x8xf32> -> vector<16x8xf32>
    %113 = arith.truncf %112 : vector<16x8xf32> to vector<16x8xbf16>
    %cst_105 = arith.constant dense<0.000000e+00> : vector<16x32xf32>
    %114 = tpu.matmul %113, %90, %cst_105 {dimension_numbers = #tpu.dot_dimension_numbers<[1], [1], [0], [0], [0, 0, 1, 0], [], []>} : vector<16x8xbf16>, vector<32x8xbf16>, vector<16x32xf32> -> vector<16x32xf32>
    %115 = arith.addf %82, %114 : vector<16x32xf32>
    %c0_106 = arith.constant 0 : index
    %c0_107 = arith.constant 0 : index
    %c3_108 = arith.constant 3 : index
    %c0_109 = arith.constant 0 : index
    %c0_110 = arith.constant 0 : index
    %116 = vector.load %arg4[%c0_106, %c0_107, %c3_108, %c0_109, %c0_110] : memref<2x4x4x32x8xbf16, #tpu.memory_space<vmem>>, vector<1x1x1x32x8xbf16>
    %117 = vector.shape_cast %116 : vector<1x1x1x32x8xbf16> to vector<32x8xbf16>
    %c0_111 = arith.constant 0 : index
    %c1_112 = arith.constant 1 : index
    %c3_113 = arith.constant 3 : index
    %c0_114 = arith.constant 0 : index
    %c0_115 = arith.constant 0 : index
    %118 = vector.load %arg4[%c0_111, %c1_112, %c3_113, %c0_114, %c0_115] : memref<2x4x4x32x8xbf16, #tpu.memory_space<vmem>>, vector<1x1x1x32x8xbf16>
    %119 = vector.shape_cast %118 : vector<1x1x1x32x8xbf16> to vector<32x8xbf16>
    %c0_116 = arith.constant 0 : index
    %c2_117 = arith.constant 2 : index
    %c3_118 = arith.constant 3 : index
    %c0_119 = arith.constant 0 : index
    %c0_120 = arith.constant 0 : index
    %120 = vector.load %arg4[%c0_116, %c2_117, %c3_118, %c0_119, %c0_120] : memref<2x4x4x32x8xbf16, #tpu.memory_space<vmem>>, vector<1x1x1x32x8xbf16>
    %121 = vector.shape_cast %120 : vector<1x1x1x32x8xbf16> to vector<32x8xbf16>
    %c0_121 = arith.constant 0 : index
    %c3_122 = arith.constant 3 : index
    %c3_123 = arith.constant 3 : index
    %c0_124 = arith.constant 0 : index
    %c0_125 = arith.constant 0 : index
    %122 = vector.load %arg4[%c0_121, %c3_122, %c3_123, %c0_124, %c0_125] : memref<2x4x4x32x8xbf16, #tpu.memory_space<vmem>>, vector<1x1x1x32x8xbf16>
    %123 = vector.shape_cast %122 : vector<1x1x1x32x8xbf16> to vector<32x8xbf16>
    %cst_126 = arith.constant dense<0.000000e+00> : vector<16x8xf32>
    %124 = tpu.matmul %15, %117, %cst_126 {dimension_numbers = #tpu.dot_dimension_numbers<[1], [0], [0], [1], [0, 0, 1, 1], [], []>} : vector<16x32xbf16>, vector<32x8xbf16>, vector<16x8xf32> -> vector<16x8xf32>
    %c0_127 = arith.constant 0 : index
    %c3_128 = arith.constant 3 : index
    %c0_129 = arith.constant 0 : index
    %c0_130 = arith.constant 0 : index
    %125 = vector.load %arg5[%c0_127, %c3_128, %c0_129, %c0_130] : memref<2x4x1x8xf32, #tpu.memory_space<vmem>>, vector<1x1x1x8xf32>
    %126 = vector.shape_cast %125 : vector<1x1x1x8xf32> to vector<1x8xf32>
    %127 = vector.broadcast %126 : vector<1x8xf32> to vector<16x8xf32>
    %128 = arith.addf %124, %127 : vector<16x8xf32>
    %cst_131 = arith.constant dense<0.000000e+00> : vector<16x8xf32>
    %129 = tpu.matmul %15, %119, %cst_131 {dimension_numbers = #tpu.dot_dimension_numbers<[1], [0], [0], [1], [0, 0, 1, 1], [], []>} : vector<16x32xbf16>, vector<32x8xbf16>, vector<16x8xf32> -> vector<16x8xf32>
    %cst_132 = arith.constant dense<0.000000e+00> : vector<16x8xf32>
    %130 = tpu.matmul %15, %121, %cst_132 {dimension_numbers = #tpu.dot_dimension_numbers<[1], [0], [0], [1], [0, 0, 1, 1], [], []>} : vector<16x32xbf16>, vector<32x8xbf16>, vector<16x8xf32> -> vector<16x8xf32>
    %cst_133 = arith.constant dense<0.000000e+00> : vector<16x16xf32>
    %131 = tpu.matmul %128, %129, %cst_133 {dimension_numbers = #tpu.dot_dimension_numbers<[1], [1], [0], [0], [0, 0, 1, 0], [], []>} : vector<16x8xf32>, vector<16x8xf32>, vector<16x16xf32> -> vector<16x16xf32>
    %cst_134 = arith.constant 0.353553385 : f32
    %132 = vector.broadcast %cst_134 : f32 to vector<16x16xf32>
    %133 = arith.mulf %131, %132 : vector<16x16xf32>
    %cst_135 = arith.constant dense<0xFF800000> : vector<16xf32>
    %134 = vector.multi_reduction <maximumf>, %133, %cst_135 [1] : vector<16x16xf32> to vector<16xf32>
    %135 = vector.shape_cast %134 : vector<16xf32> to vector<16x1xf32>
    %136 = vector.broadcast %135 : vector<16x1xf32> to vector<16x16xf32>
    %137 = arith.subf %133, %136 : vector<16x16xf32>
    %138 = math.exp %137 : vector<16x16xf32>
    %cst_136 = arith.constant dense<0.000000e+00> : vector<16xf32>
    %139 = vector.multi_reduction <add>, %138, %cst_136 [1] : vector<16x16xf32> to vector<16xf32>
    %140 = vector.shape_cast %139 : vector<16xf32> to vector<16x1xf32>
    %141 = vector.broadcast %140 : vector<16x1xf32> to vector<16x16xf32>
    %142 = arith.divf %138, %141 : vector<16x16xf32>
    %143 = arith.truncf %142 : vector<16x16xf32> to vector<16x16xbf16>
    %144 = arith.truncf %130 : vector<16x8xf32> to vector<16x8xbf16>
    %cst_137 = arith.constant dense<0.000000e+00> : vector<16x8xf32>
    %145 = tpu.matmul %143, %144, %cst_137 {dimension_numbers = #tpu.dot_dimension_numbers<[1], [0], [0], [1], [0, 0, 1, 1], [], []>} : vector<16x16xbf16>, vector<16x8xbf16>, vector<16x8xf32> -> vector<16x8xf32>
    %146 = arith.truncf %145 : vector<16x8xf32> to vector<16x8xbf16>
    %cst_138 = arith.constant dense<0.000000e+00> : vector<16x32xf32>
    %147 = tpu.matmul %146, %123, %cst_138 {dimension_numbers = #tpu.dot_dimension_numbers<[1], [1], [0], [0], [0, 0, 1, 0], [], []>} : vector<16x8xbf16>, vector<32x8xbf16>, vector<16x32xf32> -> vector<16x32xf32>
    %148 = arith.addf %115, %147 : vector<16x32xf32>
    %149 = vector.broadcast %8 : vector<1x32xf32> to vector<16x32xf32>
    %150 = arith.addf %148, %149 : vector<16x32xf32>
    %151 = arith.addf %5, %150 : vector<16x32xf32>
    %cst_139 = arith.constant dense<0.000000e+00> : vector<16xf32>
    %152 = vector.multi_reduction <add>, %151, %cst_139 [1] : vector<16x32xf32> to vector<16xf32>
    %153 = vector.shape_cast %152 : vector<16xf32> to vector<16x1xf32>
    %cst_140 = arith.constant 3.200000e+01 : f32
    %154 = vector.broadcast %cst_140 : f32 to vector<16x1xf32>
    %155 = arith.divf %153, %154 : vector<16x1xf32>
    %156 = vector.broadcast %155 : vector<16x1xf32> to vector<16x32xf32>
    %157 = arith.subf %151, %156 : vector<16x32xf32>
    %158 = arith.mulf %157, %157 : vector<16x32xf32>
    %cst_141 = arith.constant dense<0.000000e+00> : vector<16xf32>
    %159 = vector.multi_reduction <add>, %158, %cst_141 [1] : vector<16x32xf32> to vector<16xf32>
    %160 = vector.shape_cast %159 : vector<16xf32> to vector<16x1xf32>
    %cst_142 = arith.constant 3.200000e+01 : f32
    %161 = vector.broadcast %cst_142 : f32 to vector<16x1xf32>
    %162 = arith.divf %160, %161 : vector<16x1xf32>
    %163 = vector.broadcast %155 : vector<16x1xf32> to vector<16x32xf32>
    %164 = arith.subf %151, %163 : vector<16x32xf32>
    %cst_143 = arith.constant 9.99999997E-7 : f32
    %165 = vector.broadcast %cst_143 : f32 to vector<16x1xf32>
    %166 = arith.addf %162, %165 : vector<16x1xf32>
    %167 = math.rsqrt %166 : vector<16x1xf32>
    %168 = vector.broadcast %167 : vector<16x1xf32> to vector<16x32xf32>
    %169 = arith.mulf %164, %168 : vector<16x32xf32>
    %170 = vector.broadcast %9 : vector<1x32xf32> to vector<16x32xf32>
    %171 = arith.mulf %169, %170 : vector<16x32xf32>
    %172 = vector.broadcast %10 : vector<1x32xf32> to vector<16x32xf32>
    %173 = arith.addf %171, %172 : vector<16x32xf32>
    %174 = arith.truncf %173 : vector<16x32xf32> to vector<16x32xbf16>
    %c0_144 = arith.constant 0 : index
    %c0_145 = arith.constant 0 : index
    %c0_146 = arith.constant 0 : index
    %175 = vector.load %arg7[%c0_144, %c0_145, %c0_146] : memref<2x32x32xbf16, #tpu.memory_space<vmem>>, vector<1x32x32xbf16>
    %176 = vector.shape_cast %175 : vector<1x32x32xbf16> to vector<32x32xbf16>
    %cst_147 = arith.constant dense<0.000000e+00> : vector<16x32xf32>
    %177 = tpu.matmul %174, %176, %cst_147 {dimension_numbers = #tpu.dot_dimension_numbers<[1], [0], [0], [1], [0, 0, 1, 1], [], []>} : vector<16x32xbf16>, vector<32x32xbf16>, vector<16x32xf32> -> vector<16x32xf32>
    %178 = vector.broadcast %11 : vector<1x32xf32> to vector<16x32xf32>
    %179 = arith.addf %177, %178 : vector<16x32xf32>
    %cst_148 = arith.constant 5.000000e-01 : f32
    %180 = vector.broadcast %cst_148 : f32 to vector<16x32xf32>
    %181 = arith.mulf %180, %179 : vector<16x32xf32>
    %cst_149 = arith.constant 0.707106769 : f32
    %182 = vector.broadcast %cst_149 : f32 to vector<16x32xf32>
    %183 = arith.mulf %179, %182 : vector<16x32xf32>
    %184 = math.erf %183 : vector<16x32xf32>
    %cst_150 = arith.constant 1.000000e+00 : f32
    %185 = vector.broadcast %cst_150 : f32 to vector<16x32xf32>
    %186 = arith.addf %185, %184 : vector<16x32xf32>
    %187 = arith.mulf %181, %186 : vector<16x32xf32>
    %188 = arith.truncf %187 : vector<16x32xf32> to vector<16x32xbf16>
    %c0_151 = arith.constant 0 : index
    %c0_152 = arith.constant 0 : index
    %c0_153 = arith.constant 0 : index
    %189 = vector.load %arg8[%c0_151, %c0_152, %c0_153] : memref<2x32x32xbf16, #tpu.memory_space<vmem>>, vector<1x32x32xbf16>
    %190 = vector.shape_cast %189 : vector<1x32x32xbf16> to vector<32x32xbf16>
    %cst_154 = arith.constant dense<0.000000e+00> : vector<16x32xf32>
    %191 = tpu.matmul %188, %190, %cst_154 {dimension_numbers = #tpu.dot_dimension_numbers<[1], [0], [0], [1], [0, 0, 1, 1], [], []>} : vector<16x32xbf16>, vector<32x32xbf16>, vector<16x32xf32> -> vector<16x32xf32>
    %192 = vector.broadcast %12 : vector<1x32xf32> to vector<16x32xf32>
    %193 = arith.addf %191, %192 : vector<16x32xf32>
    %194 = arith.addf %173, %193 : vector<16x32xf32>
    %cst_155 = arith.constant dense<0.000000e+00> : vector<16xf32>
    %195 = vector.multi_reduction <add>, %194, %cst_155 [1] : vector<16x32xf32> to vector<16xf32>
    %196 = vector.shape_cast %195 : vector<16xf32> to vector<16x1xf32>
    %cst_156 = arith.constant 3.200000e+01 : f32
    %197 = vector.broadcast %cst_156 : f32 to vector<16x1xf32>
    %198 = arith.divf %196, %197 : vector<16x1xf32>
    %199 = vector.broadcast %198 : vector<16x1xf32> to vector<16x32xf32>
    %200 = arith.subf %194, %199 : vector<16x32xf32>
    %201 = arith.mulf %200, %200 : vector<16x32xf32>
    %cst_157 = arith.constant dense<0.000000e+00> : vector<16xf32>
    %202 = vector.multi_reduction <add>, %201, %cst_157 [1] : vector<16x32xf32> to vector<16xf32>
    %203 = vector.shape_cast %202 : vector<16xf32> to vector<16x1xf32>
    %cst_158 = arith.constant 3.200000e+01 : f32
    %204 = vector.broadcast %cst_158 : f32 to vector<16x1xf32>
    %205 = arith.divf %203, %204 : vector<16x1xf32>
    %206 = vector.broadcast %198 : vector<16x1xf32> to vector<16x32xf32>
    %207 = arith.subf %194, %206 : vector<16x32xf32>
    %cst_159 = arith.constant 9.99999997E-7 : f32
    %208 = vector.broadcast %cst_159 : f32 to vector<16x1xf32>
    %209 = arith.addf %205, %208 : vector<16x1xf32>
    %210 = math.rsqrt %209 : vector<16x1xf32>
    %211 = vector.broadcast %210 : vector<16x1xf32> to vector<16x32xf32>
    %212 = arith.mulf %207, %211 : vector<16x32xf32>
    %213 = vector.broadcast %13 : vector<1x32xf32> to vector<16x32xf32>
    %214 = arith.mulf %212, %213 : vector<16x32xf32>
    %215 = vector.broadcast %14 : vector<1x32xf32> to vector<16x32xf32>
    %216 = arith.addf %214, %215 : vector<16x32xf32>
    %c1_160 = arith.constant 1 : index
    %c0_161 = arith.constant 0 : index
    %c0_162 = arith.constant 0 : index
    %217 = vector.load %arg6[%c1_160, %c0_161, %c0_162] : memref<2x8x32xf32, #tpu.memory_space<vmem>>, vector<1x8x32xf32>
    %218 = vector.shape_cast %217 : vector<1x8x32xf32> to vector<8x32xf32>
    %219 = vector.extract_strided_slice %218 {offsets = [0, 0], sizes = [1, 32], strides = [1, 1]} : vector<8x32xf32> to vector<1x32xf32>
    %220 = vector.extract_strided_slice %218 {offsets = [1, 0], sizes = [1, 32], strides = [1, 1]} : vector<8x32xf32> to vector<1x32xf32>
    %221 = vector.extract_strided_slice %218 {offsets = [2, 0], sizes = [1, 32], strides = [1, 1]} : vector<8x32xf32> to vector<1x32xf32>
    %222 = vector.extract_strided_slice %218 {offsets = [3, 0], sizes = [1, 32], strides = [1, 1]} : vector<8x32xf32> to vector<1x32xf32>
    %223 = vector.extract_strided_slice %218 {offsets = [4, 0], sizes = [1, 32], strides = [1, 1]} : vector<8x32xf32> to vector<1x32xf32>
    %224 = vector.extract_strided_slice %218 {offsets = [5, 0], sizes = [1, 32], strides = [1, 1]} : vector<8x32xf32> to vector<1x32xf32>
    %225 = vector.extract_strided_slice %218 {offsets = [6, 0], sizes = [1, 32], strides = [1, 1]} : vector<8x32xf32> to vector<1x32xf32>
    %226 = arith.truncf %216 : vector<16x32xf32> to vector<16x32xbf16>
    %cst_163 = arith.constant 0.000000e+00 : f32
    %227 = vector.broadcast %cst_163 : f32 to vector<16x32xf32>
    %c1_164 = arith.constant 1 : index
    %c0_165 = arith.constant 0 : index
    %c0_166 = arith.constant 0 : index
    %c0_167 = arith.constant 0 : index
    %c0_168 = arith.constant 0 : index
    %228 = vector.load %arg4[%c1_164, %c0_165, %c0_166, %c0_167, %c0_168] : memref<2x4x4x32x8xbf16, #tpu.memory_space<vmem>>, vector<1x1x1x32x8xbf16>
    %229 = vector.shape_cast %228 : vector<1x1x1x32x8xbf16> to vector<32x8xbf16>
    %c1_169 = arith.constant 1 : index
    %c1_170 = arith.constant 1 : index
    %c0_171 = arith.constant 0 : index
    %c0_172 = arith.constant 0 : index
    %c0_173 = arith.constant 0 : index
    %230 = vector.load %arg4[%c1_169, %c1_170, %c0_171, %c0_172, %c0_173] : memref<2x4x4x32x8xbf16, #tpu.memory_space<vmem>>, vector<1x1x1x32x8xbf16>
    %231 = vector.shape_cast %230 : vector<1x1x1x32x8xbf16> to vector<32x8xbf16>
    %c1_174 = arith.constant 1 : index
    %c2_175 = arith.constant 2 : index
    %c0_176 = arith.constant 0 : index
    %c0_177 = arith.constant 0 : index
    %c0_178 = arith.constant 0 : index
    %232 = vector.load %arg4[%c1_174, %c2_175, %c0_176, %c0_177, %c0_178] : memref<2x4x4x32x8xbf16, #tpu.memory_space<vmem>>, vector<1x1x1x32x8xbf16>
    %233 = vector.shape_cast %232 : vector<1x1x1x32x8xbf16> to vector<32x8xbf16>
    %c1_179 = arith.constant 1 : index
    %c3_180 = arith.constant 3 : index
    %c0_181 = arith.constant 0 : index
    %c0_182 = arith.constant 0 : index
    %c0_183 = arith.constant 0 : index
    %234 = vector.load %arg4[%c1_179, %c3_180, %c0_181, %c0_182, %c0_183] : memref<2x4x4x32x8xbf16, #tpu.memory_space<vmem>>, vector<1x1x1x32x8xbf16>
    %235 = vector.shape_cast %234 : vector<1x1x1x32x8xbf16> to vector<32x8xbf16>
    %cst_184 = arith.constant dense<0.000000e+00> : vector<16x8xf32>
    %236 = tpu.matmul %226, %229, %cst_184 {dimension_numbers = #tpu.dot_dimension_numbers<[1], [0], [0], [1], [0, 0, 1, 1], [], []>} : vector<16x32xbf16>, vector<32x8xbf16>, vector<16x8xf32> -> vector<16x8xf32>
    %c1_185 = arith.constant 1 : index
    %c0_186 = arith.constant 0 : index
    %c0_187 = arith.constant 0 : index
    %c0_188 = arith.constant 0 : index
    %237 = vector.load %arg5[%c1_185, %c0_186, %c0_187, %c0_188] : memref<2x4x1x8xf32, #tpu.memory_space<vmem>>, vector<1x1x1x8xf32>
    %238 = vector.shape_cast %237 : vector<1x1x1x8xf32> to vector<1x8xf32>
    %239 = vector.broadcast %238 : vector<1x8xf32> to vector<16x8xf32>
    %240 = arith.addf %236, %239 : vector<16x8xf32>
    %cst_189 = arith.constant dense<0.000000e+00> : vector<16x8xf32>
    %241 = tpu.matmul %226, %231, %cst_189 {dimension_numbers = #tpu.dot_dimension_numbers<[1], [0], [0], [1], [0, 0, 1, 1], [], []>} : vector<16x32xbf16>, vector<32x8xbf16>, vector<16x8xf32> -> vector<16x8xf32>
    %cst_190 = arith.constant dense<0.000000e+00> : vector<16x8xf32>
    %242 = tpu.matmul %226, %233, %cst_190 {dimension_numbers = #tpu.dot_dimension_numbers<[1], [0], [0], [1], [0, 0, 1, 1], [], []>} : vector<16x32xbf16>, vector<32x8xbf16>, vector<16x8xf32> -> vector<16x8xf32>
    %cst_191 = arith.constant dense<0.000000e+00> : vector<16x16xf32>
    %243 = tpu.matmul %240, %241, %cst_191 {dimension_numbers = #tpu.dot_dimension_numbers<[1], [1], [0], [0], [0, 0, 1, 0], [], []>} : vector<16x8xf32>, vector<16x8xf32>, vector<16x16xf32> -> vector<16x16xf32>
    %cst_192 = arith.constant 0.353553385 : f32
    %244 = vector.broadcast %cst_192 : f32 to vector<16x16xf32>
    %245 = arith.mulf %243, %244 : vector<16x16xf32>
    %cst_193 = arith.constant dense<0xFF800000> : vector<16xf32>
    %246 = vector.multi_reduction <maximumf>, %245, %cst_193 [1] : vector<16x16xf32> to vector<16xf32>
    %247 = vector.shape_cast %246 : vector<16xf32> to vector<16x1xf32>
    %248 = vector.broadcast %247 : vector<16x1xf32> to vector<16x16xf32>
    %249 = arith.subf %245, %248 : vector<16x16xf32>
    %250 = math.exp %249 : vector<16x16xf32>
    %cst_194 = arith.constant dense<0.000000e+00> : vector<16xf32>
    %251 = vector.multi_reduction <add>, %250, %cst_194 [1] : vector<16x16xf32> to vector<16xf32>
    %252 = vector.shape_cast %251 : vector<16xf32> to vector<16x1xf32>
    %253 = vector.broadcast %252 : vector<16x1xf32> to vector<16x16xf32>
    %254 = arith.divf %250, %253 : vector<16x16xf32>
    %255 = arith.truncf %254 : vector<16x16xf32> to vector<16x16xbf16>
    %256 = arith.truncf %242 : vector<16x8xf32> to vector<16x8xbf16>
    %cst_195 = arith.constant dense<0.000000e+00> : vector<16x8xf32>
    %257 = tpu.matmul %255, %256, %cst_195 {dimension_numbers = #tpu.dot_dimension_numbers<[1], [0], [0], [1], [0, 0, 1, 1], [], []>} : vector<16x16xbf16>, vector<16x8xbf16>, vector<16x8xf32> -> vector<16x8xf32>
    %258 = arith.truncf %257 : vector<16x8xf32> to vector<16x8xbf16>
    %cst_196 = arith.constant dense<0.000000e+00> : vector<16x32xf32>
    %259 = tpu.matmul %258, %235, %cst_196 {dimension_numbers = #tpu.dot_dimension_numbers<[1], [1], [0], [0], [0, 0, 1, 0], [], []>} : vector<16x8xbf16>, vector<32x8xbf16>, vector<16x32xf32> -> vector<16x32xf32>
    %260 = arith.addf %227, %259 : vector<16x32xf32>
    %c1_197 = arith.constant 1 : index
    %c0_198 = arith.constant 0 : index
    %c1_199 = arith.constant 1 : index
    %c0_200 = arith.constant 0 : index
    %c0_201 = arith.constant 0 : index
    %261 = vector.load %arg4[%c1_197, %c0_198, %c1_199, %c0_200, %c0_201] : memref<2x4x4x32x8xbf16, #tpu.memory_space<vmem>>, vector<1x1x1x32x8xbf16>
    %262 = vector.shape_cast %261 : vector<1x1x1x32x8xbf16> to vector<32x8xbf16>
    %c1_202 = arith.constant 1 : index
    %c1_203 = arith.constant 1 : index
    %c1_204 = arith.constant 1 : index
    %c0_205 = arith.constant 0 : index
    %c0_206 = arith.constant 0 : index
    %263 = vector.load %arg4[%c1_202, %c1_203, %c1_204, %c0_205, %c0_206] : memref<2x4x4x32x8xbf16, #tpu.memory_space<vmem>>, vector<1x1x1x32x8xbf16>
    %264 = vector.shape_cast %263 : vector<1x1x1x32x8xbf16> to vector<32x8xbf16>
    %c1_207 = arith.constant 1 : index
    %c2_208 = arith.constant 2 : index
    %c1_209 = arith.constant 1 : index
    %c0_210 = arith.constant 0 : index
    %c0_211 = arith.constant 0 : index
    %265 = vector.load %arg4[%c1_207, %c2_208, %c1_209, %c0_210, %c0_211] : memref<2x4x4x32x8xbf16, #tpu.memory_space<vmem>>, vector<1x1x1x32x8xbf16>
    %266 = vector.shape_cast %265 : vector<1x1x1x32x8xbf16> to vector<32x8xbf16>
    %c1_212 = arith.constant 1 : index
    %c3_213 = arith.constant 3 : index
    %c1_214 = arith.constant 1 : index
    %c0_215 = arith.constant 0 : index
    %c0_216 = arith.constant 0 : index
    %267 = vector.load %arg4[%c1_212, %c3_213, %c1_214, %c0_215, %c0_216] : memref<2x4x4x32x8xbf16, #tpu.memory_space<vmem>>, vector<1x1x1x32x8xbf16>
    %268 = vector.shape_cast %267 : vector<1x1x1x32x8xbf16> to vector<32x8xbf16>
    %cst_217 = arith.constant dense<0.000000e+00> : vector<16x8xf32>
    %269 = tpu.matmul %226, %262, %cst_217 {dimension_numbers = #tpu.dot_dimension_numbers<[1], [0], [0], [1], [0, 0, 1, 1], [], []>} : vector<16x32xbf16>, vector<32x8xbf16>, vector<16x8xf32> -> vector<16x8xf32>
    %c1_218 = arith.constant 1 : index
    %c1_219 = arith.constant 1 : index
    %c0_220 = arith.constant 0 : index
    %c0_221 = arith.constant 0 : index
    %270 = vector.load %arg5[%c1_218, %c1_219, %c0_220, %c0_221] : memref<2x4x1x8xf32, #tpu.memory_space<vmem>>, vector<1x1x1x8xf32>
    %271 = vector.shape_cast %270 : vector<1x1x1x8xf32> to vector<1x8xf32>
    %272 = vector.broadcast %271 : vector<1x8xf32> to vector<16x8xf32>
    %273 = arith.addf %269, %272 : vector<16x8xf32>
    %cst_222 = arith.constant dense<0.000000e+00> : vector<16x8xf32>
    %274 = tpu.matmul %226, %264, %cst_222 {dimension_numbers = #tpu.dot_dimension_numbers<[1], [0], [0], [1], [0, 0, 1, 1], [], []>} : vector<16x32xbf16>, vector<32x8xbf16>, vector<16x8xf32> -> vector<16x8xf32>
    %cst_223 = arith.constant dense<0.000000e+00> : vector<16x8xf32>
    %275 = tpu.matmul %226, %266, %cst_223 {dimension_numbers = #tpu.dot_dimension_numbers<[1], [0], [0], [1], [0, 0, 1, 1], [], []>} : vector<16x32xbf16>, vector<32x8xbf16>, vector<16x8xf32> -> vector<16x8xf32>
    %cst_224 = arith.constant dense<0.000000e+00> : vector<16x16xf32>
    %276 = tpu.matmul %273, %274, %cst_224 {dimension_numbers = #tpu.dot_dimension_numbers<[1], [1], [0], [0], [0, 0, 1, 0], [], []>} : vector<16x8xf32>, vector<16x8xf32>, vector<16x16xf32> -> vector<16x16xf32>
    %cst_225 = arith.constant 0.353553385 : f32
    %277 = vector.broadcast %cst_225 : f32 to vector<16x16xf32>
    %278 = arith.mulf %276, %277 : vector<16x16xf32>
    %cst_226 = arith.constant dense<0xFF800000> : vector<16xf32>
    %279 = vector.multi_reduction <maximumf>, %278, %cst_226 [1] : vector<16x16xf32> to vector<16xf32>
    %280 = vector.shape_cast %279 : vector<16xf32> to vector<16x1xf32>
    %281 = vector.broadcast %280 : vector<16x1xf32> to vector<16x16xf32>
    %282 = arith.subf %278, %281 : vector<16x16xf32>
    %283 = math.exp %282 : vector<16x16xf32>
    %cst_227 = arith.constant dense<0.000000e+00> : vector<16xf32>
    %284 = vector.multi_reduction <add>, %283, %cst_227 [1] : vector<16x16xf32> to vector<16xf32>
    %285 = vector.shape_cast %284 : vector<16xf32> to vector<16x1xf32>
    %286 = vector.broadcast %285 : vector<16x1xf32> to vector<16x16xf32>
    %287 = arith.divf %283, %286 : vector<16x16xf32>
    %288 = arith.truncf %287 : vector<16x16xf32> to vector<16x16xbf16>
    %289 = arith.truncf %275 : vector<16x8xf32> to vector<16x8xbf16>
    %cst_228 = arith.constant dense<0.000000e+00> : vector<16x8xf32>
    %290 = tpu.matmul %288, %289, %cst_228 {dimension_numbers = #tpu.dot_dimension_numbers<[1], [0], [0], [1], [0, 0, 1, 1], [], []>} : vector<16x16xbf16>, vector<16x8xbf16>, vector<16x8xf32> -> vector<16x8xf32>
    %291 = arith.truncf %290 : vector<16x8xf32> to vector<16x8xbf16>
    %cst_229 = arith.constant dense<0.000000e+00> : vector<16x32xf32>
    %292 = tpu.matmul %291, %268, %cst_229 {dimension_numbers = #tpu.dot_dimension_numbers<[1], [1], [0], [0], [0, 0, 1, 0], [], []>} : vector<16x8xbf16>, vector<32x8xbf16>, vector<16x32xf32> -> vector<16x32xf32>
    %293 = arith.addf %260, %292 : vector<16x32xf32>
    %c1_230 = arith.constant 1 : index
    %c0_231 = arith.constant 0 : index
    %c2_232 = arith.constant 2 : index
    %c0_233 = arith.constant 0 : index
    %c0_234 = arith.constant 0 : index
    %294 = vector.load %arg4[%c1_230, %c0_231, %c2_232, %c0_233, %c0_234] : memref<2x4x4x32x8xbf16, #tpu.memory_space<vmem>>, vector<1x1x1x32x8xbf16>
    %295 = vector.shape_cast %294 : vector<1x1x1x32x8xbf16> to vector<32x8xbf16>
    %c1_235 = arith.constant 1 : index
    %c1_236 = arith.constant 1 : index
    %c2_237 = arith.constant 2 : index
    %c0_238 = arith.constant 0 : index
    %c0_239 = arith.constant 0 : index
    %296 = vector.load %arg4[%c1_235, %c1_236, %c2_237, %c0_238, %c0_239] : memref<2x4x4x32x8xbf16, #tpu.memory_space<vmem>>, vector<1x1x1x32x8xbf16>
    %297 = vector.shape_cast %296 : vector<1x1x1x32x8xbf16> to vector<32x8xbf16>
    %c1_240 = arith.constant 1 : index
    %c2_241 = arith.constant 2 : index
    %c2_242 = arith.constant 2 : index
    %c0_243 = arith.constant 0 : index
    %c0_244 = arith.constant 0 : index
    %298 = vector.load %arg4[%c1_240, %c2_241, %c2_242, %c0_243, %c0_244] : memref<2x4x4x32x8xbf16, #tpu.memory_space<vmem>>, vector<1x1x1x32x8xbf16>
    %299 = vector.shape_cast %298 : vector<1x1x1x32x8xbf16> to vector<32x8xbf16>
    %c1_245 = arith.constant 1 : index
    %c3_246 = arith.constant 3 : index
    %c2_247 = arith.constant 2 : index
    %c0_248 = arith.constant 0 : index
    %c0_249 = arith.constant 0 : index
    %300 = vector.load %arg4[%c1_245, %c3_246, %c2_247, %c0_248, %c0_249] : memref<2x4x4x32x8xbf16, #tpu.memory_space<vmem>>, vector<1x1x1x32x8xbf16>
    %301 = vector.shape_cast %300 : vector<1x1x1x32x8xbf16> to vector<32x8xbf16>
    %cst_250 = arith.constant dense<0.000000e+00> : vector<16x8xf32>
    %302 = tpu.matmul %226, %295, %cst_250 {dimension_numbers = #tpu.dot_dimension_numbers<[1], [0], [0], [1], [0, 0, 1, 1], [], []>} : vector<16x32xbf16>, vector<32x8xbf16>, vector<16x8xf32> -> vector<16x8xf32>
    %c1_251 = arith.constant 1 : index
    %c2_252 = arith.constant 2 : index
    %c0_253 = arith.constant 0 : index
    %c0_254 = arith.constant 0 : index
    %303 = vector.load %arg5[%c1_251, %c2_252, %c0_253, %c0_254] : memref<2x4x1x8xf32, #tpu.memory_space<vmem>>, vector<1x1x1x8xf32>
    %304 = vector.shape_cast %303 : vector<1x1x1x8xf32> to vector<1x8xf32>
    %305 = vector.broadcast %304 : vector<1x8xf32> to vector<16x8xf32>
    %306 = arith.addf %302, %305 : vector<16x8xf32>
    %cst_255 = arith.constant dense<0.000000e+00> : vector<16x8xf32>
    %307 = tpu.matmul %226, %297, %cst_255 {dimension_numbers = #tpu.dot_dimension_numbers<[1], [0], [0], [1], [0, 0, 1, 1], [], []>} : vector<16x32xbf16>, vector<32x8xbf16>, vector<16x8xf32> -> vector<16x8xf32>
    %cst_256 = arith.constant dense<0.000000e+00> : vector<16x8xf32>
    %308 = tpu.matmul %226, %299, %cst_256 {dimension_numbers = #tpu.dot_dimension_numbers<[1], [0], [0], [1], [0, 0, 1, 1], [], []>} : vector<16x32xbf16>, vector<32x8xbf16>, vector<16x8xf32> -> vector<16x8xf32>
    %cst_257 = arith.constant dense<0.000000e+00> : vector<16x16xf32>
    %309 = tpu.matmul %306, %307, %cst_257 {dimension_numbers = #tpu.dot_dimension_numbers<[1], [1], [0], [0], [0, 0, 1, 0], [], []>} : vector<16x8xf32>, vector<16x8xf32>, vector<16x16xf32> -> vector<16x16xf32>
    %cst_258 = arith.constant 0.353553385 : f32
    %310 = vector.broadcast %cst_258 : f32 to vector<16x16xf32>
    %311 = arith.mulf %309, %310 : vector<16x16xf32>
    %cst_259 = arith.constant dense<0xFF800000> : vector<16xf32>
    %312 = vector.multi_reduction <maximumf>, %311, %cst_259 [1] : vector<16x16xf32> to vector<16xf32>
    %313 = vector.shape_cast %312 : vector<16xf32> to vector<16x1xf32>
    %314 = vector.broadcast %313 : vector<16x1xf32> to vector<16x16xf32>
    %315 = arith.subf %311, %314 : vector<16x16xf32>
    %316 = math.exp %315 : vector<16x16xf32>
    %cst_260 = arith.constant dense<0.000000e+00> : vector<16xf32>
    %317 = vector.multi_reduction <add>, %316, %cst_260 [1] : vector<16x16xf32> to vector<16xf32>
    %318 = vector.shape_cast %317 : vector<16xf32> to vector<16x1xf32>
    %319 = vector.broadcast %318 : vector<16x1xf32> to vector<16x16xf32>
    %320 = arith.divf %316, %319 : vector<16x16xf32>
    %321 = arith.truncf %320 : vector<16x16xf32> to vector<16x16xbf16>
    %322 = arith.truncf %308 : vector<16x8xf32> to vector<16x8xbf16>
    %cst_261 = arith.constant dense<0.000000e+00> : vector<16x8xf32>
    %323 = tpu.matmul %321, %322, %cst_261 {dimension_numbers = #tpu.dot_dimension_numbers<[1], [0], [0], [1], [0, 0, 1, 1], [], []>} : vector<16x16xbf16>, vector<16x8xbf16>, vector<16x8xf32> -> vector<16x8xf32>
    %324 = arith.truncf %323 : vector<16x8xf32> to vector<16x8xbf16>
    %cst_262 = arith.constant dense<0.000000e+00> : vector<16x32xf32>
    %325 = tpu.matmul %324, %301, %cst_262 {dimension_numbers = #tpu.dot_dimension_numbers<[1], [1], [0], [0], [0, 0, 1, 0], [], []>} : vector<16x8xbf16>, vector<32x8xbf16>, vector<16x32xf32> -> vector<16x32xf32>
    %326 = arith.addf %293, %325 : vector<16x32xf32>
    %c1_263 = arith.constant 1 : index
    %c0_264 = arith.constant 0 : index
    %c3_265 = arith.constant 3 : index
    %c0_266 = arith.constant 0 : index
    %c0_267 = arith.constant 0 : index
    %327 = vector.load %arg4[%c1_263, %c0_264, %c3_265, %c0_266, %c0_267] : memref<2x4x4x32x8xbf16, #tpu.memory_space<vmem>>, vector<1x1x1x32x8xbf16>
    %328 = vector.shape_cast %327 : vector<1x1x1x32x8xbf16> to vector<32x8xbf16>
    %c1_268 = arith.constant 1 : index
    %c1_269 = arith.constant 1 : index
    %c3_270 = arith.constant 3 : index
    %c0_271 = arith.constant 0 : index
    %c0_272 = arith.constant 0 : index
    %329 = vector.load %arg4[%c1_268, %c1_269, %c3_270, %c0_271, %c0_272] : memref<2x4x4x32x8xbf16, #tpu.memory_space<vmem>>, vector<1x1x1x32x8xbf16>
    %330 = vector.shape_cast %329 : vector<1x1x1x32x8xbf16> to vector<32x8xbf16>
    %c1_273 = arith.constant 1 : index
    %c2_274 = arith.constant 2 : index
    %c3_275 = arith.constant 3 : index
    %c0_276 = arith.constant 0 : index
    %c0_277 = arith.constant 0 : index
    %331 = vector.load %arg4[%c1_273, %c2_274, %c3_275, %c0_276, %c0_277] : memref<2x4x4x32x8xbf16, #tpu.memory_space<vmem>>, vector<1x1x1x32x8xbf16>
    %332 = vector.shape_cast %331 : vector<1x1x1x32x8xbf16> to vector<32x8xbf16>
    %c1_278 = arith.constant 1 : index
    %c3_279 = arith.constant 3 : index
    %c3_280 = arith.constant 3 : index
    %c0_281 = arith.constant 0 : index
    %c0_282 = arith.constant 0 : index
    %333 = vector.load %arg4[%c1_278, %c3_279, %c3_280, %c0_281, %c0_282] : memref<2x4x4x32x8xbf16, #tpu.memory_space<vmem>>, vector<1x1x1x32x8xbf16>
    %334 = vector.shape_cast %333 : vector<1x1x1x32x8xbf16> to vector<32x8xbf16>
    %cst_283 = arith.constant dense<0.000000e+00> : vector<16x8xf32>
    %335 = tpu.matmul %226, %328, %cst_283 {dimension_numbers = #tpu.dot_dimension_numbers<[1], [0], [0], [1], [0, 0, 1, 1], [], []>} : vector<16x32xbf16>, vector<32x8xbf16>, vector<16x8xf32> -> vector<16x8xf32>
    %c1_284 = arith.constant 1 : index
    %c3_285 = arith.constant 3 : index
    %c0_286 = arith.constant 0 : index
    %c0_287 = arith.constant 0 : index
    %336 = vector.load %arg5[%c1_284, %c3_285, %c0_286, %c0_287] : memref<2x4x1x8xf32, #tpu.memory_space<vmem>>, vector<1x1x1x8xf32>
    %337 = vector.shape_cast %336 : vector<1x1x1x8xf32> to vector<1x8xf32>
    %338 = vector.broadcast %337 : vector<1x8xf32> to vector<16x8xf32>
    %339 = arith.addf %335, %338 : vector<16x8xf32>
    %cst_288 = arith.constant dense<0.000000e+00> : vector<16x8xf32>
    %340 = tpu.matmul %226, %330, %cst_288 {dimension_numbers = #tpu.dot_dimension_numbers<[1], [0], [0], [1], [0, 0, 1, 1], [], []>} : vector<16x32xbf16>, vector<32x8xbf16>, vector<16x8xf32> -> vector<16x8xf32>
    %cst_289 = arith.constant dense<0.000000e+00> : vector<16x8xf32>
    %341 = tpu.matmul %226, %332, %cst_289 {dimension_numbers = #tpu.dot_dimension_numbers<[1], [0], [0], [1], [0, 0, 1, 1], [], []>} : vector<16x32xbf16>, vector<32x8xbf16>, vector<16x8xf32> -> vector<16x8xf32>
    %cst_290 = arith.constant dense<0.000000e+00> : vector<16x16xf32>
    %342 = tpu.matmul %339, %340, %cst_290 {dimension_numbers = #tpu.dot_dimension_numbers<[1], [1], [0], [0], [0, 0, 1, 0], [], []>} : vector<16x8xf32>, vector<16x8xf32>, vector<16x16xf32> -> vector<16x16xf32>
    %cst_291 = arith.constant 0.353553385 : f32
    %343 = vector.broadcast %cst_291 : f32 to vector<16x16xf32>
    %344 = arith.mulf %342, %343 : vector<16x16xf32>
    %cst_292 = arith.constant dense<0xFF800000> : vector<16xf32>
    %345 = vector.multi_reduction <maximumf>, %344, %cst_292 [1] : vector<16x16xf32> to vector<16xf32>
    %346 = vector.shape_cast %345 : vector<16xf32> to vector<16x1xf32>
    %347 = vector.broadcast %346 : vector<16x1xf32> to vector<16x16xf32>
    %348 = arith.subf %344, %347 : vector<16x16xf32>
    %349 = math.exp %348 : vector<16x16xf32>
    %cst_293 = arith.constant dense<0.000000e+00> : vector<16xf32>
    %350 = vector.multi_reduction <add>, %349, %cst_293 [1] : vector<16x16xf32> to vector<16xf32>
    %351 = vector.shape_cast %350 : vector<16xf32> to vector<16x1xf32>
    %352 = vector.broadcast %351 : vector<16x1xf32> to vector<16x16xf32>
    %353 = arith.divf %349, %352 : vector<16x16xf32>
    %354 = arith.truncf %353 : vector<16x16xf32> to vector<16x16xbf16>
    %355 = arith.truncf %341 : vector<16x8xf32> to vector<16x8xbf16>
    %cst_294 = arith.constant dense<0.000000e+00> : vector<16x8xf32>
    %356 = tpu.matmul %354, %355, %cst_294 {dimension_numbers = #tpu.dot_dimension_numbers<[1], [0], [0], [1], [0, 0, 1, 1], [], []>} : vector<16x16xbf16>, vector<16x8xbf16>, vector<16x8xf32> -> vector<16x8xf32>
    %357 = arith.truncf %356 : vector<16x8xf32> to vector<16x8xbf16>
    %cst_295 = arith.constant dense<0.000000e+00> : vector<16x32xf32>
    %358 = tpu.matmul %357, %334, %cst_295 {dimension_numbers = #tpu.dot_dimension_numbers<[1], [1], [0], [0], [0, 0, 1, 0], [], []>} : vector<16x8xbf16>, vector<32x8xbf16>, vector<16x32xf32> -> vector<16x32xf32>
    %359 = arith.addf %326, %358 : vector<16x32xf32>
    %360 = vector.broadcast %219 : vector<1x32xf32> to vector<16x32xf32>
    %361 = arith.addf %359, %360 : vector<16x32xf32>
    %362 = arith.addf %216, %361 : vector<16x32xf32>
    %cst_296 = arith.constant dense<0.000000e+00> : vector<16xf32>
    %363 = vector.multi_reduction <add>, %362, %cst_296 [1] : vector<16x32xf32> to vector<16xf32>
    %364 = vector.shape_cast %363 : vector<16xf32> to vector<16x1xf32>
    %cst_297 = arith.constant 3.200000e+01 : f32
    %365 = vector.broadcast %cst_297 : f32 to vector<16x1xf32>
    %366 = arith.divf %364, %365 : vector<16x1xf32>
    %367 = vector.broadcast %366 : vector<16x1xf32> to vector<16x32xf32>
    %368 = arith.subf %362, %367 : vector<16x32xf32>
    %369 = arith.mulf %368, %368 : vector<16x32xf32>
    %cst_298 = arith.constant dense<0.000000e+00> : vector<16xf32>
    %370 = vector.multi_reduction <add>, %369, %cst_298 [1] : vector<16x32xf32> to vector<16xf32>
    %371 = vector.shape_cast %370 : vector<16xf32> to vector<16x1xf32>
    %cst_299 = arith.constant 3.200000e+01 : f32
    %372 = vector.broadcast %cst_299 : f32 to vector<16x1xf32>
    %373 = arith.divf %371, %372 : vector<16x1xf32>
    %374 = vector.broadcast %366 : vector<16x1xf32> to vector<16x32xf32>
    %375 = arith.subf %362, %374 : vector<16x32xf32>
    %cst_300 = arith.constant 9.99999997E-7 : f32
    %376 = vector.broadcast %cst_300 : f32 to vector<16x1xf32>
    %377 = arith.addf %373, %376 : vector<16x1xf32>
    %378 = math.rsqrt %377 : vector<16x1xf32>
    %379 = vector.broadcast %378 : vector<16x1xf32> to vector<16x32xf32>
    %380 = arith.mulf %375, %379 : vector<16x32xf32>
    %381 = vector.broadcast %220 : vector<1x32xf32> to vector<16x32xf32>
    %382 = arith.mulf %380, %381 : vector<16x32xf32>
    %383 = vector.broadcast %221 : vector<1x32xf32> to vector<16x32xf32>
    %384 = arith.addf %382, %383 : vector<16x32xf32>
    %385 = arith.truncf %384 : vector<16x32xf32> to vector<16x32xbf16>
    %c1_301 = arith.constant 1 : index
    %c0_302 = arith.constant 0 : index
    %c0_303 = arith.constant 0 : index
    %386 = vector.load %arg7[%c1_301, %c0_302, %c0_303] : memref<2x32x32xbf16, #tpu.memory_space<vmem>>, vector<1x32x32xbf16>
    %387 = vector.shape_cast %386 : vector<1x32x32xbf16> to vector<32x32xbf16>
    %cst_304 = arith.constant dense<0.000000e+00> : vector<16x32xf32>
    %388 = tpu.matmul %385, %387, %cst_304 {dimension_numbers = #tpu.dot_dimension_numbers<[1], [0], [0], [1], [0, 0, 1, 1], [], []>} : vector<16x32xbf16>, vector<32x32xbf16>, vector<16x32xf32> -> vector<16x32xf32>
    %389 = vector.broadcast %222 : vector<1x32xf32> to vector<16x32xf32>
    %390 = arith.addf %388, %389 : vector<16x32xf32>
    %cst_305 = arith.constant 5.000000e-01 : f32
    %391 = vector.broadcast %cst_305 : f32 to vector<16x32xf32>
    %392 = arith.mulf %391, %390 : vector<16x32xf32>
    %cst_306 = arith.constant 0.707106769 : f32
    %393 = vector.broadcast %cst_306 : f32 to vector<16x32xf32>
    %394 = arith.mulf %390, %393 : vector<16x32xf32>
    %395 = math.erf %394 : vector<16x32xf32>
    %cst_307 = arith.constant 1.000000e+00 : f32
    %396 = vector.broadcast %cst_307 : f32 to vector<16x32xf32>
    %397 = arith.addf %396, %395 : vector<16x32xf32>
    %398 = arith.mulf %392, %397 : vector<16x32xf32>
    %399 = arith.truncf %398 : vector<16x32xf32> to vector<16x32xbf16>
    %c1_308 = arith.constant 1 : index
    %c0_309 = arith.constant 0 : index
    %c0_310 = arith.constant 0 : index
    %400 = vector.load %arg8[%c1_308, %c0_309, %c0_310] : memref<2x32x32xbf16, #tpu.memory_space<vmem>>, vector<1x32x32xbf16>
    %401 = vector.shape_cast %400 : vector<1x32x32xbf16> to vector<32x32xbf16>
    %cst_311 = arith.constant dense<0.000000e+00> : vector<16x32xf32>
    %402 = tpu.matmul %399, %401, %cst_311 {dimension_numbers = #tpu.dot_dimension_numbers<[1], [0], [0], [1], [0, 0, 1, 1], [], []>} : vector<16x32xbf16>, vector<32x32xbf16>, vector<16x32xf32> -> vector<16x32xf32>
    %403 = vector.broadcast %223 : vector<1x32xf32> to vector<16x32xf32>
    %404 = arith.addf %402, %403 : vector<16x32xf32>
    %405 = arith.addf %384, %404 : vector<16x32xf32>
    %cst_312 = arith.constant dense<0.000000e+00> : vector<16xf32>
    %406 = vector.multi_reduction <add>, %405, %cst_312 [1] : vector<16x32xf32> to vector<16xf32>
    %407 = vector.shape_cast %406 : vector<16xf32> to vector<16x1xf32>
    %cst_313 = arith.constant 3.200000e+01 : f32
    %408 = vector.broadcast %cst_313 : f32 to vector<16x1xf32>
    %409 = arith.divf %407, %408 : vector<16x1xf32>
    %410 = vector.broadcast %409 : vector<16x1xf32> to vector<16x32xf32>
    %411 = arith.subf %405, %410 : vector<16x32xf32>
    %412 = arith.mulf %411, %411 : vector<16x32xf32>
    %cst_314 = arith.constant dense<0.000000e+00> : vector<16xf32>
    %413 = vector.multi_reduction <add>, %412, %cst_314 [1] : vector<16x32xf32> to vector<16xf32>
    %414 = vector.shape_cast %413 : vector<16xf32> to vector<16x1xf32>
    %cst_315 = arith.constant 3.200000e+01 : f32
    %415 = vector.broadcast %cst_315 : f32 to vector<16x1xf32>
    %416 = arith.divf %414, %415 : vector<16x1xf32>
    %417 = vector.broadcast %409 : vector<16x1xf32> to vector<16x32xf32>
    %418 = arith.subf %405, %417 : vector<16x32xf32>
    %cst_316 = arith.constant 9.99999997E-7 : f32
    %419 = vector.broadcast %cst_316 : f32 to vector<16x1xf32>
    %420 = arith.addf %416, %419 : vector<16x1xf32>
    %421 = math.rsqrt %420 : vector<16x1xf32>
    %422 = vector.broadcast %421 : vector<16x1xf32> to vector<16x32xf32>
    %423 = arith.mulf %418, %422 : vector<16x32xf32>
    %424 = vector.broadcast %224 : vector<1x32xf32> to vector<16x32xf32>
    %425 = arith.mulf %423, %424 : vector<16x32xf32>
    %426 = vector.broadcast %225 : vector<1x32xf32> to vector<16x32xf32>
    %427 = arith.addf %425, %426 : vector<16x32xf32>
    %428 = arith.truncf %427 : vector<16x32xf32> to vector<16x32xbf16>
    %c0_317 = arith.constant 0 : index
    %c0_318 = arith.constant 0 : index
    %429 = vector.load %arg9[%c0_317, %c0_318] : memref<32x16xbf16, #tpu.memory_space<vmem>>, vector<32x16xbf16>
    %cst_319 = arith.constant dense<0.000000e+00> : vector<16x16xf32>
    %430 = tpu.matmul %428, %429, %cst_319 {dimension_numbers = #tpu.dot_dimension_numbers<[1], [0], [0], [1], [0, 0, 1, 1], [], []>} : vector<16x32xbf16>, vector<32x16xbf16>, vector<16x16xf32> -> vector<16x16xf32>
    %431 = arith.negf %430 : vector<16x16xf32>
    %432 = math.exp %431 : vector<16x16xf32>
    %cst_320 = arith.constant 1.000000e+00 : f32
    %433 = vector.broadcast %cst_320 : f32 to vector<16x16xf32>
    %434 = arith.addf %433, %432 : vector<16x16xf32>
    %435 = arith.divf %433, %434 : vector<16x16xf32>
    %c0_321 = arith.constant 0 : index
    %c0_322 = arith.constant 0 : index
    %c0_323 = arith.constant 0 : index
    %c0_324 = arith.constant 0 : index
    %436 = vector.load %arg10[%c0_321, %c0_322, %c0_323, %c0_324] : memref<1x3x16x16xf32, #tpu.memory_space<vmem>>, vector<1x1x16x16xf32>
    %437 = vector.shape_cast %436 : vector<1x1x16x16xf32> to vector<16x16xf32>
    %438 = vector.shape_cast %435 : vector<16x16xf32> to vector<1x1x16x16xf32>
    tpu.vector_store %arg10[%c0_321, %c0_322, %c0_323, %c0_324], %438 {strides = array<i32>} : memref<1x3x16x16xf32, #tpu.memory_space<vmem>>, vector<1x1x16x16xf32>,
    %c0_325 = arith.constant 0 : index
    %c0_326 = arith.constant 0 : index
    %c0_327 = arith.constant 0 : index
    %439 = vector.load %arg6[%c0_325, %c0_326, %c0_327] : memref<2x8x32xf32, #tpu.memory_space<vmem>>, vector<1x8x32xf32>
    %440 = vector.shape_cast %439 : vector<1x8x32xf32> to vector<8x32xf32>
    %441 = vector.extract_strided_slice %440 {offsets = [0, 0], sizes = [1, 32], strides = [1, 1]} : vector<8x32xf32> to vector<1x32xf32>
    %442 = vector.extract_strided_slice %440 {offsets = [1, 0], sizes = [1, 32], strides = [1, 1]} : vector<8x32xf32> to vector<1x32xf32>
    %443 = vector.extract_strided_slice %440 {offsets = [2, 0], sizes = [1, 32], strides = [1, 1]} : vector<8x32xf32> to vector<1x32xf32>
    %444 = vector.extract_strided_slice %440 {offsets = [3, 0], sizes = [1, 32], strides = [1, 1]} : vector<8x32xf32> to vector<1x32xf32>
    %445 = vector.extract_strided_slice %440 {offsets = [4, 0], sizes = [1, 32], strides = [1, 1]} : vector<8x32xf32> to vector<1x32xf32>
    %446 = vector.extract_strided_slice %440 {offsets = [5, 0], sizes = [1, 32], strides = [1, 1]} : vector<8x32xf32> to vector<1x32xf32>
    %447 = vector.extract_strided_slice %440 {offsets = [6, 0], sizes = [1, 32], strides = [1, 1]} : vector<8x32xf32> to vector<1x32xf32>
    %448 = arith.truncf %427 : vector<16x32xf32> to vector<16x32xbf16>
    %cst_328 = arith.constant 0.000000e+00 : f32
    %449 = vector.broadcast %cst_328 : f32 to vector<16x32xf32>
    %c0_329 = arith.constant 0 : index
    %c0_330 = arith.constant 0 : index
    %c0_331 = arith.constant 0 : index
    %c0_332 = arith.constant 0 : index
    %c0_333 = arith.constant 0 : index
    %450 = vector.load %arg4[%c0_329, %c0_330, %c0_331, %c0_332, %c0_333] : memref<2x4x4x32x8xbf16, #tpu.memory_space<vmem>>, vector<1x1x1x32x8xbf16>
    %451 = vector.shape_cast %450 : vector<1x1x1x32x8xbf16> to vector<32x8xbf16>
    %c0_334 = arith.constant 0 : index
    %c1_335 = arith.constant 1 : index
    %c0_336 = arith.constant 0 : index
    %c0_337 = arith.constant 0 : index
    %c0_338 = arith.constant 0 : index
    %452 = vector.load %arg4[%c0_334, %c1_335, %c0_336, %c0_337, %c0_338] : memref<2x4x4x32x8xbf16, #tpu.memory_space<vmem>>, vector<1x1x1x32x8xbf16>
    %453 = vector.shape_cast %452 : vector<1x1x1x32x8xbf16> to vector<32x8xbf16>
    %c0_339 = arith.constant 0 : index
    %c2_340 = arith.constant 2 : index
    %c0_341 = arith.constant 0 : index
    %c0_342 = arith.constant 0 : index
    %c0_343 = arith.constant 0 : index
    %454 = vector.load %arg4[%c0_339, %c2_340, %c0_341, %c0_342, %c0_343] : memref<2x4x4x32x8xbf16, #tpu.memory_space<vmem>>, vector<1x1x1x32x8xbf16>
    %455 = vector.shape_cast %454 : vector<1x1x1x32x8xbf16> to vector<32x8xbf16>
    %c0_344 = arith.constant 0 : index
    %c3_345 = arith.constant 3 : index
    %c0_346 = arith.constant 0 : index
    %c0_347 = arith.constant 0 : index
    %c0_348 = arith.constant 0 : index
    %456 = vector.load %arg4[%c0_344, %c3_345, %c0_346, %c0_347, %c0_348] : memref<2x4x4x32x8xbf16, #tpu.memory_space<vmem>>, vector<1x1x1x32x8xbf16>
    %457 = vector.shape_cast %456 : vector<1x1x1x32x8xbf16> to vector<32x8xbf16>
    %cst_349 = arith.constant dense<0.000000e+00> : vector<16x8xf32>
    %458 = tpu.matmul %448, %451, %cst_349 {dimension_numbers = #tpu.dot_dimension_numbers<[1], [0], [0], [1], [0, 0, 1, 1], [], []>} : vector<16x32xbf16>, vector<32x8xbf16>, vector<16x8xf32> -> vector<16x8xf32>
    %c0_350 = arith.constant 0 : index
    %c0_351 = arith.constant 0 : index
    %c0_352 = arith.constant 0 : index
    %c0_353 = arith.constant 0 : index
    %459 = vector.load %arg5[%c0_350, %c0_351, %c0_352, %c0_353] : memref<2x4x1x8xf32, #tpu.memory_space<vmem>>, vector<1x1x1x8xf32>
    %460 = vector.shape_cast %459 : vector<1x1x1x8xf32> to vector<1x8xf32>
    %461 = vector.broadcast %460 : vector<1x8xf32> to vector<16x8xf32>
    %462 = arith.addf %458, %461 : vector<16x8xf32>
    %cst_354 = arith.constant dense<0.000000e+00> : vector<16x8xf32>
    %463 = tpu.matmul %448, %453, %cst_354 {dimension_numbers = #tpu.dot_dimension_numbers<[1], [0], [0], [1], [0, 0, 1, 1], [], []>} : vector<16x32xbf16>, vector<32x8xbf16>, vector<16x8xf32> -> vector<16x8xf32>
    %cst_355 = arith.constant dense<0.000000e+00> : vector<16x8xf32>
    %464 = tpu.matmul %448, %455, %cst_355 {dimension_numbers = #tpu.dot_dimension_numbers<[1], [0], [0], [1], [0, 0, 1, 1], [], []>} : vector<16x32xbf16>, vector<32x8xbf16>, vector<16x8xf32> -> vector<16x8xf32>
    %cst_356 = arith.constant dense<0.000000e+00> : vector<16x16xf32>
    %465 = tpu.matmul %462, %463, %cst_356 {dimension_numbers = #tpu.dot_dimension_numbers<[1], [1], [0], [0], [0, 0, 1, 0], [], []>} : vector<16x8xf32>, vector<16x8xf32>, vector<16x16xf32> -> vector<16x16xf32>
    %cst_357 = arith.constant 0.353553385 : f32
    %466 = vector.broadcast %cst_357 : f32 to vector<16x16xf32>
    %467 = arith.mulf %465, %466 : vector<16x16xf32>
    %cst_358 = arith.constant dense<0xFF800000> : vector<16xf32>
    %468 = vector.multi_reduction <maximumf>, %467, %cst_358 [1] : vector<16x16xf32> to vector<16xf32>
    %469 = vector.shape_cast %468 : vector<16xf32> to vector<16x1xf32>
    %470 = vector.broadcast %469 : vector<16x1xf32> to vector<16x16xf32>
    %471 = arith.subf %467, %470 : vector<16x16xf32>
    %472 = math.exp %471 : vector<16x16xf32>
    %cst_359 = arith.constant dense<0.000000e+00> : vector<16xf32>
    %473 = vector.multi_reduction <add>, %472, %cst_359 [1] : vector<16x16xf32> to vector<16xf32>
    %474 = vector.shape_cast %473 : vector<16xf32> to vector<16x1xf32>
    %475 = vector.broadcast %474 : vector<16x1xf32> to vector<16x16xf32>
    %476 = arith.divf %472, %475 : vector<16x16xf32>
    %477 = arith.truncf %476 : vector<16x16xf32> to vector<16x16xbf16>
    %478 = arith.truncf %464 : vector<16x8xf32> to vector<16x8xbf16>
    %cst_360 = arith.constant dense<0.000000e+00> : vector<16x8xf32>
    %479 = tpu.matmul %477, %478, %cst_360 {dimension_numbers = #tpu.dot_dimension_numbers<[1], [0], [0], [1], [0, 0, 1, 1], [], []>} : vector<16x16xbf16>, vector<16x8xbf16>, vector<16x8xf32> -> vector<16x8xf32>
    %480 = arith.truncf %479 : vector<16x8xf32> to vector<16x8xbf16>
    %cst_361 = arith.constant dense<0.000000e+00> : vector<16x32xf32>
    %481 = tpu.matmul %480, %457, %cst_361 {dimension_numbers = #tpu.dot_dimension_numbers<[1], [1], [0], [0], [0, 0, 1, 0], [], []>} : vector<16x8xbf16>, vector<32x8xbf16>, vector<16x32xf32> -> vector<16x32xf32>
    %482 = arith.addf %449, %481 : vector<16x32xf32>
    %c0_362 = arith.constant 0 : index
    %c0_363 = arith.constant 0 : index
    %c1_364 = arith.constant 1 : index
    %c0_365 = arith.constant 0 : index
    %c0_366 = arith.constant 0 : index
    %483 = vector.load %arg4[%c0_362, %c0_363, %c1_364, %c0_365, %c0_366] : memref<2x4x4x32x8xbf16, #tpu.memory_space<vmem>>, vector<1x1x1x32x8xbf16>
    %484 = vector.shape_cast %483 : vector<1x1x1x32x8xbf16> to vector<32x8xbf16>
    %c0_367 = arith.constant 0 : index
    %c1_368 = arith.constant 1 : index
    %c1_369 = arith.constant 1 : index
    %c0_370 = arith.constant 0 : index
    %c0_371 = arith.constant 0 : index
    %485 = vector.load %arg4[%c0_367, %c1_368, %c1_369, %c0_370, %c0_371] : memref<2x4x4x32x8xbf16, #tpu.memory_space<vmem>>, vector<1x1x1x32x8xbf16>
    %486 = vector.shape_cast %485 : vector<1x1x1x32x8xbf16> to vector<32x8xbf16>
    %c0_372 = arith.constant 0 : index
    %c2_373 = arith.constant 2 : index
    %c1_374 = arith.constant 1 : index
    %c0_375 = arith.constant 0 : index
    %c0_376 = arith.constant 0 : index
    %487 = vector.load %arg4[%c0_372, %c2_373, %c1_374, %c0_375, %c0_376] : memref<2x4x4x32x8xbf16, #tpu.memory_space<vmem>>, vector<1x1x1x32x8xbf16>
    %488 = vector.shape_cast %487 : vector<1x1x1x32x8xbf16> to vector<32x8xbf16>
    %c0_377 = arith.constant 0 : index
    %c3_378 = arith.constant 3 : index
    %c1_379 = arith.constant 1 : index
    %c0_380 = arith.constant 0 : index
    %c0_381 = arith.constant 0 : index
    %489 = vector.load %arg4[%c0_377, %c3_378, %c1_379, %c0_380, %c0_381] : memref<2x4x4x32x8xbf16, #tpu.memory_space<vmem>>, vector<1x1x1x32x8xbf16>
    %490 = vector.shape_cast %489 : vector<1x1x1x32x8xbf16> to vector<32x8xbf16>
    %cst_382 = arith.constant dense<0.000000e+00> : vector<16x8xf32>
    %491 = tpu.matmul %448, %484, %cst_382 {dimension_numbers = #tpu.dot_dimension_numbers<[1], [0], [0], [1], [0, 0, 1, 1], [], []>} : vector<16x32xbf16>, vector<32x8xbf16>, vector<16x8xf32> -> vector<16x8xf32>
    %c0_383 = arith.constant 0 : index
    %c1_384 = arith.constant 1 : index
    %c0_385 = arith.constant 0 : index
    %c0_386 = arith.constant 0 : index
    %492 = vector.load %arg5[%c0_383, %c1_384, %c0_385, %c0_386] : memref<2x4x1x8xf32, #tpu.memory_space<vmem>>, vector<1x1x1x8xf32>
    %493 = vector.shape_cast %492 : vector<1x1x1x8xf32> to vector<1x8xf32>
    %494 = vector.broadcast %493 : vector<1x8xf32> to vector<16x8xf32>
    %495 = arith.addf %491, %494 : vector<16x8xf32>
    %cst_387 = arith.constant dense<0.000000e+00> : vector<16x8xf32>
    %496 = tpu.matmul %448, %486, %cst_387 {dimension_numbers = #tpu.dot_dimension_numbers<[1], [0], [0], [1], [0, 0, 1, 1], [], []>} : vector<16x32xbf16>, vector<32x8xbf16>, vector<16x8xf32> -> vector<16x8xf32>
    %cst_388 = arith.constant dense<0.000000e+00> : vector<16x8xf32>
    %497 = tpu.matmul %448, %488, %cst_388 {dimension_numbers = #tpu.dot_dimension_numbers<[1], [0], [0], [1], [0, 0, 1, 1], [], []>} : vector<16x32xbf16>, vector<32x8xbf16>, vector<16x8xf32> -> vector<16x8xf32>
    %cst_389 = arith.constant dense<0.000000e+00> : vector<16x16xf32>
    %498 = tpu.matmul %495, %496, %cst_389 {dimension_numbers = #tpu.dot_dimension_numbers<[1], [1], [0], [0], [0, 0, 1, 0], [], []>} : vector<16x8xf32>, vector<16x8xf32>, vector<16x16xf32> -> vector<16x16xf32>
    %cst_390 = arith.constant 0.353553385 : f32
    %499 = vector.broadcast %cst_390 : f32 to vector<16x16xf32>
    %500 = arith.mulf %498, %499 : vector<16x16xf32>
    %cst_391 = arith.constant dense<0xFF800000> : vector<16xf32>
    %501 = vector.multi_reduction <maximumf>, %500, %cst_391 [1] : vector<16x16xf32> to vector<16xf32>
    %502 = vector.shape_cast %501 : vector<16xf32> to vector<16x1xf32>
    %503 = vector.broadcast %502 : vector<16x1xf32> to vector<16x16xf32>
    %504 = arith.subf %500, %503 : vector<16x16xf32>
    %505 = math.exp %504 : vector<16x16xf32>
    %cst_392 = arith.constant dense<0.000000e+00> : vector<16xf32>
    %506 = vector.multi_reduction <add>, %505, %cst_392 [1] : vector<16x16xf32> to vector<16xf32>
    %507 = vector.shape_cast %506 : vector<16xf32> to vector<16x1xf32>
    %508 = vector.broadcast %507 : vector<16x1xf32> to vector<16x16xf32>
    %509 = arith.divf %505, %508 : vector<16x16xf32>
    %510 = arith.truncf %509 : vector<16x16xf32> to vector<16x16xbf16>
    %511 = arith.truncf %497 : vector<16x8xf32> to vector<16x8xbf16>
    %cst_393 = arith.constant dense<0.000000e+00> : vector<16x8xf32>
    %512 = tpu.matmul %510, %511, %cst_393 {dimension_numbers = #tpu.dot_dimension_numbers<[1], [0], [0], [1], [0, 0, 1, 1], [], []>} : vector<16x16xbf16>, vector<16x8xbf16>, vector<16x8xf32> -> vector<16x8xf32>
    %513 = arith.truncf %512 : vector<16x8xf32> to vector<16x8xbf16>
    %cst_394 = arith.constant dense<0.000000e+00> : vector<16x32xf32>
    %514 = tpu.matmul %513, %490, %cst_394 {dimension_numbers = #tpu.dot_dimension_numbers<[1], [1], [0], [0], [0, 0, 1, 0], [], []>} : vector<16x8xbf16>, vector<32x8xbf16>, vector<16x32xf32> -> vector<16x32xf32>
    %515 = arith.addf %482, %514 : vector<16x32xf32>
    %c0_395 = arith.constant 0 : index
    %c0_396 = arith.constant 0 : index
    %c2_397 = arith.constant 2 : index
    %c0_398 = arith.constant 0 : index
    %c0_399 = arith.constant 0 : index
    %516 = vector.load %arg4[%c0_395, %c0_396, %c2_397, %c0_398, %c0_399] : memref<2x4x4x32x8xbf16, #tpu.memory_space<vmem>>, vector<1x1x1x32x8xbf16>
    %517 = vector.shape_cast %516 : vector<1x1x1x32x8xbf16> to vector<32x8xbf16>
    %c0_400 = arith.constant 0 : index
    %c1_401 = arith.constant 1 : index
    %c2_402 = arith.constant 2 : index
    %c0_403 = arith.constant 0 : index
    %c0_404 = arith.constant 0 : index
    %518 = vector.load %arg4[%c0_400, %c1_401, %c2_402, %c0_403, %c0_404] : memref<2x4x4x32x8xbf16, #tpu.memory_space<vmem>>, vector<1x1x1x32x8xbf16>
    %519 = vector.shape_cast %518 : vector<1x1x1x32x8xbf16> to vector<32x8xbf16>
    %c0_405 = arith.constant 0 : index
    %c2_406 = arith.constant 2 : index
    %c2_407 = arith.constant 2 : index
    %c0_408 = arith.constant 0 : index
    %c0_409 = arith.constant 0 : index
    %520 = vector.load %arg4[%c0_405, %c2_406, %c2_407, %c0_408, %c0_409] : memref<2x4x4x32x8xbf16, #tpu.memory_space<vmem>>, vector<1x1x1x32x8xbf16>
    %521 = vector.shape_cast %520 : vector<1x1x1x32x8xbf16> to vector<32x8xbf16>
    %c0_410 = arith.constant 0 : index
    %c3_411 = arith.constant 3 : index
    %c2_412 = arith.constant 2 : index
    %c0_413 = arith.constant 0 : index
    %c0_414 = arith.constant 0 : index
    %522 = vector.load %arg4[%c0_410, %c3_411, %c2_412, %c0_413, %c0_414] : memref<2x4x4x32x8xbf16, #tpu.memory_space<vmem>>, vector<1x1x1x32x8xbf16>
    %523 = vector.shape_cast %522 : vector<1x1x1x32x8xbf16> to vector<32x8xbf16>
    %cst_415 = arith.constant dense<0.000000e+00> : vector<16x8xf32>
    %524 = tpu.matmul %448, %517, %cst_415 {dimension_numbers = #tpu.dot_dimension_numbers<[1], [0], [0], [1], [0, 0, 1, 1], [], []>} : vector<16x32xbf16>, vector<32x8xbf16>, vector<16x8xf32> -> vector<16x8xf32>
    %c0_416 = arith.constant 0 : index
    %c2_417 = arith.constant 2 : index
    %c0_418 = arith.constant 0 : index
    %c0_419 = arith.constant 0 : index
    %525 = vector.load %arg5[%c0_416, %c2_417, %c0_418, %c0_419] : memref<2x4x1x8xf32, #tpu.memory_space<vmem>>, vector<1x1x1x8xf32>
    %526 = vector.shape_cast %525 : vector<1x1x1x8xf32> to vector<1x8xf32>
    %527 = vector.broadcast %526 : vector<1x8xf32> to vector<16x8xf32>
    %528 = arith.addf %524, %527 : vector<16x8xf32>
    %cst_420 = arith.constant dense<0.000000e+00> : vector<16x8xf32>
    %529 = tpu.matmul %448, %519, %cst_420 {dimension_numbers = #tpu.dot_dimension_numbers<[1], [0], [0], [1], [0, 0, 1, 1], [], []>} : vector<16x32xbf16>, vector<32x8xbf16>, vector<16x8xf32> -> vector<16x8xf32>
    %cst_421 = arith.constant dense<0.000000e+00> : vector<16x8xf32>
    %530 = tpu.matmul %448, %521, %cst_421 {dimension_numbers = #tpu.dot_dimension_numbers<[1], [0], [0], [1], [0, 0, 1, 1], [], []>} : vector<16x32xbf16>, vector<32x8xbf16>, vector<16x8xf32> -> vector<16x8xf32>
    %cst_422 = arith.constant dense<0.000000e+00> : vector<16x16xf32>
    %531 = tpu.matmul %528, %529, %cst_422 {dimension_numbers = #tpu.dot_dimension_numbers<[1], [1], [0], [0], [0, 0, 1, 0], [], []>} : vector<16x8xf32>, vector<16x8xf32>, vector<16x16xf32> -> vector<16x16xf32>
    %cst_423 = arith.constant 0.353553385 : f32
    %532 = vector.broadcast %cst_423 : f32 to vector<16x16xf32>
    %533 = arith.mulf %531, %532 : vector<16x16xf32>
    %cst_424 = arith.constant dense<0xFF800000> : vector<16xf32>
    %534 = vector.multi_reduction <maximumf>, %533, %cst_424 [1] : vector<16x16xf32> to vector<16xf32>
    %535 = vector.shape_cast %534 : vector<16xf32> to vector<16x1xf32>
    %536 = vector.broadcast %535 : vector<16x1xf32> to vector<16x16xf32>
    %537 = arith.subf %533, %536 : vector<16x16xf32>
    %538 = math.exp %537 : vector<16x16xf32>
    %cst_425 = arith.constant dense<0.000000e+00> : vector<16xf32>
    %539 = vector.multi_reduction <add>, %538, %cst_425 [1] : vector<16x16xf32> to vector<16xf32>
    %540 = vector.shape_cast %539 : vector<16xf32> to vector<16x1xf32>
    %541 = vector.broadcast %540 : vector<16x1xf32> to vector<16x16xf32>
    %542 = arith.divf %538, %541 : vector<16x16xf32>
    %543 = arith.truncf %542 : vector<16x16xf32> to vector<16x16xbf16>
    %544 = arith.truncf %530 : vector<16x8xf32> to vector<16x8xbf16>
    %cst_426 = arith.constant dense<0.000000e+00> : vector<16x8xf32>
    %545 = tpu.matmul %543, %544, %cst_426 {dimension_numbers = #tpu.dot_dimension_numbers<[1], [0], [0], [1], [0, 0, 1, 1], [], []>} : vector<16x16xbf16>, vector<16x8xbf16>, vector<16x8xf32> -> vector<16x8xf32>
    %546 = arith.truncf %545 : vector<16x8xf32> to vector<16x8xbf16>
    %cst_427 = arith.constant dense<0.000000e+00> : vector<16x32xf32>
    %547 = tpu.matmul %546, %523, %cst_427 {dimension_numbers = #tpu.dot_dimension_numbers<[1], [1], [0], [0], [0, 0, 1, 0], [], []>} : vector<16x8xbf16>, vector<32x8xbf16>, vector<16x32xf32> -> vector<16x32xf32>
    %548 = arith.addf %515, %547 : vector<16x32xf32>
    %c0_428 = arith.constant 0 : index
    %c0_429 = arith.constant 0 : index
    %c3_430 = arith.constant 3 : index
    %c0_431 = arith.constant 0 : index
    %c0_432 = arith.constant 0 : index
    %549 = vector.load %arg4[%c0_428, %c0_429, %c3_430, %c0_431, %c0_432] : memref<2x4x4x32x8xbf16, #tpu.memory_space<vmem>>, vector<1x1x1x32x8xbf16>
    %550 = vector.shape_cast %549 : vector<1x1x1x32x8xbf16> to vector<32x8xbf16>
    %c0_433 = arith.constant 0 : index
    %c1_434 = arith.constant 1 : index
    %c3_435 = arith.constant 3 : index
    %c0_436 = arith.constant 0 : index
    %c0_437 = arith.constant 0 : index
    %551 = vector.load %arg4[%c0_433, %c1_434, %c3_435, %c0_436, %c0_437] : memref<2x4x4x32x8xbf16, #tpu.memory_space<vmem>>, vector<1x1x1x32x8xbf16>
    %552 = vector.shape_cast %551 : vector<1x1x1x32x8xbf16> to vector<32x8xbf16>
    %c0_438 = arith.constant 0 : index
    %c2_439 = arith.constant 2 : index
    %c3_440 = arith.constant 3 : index
    %c0_441 = arith.constant 0 : index
    %c0_442 = arith.constant 0 : index
    %553 = vector.load %arg4[%c0_438, %c2_439, %c3_440, %c0_441, %c0_442] : memref<2x4x4x32x8xbf16, #tpu.memory_space<vmem>>, vector<1x1x1x32x8xbf16>
    %554 = vector.shape_cast %553 : vector<1x1x1x32x8xbf16> to vector<32x8xbf16>
    %c0_443 = arith.constant 0 : index
    %c3_444 = arith.constant 3 : index
    %c3_445 = arith.constant 3 : index
    %c0_446 = arith.constant 0 : index
    %c0_447 = arith.constant 0 : index
    %555 = vector.load %arg4[%c0_443, %c3_444, %c3_445, %c0_446, %c0_447] : memref<2x4x4x32x8xbf16, #tpu.memory_space<vmem>>, vector<1x1x1x32x8xbf16>
    %556 = vector.shape_cast %555 : vector<1x1x1x32x8xbf16> to vector<32x8xbf16>
    %cst_448 = arith.constant dense<0.000000e+00> : vector<16x8xf32>
    %557 = tpu.matmul %448, %550, %cst_448 {dimension_numbers = #tpu.dot_dimension_numbers<[1], [0], [0], [1], [0, 0, 1, 1], [], []>} : vector<16x32xbf16>, vector<32x8xbf16>, vector<16x8xf32> -> vector<16x8xf32>
    %c0_449 = arith.constant 0 : index
    %c3_450 = arith.constant 3 : index
    %c0_451 = arith.constant 0 : index
    %c0_452 = arith.constant 0 : index
    %558 = vector.load %arg5[%c0_449, %c3_450, %c0_451, %c0_452] : memref<2x4x1x8xf32, #tpu.memory_space<vmem>>, vector<1x1x1x8xf32>
    %559 = vector.shape_cast %558 : vector<1x1x1x8xf32> to vector<1x8xf32>
    %560 = vector.broadcast %559 : vector<1x8xf32> to vector<16x8xf32>
    %561 = arith.addf %557, %560 : vector<16x8xf32>
    %cst_453 = arith.constant dense<0.000000e+00> : vector<16x8xf32>
    %562 = tpu.matmul %448, %552, %cst_453 {dimension_numbers = #tpu.dot_dimension_numbers<[1], [0], [0], [1], [0, 0, 1, 1], [], []>} : vector<16x32xbf16>, vector<32x8xbf16>, vector<16x8xf32> -> vector<16x8xf32>
    %cst_454 = arith.constant dense<0.000000e+00> : vector<16x8xf32>
    %563 = tpu.matmul %448, %554, %cst_454 {dimension_numbers = #tpu.dot_dimension_numbers<[1], [0], [0], [1], [0, 0, 1, 1], [], []>} : vector<16x32xbf16>, vector<32x8xbf16>, vector<16x8xf32> -> vector<16x8xf32>
    %cst_455 = arith.constant dense<0.000000e+00> : vector<16x16xf32>
    %564 = tpu.matmul %561, %562, %cst_455 {dimension_numbers = #tpu.dot_dimension_numbers<[1], [1], [0], [0], [0, 0, 1, 0], [], []>} : vector<16x8xf32>, vector<16x8xf32>, vector<16x16xf32> -> vector<16x16xf32>
    %cst_456 = arith.constant 0.353553385 : f32
    %565 = vector.broadcast %cst_456 : f32 to vector<16x16xf32>
    %566 = arith.mulf %564, %565 : vector<16x16xf32>
    %cst_457 = arith.constant dense<0xFF800000> : vector<16xf32>
    %567 = vector.multi_reduction <maximumf>, %566, %cst_457 [1] : vector<16x16xf32> to vector<16xf32>
    %568 = vector.shape_cast %567 : vector<16xf32> to vector<16x1xf32>
    %569 = vector.broadcast %568 : vector<16x1xf32> to vector<16x16xf32>
    %570 = arith.subf %566, %569 : vector<16x16xf32>
    %571 = math.exp %570 : vector<16x16xf32>
    %cst_458 = arith.constant dense<0.000000e+00> : vector<16xf32>
    %572 = vector.multi_reduction <add>, %571, %cst_458 [1] : vector<16x16xf32> to vector<16xf32>
    %573 = vector.shape_cast %572 : vector<16xf32> to vector<16x1xf32>
    %574 = vector.broadcast %573 : vector<16x1xf32> to vector<16x16xf32>
    %575 = arith.divf %571, %574 : vector<16x16xf32>
    %576 = arith.truncf %575 : vector<16x16xf32> to vector<16x16xbf16>
    %577 = arith.truncf %563 : vector<16x8xf32> to vector<16x8xbf16>
    %cst_459 = arith.constant dense<0.000000e+00> : vector<16x8xf32>
    %578 = tpu.matmul %576, %577, %cst_459 {dimension_numbers = #tpu.dot_dimension_numbers<[1], [0], [0], [1], [0, 0, 1, 1], [], []>} : vector<16x16xbf16>, vector<16x8xbf16>, vector<16x8xf32> -> vector<16x8xf32>
    %579 = arith.truncf %578 : vector<16x8xf32> to vector<16x8xbf16>
    %cst_460 = arith.constant dense<0.000000e+00> : vector<16x32xf32>
    %580 = tpu.matmul %579, %556, %cst_460 {dimension_numbers = #tpu.dot_dimension_numbers<[1], [1], [0], [0], [0, 0, 1, 0], [], []>} : vector<16x8xbf16>, vector<32x8xbf16>, vector<16x32xf32> -> vector<16x32xf32>
    %581 = arith.addf %548, %580 : vector<16x32xf32>
    %582 = vector.broadcast %441 : vector<1x32xf32> to vector<16x32xf32>
    %583 = arith.addf %581, %582 : vector<16x32xf32>
    %584 = arith.addf %427, %583 : vector<16x32xf32>
    %cst_461 = arith.constant dense<0.000000e+00> : vector<16xf32>
    %585 = vector.multi_reduction <add>, %584, %cst_461 [1] : vector<16x32xf32> to vector<16xf32>
    %586 = vector.shape_cast %585 : vector<16xf32> to vector<16x1xf32>
    %cst_462 = arith.constant 3.200000e+01 : f32
    %587 = vector.broadcast %cst_462 : f32 to vector<16x1xf32>
    %588 = arith.divf %586, %587 : vector<16x1xf32>
    %589 = vector.broadcast %588 : vector<16x1xf32> to vector<16x32xf32>
    %590 = arith.subf %584, %589 : vector<16x32xf32>
    %591 = arith.mulf %590, %590 : vector<16x32xf32>
    %cst_463 = arith.constant dense<0.000000e+00> : vector<16xf32>
    %592 = vector.multi_reduction <add>, %591, %cst_463 [1] : vector<16x32xf32> to vector<16xf32>
    %593 = vector.shape_cast %592 : vector<16xf32> to vector<16x1xf32>
    %cst_464 = arith.constant 3.200000e+01 : f32
    %594 = vector.broadcast %cst_464 : f32 to vector<16x1xf32>
    %595 = arith.divf %593, %594 : vector<16x1xf32>
    %596 = vector.broadcast %588 : vector<16x1xf32> to vector<16x32xf32>
    %597 = arith.subf %584, %596 : vector<16x32xf32>
    %cst_465 = arith.constant 9.99999997E-7 : f32
    %598 = vector.broadcast %cst_465 : f32 to vector<16x1xf32>
    %599 = arith.addf %595, %598 : vector<16x1xf32>
    %600 = math.rsqrt %599 : vector<16x1xf32>
    %601 = vector.broadcast %600 : vector<16x1xf32> to vector<16x32xf32>
    %602 = arith.mulf %597, %601 : vector<16x32xf32>
    %603 = vector.broadcast %442 : vector<1x32xf32> to vector<16x32xf32>
    %604 = arith.mulf %602, %603 : vector<16x32xf32>
    %605 = vector.broadcast %443 : vector<1x32xf32> to vector<16x32xf32>
    %606 = arith.addf %604, %605 : vector<16x32xf32>
    %607 = arith.truncf %606 : vector<16x32xf32> to vector<16x32xbf16>
    %c0_466 = arith.constant 0 : index
    %c0_467 = arith.constant 0 : index
    %c0_468 = arith.constant 0 : index
    %608 = vector.load %arg7[%c0_466, %c0_467, %c0_468] : memref<2x32x32xbf16, #tpu.memory_space<vmem>>, vector<1x32x32xbf16>
    %609 = vector.shape_cast %608 : vector<1x32x32xbf16> to vector<32x32xbf16>
    %cst_469 = arith.constant dense<0.000000e+00> : vector<16x32xf32>
    %610 = tpu.matmul %607, %609, %cst_469 {dimension_numbers = #tpu.dot_dimension_numbers<[1], [0], [0], [1], [0, 0, 1, 1], [], []>} : vector<16x32xbf16>, vector<32x32xbf16>, vector<16x32xf32> -> vector<16x32xf32>
    %611 = vector.broadcast %444 : vector<1x32xf32> to vector<16x32xf32>
    %612 = arith.addf %610, %611 : vector<16x32xf32>
    %cst_470 = arith.constant 5.000000e-01 : f32
    %613 = vector.broadcast %cst_470 : f32 to vector<16x32xf32>
    %614 = arith.mulf %613, %612 : vector<16x32xf32>
    %cst_471 = arith.constant 0.707106769 : f32
    %615 = vector.broadcast %cst_471 : f32 to vector<16x32xf32>
    %616 = arith.mulf %612, %615 : vector<16x32xf32>
    %617 = math.erf %616 : vector<16x32xf32>
    %cst_472 = arith.constant 1.000000e+00 : f32
    %618 = vector.broadcast %cst_472 : f32 to vector<16x32xf32>
    %619 = arith.addf %618, %617 : vector<16x32xf32>
    %620 = arith.mulf %614, %619 : vector<16x32xf32>
    %621 = arith.truncf %620 : vector<16x32xf32> to vector<16x32xbf16>
    %c0_473 = arith.constant 0 : index
    %c0_474 = arith.constant 0 : index
    %c0_475 = arith.constant 0 : index
    %622 = vector.load %arg8[%c0_473, %c0_474, %c0_475] : memref<2x32x32xbf16, #tpu.memory_space<vmem>>, vector<1x32x32xbf16>
    %623 = vector.shape_cast %622 : vector<1x32x32xbf16> to vector<32x32xbf16>
    %cst_476 = arith.constant dense<0.000000e+00> : vector<16x32xf32>
    %624 = tpu.matmul %621, %623, %cst_476 {dimension_numbers = #tpu.dot_dimension_numbers<[1], [0], [0], [1], [0, 0, 1, 1], [], []>} : vector<16x32xbf16>, vector<32x32xbf16>, vector<16x32xf32> -> vector<16x32xf32>
    %625 = vector.broadcast %445 : vector<1x32xf32> to vector<16x32xf32>
    %626 = arith.addf %624, %625 : vector<16x32xf32>
    %627 = arith.addf %606, %626 : vector<16x32xf32>
    %cst_477 = arith.constant dense<0.000000e+00> : vector<16xf32>
    %628 = vector.multi_reduction <add>, %627, %cst_477 [1] : vector<16x32xf32> to vector<16xf32>
    %629 = vector.shape_cast %628 : vector<16xf32> to vector<16x1xf32>
    %cst_478 = arith.constant 3.200000e+01 : f32
    %630 = vector.broadcast %cst_478 : f32 to vector<16x1xf32>
    %631 = arith.divf %629, %630 : vector<16x1xf32>
    %632 = vector.broadcast %631 : vector<16x1xf32> to vector<16x32xf32>
    %633 = arith.subf %627, %632 : vector<16x32xf32>
    %634 = arith.mulf %633, %633 : vector<16x32xf32>
    %cst_479 = arith.constant dense<0.000000e+00> : vector<16xf32>
    %635 = vector.multi_reduction <add>, %634, %cst_479 [1] : vector<16x32xf32> to vector<16xf32>
    %636 = vector.shape_cast %635 : vector<16xf32> to vector<16x1xf32>
    %cst_480 = arith.constant 3.200000e+01 : f32
    %637 = vector.broadcast %cst_480 : f32 to vector<16x1xf32>
    %638 = arith.divf %636, %637 : vector<16x1xf32>
    %639 = vector.broadcast %631 : vector<16x1xf32> to vector<16x32xf32>
    %640 = arith.subf %627, %639 : vector<16x32xf32>
    %cst_481 = arith.constant 9.99999997E-7 : f32
    %641 = vector.broadcast %cst_481 : f32 to vector<16x1xf32>
    %642 = arith.addf %638, %641 : vector<16x1xf32>
    %643 = math.rsqrt %642 : vector<16x1xf32>
    %644 = vector.broadcast %643 : vector<16x1xf32> to vector<16x32xf32>
    %645 = arith.mulf %640, %644 : vector<16x32xf32>
    %646 = vector.broadcast %446 : vector<1x32xf32> to vector<16x32xf32>
    %647 = arith.mulf %645, %646 : vector<16x32xf32>
    %648 = vector.broadcast %447 : vector<1x32xf32> to vector<16x32xf32>
    %649 = arith.addf %647, %648 : vector<16x32xf32>
    %c1_482 = arith.constant 1 : index
    %c0_483 = arith.constant 0 : index
    %c0_484 = arith.constant 0 : index
    %650 = vector.load %arg6[%c1_482, %c0_483, %c0_484] : memref<2x8x32xf32, #tpu.memory_space<vmem>>, vector<1x8x32xf32>
    %651 = vector.shape_cast %650 : vector<1x8x32xf32> to vector<8x32xf32>
    %652 = vector.extract_strided_slice %651 {offsets = [0, 0], sizes = [1, 32], strides = [1, 1]} : vector<8x32xf32> to vector<1x32xf32>
    %653 = vector.extract_strided_slice %651 {offsets = [1, 0], sizes = [1, 32], strides = [1, 1]} : vector<8x32xf32> to vector<1x32xf32>
    %654 = vector.extract_strided_slice %651 {offsets = [2, 0], sizes = [1, 32], strides = [1, 1]} : vector<8x32xf32> to vector<1x32xf32>
    %655 = vector.extract_strided_slice %651 {offsets = [3, 0], sizes = [1, 32], strides = [1, 1]} : vector<8x32xf32> to vector<1x32xf32>
    %656 = vector.extract_strided_slice %651 {offsets = [4, 0], sizes = [1, 32], strides = [1, 1]} : vector<8x32xf32> to vector<1x32xf32>
    %657 = vector.extract_strided_slice %651 {offsets = [5, 0], sizes = [1, 32], strides = [1, 1]} : vector<8x32xf32> to vector<1x32xf32>
    %658 = vector.extract_strided_slice %651 {offsets = [6, 0], sizes = [1, 32], strides = [1, 1]} : vector<8x32xf32> to vector<1x32xf32>
    %659 = arith.truncf %649 : vector<16x32xf32> to vector<16x32xbf16>
    %cst_485 = arith.constant 0.000000e+00 : f32
    %660 = vector.broadcast %cst_485 : f32 to vector<16x32xf32>
    %c1_486 = arith.constant 1 : index
    %c0_487 = arith.constant 0 : index
    %c0_488 = arith.constant 0 : index
    %c0_489 = arith.constant 0 : index
    %c0_490 = arith.constant 0 : index
    %661 = vector.load %arg4[%c1_486, %c0_487, %c0_488, %c0_489, %c0_490] : memref<2x4x4x32x8xbf16, #tpu.memory_space<vmem>>, vector<1x1x1x32x8xbf16>
    %662 = vector.shape_cast %661 : vector<1x1x1x32x8xbf16> to vector<32x8xbf16>
    %c1_491 = arith.constant 1 : index
    %c1_492 = arith.constant 1 : index
    %c0_493 = arith.constant 0 : index
    %c0_494 = arith.constant 0 : index
    %c0_495 = arith.constant 0 : index
    %663 = vector.load %arg4[%c1_491, %c1_492, %c0_493, %c0_494, %c0_495] : memref<2x4x4x32x8xbf16, #tpu.memory_space<vmem>>, vector<1x1x1x32x8xbf16>
    %664 = vector.shape_cast %663 : vector<1x1x1x32x8xbf16> to vector<32x8xbf16>
    %c1_496 = arith.constant 1 : index
    %c2_497 = arith.constant 2 : index
    %c0_498 = arith.constant 0 : index
    %c0_499 = arith.constant 0 : index
    %c0_500 = arith.constant 0 : index
    %665 = vector.load %arg4[%c1_496, %c2_497, %c0_498, %c0_499, %c0_500] : memref<2x4x4x32x8xbf16, #tpu.memory_space<vmem>>, vector<1x1x1x32x8xbf16>
    %666 = vector.shape_cast %665 : vector<1x1x1x32x8xbf16> to vector<32x8xbf16>
    %c1_501 = arith.constant 1 : index
    %c3_502 = arith.constant 3 : index
    %c0_503 = arith.constant 0 : index
    %c0_504 = arith.constant 0 : index
    %c0_505 = arith.constant 0 : index
    %667 = vector.load %arg4[%c1_501, %c3_502, %c0_503, %c0_504, %c0_505] : memref<2x4x4x32x8xbf16, #tpu.memory_space<vmem>>, vector<1x1x1x32x8xbf16>
    %668 = vector.shape_cast %667 : vector<1x1x1x32x8xbf16> to vector<32x8xbf16>
    %cst_506 = arith.constant dense<0.000000e+00> : vector<16x8xf32>
    %669 = tpu.matmul %659, %662, %cst_506 {dimension_numbers = #tpu.dot_dimension_numbers<[1], [0], [0], [1], [0, 0, 1, 1], [], []>} : vector<16x32xbf16>, vector<32x8xbf16>, vector<16x8xf32> -> vector<16x8xf32>
    %c1_507 = arith.constant 1 : index
    %c0_508 = arith.constant 0 : index
    %c0_509 = arith.constant 0 : index
    %c0_510 = arith.constant 0 : index
    %670 = vector.load %arg5[%c1_507, %c0_508, %c0_509, %c0_510] : memref<2x4x1x8xf32, #tpu.memory_space<vmem>>, vector<1x1x1x8xf32>
    %671 = vector.shape_cast %670 : vector<1x1x1x8xf32> to vector<1x8xf32>
    %672 = vector.broadcast %671 : vector<1x8xf32> to vector<16x8xf32>
    %673 = arith.addf %669, %672 : vector<16x8xf32>
    %cst_511 = arith.constant dense<0.000000e+00> : vector<16x8xf32>
    %674 = tpu.matmul %659, %664, %cst_511 {dimension_numbers = #tpu.dot_dimension_numbers<[1], [0], [0], [1], [0, 0, 1, 1], [], []>} : vector<16x32xbf16>, vector<32x8xbf16>, vector<16x8xf32> -> vector<16x8xf32>
    %cst_512 = arith.constant dense<0.000000e+00> : vector<16x8xf32>
    %675 = tpu.matmul %659, %666, %cst_512 {dimension_numbers = #tpu.dot_dimension_numbers<[1], [0], [0], [1], [0, 0, 1, 1], [], []>} : vector<16x32xbf16>, vector<32x8xbf16>, vector<16x8xf32> -> vector<16x8xf32>
    %cst_513 = arith.constant dense<0.000000e+00> : vector<16x16xf32>
    %676 = tpu.matmul %673, %674, %cst_513 {dimension_numbers = #tpu.dot_dimension_numbers<[1], [1], [0], [0], [0, 0, 1, 0], [], []>} : vector<16x8xf32>, vector<16x8xf32>, vector<16x16xf32> -> vector<16x16xf32>
    %cst_514 = arith.constant 0.353553385 : f32
    %677 = vector.broadcast %cst_514 : f32 to vector<16x16xf32>
    %678 = arith.mulf %676, %677 : vector<16x16xf32>
    %cst_515 = arith.constant dense<0xFF800000> : vector<16xf32>
    %679 = vector.multi_reduction <maximumf>, %678, %cst_515 [1] : vector<16x16xf32> to vector<16xf32>
    %680 = vector.shape_cast %679 : vector<16xf32> to vector<16x1xf32>
    %681 = vector.broadcast %680 : vector<16x1xf32> to vector<16x16xf32>
    %682 = arith.subf %678, %681 : vector<16x16xf32>
    %683 = math.exp %682 : vector<16x16xf32>
    %cst_516 = arith.constant dense<0.000000e+00> : vector<16xf32>
    %684 = vector.multi_reduction <add>, %683, %cst_516 [1] : vector<16x16xf32> to vector<16xf32>
    %685 = vector.shape_cast %684 : vector<16xf32> to vector<16x1xf32>
    %686 = vector.broadcast %685 : vector<16x1xf32> to vector<16x16xf32>
    %687 = arith.divf %683, %686 : vector<16x16xf32>
    %688 = arith.truncf %687 : vector<16x16xf32> to vector<16x16xbf16>
    %689 = arith.truncf %675 : vector<16x8xf32> to vector<16x8xbf16>
    %cst_517 = arith.constant dense<0.000000e+00> : vector<16x8xf32>
    %690 = tpu.matmul %688, %689, %cst_517 {dimension_numbers = #tpu.dot_dimension_numbers<[1], [0], [0], [1], [0, 0, 1, 1], [], []>} : vector<16x16xbf16>, vector<16x8xbf16>, vector<16x8xf32> -> vector<16x8xf32>
    %691 = arith.truncf %690 : vector<16x8xf32> to vector<16x8xbf16>
    %cst_518 = arith.constant dense<0.000000e+00> : vector<16x32xf32>
    %692 = tpu.matmul %691, %668, %cst_518 {dimension_numbers = #tpu.dot_dimension_numbers<[1], [1], [0], [0], [0, 0, 1, 0], [], []>} : vector<16x8xbf16>, vector<32x8xbf16>, vector<16x32xf32> -> vector<16x32xf32>
    %693 = arith.addf %660, %692 : vector<16x32xf32>
    %c1_519 = arith.constant 1 : index
    %c0_520 = arith.constant 0 : index
    %c1_521 = arith.constant 1 : index
    %c0_522 = arith.constant 0 : index
    %c0_523 = arith.constant 0 : index
    %694 = vector.load %arg4[%c1_519, %c0_520, %c1_521, %c0_522, %c0_523] : memref<2x4x4x32x8xbf16, #tpu.memory_space<vmem>>, vector<1x1x1x32x8xbf16>
    %695 = vector.shape_cast %694 : vector<1x1x1x32x8xbf16> to vector<32x8xbf16>
    %c1_524 = arith.constant 1 : index
    %c1_525 = arith.constant 1 : index
    %c1_526 = arith.constant 1 : index
    %c0_527 = arith.constant 0 : index
    %c0_528 = arith.constant 0 : index
    %696 = vector.load %arg4[%c1_524, %c1_525, %c1_526, %c0_527, %c0_528] : memref<2x4x4x32x8xbf16, #tpu.memory_space<vmem>>, vector<1x1x1x32x8xbf16>
    %697 = vector.shape_cast %696 : vector<1x1x1x32x8xbf16> to vector<32x8xbf16>
    %c1_529 = arith.constant 1 : index
    %c2_530 = arith.constant 2 : index
    %c1_531 = arith.constant 1 : index
    %c0_532 = arith.constant 0 : index
    %c0_533 = arith.constant 0 : index
    %698 = vector.load %arg4[%c1_529, %c2_530, %c1_531, %c0_532, %c0_533] : memref<2x4x4x32x8xbf16, #tpu.memory_space<vmem>>, vector<1x1x1x32x8xbf16>
    %699 = vector.shape_cast %698 : vector<1x1x1x32x8xbf16> to vector<32x8xbf16>
    %c1_534 = arith.constant 1 : index
    %c3_535 = arith.constant 3 : index
    %c1_536 = arith.constant 1 : index
    %c0_537 = arith.constant 0 : index
    %c0_538 = arith.constant 0 : index
    %700 = vector.load %arg4[%c1_534, %c3_535, %c1_536, %c0_537, %c0_538] : memref<2x4x4x32x8xbf16, #tpu.memory_space<vmem>>, vector<1x1x1x32x8xbf16>
    %701 = vector.shape_cast %700 : vector<1x1x1x32x8xbf16> to vector<32x8xbf16>
    %cst_539 = arith.constant dense<0.000000e+00> : vector<16x8xf32>
    %702 = tpu.matmul %659, %695, %cst_539 {dimension_numbers = #tpu.dot_dimension_numbers<[1], [0], [0], [1], [0, 0, 1, 1], [], []>} : vector<16x32xbf16>, vector<32x8xbf16>, vector<16x8xf32> -> vector<16x8xf32>
    %c1_540 = arith.constant 1 : index
    %c1_541 = arith.constant 1 : index
    %c0_542 = arith.constant 0 : index
    %c0_543 = arith.constant 0 : index
    %703 = vector.load %arg5[%c1_540, %c1_541, %c0_542, %c0_543] : memref<2x4x1x8xf32, #tpu.memory_space<vmem>>, vector<1x1x1x8xf32>
    %704 = vector.shape_cast %703 : vector<1x1x1x8xf32> to vector<1x8xf32>
    %705 = vector.broadcast %704 : vector<1x8xf32> to vector<16x8xf32>
    %706 = arith.addf %702, %705 : vector<16x8xf32>
    %cst_544 = arith.constant dense<0.000000e+00> : vector<16x8xf32>
    %707 = tpu.matmul %659, %697, %cst_544 {dimension_numbers = #tpu.dot_dimension_numbers<[1], [0], [0], [1], [0, 0, 1, 1], [], []>} : vector<16x32xbf16>, vector<32x8xbf16>, vector<16x8xf32> -> vector<16x8xf32>
    %cst_545 = arith.constant dense<0.000000e+00> : vector<16x8xf32>
    %708 = tpu.matmul %659, %699, %cst_545 {dimension_numbers = #tpu.dot_dimension_numbers<[1], [0], [0], [1], [0, 0, 1, 1], [], []>} : vector<16x32xbf16>, vector<32x8xbf16>, vector<16x8xf32> -> vector<16x8xf32>
    %cst_546 = arith.constant dense<0.000000e+00> : vector<16x16xf32>
    %709 = tpu.matmul %706, %707, %cst_546 {dimension_numbers = #tpu.dot_dimension_numbers<[1], [1], [0], [0], [0, 0, 1, 0], [], []>} : vector<16x8xf32>, vector<16x8xf32>, vector<16x16xf32> -> vector<16x16xf32>
    %cst_547 = arith.constant 0.353553385 : f32
    %710 = vector.broadcast %cst_547 : f32 to vector<16x16xf32>
    %711 = arith.mulf %709, %710 : vector<16x16xf32>
    %cst_548 = arith.constant dense<0xFF800000> : vector<16xf32>
    %712 = vector.multi_reduction <maximumf>, %711, %cst_548 [1] : vector<16x16xf32> to vector<16xf32>
    %713 = vector.shape_cast %712 : vector<16xf32> to vector<16x1xf32>
    %714 = vector.broadcast %713 : vector<16x1xf32> to vector<16x16xf32>
    %715 = arith.subf %711, %714 : vector<16x16xf32>
    %716 = math.exp %715 : vector<16x16xf32>
    %cst_549 = arith.constant dense<0.000000e+00> : vector<16xf32>
    %717 = vector.multi_reduction <add>, %716, %cst_549 [1] : vector<16x16xf32> to vector<16xf32>
    %718 = vector.shape_cast %717 : vector<16xf32> to vector<16x1xf32>
    %719 = vector.broadcast %718 : vector<16x1xf32> to vector<16x16xf32>
    %720 = arith.divf %716, %719 : vector<16x16xf32>
    %721 = arith.truncf %720 : vector<16x16xf32> to vector<16x16xbf16>
    %722 = arith.truncf %708 : vector<16x8xf32> to vector<16x8xbf16>
    %cst_550 = arith.constant dense<0.000000e+00> : vector<16x8xf32>
    %723 = tpu.matmul %721, %722, %cst_550 {dimension_numbers = #tpu.dot_dimension_numbers<[1], [0], [0], [1], [0, 0, 1, 1], [], []>} : vector<16x16xbf16>, vector<16x8xbf16>, vector<16x8xf32> -> vector<16x8xf32>
    %724 = arith.truncf %723 : vector<16x8xf32> to vector<16x8xbf16>
    %cst_551 = arith.constant dense<0.000000e+00> : vector<16x32xf32>
    %725 = tpu.matmul %724, %701, %cst_551 {dimension_numbers = #tpu.dot_dimension_numbers<[1], [1], [0], [0], [0, 0, 1, 0], [], []>} : vector<16x8xbf16>, vector<32x8xbf16>, vector<16x32xf32> -> vector<16x32xf32>
    %726 = arith.addf %693, %725 : vector<16x32xf32>
    %c1_552 = arith.constant 1 : index
    %c0_553 = arith.constant 0 : index
    %c2_554 = arith.constant 2 : index
    %c0_555 = arith.constant 0 : index
    %c0_556 = arith.constant 0 : index
    %727 = vector.load %arg4[%c1_552, %c0_553, %c2_554, %c0_555, %c0_556] : memref<2x4x4x32x8xbf16, #tpu.memory_space<vmem>>, vector<1x1x1x32x8xbf16>
    %728 = vector.shape_cast %727 : vector<1x1x1x32x8xbf16> to vector<32x8xbf16>
    %c1_557 = arith.constant 1 : index
    %c1_558 = arith.constant 1 : index
    %c2_559 = arith.constant 2 : index
    %c0_560 = arith.constant 0 : index
    %c0_561 = arith.constant 0 : index
    %729 = vector.load %arg4[%c1_557, %c1_558, %c2_559, %c0_560, %c0_561] : memref<2x4x4x32x8xbf16, #tpu.memory_space<vmem>>, vector<1x1x1x32x8xbf16>
    %730 = vector.shape_cast %729 : vector<1x1x1x32x8xbf16> to vector<32x8xbf16>
    %c1_562 = arith.constant 1 : index
    %c2_563 = arith.constant 2 : index
    %c2_564 = arith.constant 2 : index
    %c0_565 = arith.constant 0 : index
    %c0_566 = arith.constant 0 : index
    %731 = vector.load %arg4[%c1_562, %c2_563, %c2_564, %c0_565, %c0_566] : memref<2x4x4x32x8xbf16, #tpu.memory_space<vmem>>, vector<1x1x1x32x8xbf16>
    %732 = vector.shape_cast %731 : vector<1x1x1x32x8xbf16> to vector<32x8xbf16>
    %c1_567 = arith.constant 1 : index
    %c3_568 = arith.constant 3 : index
    %c2_569 = arith.constant 2 : index
    %c0_570 = arith.constant 0 : index
    %c0_571 = arith.constant 0 : index
    %733 = vector.load %arg4[%c1_567, %c3_568, %c2_569, %c0_570, %c0_571] : memref<2x4x4x32x8xbf16, #tpu.memory_space<vmem>>, vector<1x1x1x32x8xbf16>
    %734 = vector.shape_cast %733 : vector<1x1x1x32x8xbf16> to vector<32x8xbf16>
    %cst_572 = arith.constant dense<0.000000e+00> : vector<16x8xf32>
    %735 = tpu.matmul %659, %728, %cst_572 {dimension_numbers = #tpu.dot_dimension_numbers<[1], [0], [0], [1], [0, 0, 1, 1], [], []>} : vector<16x32xbf16>, vector<32x8xbf16>, vector<16x8xf32> -> vector<16x8xf32>
    %c1_573 = arith.constant 1 : index
    %c2_574 = arith.constant 2 : index
    %c0_575 = arith.constant 0 : index
    %c0_576 = arith.constant 0 : index
    %736 = vector.load %arg5[%c1_573, %c2_574, %c0_575, %c0_576] : memref<2x4x1x8xf32, #tpu.memory_space<vmem>>, vector<1x1x1x8xf32>
    %737 = vector.shape_cast %736 : vector<1x1x1x8xf32> to vector<1x8xf32>
    %738 = vector.broadcast %737 : vector<1x8xf32> to vector<16x8xf32>
    %739 = arith.addf %735, %738 : vector<16x8xf32>
    %cst_577 = arith.constant dense<0.000000e+00> : vector<16x8xf32>
    %740 = tpu.matmul %659, %730, %cst_577 {dimension_numbers = #tpu.dot_dimension_numbers<[1], [0], [0], [1], [0, 0, 1, 1], [], []>} : vector<16x32xbf16>, vector<32x8xbf16>, vector<16x8xf32> -> vector<16x8xf32>
    %cst_578 = arith.constant dense<0.000000e+00> : vector<16x8xf32>
    %741 = tpu.matmul %659, %732, %cst_578 {dimension_numbers = #tpu.dot_dimension_numbers<[1], [0], [0], [1], [0, 0, 1, 1], [], []>} : vector<16x32xbf16>, vector<32x8xbf16>, vector<16x8xf32> -> vector<16x8xf32>
    %cst_579 = arith.constant dense<0.000000e+00> : vector<16x16xf32>
    %742 = tpu.matmul %739, %740, %cst_579 {dimension_numbers = #tpu.dot_dimension_numbers<[1], [1], [0], [0], [0, 0, 1, 0], [], []>} : vector<16x8xf32>, vector<16x8xf32>, vector<16x16xf32> -> vector<16x16xf32>
    %cst_580 = arith.constant 0.353553385 : f32
    %743 = vector.broadcast %cst_580 : f32 to vector<16x16xf32>
    %744 = arith.mulf %742, %743 : vector<16x16xf32>
    %cst_581 = arith.constant dense<0xFF800000> : vector<16xf32>
    %745 = vector.multi_reduction <maximumf>, %744, %cst_581 [1] : vector<16x16xf32> to vector<16xf32>
    %746 = vector.shape_cast %745 : vector<16xf32> to vector<16x1xf32>
    %747 = vector.broadcast %746 : vector<16x1xf32> to vector<16x16xf32>
    %748 = arith.subf %744, %747 : vector<16x16xf32>
    %749 = math.exp %748 : vector<16x16xf32>
    %cst_582 = arith.constant dense<0.000000e+00> : vector<16xf32>
    %750 = vector.multi_reduction <add>, %749, %cst_582 [1] : vector<16x16xf32> to vector<16xf32>
    %751 = vector.shape_cast %750 : vector<16xf32> to vector<16x1xf32>
    %752 = vector.broadcast %751 : vector<16x1xf32> to vector<16x16xf32>
    %753 = arith.divf %749, %752 : vector<16x16xf32>
    %754 = arith.truncf %753 : vector<16x16xf32> to vector<16x16xbf16>
    %755 = arith.truncf %741 : vector<16x8xf32> to vector<16x8xbf16>
    %cst_583 = arith.constant dense<0.000000e+00> : vector<16x8xf32>
    %756 = tpu.matmul %754, %755, %cst_583 {dimension_numbers = #tpu.dot_dimension_numbers<[1], [0], [0], [1], [0, 0, 1, 1], [], []>} : vector<16x16xbf16>, vector<16x8xbf16>, vector<16x8xf32> -> vector<16x8xf32>
    %757 = arith.truncf %756 : vector<16x8xf32> to vector<16x8xbf16>
    %cst_584 = arith.constant dense<0.000000e+00> : vector<16x32xf32>
    %758 = tpu.matmul %757, %734, %cst_584 {dimension_numbers = #tpu.dot_dimension_numbers<[1], [1], [0], [0], [0, 0, 1, 0], [], []>} : vector<16x8xbf16>, vector<32x8xbf16>, vector<16x32xf32> -> vector<16x32xf32>
    %759 = arith.addf %726, %758 : vector<16x32xf32>
    %c1_585 = arith.constant 1 : index
    %c0_586 = arith.constant 0 : index
    %c3_587 = arith.constant 3 : index
    %c0_588 = arith.constant 0 : index
    %c0_589 = arith.constant 0 : index
    %760 = vector.load %arg4[%c1_585, %c0_586, %c3_587, %c0_588, %c0_589] : memref<2x4x4x32x8xbf16, #tpu.memory_space<vmem>>, vector<1x1x1x32x8xbf16>
    %761 = vector.shape_cast %760 : vector<1x1x1x32x8xbf16> to vector<32x8xbf16>
    %c1_590 = arith.constant 1 : index
    %c1_591 = arith.constant 1 : index
    %c3_592 = arith.constant 3 : index
    %c0_593 = arith.constant 0 : index
    %c0_594 = arith.constant 0 : index
    %762 = vector.load %arg4[%c1_590, %c1_591, %c3_592, %c0_593, %c0_594] : memref<2x4x4x32x8xbf16, #tpu.memory_space<vmem>>, vector<1x1x1x32x8xbf16>
    %763 = vector.shape_cast %762 : vector<1x1x1x32x8xbf16> to vector<32x8xbf16>
    %c1_595 = arith.constant 1 : index
    %c2_596 = arith.constant 2 : index
    %c3_597 = arith.constant 3 : index
    %c0_598 = arith.constant 0 : index
    %c0_599 = arith.constant 0 : index
    %764 = vector.load %arg4[%c1_595, %c2_596, %c3_597, %c0_598, %c0_599] : memref<2x4x4x32x8xbf16, #tpu.memory_space<vmem>>, vector<1x1x1x32x8xbf16>
    %765 = vector.shape_cast %764 : vector<1x1x1x32x8xbf16> to vector<32x8xbf16>
    %c1_600 = arith.constant 1 : index
    %c3_601 = arith.constant 3 : index
    %c3_602 = arith.constant 3 : index
    %c0_603 = arith.constant 0 : index
    %c0_604 = arith.constant 0 : index
    %766 = vector.load %arg4[%c1_600, %c3_601, %c3_602, %c0_603, %c0_604] : memref<2x4x4x32x8xbf16, #tpu.memory_space<vmem>>, vector<1x1x1x32x8xbf16>
    %767 = vector.shape_cast %766 : vector<1x1x1x32x8xbf16> to vector<32x8xbf16>
    %cst_605 = arith.constant dense<0.000000e+00> : vector<16x8xf32>
    %768 = tpu.matmul %659, %761, %cst_605 {dimension_numbers = #tpu.dot_dimension_numbers<[1], [0], [0], [1], [0, 0, 1, 1], [], []>} : vector<16x32xbf16>, vector<32x8xbf16>, vector<16x8xf32> -> vector<16x8xf32>
    %c1_606 = arith.constant 1 : index
    %c3_607 = arith.constant 3 : index
    %c0_608 = arith.constant 0 : index
    %c0_609 = arith.constant 0 : index
    %769 = vector.load %arg5[%c1_606, %c3_607, %c0_608, %c0_609] : memref<2x4x1x8xf32, #tpu.memory_space<vmem>>, vector<1x1x1x8xf32>
    %770 = vector.shape_cast %769 : vector<1x1x1x8xf32> to vector<1x8xf32>
    %771 = vector.broadcast %770 : vector<1x8xf32> to vector<16x8xf32>
    %772 = arith.addf %768, %771 : vector<16x8xf32>
    %cst_610 = arith.constant dense<0.000000e+00> : vector<16x8xf32>
    %773 = tpu.matmul %659, %763, %cst_610 {dimension_numbers = #tpu.dot_dimension_numbers<[1], [0], [0], [1], [0, 0, 1, 1], [], []>} : vector<16x32xbf16>, vector<32x8xbf16>, vector<16x8xf32> -> vector<16x8xf32>
    %cst_611 = arith.constant dense<0.000000e+00> : vector<16x8xf32>
    %774 = tpu.matmul %659, %765, %cst_611 {dimension_numbers = #tpu.dot_dimension_numbers<[1], [0], [0], [1], [0, 0, 1, 1], [], []>} : vector<16x32xbf16>, vector<32x8xbf16>, vector<16x8xf32> -> vector<16x8xf32>
    %cst_612 = arith.constant dense<0.000000e+00> : vector<16x16xf32>
    %775 = tpu.matmul %772, %773, %cst_612 {dimension_numbers = #tpu.dot_dimension_numbers<[1], [1], [0], [0], [0, 0, 1, 0], [], []>} : vector<16x8xf32>, vector<16x8xf32>, vector<16x16xf32> -> vector<16x16xf32>
    %cst_613 = arith.constant 0.353553385 : f32
    %776 = vector.broadcast %cst_613 : f32 to vector<16x16xf32>
    %777 = arith.mulf %775, %776 : vector<16x16xf32>
    %cst_614 = arith.constant dense<0xFF800000> : vector<16xf32>
    %778 = vector.multi_reduction <maximumf>, %777, %cst_614 [1] : vector<16x16xf32> to vector<16xf32>
    %779 = vector.shape_cast %778 : vector<16xf32> to vector<16x1xf32>
    %780 = vector.broadcast %779 : vector<16x1xf32> to vector<16x16xf32>
    %781 = arith.subf %777, %780 : vector<16x16xf32>
    %782 = math.exp %781 : vector<16x16xf32>
    %cst_615 = arith.constant dense<0.000000e+00> : vector<16xf32>
    %783 = vector.multi_reduction <add>, %782, %cst_615 [1] : vector<16x16xf32> to vector<16xf32>
    %784 = vector.shape_cast %783 : vector<16xf32> to vector<16x1xf32>
    %785 = vector.broadcast %784 : vector<16x1xf32> to vector<16x16xf32>
    %786 = arith.divf %782, %785 : vector<16x16xf32>
    %787 = arith.truncf %786 : vector<16x16xf32> to vector<16x16xbf16>
    %788 = arith.truncf %774 : vector<16x8xf32> to vector<16x8xbf16>
    %cst_616 = arith.constant dense<0.000000e+00> : vector<16x8xf32>
    %789 = tpu.matmul %787, %788, %cst_616 {dimension_numbers = #tpu.dot_dimension_numbers<[1], [0], [0], [1], [0, 0, 1, 1], [], []>} : vector<16x16xbf16>, vector<16x8xbf16>, vector<16x8xf32> -> vector<16x8xf32>
    %790 = arith.truncf %789 : vector<16x8xf32> to vector<16x8xbf16>
    %cst_617 = arith.constant dense<0.000000e+00> : vector<16x32xf32>
    %791 = tpu.matmul %790, %767, %cst_617 {dimension_numbers = #tpu.dot_dimension_numbers<[1], [1], [0], [0], [0, 0, 1, 0], [], []>} : vector<16x8xbf16>, vector<32x8xbf16>, vector<16x32xf32> -> vector<16x32xf32>
    %792 = arith.addf %759, %791 : vector<16x32xf32>
    %793 = vector.broadcast %652 : vector<1x32xf32> to vector<16x32xf32>
    %794 = arith.addf %792, %793 : vector<16x32xf32>
    %795 = arith.addf %649, %794 : vector<16x32xf32>
    %cst_618 = arith.constant dense<0.000000e+00> : vector<16xf32>
    %796 = vector.multi_reduction <add>, %795, %cst_618 [1] : vector<16x32xf32> to vector<16xf32>
    %797 = vector.shape_cast %796 : vector<16xf32> to vector<16x1xf32>
    %cst_619 = arith.constant 3.200000e+01 : f32
    %798 = vector.broadcast %cst_619 : f32 to vector<16x1xf32>
    %799 = arith.divf %797, %798 : vector<16x1xf32>
    %800 = vector.broadcast %799 : vector<16x1xf32> to vector<16x32xf32>
    %801 = arith.subf %795, %800 : vector<16x32xf32>
    %802 = arith.mulf %801, %801 : vector<16x32xf32>
    %cst_620 = arith.constant dense<0.000000e+00> : vector<16xf32>
    %803 = vector.multi_reduction <add>, %802, %cst_620 [1] : vector<16x32xf32> to vector<16xf32>
    %804 = vector.shape_cast %803 : vector<16xf32> to vector<16x1xf32>
    %cst_621 = arith.constant 3.200000e+01 : f32
    %805 = vector.broadcast %cst_621 : f32 to vector<16x1xf32>
    %806 = arith.divf %804, %805 : vector<16x1xf32>
    %807 = vector.broadcast %799 : vector<16x1xf32> to vector<16x32xf32>
    %808 = arith.subf %795, %807 : vector<16x32xf32>
    %cst_622 = arith.constant 9.99999997E-7 : f32
    %809 = vector.broadcast %cst_622 : f32 to vector<16x1xf32>
    %810 = arith.addf %806, %809 : vector<16x1xf32>
    %811 = math.rsqrt %810 : vector<16x1xf32>
    %812 = vector.broadcast %811 : vector<16x1xf32> to vector<16x32xf32>
    %813 = arith.mulf %808, %812 : vector<16x32xf32>
    %814 = vector.broadcast %653 : vector<1x32xf32> to vector<16x32xf32>
    %815 = arith.mulf %813, %814 : vector<16x32xf32>
    %816 = vector.broadcast %654 : vector<1x32xf32> to vector<16x32xf32>
    %817 = arith.addf %815, %816 : vector<16x32xf32>
    %818 = arith.truncf %817 : vector<16x32xf32> to vector<16x32xbf16>
    %c1_623 = arith.constant 1 : index
    %c0_624 = arith.constant 0 : index
    %c0_625 = arith.constant 0 : index
    %819 = vector.load %arg7[%c1_623, %c0_624, %c0_625] : memref<2x32x32xbf16, #tpu.memory_space<vmem>>, vector<1x32x32xbf16>
    %820 = vector.shape_cast %819 : vector<1x32x32xbf16> to vector<32x32xbf16>
    %cst_626 = arith.constant dense<0.000000e+00> : vector<16x32xf32>
    %821 = tpu.matmul %818, %820, %cst_626 {dimension_numbers = #tpu.dot_dimension_numbers<[1], [0], [0], [1], [0, 0, 1, 1], [], []>} : vector<16x32xbf16>, vector<32x32xbf16>, vector<16x32xf32> -> vector<16x32xf32>
    %822 = vector.broadcast %655 : vector<1x32xf32> to vector<16x32xf32>
    %823 = arith.addf %821, %822 : vector<16x32xf32>
    %cst_627 = arith.constant 5.000000e-01 : f32
    %824 = vector.broadcast %cst_627 : f32 to vector<16x32xf32>
    %825 = arith.mulf %824, %823 : vector<16x32xf32>
    %cst_628 = arith.constant 0.707106769 : f32
    %826 = vector.broadcast %cst_628 : f32 to vector<16x32xf32>
    %827 = arith.mulf %823, %826 : vector<16x32xf32>
    %828 = math.erf %827 : vector<16x32xf32>
    %cst_629 = arith.constant 1.000000e+00 : f32
    %829 = vector.broadcast %cst_629 : f32 to vector<16x32xf32>
    %830 = arith.addf %829, %828 : vector<16x32xf32>
    %831 = arith.mulf %825, %830 : vector<16x32xf32>
    %832 = arith.truncf %831 : vector<16x32xf32> to vector<16x32xbf16>
    %c1_630 = arith.constant 1 : index
    %c0_631 = arith.constant 0 : index
    %c0_632 = arith.constant 0 : index
    %833 = vector.load %arg8[%c1_630, %c0_631, %c0_632] : memref<2x32x32xbf16, #tpu.memory_space<vmem>>, vector<1x32x32xbf16>
    %834 = vector.shape_cast %833 : vector<1x32x32xbf16> to vector<32x32xbf16>
    %cst_633 = arith.constant dense<0.000000e+00> : vector<16x32xf32>
    %835 = tpu.matmul %832, %834, %cst_633 {dimension_numbers = #tpu.dot_dimension_numbers<[1], [0], [0], [1], [0, 0, 1, 1], [], []>} : vector<16x32xbf16>, vector<32x32xbf16>, vector<16x32xf32> -> vector<16x32xf32>
    %836 = vector.broadcast %656 : vector<1x32xf32> to vector<16x32xf32>
    %837 = arith.addf %835, %836 : vector<16x32xf32>
    %838 = arith.addf %817, %837 : vector<16x32xf32>
    %cst_634 = arith.constant dense<0.000000e+00> : vector<16xf32>
    %839 = vector.multi_reduction <add>, %838, %cst_634 [1] : vector<16x32xf32> to vector<16xf32>
    %840 = vector.shape_cast %839 : vector<16xf32> to vector<16x1xf32>
    %cst_635 = arith.constant 3.200000e+01 : f32
    %841 = vector.broadcast %cst_635 : f32 to vector<16x1xf32>
    %842 = arith.divf %840, %841 : vector<16x1xf32>
    %843 = vector.broadcast %842 : vector<16x1xf32> to vector<16x32xf32>
    %844 = arith.subf %838, %843 : vector<16x32xf32>
    %845 = arith.mulf %844, %844 : vector<16x32xf32>
    %cst_636 = arith.constant dense<0.000000e+00> : vector<16xf32>
    %846 = vector.multi_reduction <add>, %845, %cst_636 [1] : vector<16x32xf32> to vector<16xf32>
    %847 = vector.shape_cast %846 : vector<16xf32> to vector<16x1xf32>
    %cst_637 = arith.constant 3.200000e+01 : f32
    %848 = vector.broadcast %cst_637 : f32 to vector<16x1xf32>
    %849 = arith.divf %847, %848 : vector<16x1xf32>
    %850 = vector.broadcast %842 : vector<16x1xf32> to vector<16x32xf32>
    %851 = arith.subf %838, %850 : vector<16x32xf32>
    %cst_638 = arith.constant 9.99999997E-7 : f32
    %852 = vector.broadcast %cst_638 : f32 to vector<16x1xf32>
    %853 = arith.addf %849, %852 : vector<16x1xf32>
    %854 = math.rsqrt %853 : vector<16x1xf32>
    %855 = vector.broadcast %854 : vector<16x1xf32> to vector<16x32xf32>
    %856 = arith.mulf %851, %855 : vector<16x32xf32>
    %857 = vector.broadcast %657 : vector<1x32xf32> to vector<16x32xf32>
    %858 = arith.mulf %856, %857 : vector<16x32xf32>
    %859 = vector.broadcast %658 : vector<1x32xf32> to vector<16x32xf32>
    %860 = arith.addf %858, %859 : vector<16x32xf32>
    %861 = arith.truncf %860 : vector<16x32xf32> to vector<16x32xbf16>
    %c0_639 = arith.constant 0 : index
    %c0_640 = arith.constant 0 : index
    %862 = vector.load %arg9[%c0_639, %c0_640] : memref<32x16xbf16, #tpu.memory_space<vmem>>, vector<32x16xbf16>
    %cst_641 = arith.constant dense<0.000000e+00> : vector<16x16xf32>
    %863 = tpu.matmul %861, %862, %cst_641 {dimension_numbers = #tpu.dot_dimension_numbers<[1], [0], [0], [1], [0, 0, 1, 1], [], []>} : vector<16x32xbf16>, vector<32x16xbf16>, vector<16x16xf32> -> vector<16x16xf32>
    %864 = arith.negf %863 : vector<16x16xf32>
    %865 = math.exp %864 : vector<16x16xf32>
    %cst_642 = arith.constant 1.000000e+00 : f32
    %866 = vector.broadcast %cst_642 : f32 to vector<16x16xf32>
    %867 = arith.addf %866, %865 : vector<16x16xf32>
    %868 = arith.divf %866, %867 : vector<16x16xf32>
    %c0_643 = arith.constant 0 : index
    %c1_644 = arith.constant 1 : index
    %c0_645 = arith.constant 0 : index
    %c0_646 = arith.constant 0 : index
    %869 = vector.load %arg10[%c0_643, %c1_644, %c0_645, %c0_646] : memref<1x3x16x16xf32, #tpu.memory_space<vmem>>, vector<1x1x16x16xf32>
    %870 = vector.shape_cast %869 : vector<1x1x16x16xf32> to vector<16x16xf32>
    %871 = vector.shape_cast %868 : vector<16x16xf32> to vector<1x1x16x16xf32>
    tpu.vector_store %arg10[%c0_643, %c1_644, %c0_645, %c0_646], %871 {strides = array<i32>} : memref<1x3x16x16xf32, #tpu.memory_space<vmem>>, vector<1x1x16x16xf32>,
    %c0_647 = arith.constant 0 : index
    %c0_648 = arith.constant 0 : index
    %c0_649 = arith.constant 0 : index
    %872 = vector.load %arg6[%c0_647, %c0_648, %c0_649] : memref<2x8x32xf32, #tpu.memory_space<vmem>>, vector<1x8x32xf32>
    %873 = vector.shape_cast %872 : vector<1x8x32xf32> to vector<8x32xf32>
    %874 = vector.extract_strided_slice %873 {offsets = [0, 0], sizes = [1, 32], strides = [1, 1]} : vector<8x32xf32> to vector<1x32xf32>
    %875 = vector.extract_strided_slice %873 {offsets = [1, 0], sizes = [1, 32], strides = [1, 1]} : vector<8x32xf32> to vector<1x32xf32>
    %876 = vector.extract_strided_slice %873 {offsets = [2, 0], sizes = [1, 32], strides = [1, 1]} : vector<8x32xf32> to vector<1x32xf32>
    %877 = vector.extract_strided_slice %873 {offsets = [3, 0], sizes = [1, 32], strides = [1, 1]} : vector<8x32xf32> to vector<1x32xf32>
    %878 = vector.extract_strided_slice %873 {offsets = [4, 0], sizes = [1, 32], strides = [1, 1]} : vector<8x32xf32> to vector<1x32xf32>
    %879 = vector.extract_strided_slice %873 {offsets = [5, 0], sizes = [1, 32], strides = [1, 1]} : vector<8x32xf32> to vector<1x32xf32>
    %880 = vector.extract_strided_slice %873 {offsets = [6, 0], sizes = [1, 32], strides = [1, 1]} : vector<8x32xf32> to vector<1x32xf32>
    %881 = arith.truncf %860 : vector<16x32xf32> to vector<16x32xbf16>
    %cst_650 = arith.constant 0.000000e+00 : f32
    %882 = vector.broadcast %cst_650 : f32 to vector<16x32xf32>
    %c0_651 = arith.constant 0 : index
    %c0_652 = arith.constant 0 : index
    %c0_653 = arith.constant 0 : index
    %c0_654 = arith.constant 0 : index
    %c0_655 = arith.constant 0 : index
    %883 = vector.load %arg4[%c0_651, %c0_652, %c0_653, %c0_654, %c0_655] : memref<2x4x4x32x8xbf16, #tpu.memory_space<vmem>>, vector<1x1x1x32x8xbf16>
    %884 = vector.shape_cast %883 : vector<1x1x1x32x8xbf16> to vector<32x8xbf16>
    %c0_656 = arith.constant 0 : index
    %c1_657 = arith.constant 1 : index
    %c0_658 = arith.constant 0 : index
    %c0_659 = arith.constant 0 : index
    %c0_660 = arith.constant 0 : index
    %885 = vector.load %arg4[%c0_656, %c1_657, %c0_658, %c0_659, %c0_660] : memref<2x4x4x32x8xbf16, #tpu.memory_space<vmem>>, vector<1x1x1x32x8xbf16>
    %886 = vector.shape_cast %885 : vector<1x1x1x32x8xbf16> to vector<32x8xbf16>
    %c0_661 = arith.constant 0 : index
    %c2_662 = arith.constant 2 : index
    %c0_663 = arith.constant 0 : index
    %c0_664 = arith.constant 0 : index
    %c0_665 = arith.constant 0 : index
    %887 = vector.load %arg4[%c0_661, %c2_662, %c0_663, %c0_664, %c0_665] : memref<2x4x4x32x8xbf16, #tpu.memory_space<vmem>>, vector<1x1x1x32x8xbf16>
    %888 = vector.shape_cast %887 : vector<1x1x1x32x8xbf16> to vector<32x8xbf16>
    %c0_666 = arith.constant 0 : index
    %c3_667 = arith.constant 3 : index
    %c0_668 = arith.constant 0 : index
    %c0_669 = arith.constant 0 : index
    %c0_670 = arith.constant 0 : index
    %889 = vector.load %arg4[%c0_666, %c3_667, %c0_668, %c0_669, %c0_670] : memref<2x4x4x32x8xbf16, #tpu.memory_space<vmem>>, vector<1x1x1x32x8xbf16>
    %890 = vector.shape_cast %889 : vector<1x1x1x32x8xbf16> to vector<32x8xbf16>
    %cst_671 = arith.constant dense<0.000000e+00> : vector<16x8xf32>
    %891 = tpu.matmul %881, %884, %cst_671 {dimension_numbers = #tpu.dot_dimension_numbers<[1], [0], [0], [1], [0, 0, 1, 1], [], []>} : vector<16x32xbf16>, vector<32x8xbf16>, vector<16x8xf32> -> vector<16x8xf32>
    %c0_672 = arith.constant 0 : index
    %c0_673 = arith.constant 0 : index
    %c0_674 = arith.constant 0 : index
    %c0_675 = arith.constant 0 : index
    %892 = vector.load %arg5[%c0_672, %c0_673, %c0_674, %c0_675] : memref<2x4x1x8xf32, #tpu.memory_space<vmem>>, vector<1x1x1x8xf32>
    %893 = vector.shape_cast %892 : vector<1x1x1x8xf32> to vector<1x8xf32>
    %894 = vector.broadcast %893 : vector<1x8xf32> to vector<16x8xf32>
    %895 = arith.addf %891, %894 : vector<16x8xf32>
    %cst_676 = arith.constant dense<0.000000e+00> : vector<16x8xf32>
    %896 = tpu.matmul %881, %886, %cst_676 {dimension_numbers = #tpu.dot_dimension_numbers<[1], [0], [0], [1], [0, 0, 1, 1], [], []>} : vector<16x32xbf16>, vector<32x8xbf16>, vector<16x8xf32> -> vector<16x8xf32>
    %cst_677 = arith.constant dense<0.000000e+00> : vector<16x8xf32>
    %897 = tpu.matmul %881, %888, %cst_677 {dimension_numbers = #tpu.dot_dimension_numbers<[1], [0], [0], [1], [0, 0, 1, 1], [], []>} : vector<16x32xbf16>, vector<32x8xbf16>, vector<16x8xf32> -> vector<16x8xf32>
    %cst_678 = arith.constant dense<0.000000e+00> : vector<16x16xf32>
    %898 = tpu.matmul %895, %896, %cst_678 {dimension_numbers = #tpu.dot_dimension_numbers<[1], [1], [0], [0], [0, 0, 1, 0], [], []>} : vector<16x8xf32>, vector<16x8xf32>, vector<16x16xf32> -> vector<16x16xf32>
    %cst_679 = arith.constant 0.353553385 : f32
    %899 = vector.broadcast %cst_679 : f32 to vector<16x16xf32>
    %900 = arith.mulf %898, %899 : vector<16x16xf32>
    %cst_680 = arith.constant dense<0xFF800000> : vector<16xf32>
    %901 = vector.multi_reduction <maximumf>, %900, %cst_680 [1] : vector<16x16xf32> to vector<16xf32>
    %902 = vector.shape_cast %901 : vector<16xf32> to vector<16x1xf32>
    %903 = vector.broadcast %902 : vector<16x1xf32> to vector<16x16xf32>
    %904 = arith.subf %900, %903 : vector<16x16xf32>
    %905 = math.exp %904 : vector<16x16xf32>
    %cst_681 = arith.constant dense<0.000000e+00> : vector<16xf32>
    %906 = vector.multi_reduction <add>, %905, %cst_681 [1] : vector<16x16xf32> to vector<16xf32>
    %907 = vector.shape_cast %906 : vector<16xf32> to vector<16x1xf32>
    %908 = vector.broadcast %907 : vector<16x1xf32> to vector<16x16xf32>
    %909 = arith.divf %905, %908 : vector<16x16xf32>
    %910 = arith.truncf %909 : vector<16x16xf32> to vector<16x16xbf16>
    %911 = arith.truncf %897 : vector<16x8xf32> to vector<16x8xbf16>
    %cst_682 = arith.constant dense<0.000000e+00> : vector<16x8xf32>
    %912 = tpu.matmul %910, %911, %cst_682 {dimension_numbers = #tpu.dot_dimension_numbers<[1], [0], [0], [1], [0, 0, 1, 1], [], []>} : vector<16x16xbf16>, vector<16x8xbf16>, vector<16x8xf32> -> vector<16x8xf32>
    %913 = arith.truncf %912 : vector<16x8xf32> to vector<16x8xbf16>
    %cst_683 = arith.constant dense<0.000000e+00> : vector<16x32xf32>
    %914 = tpu.matmul %913, %890, %cst_683 {dimension_numbers = #tpu.dot_dimension_numbers<[1], [1], [0], [0], [0, 0, 1, 0], [], []>} : vector<16x8xbf16>, vector<32x8xbf16>, vector<16x32xf32> -> vector<16x32xf32>
    %915 = arith.addf %882, %914 : vector<16x32xf32>
    %c0_684 = arith.constant 0 : index
    %c0_685 = arith.constant 0 : index
    %c1_686 = arith.constant 1 : index
    %c0_687 = arith.constant 0 : index
    %c0_688 = arith.constant 0 : index
    %916 = vector.load %arg4[%c0_684, %c0_685, %c1_686, %c0_687, %c0_688] : memref<2x4x4x32x8xbf16, #tpu.memory_space<vmem>>, vector<1x1x1x32x8xbf16>
    %917 = vector.shape_cast %916 : vector<1x1x1x32x8xbf16> to vector<32x8xbf16>
    %c0_689 = arith.constant 0 : index
    %c1_690 = arith.constant 1 : index
    %c1_691 = arith.constant 1 : index
    %c0_692 = arith.constant 0 : index
    %c0_693 = arith.constant 0 : index
    %918 = vector.load %arg4[%c0_689, %c1_690, %c1_691, %c0_692, %c0_693] : memref<2x4x4x32x8xbf16, #tpu.memory_space<vmem>>, vector<1x1x1x32x8xbf16>
    %919 = vector.shape_cast %918 : vector<1x1x1x32x8xbf16> to vector<32x8xbf16>
    %c0_694 = arith.constant 0 : index
    %c2_695 = arith.constant 2 : index
    %c1_696 = arith.constant 1 : index
    %c0_697 = arith.constant 0 : index
    %c0_698 = arith.constant 0 : index
    %920 = vector.load %arg4[%c0_694, %c2_695, %c1_696, %c0_697, %c0_698] : memref<2x4x4x32x8xbf16, #tpu.memory_space<vmem>>, vector<1x1x1x32x8xbf16>
    %921 = vector.shape_cast %920 : vector<1x1x1x32x8xbf16> to vector<32x8xbf16>
    %c0_699 = arith.constant 0 : index
    %c3_700 = arith.constant 3 : index
    %c1_701 = arith.constant 1 : index
    %c0_702 = arith.constant 0 : index
    %c0_703 = arith.constant 0 : index
    %922 = vector.load %arg4[%c0_699, %c3_700, %c1_701, %c0_702, %c0_703] : memref<2x4x4x32x8xbf16, #tpu.memory_space<vmem>>, vector<1x1x1x32x8xbf16>
    %923 = vector.shape_cast %922 : vector<1x1x1x32x8xbf16> to vector<32x8xbf16>
    %cst_704 = arith.constant dense<0.000000e+00> : vector<16x8xf32>
    %924 = tpu.matmul %881, %917, %cst_704 {dimension_numbers = #tpu.dot_dimension_numbers<[1], [0], [0], [1], [0, 0, 1, 1], [], []>} : vector<16x32xbf16>, vector<32x8xbf16>, vector<16x8xf32> -> vector<16x8xf32>
    %c0_705 = arith.constant 0 : index
    %c1_706 = arith.constant 1 : index
    %c0_707 = arith.constant 0 : index
    %c0_708 = arith.constant 0 : index
    %925 = vector.load %arg5[%c0_705, %c1_706, %c0_707, %c0_708] : memref<2x4x1x8xf32, #tpu.memory_space<vmem>>, vector<1x1x1x8xf32>
    %926 = vector.shape_cast %925 : vector<1x1x1x8xf32> to vector<1x8xf32>
    %927 = vector.broadcast %926 : vector<1x8xf32> to vector<16x8xf32>
    %928 = arith.addf %924, %927 : vector<16x8xf32>
    %cst_709 = arith.constant dense<0.000000e+00> : vector<16x8xf32>
    %929 = tpu.matmul %881, %919, %cst_709 {dimension_numbers = #tpu.dot_dimension_numbers<[1], [0], [0], [1], [0, 0, 1, 1], [], []>} : vector<16x32xbf16>, vector<32x8xbf16>, vector<16x8xf32> -> vector<16x8xf32>
    %cst_710 = arith.constant dense<0.000000e+00> : vector<16x8xf32>
    %930 = tpu.matmul %881, %921, %cst_710 {dimension_numbers = #tpu.dot_dimension_numbers<[1], [0], [0], [1], [0, 0, 1, 1], [], []>} : vector<16x32xbf16>, vector<32x8xbf16>, vector<16x8xf32> -> vector<16x8xf32>
    %cst_711 = arith.constant dense<0.000000e+00> : vector<16x16xf32>
    %931 = tpu.matmul %928, %929, %cst_711 {dimension_numbers = #tpu.dot_dimension_numbers<[1], [1], [0], [0], [0, 0, 1, 0], [], []>} : vector<16x8xf32>, vector<16x8xf32>, vector<16x16xf32> -> vector<16x16xf32>
    %cst_712 = arith.constant 0.353553385 : f32
    %932 = vector.broadcast %cst_712 : f32 to vector<16x16xf32>
    %933 = arith.mulf %931, %932 : vector<16x16xf32>
    %cst_713 = arith.constant dense<0xFF800000> : vector<16xf32>
    %934 = vector.multi_reduction <maximumf>, %933, %cst_713 [1] : vector<16x16xf32> to vector<16xf32>
    %935 = vector.shape_cast %934 : vector<16xf32> to vector<16x1xf32>
    %936 = vector.broadcast %935 : vector<16x1xf32> to vector<16x16xf32>
    %937 = arith.subf %933, %936 : vector<16x16xf32>
    %938 = math.exp %937 : vector<16x16xf32>
    %cst_714 = arith.constant dense<0.000000e+00> : vector<16xf32>
    %939 = vector.multi_reduction <add>, %938, %cst_714 [1] : vector<16x16xf32> to vector<16xf32>
    %940 = vector.shape_cast %939 : vector<16xf32> to vector<16x1xf32>
    %941 = vector.broadcast %940 : vector<16x1xf32> to vector<16x16xf32>
    %942 = arith.divf %938, %941 : vector<16x16xf32>
    %943 = arith.truncf %942 : vector<16x16xf32> to vector<16x16xbf16>
    %944 = arith.truncf %930 : vector<16x8xf32> to vector<16x8xbf16>
    %cst_715 = arith.constant dense<0.000000e+00> : vector<16x8xf32>
    %945 = tpu.matmul %943, %944, %cst_715 {dimension_numbers = #tpu.dot_dimension_numbers<[1], [0], [0], [1], [0, 0, 1, 1], [], []>} : vector<16x16xbf16>, vector<16x8xbf16>, vector<16x8xf32> -> vector<16x8xf32>
    %946 = arith.truncf %945 : vector<16x8xf32> to vector<16x8xbf16>
    %cst_716 = arith.constant dense<0.000000e+00> : vector<16x32xf32>
    %947 = tpu.matmul %946, %923, %cst_716 {dimension_numbers = #tpu.dot_dimension_numbers<[1], [1], [0], [0], [0, 0, 1, 0], [], []>} : vector<16x8xbf16>, vector<32x8xbf16>, vector<16x32xf32> -> vector<16x32xf32>
    %948 = arith.addf %915, %947 : vector<16x32xf32>
    %c0_717 = arith.constant 0 : index
    %c0_718 = arith.constant 0 : index
    %c2_719 = arith.constant 2 : index
    %c0_720 = arith.constant 0 : index
    %c0_721 = arith.constant 0 : index
    %949 = vector.load %arg4[%c0_717, %c0_718, %c2_719, %c0_720, %c0_721] : memref<2x4x4x32x8xbf16, #tpu.memory_space<vmem>>, vector<1x1x1x32x8xbf16>
    %950 = vector.shape_cast %949 : vector<1x1x1x32x8xbf16> to vector<32x8xbf16>
    %c0_722 = arith.constant 0 : index
    %c1_723 = arith.constant 1 : index
    %c2_724 = arith.constant 2 : index
    %c0_725 = arith.constant 0 : index
    %c0_726 = arith.constant 0 : index
    %951 = vector.load %arg4[%c0_722, %c1_723, %c2_724, %c0_725, %c0_726] : memref<2x4x4x32x8xbf16, #tpu.memory_space<vmem>>, vector<1x1x1x32x8xbf16>
    %952 = vector.shape_cast %951 : vector<1x1x1x32x8xbf16> to vector<32x8xbf16>
    %c0_727 = arith.constant 0 : index
    %c2_728 = arith.constant 2 : index
    %c2_729 = arith.constant 2 : index
    %c0_730 = arith.constant 0 : index
    %c0_731 = arith.constant 0 : index
    %953 = vector.load %arg4[%c0_727, %c2_728, %c2_729, %c0_730, %c0_731] : memref<2x4x4x32x8xbf16, #tpu.memory_space<vmem>>, vector<1x1x1x32x8xbf16>
    %954 = vector.shape_cast %953 : vector<1x1x1x32x8xbf16> to vector<32x8xbf16>
    %c0_732 = arith.constant 0 : index
    %c3_733 = arith.constant 3 : index
    %c2_734 = arith.constant 2 : index
    %c0_735 = arith.constant 0 : index
    %c0_736 = arith.constant 0 : index
    %955 = vector.load %arg4[%c0_732, %c3_733, %c2_734, %c0_735, %c0_736] : memref<2x4x4x32x8xbf16, #tpu.memory_space<vmem>>, vector<1x1x1x32x8xbf16>
    %956 = vector.shape_cast %955 : vector<1x1x1x32x8xbf16> to vector<32x8xbf16>
    %cst_737 = arith.constant dense<0.000000e+00> : vector<16x8xf32>
    %957 = tpu.matmul %881, %950, %cst_737 {dimension_numbers = #tpu.dot_dimension_numbers<[1], [0], [0], [1], [0, 0, 1, 1], [], []>} : vector<16x32xbf16>, vector<32x8xbf16>, vector<16x8xf32> -> vector<16x8xf32>
    %c0_738 = arith.constant 0 : index
    %c2_739 = arith.constant 2 : index
    %c0_740 = arith.constant 0 : index
    %c0_741 = arith.constant 0 : index
    %958 = vector.load %arg5[%c0_738, %c2_739, %c0_740, %c0_741] : memref<2x4x1x8xf32, #tpu.memory_space<vmem>>, vector<1x1x1x8xf32>
    %959 = vector.shape_cast %958 : vector<1x1x1x8xf32> to vector<1x8xf32>
    %960 = vector.broadcast %959 : vector<1x8xf32> to vector<16x8xf32>
    %961 = arith.addf %957, %960 : vector<16x8xf32>
    %cst_742 = arith.constant dense<0.000000e+00> : vector<16x8xf32>
    %962 = tpu.matmul %881, %952, %cst_742 {dimension_numbers = #tpu.dot_dimension_numbers<[1], [0], [0], [1], [0, 0, 1, 1], [], []>} : vector<16x32xbf16>, vector<32x8xbf16>, vector<16x8xf32> -> vector<16x8xf32>
    %cst_743 = arith.constant dense<0.000000e+00> : vector<16x8xf32>
    %963 = tpu.matmul %881, %954, %cst_743 {dimension_numbers = #tpu.dot_dimension_numbers<[1], [0], [0], [1], [0, 0, 1, 1], [], []>} : vector<16x32xbf16>, vector<32x8xbf16>, vector<16x8xf32> -> vector<16x8xf32>
    %cst_744 = arith.constant dense<0.000000e+00> : vector<16x16xf32>
    %964 = tpu.matmul %961, %962, %cst_744 {dimension_numbers = #tpu.dot_dimension_numbers<[1], [1], [0], [0], [0, 0, 1, 0], [], []>} : vector<16x8xf32>, vector<16x8xf32>, vector<16x16xf32> -> vector<16x16xf32>
    %cst_745 = arith.constant 0.353553385 : f32
    %965 = vector.broadcast %cst_745 : f32 to vector<16x16xf32>
    %966 = arith.mulf %964, %965 : vector<16x16xf32>
    %cst_746 = arith.constant dense<0xFF800000> : vector<16xf32>
    %967 = vector.multi_reduction <maximumf>, %966, %cst_746 [1] : vector<16x16xf32> to vector<16xf32>
    %968 = vector.shape_cast %967 : vector<16xf32> to vector<16x1xf32>
    %969 = vector.broadcast %968 : vector<16x1xf32> to vector<16x16xf32>
    %970 = arith.subf %966, %969 : vector<16x16xf32>
    %971 = math.exp %970 : vector<16x16xf32>
    %cst_747 = arith.constant dense<0.000000e+00> : vector<16xf32>
    %972 = vector.multi_reduction <add>, %971, %cst_747 [1] : vector<16x16xf32> to vector<16xf32>
    %973 = vector.shape_cast %972 : vector<16xf32> to vector<16x1xf32>
    %974 = vector.broadcast %973 : vector<16x1xf32> to vector<16x16xf32>
    %975 = arith.divf %971, %974 : vector<16x16xf32>
    %976 = arith.truncf %975 : vector<16x16xf32> to vector<16x16xbf16>
    %977 = arith.truncf %963 : vector<16x8xf32> to vector<16x8xbf16>
    %cst_748 = arith.constant dense<0.000000e+00> : vector<16x8xf32>
    %978 = tpu.matmul %976, %977, %cst_748 {dimension_numbers = #tpu.dot_dimension_numbers<[1], [0], [0], [1], [0, 0, 1, 1], [], []>} : vector<16x16xbf16>, vector<16x8xbf16>, vector<16x8xf32> -> vector<16x8xf32>
    %979 = arith.truncf %978 : vector<16x8xf32> to vector<16x8xbf16>
    %cst_749 = arith.constant dense<0.000000e+00> : vector<16x32xf32>
    %980 = tpu.matmul %979, %956, %cst_749 {dimension_numbers = #tpu.dot_dimension_numbers<[1], [1], [0], [0], [0, 0, 1, 0], [], []>} : vector<16x8xbf16>, vector<32x8xbf16>, vector<16x32xf32> -> vector<16x32xf32>
    %981 = arith.addf %948, %980 : vector<16x32xf32>
    %c0_750 = arith.constant 0 : index
    %c0_751 = arith.constant 0 : index
    %c3_752 = arith.constant 3 : index
    %c0_753 = arith.constant 0 : index
    %c0_754 = arith.constant 0 : index
    %982 = vector.load %arg4[%c0_750, %c0_751, %c3_752, %c0_753, %c0_754] : memref<2x4x4x32x8xbf16, #tpu.memory_space<vmem>>, vector<1x1x1x32x8xbf16>
    %983 = vector.shape_cast %982 : vector<1x1x1x32x8xbf16> to vector<32x8xbf16>
    %c0_755 = arith.constant 0 : index
    %c1_756 = arith.constant 1 : index
    %c3_757 = arith.constant 3 : index
    %c0_758 = arith.constant 0 : index
    %c0_759 = arith.constant 0 : index
    %984 = vector.load %arg4[%c0_755, %c1_756, %c3_757, %c0_758, %c0_759] : memref<2x4x4x32x8xbf16, #tpu.memory_space<vmem>>, vector<1x1x1x32x8xbf16>
    %985 = vector.shape_cast %984 : vector<1x1x1x32x8xbf16> to vector<32x8xbf16>
    %c0_760 = arith.constant 0 : index
    %c2_761 = arith.constant 2 : index
    %c3_762 = arith.constant 3 : index
    %c0_763 = arith.constant 0 : index
    %c0_764 = arith.constant 0 : index
    %986 = vector.load %arg4[%c0_760, %c2_761, %c3_762, %c0_763, %c0_764] : memref<2x4x4x32x8xbf16, #tpu.memory_space<vmem>>, vector<1x1x1x32x8xbf16>
    %987 = vector.shape_cast %986 : vector<1x1x1x32x8xbf16> to vector<32x8xbf16>
    %c0_765 = arith.constant 0 : index
    %c3_766 = arith.constant 3 : index
    %c3_767 = arith.constant 3 : index
    %c0_768 = arith.constant 0 : index
    %c0_769 = arith.constant 0 : index
    %988 = vector.load %arg4[%c0_765, %c3_766, %c3_767, %c0_768, %c0_769] : memref<2x4x4x32x8xbf16, #tpu.memory_space<vmem>>, vector<1x1x1x32x8xbf16>
    %989 = vector.shape_cast %988 : vector<1x1x1x32x8xbf16> to vector<32x8xbf16>
    %cst_770 = arith.constant dense<0.000000e+00> : vector<16x8xf32>
    %990 = tpu.matmul %881, %983, %cst_770 {dimension_numbers = #tpu.dot_dimension_numbers<[1], [0], [0], [1], [0, 0, 1, 1], [], []>} : vector<16x32xbf16>, vector<32x8xbf16>, vector<16x8xf32> -> vector<16x8xf32>
    %c0_771 = arith.constant 0 : index
    %c3_772 = arith.constant 3 : index
    %c0_773 = arith.constant 0 : index
    %c0_774 = arith.constant 0 : index
    %991 = vector.load %arg5[%c0_771, %c3_772, %c0_773, %c0_774] : memref<2x4x1x8xf32, #tpu.memory_space<vmem>>, vector<1x1x1x8xf32>
    %992 = vector.shape_cast %991 : vector<1x1x1x8xf32> to vector<1x8xf32>
    %993 = vector.broadcast %992 : vector<1x8xf32> to vector<16x8xf32>
    %994 = arith.addf %990, %993 : vector<16x8xf32>
    %cst_775 = arith.constant dense<0.000000e+00> : vector<16x8xf32>
    %995 = tpu.matmul %881, %985, %cst_775 {dimension_numbers = #tpu.dot_dimension_numbers<[1], [0], [0], [1], [0, 0, 1, 1], [], []>} : vector<16x32xbf16>, vector<32x8xbf16>, vector<16x8xf32> -> vector<16x8xf32>
    %cst_776 = arith.constant dense<0.000000e+00> : vector<16x8xf32>
    %996 = tpu.matmul %881, %987, %cst_776 {dimension_numbers = #tpu.dot_dimension_numbers<[1], [0], [0], [1], [0, 0, 1, 1], [], []>} : vector<16x32xbf16>, vector<32x8xbf16>, vector<16x8xf32> -> vector<16x8xf32>
    %cst_777 = arith.constant dense<0.000000e+00> : vector<16x16xf32>
    %997 = tpu.matmul %994, %995, %cst_777 {dimension_numbers = #tpu.dot_dimension_numbers<[1], [1], [0], [0], [0, 0, 1, 0], [], []>} : vector<16x8xf32>, vector<16x8xf32>, vector<16x16xf32> -> vector<16x16xf32>
    %cst_778 = arith.constant 0.353553385 : f32
    %998 = vector.broadcast %cst_778 : f32 to vector<16x16xf32>
    %999 = arith.mulf %997, %998 : vector<16x16xf32>
    %cst_779 = arith.constant dense<0xFF800000> : vector<16xf32>
    %1000 = vector.multi_reduction <maximumf>, %999, %cst_779 [1] : vector<16x16xf32> to vector<16xf32>
    %1001 = vector.shape_cast %1000 : vector<16xf32> to vector<16x1xf32>
    %1002 = vector.broadcast %1001 : vector<16x1xf32> to vector<16x16xf32>
    %1003 = arith.subf %999, %1002 : vector<16x16xf32>
    %1004 = math.exp %1003 : vector<16x16xf32>
    %cst_780 = arith.constant dense<0.000000e+00> : vector<16xf32>
    %1005 = vector.multi_reduction <add>, %1004, %cst_780 [1] : vector<16x16xf32> to vector<16xf32>
    %1006 = vector.shape_cast %1005 : vector<16xf32> to vector<16x1xf32>
    %1007 = vector.broadcast %1006 : vector<16x1xf32> to vector<16x16xf32>
    %1008 = arith.divf %1004, %1007 : vector<16x16xf32>
    %1009 = arith.truncf %1008 : vector<16x16xf32> to vector<16x16xbf16>
    %1010 = arith.truncf %996 : vector<16x8xf32> to vector<16x8xbf16>
    %cst_781 = arith.constant dense<0.000000e+00> : vector<16x8xf32>
    %1011 = tpu.matmul %1009, %1010, %cst_781 {dimension_numbers = #tpu.dot_dimension_numbers<[1], [0], [0], [1], [0, 0, 1, 1], [], []>} : vector<16x16xbf16>, vector<16x8xbf16>, vector<16x8xf32> -> vector<16x8xf32>
    %1012 = arith.truncf %1011 : vector<16x8xf32> to vector<16x8xbf16>
    %cst_782 = arith.constant dense<0.000000e+00> : vector<16x32xf32>
    %1013 = tpu.matmul %1012, %989, %cst_782 {dimension_numbers = #tpu.dot_dimension_numbers<[1], [1], [0], [0], [0, 0, 1, 0], [], []>} : vector<16x8xbf16>, vector<32x8xbf16>, vector<16x32xf32> -> vector<16x32xf32>
    %1014 = arith.addf %981, %1013 : vector<16x32xf32>
    %1015 = vector.broadcast %874 : vector<1x32xf32> to vector<16x32xf32>
    %1016 = arith.addf %1014, %1015 : vector<16x32xf32>
    %1017 = arith.addf %860, %1016 : vector<16x32xf32>
    %cst_783 = arith.constant dense<0.000000e+00> : vector<16xf32>
    %1018 = vector.multi_reduction <add>, %1017, %cst_783 [1] : vector<16x32xf32> to vector<16xf32>
    %1019 = vector.shape_cast %1018 : vector<16xf32> to vector<16x1xf32>
    %cst_784 = arith.constant 3.200000e+01 : f32
    %1020 = vector.broadcast %cst_784 : f32 to vector<16x1xf32>
    %1021 = arith.divf %1019, %1020 : vector<16x1xf32>
    %1022 = vector.broadcast %1021 : vector<16x1xf32> to vector<16x32xf32>
    %1023 = arith.subf %1017, %1022 : vector<16x32xf32>
    %1024 = arith.mulf %1023, %1023 : vector<16x32xf32>
    %cst_785 = arith.constant dense<0.000000e+00> : vector<16xf32>
    %1025 = vector.multi_reduction <add>, %1024, %cst_785 [1] : vector<16x32xf32> to vector<16xf32>
    %1026 = vector.shape_cast %1025 : vector<16xf32> to vector<16x1xf32>
    %cst_786 = arith.constant 3.200000e+01 : f32
    %1027 = vector.broadcast %cst_786 : f32 to vector<16x1xf32>
    %1028 = arith.divf %1026, %1027 : vector<16x1xf32>
    %1029 = vector.broadcast %1021 : vector<16x1xf32> to vector<16x32xf32>
    %1030 = arith.subf %1017, %1029 : vector<16x32xf32>
    %cst_787 = arith.constant 9.99999997E-7 : f32
    %1031 = vector.broadcast %cst_787 : f32 to vector<16x1xf32>
    %1032 = arith.addf %1028, %1031 : vector<16x1xf32>
    %1033 = math.rsqrt %1032 : vector<16x1xf32>
    %1034 = vector.broadcast %1033 : vector<16x1xf32> to vector<16x32xf32>
    %1035 = arith.mulf %1030, %1034 : vector<16x32xf32>
    %1036 = vector.broadcast %875 : vector<1x32xf32> to vector<16x32xf32>
    %1037 = arith.mulf %1035, %1036 : vector<16x32xf32>
    %1038 = vector.broadcast %876 : vector<1x32xf32> to vector<16x32xf32>
    %1039 = arith.addf %1037, %1038 : vector<16x32xf32>
    %1040 = arith.truncf %1039 : vector<16x32xf32> to vector<16x32xbf16>
    %c0_788 = arith.constant 0 : index
    %c0_789 = arith.constant 0 : index
    %c0_790 = arith.constant 0 : index
    %1041 = vector.load %arg7[%c0_788, %c0_789, %c0_790] : memref<2x32x32xbf16, #tpu.memory_space<vmem>>, vector<1x32x32xbf16>
    %1042 = vector.shape_cast %1041 : vector<1x32x32xbf16> to vector<32x32xbf16>
    %cst_791 = arith.constant dense<0.000000e+00> : vector<16x32xf32>
    %1043 = tpu.matmul %1040, %1042, %cst_791 {dimension_numbers = #tpu.dot_dimension_numbers<[1], [0], [0], [1], [0, 0, 1, 1], [], []>} : vector<16x32xbf16>, vector<32x32xbf16>, vector<16x32xf32> -> vector<16x32xf32>
    %1044 = vector.broadcast %877 : vector<1x32xf32> to vector<16x32xf32>
    %1045 = arith.addf %1043, %1044 : vector<16x32xf32>
    %cst_792 = arith.constant 5.000000e-01 : f32
    %1046 = vector.broadcast %cst_792 : f32 to vector<16x32xf32>
    %1047 = arith.mulf %1046, %1045 : vector<16x32xf32>
    %cst_793 = arith.constant 0.707106769 : f32
    %1048 = vector.broadcast %cst_793 : f32 to vector<16x32xf32>
    %1049 = arith.mulf %1045, %1048 : vector<16x32xf32>
    %1050 = math.erf %1049 : vector<16x32xf32>
    %cst_794 = arith.constant 1.000000e+00 : f32
    %1051 = vector.broadcast %cst_794 : f32 to vector<16x32xf32>
    %1052 = arith.addf %1051, %1050 : vector<16x32xf32>
    %1053 = arith.mulf %1047, %1052 : vector<16x32xf32>
    %1054 = arith.truncf %1053 : vector<16x32xf32> to vector<16x32xbf16>
    %c0_795 = arith.constant 0 : index
    %c0_796 = arith.constant 0 : index
    %c0_797 = arith.constant 0 : index
    %1055 = vector.load %arg8[%c0_795, %c0_796, %c0_797] : memref<2x32x32xbf16, #tpu.memory_space<vmem>>, vector<1x32x32xbf16>
    %1056 = vector.shape_cast %1055 : vector<1x32x32xbf16> to vector<32x32xbf16>
    %cst_798 = arith.constant dense<0.000000e+00> : vector<16x32xf32>
    %1057 = tpu.matmul %1054, %1056, %cst_798 {dimension_numbers = #tpu.dot_dimension_numbers<[1], [0], [0], [1], [0, 0, 1, 1], [], []>} : vector<16x32xbf16>, vector<32x32xbf16>, vector<16x32xf32> -> vector<16x32xf32>
    %1058 = vector.broadcast %878 : vector<1x32xf32> to vector<16x32xf32>
    %1059 = arith.addf %1057, %1058 : vector<16x32xf32>
    %1060 = arith.addf %1039, %1059 : vector<16x32xf32>
    %cst_799 = arith.constant dense<0.000000e+00> : vector<16xf32>
    %1061 = vector.multi_reduction <add>, %1060, %cst_799 [1] : vector<16x32xf32> to vector<16xf32>
    %1062 = vector.shape_cast %1061 : vector<16xf32> to vector<16x1xf32>
    %cst_800 = arith.constant 3.200000e+01 : f32
    %1063 = vector.broadcast %cst_800 : f32 to vector<16x1xf32>
    %1064 = arith.divf %1062, %1063 : vector<16x1xf32>
    %1065 = vector.broadcast %1064 : vector<16x1xf32> to vector<16x32xf32>
    %1066 = arith.subf %1060, %1065 : vector<16x32xf32>
    %1067 = arith.mulf %1066, %1066 : vector<16x32xf32>
    %cst_801 = arith.constant dense<0.000000e+00> : vector<16xf32>
    %1068 = vector.multi_reduction <add>, %1067, %cst_801 [1] : vector<16x32xf32> to vector<16xf32>
    %1069 = vector.shape_cast %1068 : vector<16xf32> to vector<16x1xf32>
    %cst_802 = arith.constant 3.200000e+01 : f32
    %1070 = vector.broadcast %cst_802 : f32 to vector<16x1xf32>
    %1071 = arith.divf %1069, %1070 : vector<16x1xf32>
    %1072 = vector.broadcast %1064 : vector<16x1xf32> to vector<16x32xf32>
    %1073 = arith.subf %1060, %1072 : vector<16x32xf32>
    %cst_803 = arith.constant 9.99999997E-7 : f32
    %1074 = vector.broadcast %cst_803 : f32 to vector<16x1xf32>
    %1075 = arith.addf %1071, %1074 : vector<16x1xf32>
    %1076 = math.rsqrt %1075 : vector<16x1xf32>
    %1077 = vector.broadcast %1076 : vector<16x1xf32> to vector<16x32xf32>
    %1078 = arith.mulf %1073, %1077 : vector<16x32xf32>
    %1079 = vector.broadcast %879 : vector<1x32xf32> to vector<16x32xf32>
    %1080 = arith.mulf %1078, %1079 : vector<16x32xf32>
    %1081 = vector.broadcast %880 : vector<1x32xf32> to vector<16x32xf32>
    %1082 = arith.addf %1080, %1081 : vector<16x32xf32>
    %c1_804 = arith.constant 1 : index
    %c0_805 = arith.constant 0 : index
    %c0_806 = arith.constant 0 : index
    %1083 = vector.load %arg6[%c1_804, %c0_805, %c0_806] : memref<2x8x32xf32, #tpu.memory_space<vmem>>, vector<1x8x32xf32>
    %1084 = vector.shape_cast %1083 : vector<1x8x32xf32> to vector<8x32xf32>
    %1085 = vector.extract_strided_slice %1084 {offsets = [0, 0], sizes = [1, 32], strides = [1, 1]} : vector<8x32xf32> to vector<1x32xf32>
    %1086 = vector.extract_strided_slice %1084 {offsets = [1, 0], sizes = [1, 32], strides = [1, 1]} : vector<8x32xf32> to vector<1x32xf32>
    %1087 = vector.extract_strided_slice %1084 {offsets = [2, 0], sizes = [1, 32], strides = [1, 1]} : vector<8x32xf32> to vector<1x32xf32>
    %1088 = vector.extract_strided_slice %1084 {offsets = [3, 0], sizes = [1, 32], strides = [1, 1]} : vector<8x32xf32> to vector<1x32xf32>
    %1089 = vector.extract_strided_slice %1084 {offsets = [4, 0], sizes = [1, 32], strides = [1, 1]} : vector<8x32xf32> to vector<1x32xf32>
    %1090 = vector.extract_strided_slice %1084 {offsets = [5, 0], sizes = [1, 32], strides = [1, 1]} : vector<8x32xf32> to vector<1x32xf32>
    %1091 = vector.extract_strided_slice %1084 {offsets = [6, 0], sizes = [1, 32], strides = [1, 1]} : vector<8x32xf32> to vector<1x32xf32>
    %1092 = arith.truncf %1082 : vector<16x32xf32> to vector<16x32xbf16>
    %cst_807 = arith.constant 0.000000e+00 : f32
    %1093 = vector.broadcast %cst_807 : f32 to vector<16x32xf32>
    %c1_808 = arith.constant 1 : index
    %c0_809 = arith.constant 0 : index
    %c0_810 = arith.constant 0 : index
    %c0_811 = arith.constant 0 : index
    %c0_812 = arith.constant 0 : index
    %1094 = vector.load %arg4[%c1_808, %c0_809, %c0_810, %c0_811, %c0_812] : memref<2x4x4x32x8xbf16, #tpu.memory_space<vmem>>, vector<1x1x1x32x8xbf16>
    %1095 = vector.shape_cast %1094 : vector<1x1x1x32x8xbf16> to vector<32x8xbf16>
    %c1_813 = arith.constant 1 : index
    %c1_814 = arith.constant 1 : index
    %c0_815 = arith.constant 0 : index
    %c0_816 = arith.constant 0 : index
    %c0_817 = arith.constant 0 : index
    %1096 = vector.load %arg4[%c1_813, %c1_814, %c0_815, %c0_816, %c0_817] : memref<2x4x4x32x8xbf16, #tpu.memory_space<vmem>>, vector<1x1x1x32x8xbf16>
    %1097 = vector.shape_cast %1096 : vector<1x1x1x32x8xbf16> to vector<32x8xbf16>
    %c1_818 = arith.constant 1 : index
    %c2_819 = arith.constant 2 : index
    %c0_820 = arith.constant 0 : index
    %c0_821 = arith.constant 0 : index
    %c0_822 = arith.constant 0 : index
    %1098 = vector.load %arg4[%c1_818, %c2_819, %c0_820, %c0_821, %c0_822] : memref<2x4x4x32x8xbf16, #tpu.memory_space<vmem>>, vector<1x1x1x32x8xbf16>
    %1099 = vector.shape_cast %1098 : vector<1x1x1x32x8xbf16> to vector<32x8xbf16>
    %c1_823 = arith.constant 1 : index
    %c3_824 = arith.constant 3 : index
    %c0_825 = arith.constant 0 : index
    %c0_826 = arith.constant 0 : index
    %c0_827 = arith.constant 0 : index
    %1100 = vector.load %arg4[%c1_823, %c3_824, %c0_825, %c0_826, %c0_827] : memref<2x4x4x32x8xbf16, #tpu.memory_space<vmem>>, vector<1x1x1x32x8xbf16>
    %1101 = vector.shape_cast %1100 : vector<1x1x1x32x8xbf16> to vector<32x8xbf16>
    %cst_828 = arith.constant dense<0.000000e+00> : vector<16x8xf32>
    %1102 = tpu.matmul %1092, %1095, %cst_828 {dimension_numbers = #tpu.dot_dimension_numbers<[1], [0], [0], [1], [0, 0, 1, 1], [], []>} : vector<16x32xbf16>, vector<32x8xbf16>, vector<16x8xf32> -> vector<16x8xf32>
    %c1_829 = arith.constant 1 : index
    %c0_830 = arith.constant 0 : index
    %c0_831 = arith.constant 0 : index
    %c0_832 = arith.constant 0 : index
    %1103 = vector.load %arg5[%c1_829, %c0_830, %c0_831, %c0_832] : memref<2x4x1x8xf32, #tpu.memory_space<vmem>>, vector<1x1x1x8xf32>
    %1104 = vector.shape_cast %1103 : vector<1x1x1x8xf32> to vector<1x8xf32>
    %1105 = vector.broadcast %1104 : vector<1x8xf32> to vector<16x8xf32>
    %1106 = arith.addf %1102, %1105 : vector<16x8xf32>
    %cst_833 = arith.constant dense<0.000000e+00> : vector<16x8xf32>
    %1107 = tpu.matmul %1092, %1097, %cst_833 {dimension_numbers = #tpu.dot_dimension_numbers<[1], [0], [0], [1], [0, 0, 1, 1], [], []>} : vector<16x32xbf16>, vector<32x8xbf16>, vector<16x8xf32> -> vector<16x8xf32>
    %cst_834 = arith.constant dense<0.000000e+00> : vector<16x8xf32>
    %1108 = tpu.matmul %1092, %1099, %cst_834 {dimension_numbers = #tpu.dot_dimension_numbers<[1], [0], [0], [1], [0, 0, 1, 1], [], []>} : vector<16x32xbf16>, vector<32x8xbf16>, vector<16x8xf32> -> vector<16x8xf32>
    %cst_835 = arith.constant dense<0.000000e+00> : vector<16x16xf32>
    %1109 = tpu.matmul %1106, %1107, %cst_835 {dimension_numbers = #tpu.dot_dimension_numbers<[1], [1], [0], [0], [0, 0, 1, 0], [], []>} : vector<16x8xf32>, vector<16x8xf32>, vector<16x16xf32> -> vector<16x16xf32>
    %cst_836 = arith.constant 0.353553385 : f32
    %1110 = vector.broadcast %cst_836 : f32 to vector<16x16xf32>
    %1111 = arith.mulf %1109, %1110 : vector<16x16xf32>
    %cst_837 = arith.constant dense<0xFF800000> : vector<16xf32>
    %1112 = vector.multi_reduction <maximumf>, %1111, %cst_837 [1] : vector<16x16xf32> to vector<16xf32>
    %1113 = vector.shape_cast %1112 : vector<16xf32> to vector<16x1xf32>
    %1114 = vector.broadcast %1113 : vector<16x1xf32> to vector<16x16xf32>
    %1115 = arith.subf %1111, %1114 : vector<16x16xf32>
    %1116 = math.exp %1115 : vector<16x16xf32>
    %cst_838 = arith.constant dense<0.000000e+00> : vector<16xf32>
    %1117 = vector.multi_reduction <add>, %1116, %cst_838 [1] : vector<16x16xf32> to vector<16xf32>
    %1118 = vector.shape_cast %1117 : vector<16xf32> to vector<16x1xf32>
    %1119 = vector.broadcast %1118 : vector<16x1xf32> to vector<16x16xf32>
    %1120 = arith.divf %1116, %1119 : vector<16x16xf32>
    %1121 = arith.truncf %1120 : vector<16x16xf32> to vector<16x16xbf16>
    %1122 = arith.truncf %1108 : vector<16x8xf32> to vector<16x8xbf16>
    %cst_839 = arith.constant dense<0.000000e+00> : vector<16x8xf32>
    %1123 = tpu.matmul %1121, %1122, %cst_839 {dimension_numbers = #tpu.dot_dimension_numbers<[1], [0], [0], [1], [0, 0, 1, 1], [], []>} : vector<16x16xbf16>, vector<16x8xbf16>, vector<16x8xf32> -> vector<16x8xf32>
    %1124 = arith.truncf %1123 : vector<16x8xf32> to vector<16x8xbf16>
    %cst_840 = arith.constant dense<0.000000e+00> : vector<16x32xf32>
    %1125 = tpu.matmul %1124, %1101, %cst_840 {dimension_numbers = #tpu.dot_dimension_numbers<[1], [1], [0], [0], [0, 0, 1, 0], [], []>} : vector<16x8xbf16>, vector<32x8xbf16>, vector<16x32xf32> -> vector<16x32xf32>
    %1126 = arith.addf %1093, %1125 : vector<16x32xf32>
    %c1_841 = arith.constant 1 : index
    %c0_842 = arith.constant 0 : index
    %c1_843 = arith.constant 1 : index
    %c0_844 = arith.constant 0 : index
    %c0_845 = arith.constant 0 : index
    %1127 = vector.load %arg4[%c1_841, %c0_842, %c1_843, %c0_844, %c0_845] : memref<2x4x4x32x8xbf16, #tpu.memory_space<vmem>>, vector<1x1x1x32x8xbf16>
    %1128 = vector.shape_cast %1127 : vector<1x1x1x32x8xbf16> to vector<32x8xbf16>
    %c1_846 = arith.constant 1 : index
    %c1_847 = arith.constant 1 : index
    %c1_848 = arith.constant 1 : index
    %c0_849 = arith.constant 0 : index
    %c0_850 = arith.constant 0 : index
    %1129 = vector.load %arg4[%c1_846, %c1_847, %c1_848, %c0_849, %c0_850] : memref<2x4x4x32x8xbf16, #tpu.memory_space<vmem>>, vector<1x1x1x32x8xbf16>
    %1130 = vector.shape_cast %1129 : vector<1x1x1x32x8xbf16> to vector<32x8xbf16>
    %c1_851 = arith.constant 1 : index
    %c2_852 = arith.constant 2 : index
    %c1_853 = arith.constant 1 : index
    %c0_854 = arith.constant 0 : index
    %c0_855 = arith.constant 0 : index
    %1131 = vector.load %arg4[%c1_851, %c2_852, %c1_853, %c0_854, %c0_855] : memref<2x4x4x32x8xbf16, #tpu.memory_space<vmem>>, vector<1x1x1x32x8xbf16>
    %1132 = vector.shape_cast %1131 : vector<1x1x1x32x8xbf16> to vector<32x8xbf16>
    %c1_856 = arith.constant 1 : index
    %c3_857 = arith.constant 3 : index
    %c1_858 = arith.constant 1 : index
    %c0_859 = arith.constant 0 : index
    %c0_860 = arith.constant 0 : index
    %1133 = vector.load %arg4[%c1_856, %c3_857, %c1_858, %c0_859, %c0_860] : memref<2x4x4x32x8xbf16, #tpu.memory_space<vmem>>, vector<1x1x1x32x8xbf16>
    %1134 = vector.shape_cast %1133 : vector<1x1x1x32x8xbf16> to vector<32x8xbf16>
    %cst_861 = arith.constant dense<0.000000e+00> : vector<16x8xf32>
    %1135 = tpu.matmul %1092, %1128, %cst_861 {dimension_numbers = #tpu.dot_dimension_numbers<[1], [0], [0], [1], [0, 0, 1, 1], [], []>} : vector<16x32xbf16>, vector<32x8xbf16>, vector<16x8xf32> -> vector<16x8xf32>
    %c1_862 = arith.constant 1 : index
    %c1_863 = arith.constant 1 : index
    %c0_864 = arith.constant 0 : index
    %c0_865 = arith.constant 0 : index
    %1136 = vector.load %arg5[%c1_862, %c1_863, %c0_864, %c0_865] : memref<2x4x1x8xf32, #tpu.memory_space<vmem>>, vector<1x1x1x8xf32>
    %1137 = vector.shape_cast %1136 : vector<1x1x1x8xf32> to vector<1x8xf32>
    %1138 = vector.broadcast %1137 : vector<1x8xf32> to vector<16x8xf32>
    %1139 = arith.addf %1135, %1138 : vector<16x8xf32>
    %cst_866 = arith.constant dense<0.000000e+00> : vector<16x8xf32>
    %1140 = tpu.matmul %1092, %1130, %cst_866 {dimension_numbers = #tpu.dot_dimension_numbers<[1], [0], [0], [1], [0, 0, 1, 1], [], []>} : vector<16x32xbf16>, vector<32x8xbf16>, vector<16x8xf32> -> vector<16x8xf32>
    %cst_867 = arith.constant dense<0.000000e+00> : vector<16x8xf32>
    %1141 = tpu.matmul %1092, %1132, %cst_867 {dimension_numbers = #tpu.dot_dimension_numbers<[1], [0], [0], [1], [0, 0, 1, 1], [], []>} : vector<16x32xbf16>, vector<32x8xbf16>, vector<16x8xf32> -> vector<16x8xf32>
    %cst_868 = arith.constant dense<0.000000e+00> : vector<16x16xf32>
    %1142 = tpu.matmul %1139, %1140, %cst_868 {dimension_numbers = #tpu.dot_dimension_numbers<[1], [1], [0], [0], [0, 0, 1, 0], [], []>} : vector<16x8xf32>, vector<16x8xf32>, vector<16x16xf32> -> vector<16x16xf32>
    %cst_869 = arith.constant 0.353553385 : f32
    %1143 = vector.broadcast %cst_869 : f32 to vector<16x16xf32>
    %1144 = arith.mulf %1142, %1143 : vector<16x16xf32>
    %cst_870 = arith.constant dense<0xFF800000> : vector<16xf32>
    %1145 = vector.multi_reduction <maximumf>, %1144, %cst_870 [1] : vector<16x16xf32> to vector<16xf32>
    %1146 = vector.shape_cast %1145 : vector<16xf32> to vector<16x1xf32>
    %1147 = vector.broadcast %1146 : vector<16x1xf32> to vector<16x16xf32>
    %1148 = arith.subf %1144, %1147 : vector<16x16xf32>
    %1149 = math.exp %1148 : vector<16x16xf32>
    %cst_871 = arith.constant dense<0.000000e+00> : vector<16xf32>
    %1150 = vector.multi_reduction <add>, %1149, %cst_871 [1] : vector<16x16xf32> to vector<16xf32>
    %1151 = vector.shape_cast %1150 : vector<16xf32> to vector<16x1xf32>
    %1152 = vector.broadcast %1151 : vector<16x1xf32> to vector<16x16xf32>
    %1153 = arith.divf %1149, %1152 : vector<16x16xf32>
    %1154 = arith.truncf %1153 : vector<16x16xf32> to vector<16x16xbf16>
    %1155 = arith.truncf %1141 : vector<16x8xf32> to vector<16x8xbf16>
    %cst_872 = arith.constant dense<0.000000e+00> : vector<16x8xf32>
    %1156 = tpu.matmul %1154, %1155, %cst_872 {dimension_numbers = #tpu.dot_dimension_numbers<[1], [0], [0], [1], [0, 0, 1, 1], [], []>} : vector<16x16xbf16>, vector<16x8xbf16>, vector<16x8xf32> -> vector<16x8xf32>
    %1157 = arith.truncf %1156 : vector<16x8xf32> to vector<16x8xbf16>
    %cst_873 = arith.constant dense<0.000000e+00> : vector<16x32xf32>
    %1158 = tpu.matmul %1157, %1134, %cst_873 {dimension_numbers = #tpu.dot_dimension_numbers<[1], [1], [0], [0], [0, 0, 1, 0], [], []>} : vector<16x8xbf16>, vector<32x8xbf16>, vector<16x32xf32> -> vector<16x32xf32>
    %1159 = arith.addf %1126, %1158 : vector<16x32xf32>
    %c1_874 = arith.constant 1 : index
    %c0_875 = arith.constant 0 : index
    %c2_876 = arith.constant 2 : index
    %c0_877 = arith.constant 0 : index
    %c0_878 = arith.constant 0 : index
    %1160 = vector.load %arg4[%c1_874, %c0_875, %c2_876, %c0_877, %c0_878] : memref<2x4x4x32x8xbf16, #tpu.memory_space<vmem>>, vector<1x1x1x32x8xbf16>
    %1161 = vector.shape_cast %1160 : vector<1x1x1x32x8xbf16> to vector<32x8xbf16>
    %c1_879 = arith.constant 1 : index
    %c1_880 = arith.constant 1 : index
    %c2_881 = arith.constant 2 : index
    %c0_882 = arith.constant 0 : index
    %c0_883 = arith.constant 0 : index
    %1162 = vector.load %arg4[%c1_879, %c1_880, %c2_881, %c0_882, %c0_883] : memref<2x4x4x32x8xbf16, #tpu.memory_space<vmem>>, vector<1x1x1x32x8xbf16>
    %1163 = vector.shape_cast %1162 : vector<1x1x1x32x8xbf16> to vector<32x8xbf16>
    %c1_884 = arith.constant 1 : index
    %c2_885 = arith.constant 2 : index
    %c2_886 = arith.constant 2 : index
    %c0_887 = arith.constant 0 : index
    %c0_888 = arith.constant 0 : index
    %1164 = vector.load %arg4[%c1_884, %c2_885, %c2_886, %c0_887, %c0_888] : memref<2x4x4x32x8xbf16, #tpu.memory_space<vmem>>, vector<1x1x1x32x8xbf16>
    %1165 = vector.shape_cast %1164 : vector<1x1x1x32x8xbf16> to vector<32x8xbf16>
    %c1_889 = arith.constant 1 : index
    %c3_890 = arith.constant 3 : index
    %c2_891 = arith.constant 2 : index
    %c0_892 = arith.constant 0 : index
    %c0_893 = arith.constant 0 : index
    %1166 = vector.load %arg4[%c1_889, %c3_890, %c2_891, %c0_892, %c0_893] : memref<2x4x4x32x8xbf16, #tpu.memory_space<vmem>>, vector<1x1x1x32x8xbf16>
    %1167 = vector.shape_cast %1166 : vector<1x1x1x32x8xbf16> to vector<32x8xbf16>
    %cst_894 = arith.constant dense<0.000000e+00> : vector<16x8xf32>
    %1168 = tpu.matmul %1092, %1161, %cst_894 {dimension_numbers = #tpu.dot_dimension_numbers<[1], [0], [0], [1], [0, 0, 1, 1], [], []>} : vector<16x32xbf16>, vector<32x8xbf16>, vector<16x8xf32> -> vector<16x8xf32>
    %c1_895 = arith.constant 1 : index
    %c2_896 = arith.constant 2 : index
    %c0_897 = arith.constant 0 : index
    %c0_898 = arith.constant 0 : index
    %1169 = vector.load %arg5[%c1_895, %c2_896, %c0_897, %c0_898] : memref<2x4x1x8xf32, #tpu.memory_space<vmem>>, vector<1x1x1x8xf32>
    %1170 = vector.shape_cast %1169 : vector<1x1x1x8xf32> to vector<1x8xf32>
    %1171 = vector.broadcast %1170 : vector<1x8xf32> to vector<16x8xf32>
    %1172 = arith.addf %1168, %1171 : vector<16x8xf32>
    %cst_899 = arith.constant dense<0.000000e+00> : vector<16x8xf32>
    %1173 = tpu.matmul %1092, %1163, %cst_899 {dimension_numbers = #tpu.dot_dimension_numbers<[1], [0], [0], [1], [0, 0, 1, 1], [], []>} : vector<16x32xbf16>, vector<32x8xbf16>, vector<16x8xf32> -> vector<16x8xf32>
    %cst_900 = arith.constant dense<0.000000e+00> : vector<16x8xf32>
    %1174 = tpu.matmul %1092, %1165, %cst_900 {dimension_numbers = #tpu.dot_dimension_numbers<[1], [0], [0], [1], [0, 0, 1, 1], [], []>} : vector<16x32xbf16>, vector<32x8xbf16>, vector<16x8xf32> -> vector<16x8xf32>
    %cst_901 = arith.constant dense<0.000000e+00> : vector<16x16xf32>
    %1175 = tpu.matmul %1172, %1173, %cst_901 {dimension_numbers = #tpu.dot_dimension_numbers<[1], [1], [0], [0], [0, 0, 1, 0], [], []>} : vector<16x8xf32>, vector<16x8xf32>, vector<16x16xf32> -> vector<16x16xf32>
    %cst_902 = arith.constant 0.353553385 : f32
    %1176 = vector.broadcast %cst_902 : f32 to vector<16x16xf32>
    %1177 = arith.mulf %1175, %1176 : vector<16x16xf32>
    %cst_903 = arith.constant dense<0xFF800000> : vector<16xf32>
    %1178 = vector.multi_reduction <maximumf>, %1177, %cst_903 [1] : vector<16x16xf32> to vector<16xf32>
    %1179 = vector.shape_cast %1178 : vector<16xf32> to vector<16x1xf32>
    %1180 = vector.broadcast %1179 : vector<16x1xf32> to vector<16x16xf32>
    %1181 = arith.subf %1177, %1180 : vector<16x16xf32>
    %1182 = math.exp %1181 : vector<16x16xf32>
    %cst_904 = arith.constant dense<0.000000e+00> : vector<16xf32>
    %1183 = vector.multi_reduction <add>, %1182, %cst_904 [1] : vector<16x16xf32> to vector<16xf32>
    %1184 = vector.shape_cast %1183 : vector<16xf32> to vector<16x1xf32>
    %1185 = vector.broadcast %1184 : vector<16x1xf32> to vector<16x16xf32>
    %1186 = arith.divf %1182, %1185 : vector<16x16xf32>
    %1187 = arith.truncf %1186 : vector<16x16xf32> to vector<16x16xbf16>
    %1188 = arith.truncf %1174 : vector<16x8xf32> to vector<16x8xbf16>
    %cst_905 = arith.constant dense<0.000000e+00> : vector<16x8xf32>
    %1189 = tpu.matmul %1187, %1188, %cst_905 {dimension_numbers = #tpu.dot_dimension_numbers<[1], [0], [0], [1], [0, 0, 1, 1], [], []>} : vector<16x16xbf16>, vector<16x8xbf16>, vector<16x8xf32> -> vector<16x8xf32>
    %1190 = arith.truncf %1189 : vector<16x8xf32> to vector<16x8xbf16>
    %cst_906 = arith.constant dense<0.000000e+00> : vector<16x32xf32>
    %1191 = tpu.matmul %1190, %1167, %cst_906 {dimension_numbers = #tpu.dot_dimension_numbers<[1], [1], [0], [0], [0, 0, 1, 0], [], []>} : vector<16x8xbf16>, vector<32x8xbf16>, vector<16x32xf32> -> vector<16x32xf32>
    %1192 = arith.addf %1159, %1191 : vector<16x32xf32>
    %c1_907 = arith.constant 1 : index
    %c0_908 = arith.constant 0 : index
    %c3_909 = arith.constant 3 : index
    %c0_910 = arith.constant 0 : index
    %c0_911 = arith.constant 0 : index
    %1193 = vector.load %arg4[%c1_907, %c0_908, %c3_909, %c0_910, %c0_911] : memref<2x4x4x32x8xbf16, #tpu.memory_space<vmem>>, vector<1x1x1x32x8xbf16>
    %1194 = vector.shape_cast %1193 : vector<1x1x1x32x8xbf16> to vector<32x8xbf16>
    %c1_912 = arith.constant 1 : index
    %c1_913 = arith.constant 1 : index
    %c3_914 = arith.constant 3 : index
    %c0_915 = arith.constant 0 : index
    %c0_916 = arith.constant 0 : index
    %1195 = vector.load %arg4[%c1_912, %c1_913, %c3_914, %c0_915, %c0_916] : memref<2x4x4x32x8xbf16, #tpu.memory_space<vmem>>, vector<1x1x1x32x8xbf16>
    %1196 = vector.shape_cast %1195 : vector<1x1x1x32x8xbf16> to vector<32x8xbf16>
    %c1_917 = arith.constant 1 : index
    %c2_918 = arith.constant 2 : index
    %c3_919 = arith.constant 3 : index
    %c0_920 = arith.constant 0 : index
    %c0_921 = arith.constant 0 : index
    %1197 = vector.load %arg4[%c1_917, %c2_918, %c3_919, %c0_920, %c0_921] : memref<2x4x4x32x8xbf16, #tpu.memory_space<vmem>>, vector<1x1x1x32x8xbf16>
    %1198 = vector.shape_cast %1197 : vector<1x1x1x32x8xbf16> to vector<32x8xbf16>
    %c1_922 = arith.constant 1 : index
    %c3_923 = arith.constant 3 : index
    %c3_924 = arith.constant 3 : index
    %c0_925 = arith.constant 0 : index
    %c0_926 = arith.constant 0 : index
    %1199 = vector.load %arg4[%c1_922, %c3_923, %c3_924, %c0_925, %c0_926] : memref<2x4x4x32x8xbf16, #tpu.memory_space<vmem>>, vector<1x1x1x32x8xbf16>
    %1200 = vector.shape_cast %1199 : vector<1x1x1x32x8xbf16> to vector<32x8xbf16>
    %cst_927 = arith.constant dense<0.000000e+00> : vector<16x8xf32>
    %1201 = tpu.matmul %1092, %1194, %cst_927 {dimension_numbers = #tpu.dot_dimension_numbers<[1], [0], [0], [1], [0, 0, 1, 1], [], []>} : vector<16x32xbf16>, vector<32x8xbf16>, vector<16x8xf32> -> vector<16x8xf32>
    %c1_928 = arith.constant 1 : index
    %c3_929 = arith.constant 3 : index
    %c0_930 = arith.constant 0 : index
    %c0_931 = arith.constant 0 : index
    %1202 = vector.load %arg5[%c1_928, %c3_929, %c0_930, %c0_931] : memref<2x4x1x8xf32, #tpu.memory_space<vmem>>, vector<1x1x1x8xf32>
    %1203 = vector.shape_cast %1202 : vector<1x1x1x8xf32> to vector<1x8xf32>
    %1204 = vector.broadcast %1203 : vector<1x8xf32> to vector<16x8xf32>
    %1205 = arith.addf %1201, %1204 : vector<16x8xf32>
    %cst_932 = arith.constant dense<0.000000e+00> : vector<16x8xf32>
    %1206 = tpu.matmul %1092, %1196, %cst_932 {dimension_numbers = #tpu.dot_dimension_numbers<[1], [0], [0], [1], [0, 0, 1, 1], [], []>} : vector<16x32xbf16>, vector<32x8xbf16>, vector<16x8xf32> -> vector<16x8xf32>
    %cst_933 = arith.constant dense<0.000000e+00> : vector<16x8xf32>
    %1207 = tpu.matmul %1092, %1198, %cst_933 {dimension_numbers = #tpu.dot_dimension_numbers<[1], [0], [0], [1], [0, 0, 1, 1], [], []>} : vector<16x32xbf16>, vector<32x8xbf16>, vector<16x8xf32> -> vector<16x8xf32>
    %cst_934 = arith.constant dense<0.000000e+00> : vector<16x16xf32>
    %1208 = tpu.matmul %1205, %1206, %cst_934 {dimension_numbers = #tpu.dot_dimension_numbers<[1], [1], [0], [0], [0, 0, 1, 0], [], []>} : vector<16x8xf32>, vector<16x8xf32>, vector<16x16xf32> -> vector<16x16xf32>
    %cst_935 = arith.constant 0.353553385 : f32
    %1209 = vector.broadcast %cst_935 : f32 to vector<16x16xf32>
    %1210 = arith.mulf %1208, %1209 : vector<16x16xf32>
    %cst_936 = arith.constant dense<0xFF800000> : vector<16xf32>
    %1211 = vector.multi_reduction <maximumf>, %1210, %cst_936 [1] : vector<16x16xf32> to vector<16xf32>
    %1212 = vector.shape_cast %1211 : vector<16xf32> to vector<16x1xf32>
    %1213 = vector.broadcast %1212 : vector<16x1xf32> to vector<16x16xf32>
    %1214 = arith.subf %1210, %1213 : vector<16x16xf32>
    %1215 = math.exp %1214 : vector<16x16xf32>
    %cst_937 = arith.constant dense<0.000000e+00> : vector<16xf32>
    %1216 = vector.multi_reduction <add>, %1215, %cst_937 [1] : vector<16x16xf32> to vector<16xf32>
    %1217 = vector.shape_cast %1216 : vector<16xf32> to vector<16x1xf32>
    %1218 = vector.broadcast %1217 : vector<16x1xf32> to vector<16x16xf32>
    %1219 = arith.divf %1215, %1218 : vector<16x16xf32>
    %1220 = arith.truncf %1219 : vector<16x16xf32> to vector<16x16xbf16>
    %1221 = arith.truncf %1207 : vector<16x8xf32> to vector<16x8xbf16>
    %cst_938 = arith.constant dense<0.000000e+00> : vector<16x8xf32>
    %1222 = tpu.matmul %1220, %1221, %cst_938 {dimension_numbers = #tpu.dot_dimension_numbers<[1], [0], [0], [1], [0, 0, 1, 1], [], []>} : vector<16x16xbf16>, vector<16x8xbf16>, vector<16x8xf32> -> vector<16x8xf32>
    %1223 = arith.truncf %1222 : vector<16x8xf32> to vector<16x8xbf16>
    %cst_939 = arith.constant dense<0.000000e+00> : vector<16x32xf32>
    %1224 = tpu.matmul %1223, %1200, %cst_939 {dimension_numbers = #tpu.dot_dimension_numbers<[1], [1], [0], [0], [0, 0, 1, 0], [], []>} : vector<16x8xbf16>, vector<32x8xbf16>, vector<16x32xf32> -> vector<16x32xf32>
    %1225 = arith.addf %1192, %1224 : vector<16x32xf32>
    %1226 = vector.broadcast %1085 : vector<1x32xf32> to vector<16x32xf32>
    %1227 = arith.addf %1225, %1226 : vector<16x32xf32>
    %1228 = arith.addf %1082, %1227 : vector<16x32xf32>
    %cst_940 = arith.constant dense<0.000000e+00> : vector<16xf32>
    %1229 = vector.multi_reduction <add>, %1228, %cst_940 [1] : vector<16x32xf32> to vector<16xf32>
    %1230 = vector.shape_cast %1229 : vector<16xf32> to vector<16x1xf32>
    %cst_941 = arith.constant 3.200000e+01 : f32
    %1231 = vector.broadcast %cst_941 : f32 to vector<16x1xf32>
    %1232 = arith.divf %1230, %1231 : vector<16x1xf32>
    %1233 = vector.broadcast %1232 : vector<16x1xf32> to vector<16x32xf32>
    %1234 = arith.subf %1228, %1233 : vector<16x32xf32>
    %1235 = arith.mulf %1234, %1234 : vector<16x32xf32>
    %cst_942 = arith.constant dense<0.000000e+00> : vector<16xf32>
    %1236 = vector.multi_reduction <add>, %1235, %cst_942 [1] : vector<16x32xf32> to vector<16xf32>
    %1237 = vector.shape_cast %1236 : vector<16xf32> to vector<16x1xf32>
    %cst_943 = arith.constant 3.200000e+01 : f32
    %1238 = vector.broadcast %cst_943 : f32 to vector<16x1xf32>
    %1239 = arith.divf %1237, %1238 : vector<16x1xf32>
    %1240 = vector.broadcast %1232 : vector<16x1xf32> to vector<16x32xf32>
    %1241 = arith.subf %1228, %1240 : vector<16x32xf32>
    %cst_944 = arith.constant 9.99999997E-7 : f32
    %1242 = vector.broadcast %cst_944 : f32 to vector<16x1xf32>
    %1243 = arith.addf %1239, %1242 : vector<16x1xf32>
    %1244 = math.rsqrt %1243 : vector<16x1xf32>
    %1245 = vector.broadcast %1244 : vector<16x1xf32> to vector<16x32xf32>
    %1246 = arith.mulf %1241, %1245 : vector<16x32xf32>
    %1247 = vector.broadcast %1086 : vector<1x32xf32> to vector<16x32xf32>
    %1248 = arith.mulf %1246, %1247 : vector<16x32xf32>
    %1249 = vector.broadcast %1087 : vector<1x32xf32> to vector<16x32xf32>
    %1250 = arith.addf %1248, %1249 : vector<16x32xf32>
    %1251 = arith.truncf %1250 : vector<16x32xf32> to vector<16x32xbf16>
    %c1_945 = arith.constant 1 : index
    %c0_946 = arith.constant 0 : index
    %c0_947 = arith.constant 0 : index
    %1252 = vector.load %arg7[%c1_945, %c0_946, %c0_947] : memref<2x32x32xbf16, #tpu.memory_space<vmem>>, vector<1x32x32xbf16>
    %1253 = vector.shape_cast %1252 : vector<1x32x32xbf16> to vector<32x32xbf16>
    %cst_948 = arith.constant dense<0.000000e+00> : vector<16x32xf32>
    %1254 = tpu.matmul %1251, %1253, %cst_948 {dimension_numbers = #tpu.dot_dimension_numbers<[1], [0], [0], [1], [0, 0, 1, 1], [], []>} : vector<16x32xbf16>, vector<32x32xbf16>, vector<16x32xf32> -> vector<16x32xf32>
    %1255 = vector.broadcast %1088 : vector<1x32xf32> to vector<16x32xf32>
    %1256 = arith.addf %1254, %1255 : vector<16x32xf32>
    %cst_949 = arith.constant 5.000000e-01 : f32
    %1257 = vector.broadcast %cst_949 : f32 to vector<16x32xf32>
    %1258 = arith.mulf %1257, %1256 : vector<16x32xf32>
    %cst_950 = arith.constant 0.707106769 : f32
    %1259 = vector.broadcast %cst_950 : f32 to vector<16x32xf32>
    %1260 = arith.mulf %1256, %1259 : vector<16x32xf32>
    %1261 = math.erf %1260 : vector<16x32xf32>
    %cst_951 = arith.constant 1.000000e+00 : f32
    %1262 = vector.broadcast %cst_951 : f32 to vector<16x32xf32>
    %1263 = arith.addf %1262, %1261 : vector<16x32xf32>
    %1264 = arith.mulf %1258, %1263 : vector<16x32xf32>
    %1265 = arith.truncf %1264 : vector<16x32xf32> to vector<16x32xbf16>
    %c1_952 = arith.constant 1 : index
    %c0_953 = arith.constant 0 : index
    %c0_954 = arith.constant 0 : index
    %1266 = vector.load %arg8[%c1_952, %c0_953, %c0_954] : memref<2x32x32xbf16, #tpu.memory_space<vmem>>, vector<1x32x32xbf16>
    %1267 = vector.shape_cast %1266 : vector<1x32x32xbf16> to vector<32x32xbf16>
    %cst_955 = arith.constant dense<0.000000e+00> : vector<16x32xf32>
    %1268 = tpu.matmul %1265, %1267, %cst_955 {dimension_numbers = #tpu.dot_dimension_numbers<[1], [0], [0], [1], [0, 0, 1, 1], [], []>} : vector<16x32xbf16>, vector<32x32xbf16>, vector<16x32xf32> -> vector<16x32xf32>
    %1269 = vector.broadcast %1089 : vector<1x32xf32> to vector<16x32xf32>
    %1270 = arith.addf %1268, %1269 : vector<16x32xf32>
    %1271 = arith.addf %1250, %1270 : vector<16x32xf32>
    %cst_956 = arith.constant dense<0.000000e+00> : vector<16xf32>
    %1272 = vector.multi_reduction <add>, %1271, %cst_956 [1] : vector<16x32xf32> to vector<16xf32>
    %1273 = vector.shape_cast %1272 : vector<16xf32> to vector<16x1xf32>
    %cst_957 = arith.constant 3.200000e+01 : f32
    %1274 = vector.broadcast %cst_957 : f32 to vector<16x1xf32>
    %1275 = arith.divf %1273, %1274 : vector<16x1xf32>
    %1276 = vector.broadcast %1275 : vector<16x1xf32> to vector<16x32xf32>
    %1277 = arith.subf %1271, %1276 : vector<16x32xf32>
    %1278 = arith.mulf %1277, %1277 : vector<16x32xf32>
    %cst_958 = arith.constant dense<0.000000e+00> : vector<16xf32>
    %1279 = vector.multi_reduction <add>, %1278, %cst_958 [1] : vector<16x32xf32> to vector<16xf32>
    %1280 = vector.shape_cast %1279 : vector<16xf32> to vector<16x1xf32>
    %cst_959 = arith.constant 3.200000e+01 : f32
    %1281 = vector.broadcast %cst_959 : f32 to vector<16x1xf32>
    %1282 = arith.divf %1280, %1281 : vector<16x1xf32>
    %1283 = vector.broadcast %1275 : vector<16x1xf32> to vector<16x32xf32>
    %1284 = arith.subf %1271, %1283 : vector<16x32xf32>
    %cst_960 = arith.constant 9.99999997E-7 : f32
    %1285 = vector.broadcast %cst_960 : f32 to vector<16x1xf32>
    %1286 = arith.addf %1282, %1285 : vector<16x1xf32>
    %1287 = math.rsqrt %1286 : vector<16x1xf32>
    %1288 = vector.broadcast %1287 : vector<16x1xf32> to vector<16x32xf32>
    %1289 = arith.mulf %1284, %1288 : vector<16x32xf32>
    %1290 = vector.broadcast %1090 : vector<1x32xf32> to vector<16x32xf32>
    %1291 = arith.mulf %1289, %1290 : vector<16x32xf32>
    %1292 = vector.broadcast %1091 : vector<1x32xf32> to vector<16x32xf32>
    %1293 = arith.addf %1291, %1292 : vector<16x32xf32>
    %1294 = arith.truncf %1293 : vector<16x32xf32> to vector<16x32xbf16>
    %c0_961 = arith.constant 0 : index
    %c0_962 = arith.constant 0 : index
    %1295 = vector.load %arg9[%c0_961, %c0_962] : memref<32x16xbf16, #tpu.memory_space<vmem>>, vector<32x16xbf16>
    %cst_963 = arith.constant dense<0.000000e+00> : vector<16x16xf32>
    %1296 = tpu.matmul %1294, %1295, %cst_963 {dimension_numbers = #tpu.dot_dimension_numbers<[1], [0], [0], [1], [0, 0, 1, 1], [], []>} : vector<16x32xbf16>, vector<32x16xbf16>, vector<16x16xf32> -> vector<16x16xf32>
    %1297 = arith.negf %1296 : vector<16x16xf32>
    %1298 = math.exp %1297 : vector<16x16xf32>
    %cst_964 = arith.constant 1.000000e+00 : f32
    %1299 = vector.broadcast %cst_964 : f32 to vector<16x16xf32>
    %1300 = arith.addf %1299, %1298 : vector<16x16xf32>
    %1301 = arith.divf %1299, %1300 : vector<16x16xf32>
    %c0_965 = arith.constant 0 : index
    %c2_966 = arith.constant 2 : index
    %c0_967 = arith.constant 0 : index
    %c0_968 = arith.constant 0 : index
    %1302 = vector.load %arg10[%c0_965, %c2_966, %c0_967, %c0_968] : memref<1x3x16x16xf32, #tpu.memory_space<vmem>>, vector<1x1x16x16xf32>
    %1303 = vector.shape_cast %1302 : vector<1x1x16x16xf32> to vector<16x16xf32>
    %1304 = vector.shape_cast %1301 : vector<16x16xf32> to vector<1x1x16x16xf32>
    tpu.vector_store %arg10[%c0_965, %c2_966, %c0_967, %c0_968], %1304 {strides = array<i32>} : memref<1x3x16x16xf32, #tpu.memory_space<vmem>>, vector<1x1x16x16xf32>,
    return
  }
  func.func @transform_0(%arg0: i32) -> (i32, i32, i32) {
    %c0_i32 = arith.constant 0 : i32
    %c0_i32_0 = arith.constant 0 : i32
    %c0_i32_1 = arith.constant 0 : i32
    return %arg0, %c0_i32, %c0_i32_0 : i32, i32, i32
  }
  func.func @transform_1(%arg0: i32) -> (i32, i32) {
    %c0_i32 = arith.constant 0 : i32
    %c0_i32_0 = arith.constant 0 : i32
    %c0_i32_1 = arith.constant 0 : i32
    return %c0_i32, %c0_i32_0 : i32, i32
  }
  func.func @transform_2(%arg0: i32) -> (i32, i32) {
    %c0_i32 = arith.constant 0 : i32
    %c0_i32_0 = arith.constant 0 : i32
    %c0_i32_1 = arith.constant 0 : i32
    return %c0_i32, %c0_i32_0 : i32, i32
  }
  func.func @transform_3(%arg0: i32) -> (i32, i32, i32, i32, i32) {
    %c0_i32 = arith.constant 0 : i32
    %c0_i32_0 = arith.constant 0 : i32
    %c0_i32_1 = arith.constant 0 : i32
    %c0_i32_2 = arith.constant 0 : i32
    %c0_i32_3 = arith.constant 0 : i32
    %c0_i32_4 = arith.constant 0 : i32
    return %c0_i32, %c0_i32_0, %c0_i32_1, %c0_i32_2, %c0_i32_3 : i32, i32, i32, i32, i32
  }
  func.func @transform_4(%arg0: i32) -> (i32, i32, i32, i32) {
    %c0_i32 = arith.constant 0 : i32
    %c0_i32_0 = arith.constant 0 : i32
    %c0_i32_1 = arith.constant 0 : i32
    %c0_i32_2 = arith.constant 0 : i32
    %c0_i32_3 = arith.constant 0 : i32
    return %c0_i32, %c0_i32_0, %c0_i32_1, %c0_i32_2 : i32, i32, i32, i32
  }
  func.func @transform_5(%arg0: i32) -> (i32, i32, i32) {
    %c0_i32 = arith.constant 0 : i32
    %c0_i32_0 = arith.constant 0 : i32
    %c0_i32_1 = arith.constant 0 : i32
    %c0_i32_2 = arith.constant 0 : i32
    return %c0_i32, %c0_i32_0, %c0_i32_1 : i32, i32, i32
  }
  func.func @transform_6(%arg0: i32) -> (i32, i32, i32) {
    %c0_i32 = arith.constant 0 : i32
    %c0_i32_0 = arith.constant 0 : i32
    %c0_i32_1 = arith.constant 0 : i32
    %c0_i32_2 = arith.constant 0 : i32
    return %c0_i32, %c0_i32_0, %c0_i32_1 : i32, i32, i32
  }
  func.func @transform_7(%arg0: i32) -> (i32, i32, i32) {
    %c0_i32 = arith.constant 0 : i32
    %c0_i32_0 = arith.constant 0 : i32
    %c0_i32_1 = arith.constant 0 : i32
    %c0_i32_2 = arith.constant 0 : i32
    return %c0_i32, %c0_i32_0, %c0_i32_1 : i32, i32, i32
  }
  func.func @transform_8(%arg0: i32) -> (i32, i32) {
    %c0_i32 = arith.constant 0 : i32
    %c0_i32_0 = arith.constant 0 : i32
    %c0_i32_1 = arith.constant 0 : i32
    return %c0_i32, %c0_i32_0 : i32, i32
  }
  func.func @transform_9(%arg0: i32) -> (i32, i32, i32, i32) {
    %c0_i32 = arith.constant 0 : i32
    %c0_i32_0 = arith.constant 0 : i32
    %c0_i32_1 = arith.constant 0 : i32
    %c0_i32_2 = arith.constant 0 : i32
    return %arg0, %c0_i32, %c0_i32_0, %c0_i32_1 : i32, i32, i32, i32
  }
}

</mosaic_0001>

<bundles_post_ra>
// kernel: tpu_custom_call.1
= control target key start
LH: loop header
LB: loop body
LE: loop exit
PB: predicated region body
PF: predicated region fallthrough
CT: control target
= control target key end

     0   :  { %14 = vsyncpa [#allocation3], 0  ;;  %s17498_s0 = inlined_call_operand.vmem [shape: bf16[2,16,64], index: 0, kind: input, shape index: {}]   ;;  %s17499_s1 = inlined_call_operand.vmem [shape: bf16[64,32], index: 1, kind: input, shape index: {}]   ;;  %s17500_s2 = inlined_call_operand.vmem [shape: f32[16,32], index: 2, kind: input, shape index: {}]   ;;  %s17501_s3 = inlined_call_operand.vmem [shape: bf16[2,4,4,32,8], index: 3, kind: input, shape index: {}]   ;;  %s17502_s4 = inlined_call_operand.vmem [shape: f32[2,4,1,8], index: 4, kind: input, shape index: {}]   ;;  %s17503_s5 = inlined_call_operand.vmem [shape: f32[2,8,32], index: 5, kind: input, shape index: {}]   ;;  %s17504_s6 = inlined_call_operand.vmem [shape: bf16[2,32,32], index: 6, kind: input, shape index: {}]   ;;  %s17505_s7 = inlined_call_operand.vmem [shape: bf16[2,32,32], index: 7, kind: input, shape index: {}]   ;;  %s17506_s8 = inlined_call_operand.vmem [shape: bf16[32,16], index: 8, kind: input, shape index: {}]   ;;  %s17507_s9 = inlined_call_operand.hbm [shape: f32[2,3,16,16], index: 9, kind: output, shape index: {}]  }
   0x1   :  { %16 = vsyncpa [#allocation3 + $0x1], 0  ;;  %s15208_s30 = smov 0   ;;  %s15210_s10 = smov 0  }
   0x2   :  { %s15212_s11 = smov 0   ;;  %s15214_s12 = smov 0  }
   0x3 LB: > { %s15229_s13 = sadd.s32 4294967295, %s15151_s12   ;;  %s11768_s14 = sadd.s32 4294967294, %s15151_s12   ;;  %s15151_s12 = sphi %s15214_s12, %s17515_s12   ;;  %s15147_s11 = sphi %s15212_s11, %s17514_s11   ;;  %s15143_s10 = sphi %s15210_s10, %s17513_s10   ;;  %s15139_s30 = sphi %s15208_s30, %s17512_s30  }
   0x4   : > { %s15233_s15 = sadd.s32 1, %s15151_s12   ;;  %s223_s16 = sadd.s32 1, %s15147_s11 }
   0x5   : > { %s220_s17 = ssub.s32 %s15151_s12, %s15233_s15  ;;  %p233_p0 = scmp.ne.s32.totalorder %s15147_s11, %s15143_s10 }
   0x6   : > { %p221_p1 = scmp.eq.s32.totalorder %s220_s17, 0  ;;  %p234_p2 = scmp.eq.s32.totalorder %s15229_s13, 1 }
   0x7   : > { %p239_p3 = scmp.ne.s32.totalorder %s15143_s10, %s15139_s30  ;;  %p240_p4 = scmp.eq.s32.totalorder %s11768_s14, 1 }
   0x8   : > { %s15244_s18 = scalar_select %p221_p1, %s15147_s11, %s223_s16  }
   0x9   : > { %p15246_p5 = por %p234_p2, %p233_p0  ;;  %p15250_p6 = por %p240_p4, %p239_p3 }
   0xa   : > { %p11771_p7 = scmp.ge.s32.totalorder %s15151_s12, 1  ;;  %p290_p8 = scmp.lt.s32.totalorder %s15151_s12, 3 }
   0xc   : > { %p291_p9 = pnand %p11771_p7, %p290_p8 }
   0xd   : > { %v14574_v0 = vld [vmem:[%s17499_s1] sm:$0xff] (!%p291_p9)   ;;  %v15153_v1 = vmov (!%p291_p9), 0.0   ;;  %v14575_v2 = vld [vmem:[%s17499_s1 + $0x8] sm:$0xff] (!%p291_p9)   ;;  %vm15154_vm0 = vmmov (!%p291_p9), 0   ;;  %p326_p10 = scmp.lt.s32.totalorder (!%p291_p9), %s15229_s13, 1  ;;  %v14576_v3 = vld [vmem:[%s17499_s1 + $0x10] sm:$0xff] (!%p291_p9)  }
   0xe   : > { %294 = sbr.rel (%p291_p9) target bundleno = 29205 (0x7215), region = 56  ;;  %13173 = vmatprep.subr.bf16.mxu0 (!%p291_p9), %v15153_v1  ;;  %13185 = vmatprep.subr.bf16.mxu1 (!%p291_p9), %v15153_v1  ;;  %v14577_v4 = vld [vmem:[%s17499_s1 + $0x18] sm:$0xff] (!%p291_p9)   ;;  %vm373_vm1 = vcmask (!%p291_p9), 523264   ;;  %v14579_v6 = vld [vmem:[%s17501_s3] sm:$0xff] (!%p291_p9)   ;;  %v14581_v8 = vld [vmem:[%s17501_s3 + $0x8] sm:$0xff] (!%p291_p9)   ;;  %vm458_vm2 = vcmask (!%p291_p9), 261120  }
   0xf   : > { %13174 = vmatpush3.bf16.msra.mxu0 (!%p291_p9), %v14574_v0  ;;  %13181 = vmatprep.mubr.msk.bf16.mxu0 (!%p291_p9), %vm15154_vm0, %v15153_v1  ;;  %v14580_v7 = vld [vmem:[%s17501_s3 + $0x80] sm:$0xff] (!%p291_p9)   ;;  %v14582_v9 = vld [vmem:[%s17501_s3 + $0x88] sm:$0xff] (!%p291_p9)   ;;  %v14584_v19 = vld [vmem:[%s17501_s3 + $0x10] sm:$0xff] (!%p291_p9)   ;;  %vm609_vm3 = vcmask (!%p291_p9), 64512   ;;  %vm699_vm5 = vcmask (!%p291_p9), 130048   ;;  %s14530_s17 = smul.u32 (!%p291_p9), 768, %s15229_s13 }
  0x10   : > { %13175 = vmatprep.subr.bf16.mxu0 (!%p291_p9), %v15153_v1  ;;  %13189 = vmatprep.mubr.msk.bf16.mxu1 (!%p291_p9), %vm15154_vm0, %v15153_v1  ;;  %v342_v10 = vld [vmem:[%s17500_s2] sm:$0xff] (!%p291_p9)  ;;  %v343_v12 = vld [vmem:[%s17500_s2 + $0x8] sm:$0xff] (!%p291_p9)  ;;  %v14586_v22 = vld [vmem:[%s17501_s3 + $0x18] sm:$0xff] (!%p291_p9)   ;;  %s15155_s27 = smov (!%p291_p9), [#allocation2]  }
  0x11   : > { %13186 = vmatpush3.bf16.msra.mxu1 (!%p291_p9), %v14579_v6  ;;  %v14583_v18 = vld [vmem:[%s17501_s3 + $0x40] sm:$0xff] (!%p291_p9)   ;;  %v14585_v21 = vld [vmem:[%s17501_s3 + $0x48] sm:$0xff] (!%p291_p9)   ;;  %v14587_v23 = vld [vmem:[%s17501_s3 + $0x90] sm:$0xff] (!%p291_p9)   ;;  %s15093_s29 = sshll.u32 (!%p291_p9), %s15155_s27, 4  ;;  %s15094_s29 = int_to_ptr.vmem [resolvable:$false] %s15093_s29 }
  0x12   : > { %13187 = vmatprep.subr.bf16.mxu1 (!%p291_p9), %v15153_v1  ;;  %v14588_v24 = vld [vmem:[%s17501_s3 + $0x98] sm:$0xff] (!%p291_p9)   ;;  %v11792_v25 = vld [vmem:[%s17502_s4] ss:$0 sm:$0xff] (!%p291_p9)  ;;  %v15365_v40 = vld [vmem:[%s17502_s4 + $0x1] ss:$0 sm:$0xff] (!%p291_p9)  ;;  %s15095_s14 = scalar_lea.vmem (!%p291_p9), %s15094_s29, 1536 }
  0x13   : > { %13176 = vmatpush3.bf16.msra.mxu0 (!%p291_p9), %v14575_v2  ;;  %vm15369_vm4 = vmpackc.low (!%p291_p9), %vm609_vm3, %vm609_vm3 }
  0x14   : > { %13177 = vmatprep.subr.bf16.mxu0 (!%p291_p9), %v15153_v1 }
  0x15   : > { %s327_s25 = scalar_select %p326_p10, %s15229_s13, 1  ;;  %13188 = vmatpush3.bf16.msra.mxu1 %v14581_v8 }
  0x16   : > { %13193 = vmatprep.subr.bf16.mxu1 %v15153_v1 }
  0x17   : > { %s12690_s28 = sshll.u32 %s327_s25, 3  ;;  %13178 = vmatpush3.bf16.msra.mxu0 %v14576_v3  ;;  %s17447_s25 = scalar_lea.hbm %s17507_s9, %s14530_s17 }
  0x18   : > { %s330_s16 = scalar_lea.vmem %s17498_s0, %s12690_s28  ;;  %13179 = vmatprep.subr.bf16.mxu0 %v15153_v1  ;;  %s323_s28 = sand.u32 1, %s15143_s10  }
  0x19   : > { %v14578_v5 = vld [vmem:[%s330_s16] sm:$0xff]   ;;  %s14529_s16 = smul.u32 48, %s323_s28  ;;  %s17457_s26 = scalar_lea.sflag [#allocation3], %s323_s28 }
  0x1b   : > { %13180 = vmatpush3.bf16.msra.mxu0 %v14577_v4  ;;  %s16103_s24 = scalar_lea.vmem [#allocation2], %s14529_s16 }
  0x1c   : > { %13201 = vmatprep.subr.bf16.mxu0 %v15153_v1  ;;  %s11706_s21 = sshll.u32 %s16103_s24, 4  ;;  %s17449_s21 = int_to_ptr.vmem [resolvable:$true] %s11706_s21 }
  0x1d   : > { %s15089_s13 = scalar_lea.vmem %s17449_s21, 768  ;;  %p15096_p0 = scmp.lt.s32.totalorder %s17449_s21, %s15094_s29 }
  0x1e   : > { %13182 = vmatmul.mubr.msk.bf16.vlgmr.msra.gmra.mrb[0].mxu0 %vm373_vm1, %v14578_v5  ;;  %p15090_p11 = scmp.ne.s32.totalorder %s17449_s21, %s15089_s13  ;;  %p15097_p1 = scmp.lt.s32.totalorder %s15095_s14, %s15089_s13 }
  0x1f   : > { %13205 = vmatprep.mubr.msk.bf16.mxu0 %vm15154_vm0, %v15153_v1  ;;  %13202 = vmatpush3.bf16.msra.mxu0 %v14580_v7  ;;  %v14591_v7 = vld [vmem:[%s17501_s3 + $0xc0] sm:$0xff]  }
  0x20   : > { %13203 = vmatprep.subr.bf16.mxu0 %v15153_v1  ;;  %v1188_v8 = vsel %vm609_vm3, %v14591_v7, 0  ;;  %p15091_p12 = pnand %p15090_p11, %p15246_p5  ;;  %p15098_p2 = por %p15097_p1, %p15096_p0 }
  0x22   : > { %p15092_p13 = pneg %p15091_p12 }
  0x23   : > { %13204 = vmatpush3.bf16.msra.mxu0 %v14582_v9  ;;  %v14592_v9 = vld [vmem:[%s17501_s3 + $0xc8] sm:$0xff]  }
  0x24   : > { %13222 = vmatprep.subr.bf16.mxu0 %v15153_v1  ;;  %p15099_p3 = pnand %p15098_p2, %p15092_p13 }
  0xf1   : > { %v411_v11 = vpop.f32.mrb[0].mxu0 }
  0xf2   : > { %v13183_v13 = vpop.f32.mrb[1].mxu0  ;;  %v15307_v15 = vadd.f32 %v411_v11, %v342_v10  ;;  %v1191_v10 = vsel %vm609_vm3, %v14592_v9, 0 }
  0xf3   : > { %v414_v14 = vpop.f32.mrb[2].mxu0 }
  0xf4   : > { %v15309_v16 = vadd.f32 %v414_v14, %v343_v12  ;;  %v13184_v17 = vpop.f32.mrb[3].mxu0 }
  0xf6   : > { %v15319_v20 = vpack.c.bf16 %v15309_v16, %v15307_v15 }
  0xf8   : > { %13190 = vmatmul.mubr.msk.bf16.vlgmr.msra.gmra.mrb[0].mxu1 %vm458_vm2, %v15319_v20  ;;  %13206 = vmatmul.mubr.msk.bf16.vlgmr.msra.gmra.mrb[4].mxu0 %vm458_vm2, %v15319_v20 }
  0xf9   : > { %13194 = vmatpush3.bf16.msra.mxu1 %v14583_v18  ;;  %13223 = vmatpush3.bf16.msra.mxu0 %v14584_v19  ;;  %v14589_v19 = vld [vmem:[%s17501_s3 + $0x50] sm:$0xff]  }
  0xfa   : > { %13195 = vmatprep.subr.bf16.mxu1 %v15153_v1  ;;  %13224 = vmatprep.subr.bf16.mxu0 %v15153_v1 }
  0xfb   : > { %13197 = vmatprep.mubr.msk.bf16.mxu1 %vm15154_vm0, %v15153_v1  ;;  %13226 = vmatprep.mubr.msk.bf16.mxu0 %vm15154_vm0, %v15153_v1 }
  0xfd   : > { %13196 = vmatpush3.bf16.msra.mxu1 %v14585_v21  ;;  %13225 = vmatpush3.bf16.msra.mxu0 %v14586_v22  ;;  %v14590_v22 = vld [vmem:[%s17501_s3 + $0x58] sm:$0xff]  }
  0xfe   : > { %13238 = vmatprep.subr.bf16.mxu0 %v15153_v1 }
 0x100   : > { %13198 = vmatmul.mubr.msk.bf16.vlgmr.msra.gmra.mrb[4].mxu1 %vm458_vm2, %v15319_v20  ;;  %13227 = vmatmul.mubr.msk.bf16.vlgmr.msra.gmra.mrb[8].mxu0 %vm458_vm2, %v15319_v20 }
 0x101   : > { %13239 = vmatpush3.bf16.msra.mxu0 %v14587_v23  ;;  %13242 = vmatprep.mubr.msk.bf16.mxu0 %vm15154_vm0, %v15153_v1 }
 0x102   : > { %13240 = vmatprep.subr.bf16.mxu0 %v15153_v1 }
 0x105   : > { %13241 = vmatpush3.bf16.msra.mxu0 %v14588_v24 }
 0x106   : > { %13267 = vmatprep.subr.bf16.mxu0 %v15153_v1 }
 0x108   : > { %13243 = vmatmul.mubr.msk.bf16.vlgmr.msra.gmra.mrb[12].mxu0 %vm458_vm2, %v15319_v20 }
 0x109   : > { %13271 = vmatprep.mubr.msk.bf16.mxu0 %vm15154_vm0, %v15153_v1 }
 0x10e   : > { %13268 = vmatpush3.bf16.xpose.msra.mxu0 %v1188_v8  ;;  %v14596_v8 = vld [vmem:[%s17501_s3 + $0xd8] sm:$0xff]  }
 0x10f   : > { %13269 = vmatprep.subr.bf16.mxu0 %v15153_v1  ;;  %v1131_v9 = vsel %vm609_vm3, %v14596_v8, 0  ;;  %v14604_v8 = vld [vmem:[%s17501_s3 + $0x78] sm:$0xff]  }
 0x116   : > { %13270 = vmatpush3.bf16.xpose.msra.mxu0 %v1191_v10 }
 0x117   : > { %13283 = vmatprep.subr.bf16.mxu0 %v15153_v1 }
 0x1cb   : > { %v496_v26 = vpop.f32.mrb[0].mxu1  ;;  %v602_v27 = vpop.f32.mrb[4].mxu0 }
 0x1cc   : > { %v497_v28 = vadd.f32 %v11792_v25, %v496_v26  ;;  %v13191_v29 = vpop.f32.mrb[1].mxu1  ;;  %v13207_v30 = vpop.f32.mrb[5].mxu0 }
 0x1cd   : > { %v499_v31 = vpop.f32.mrb[2].mxu1  ;;  %v605_v32 = vpop.f32.mrb[6].mxu0  ;;  %v14594_v30 = vld [vmem:[%s17501_s3 + $0x68] sm:$0xff]  }
 0x1ce   : > { %v723_v33 = vpack.c.bf16 %v605_v32, %v602_v27  ;;  %v13192_v34 = vpop.f32.mrb[3].mxu1  ;;  %v13208_v35 = vpop.f32.mrb[7].mxu0  ;;  %13213 = vmatprep.mubr.msk.f32.mxu1 %vm609_vm3, %v497_v28  ;;  %v500_v51 = vadd.f32 %v11792_v25, %v499_v31  ;;  %v14593_v27 = vld [vmem:[%s17501_s3 + $0x60] sm:$0xff]  }
 0x1d3   : > { %v549_v36 = vpop.f32.mrb[4].mxu1  ;;  %v15360_v37 = vpop.f32.mrb[8].mxu0 }
 0x1d4   : > { %v13199_v38 = vpop.f32.mrb[5].mxu1  ;;  %v13228_v39 = vpop.f32.mrb[9].mxu0  ;;  %v844_v23 = vadd.f32 %v15365_v40, %v15360_v37 }
 0x1d5   : > { %v552_v41 = vpop.f32.mrb[6].mxu1  ;;  %v846_v42 = vpop.f32.mrb[10].mxu0 }
 0x1d6   : > { %v14385_v44 = vpack.c.bf16 %v552_v41, %v549_v36  ;;  %v15374_v45 = vadd.f32 %v15365_v40, %v846_v42  ;;  %v13200_v46 = vpop.f32.mrb[7].mxu1  ;;  %v13229_v47 = vpop.f32.mrb[11].mxu0 }
 0x1d8   : > { %14387 = vmatprep.subr.msk.bf16.mxu1 %vm15369_vm4, %v14385_v44 }
 0x1d9   : > { %14390 = vmatpush3.bf16.xpose.msk.msra.mxu1 %vm15369_vm4, %v14385_v44 }
 0x1da   : > { %13216 = vmatprep.subr.bf16.mxu1 %v15153_v1 }
 0x1db   : > { %v15381_v48 = vpop.f32.mrb[12].mxu0 }
 0x1dc   : > { %v13244_v49 = vpop.f32.mrb[13].mxu0 }
 0x1dd   : > { %v15383_v50 = vpop.f32.mrb[14].mxu0 }
 0x1de   : > { %v1068_v52 = vpack.c.bf16 %v15383_v50, %v15381_v48  ;;  %v13245_v53 = vpop.f32.mrb[15].mxu0 }
 0x1e0   : > { %13214 = vmatmul.mubr.msk.f32.vlgmr.msra.gmra.mrb[8].mxu1 %vm609_vm3, %v500_v51 }
 0x1e1   : > { %13217 = vmatpush3.bf16.msra.mxu1 %v723_v33  ;;  %13218 = vmatprep.mubr.msk.bf16.mxu1 %vm15154_vm0, %v15153_v1 }
 0x1e2   : > { %13230 = vmatprep.subr.bf16.mxu1 %v15153_v1 }
 0x2b3   : > { %v13215_v54 = vpop.f32.mrb[8].mxu1 }
 0x2b4   : > { %v688_v55 = vpop.f32.mrb[9].mxu1  ;;  %v698_v58 = vmul.f32 0.35355338, %v13215_v54 }
 0x2b5   : > { %v697_v56 = vmul.f32 0.35355338, %v688_v55 }
 0x2b6   : > { %v703_v59 = vsel %vm699_vm5, %v698_v58, -inf }
 0x2b7   : > { %v700_v57 = vsel %vm699_vm5, %v697_v56, -inf }
 0x2b8   : > { %701 = vmax.xlane.f32.xlu0 %v700_v57 }
 0x2bc   : > { %704 = vmax.xlane.f32.xlu0 %v703_v59 }
 0x345   : > { %v702_v60 = vpop.xlane.xlu0 %701 }
 0x346   : > { %v706_v61 = vsub.f32 %v697_v56, %v702_v60 }
 0x348   : > { %v708_v62 = vmul.f32 1.442695, %v706_v61 }
 0x349   : > { %v705_v63 = vpop.xlane.xlu0 %704 }
 0x34a   : > { %14801 = vpow2.f32 %v708_v62  ;;  %v707_v0 = vsub.f32 %v698_v58, %v705_v63 }
 0x34c   : > { %v710_v2 = vmul.f32 1.442695, %v707_v0 }
 0x34e   : > { %14803 = vpow2.f32 %v710_v2  ;;  %v14595_v2 = vld [vmem:[%s17501_s3 + $0xd0] sm:$0xff]  }
 0x34f   : > { %v1128_v7 = vsel %vm609_vm3, %v14595_v2, 0 }
 0x354   : > { %v14802_v3 = vpop.eup %14801 }
 0x355   : > { %v712_v4 = vsel %vm699_vm5, %v14802_v3, 0.0 }
 0x356   : > { %713 = vadd.xlane.f32.xlu1 %v712_v4 }
 0x358   : > { %v14804_v5 = vpop.eup %14803 }
 0x359   : > { %v715_v6 = vsel %vm699_vm5, %v14804_v5, 0.0 }
 0x35a   : > { %716 = vadd.xlane.f32.xlu1 %v715_v6 }
 0x3e3   : > { %v714_v11 = vpop.xlane.xlu1 %713 }
 0x3e4   : > { %14805 = vrcp.f32 %v714_v11 }
 0x3e7   : > { %v717_v12 = vpop.xlane.xlu1 %716 }
 0x3e8   : > { %14807 = vrcp.f32 %v717_v12 }
 0x3ee   : > { %v14806_v13 = vpop.eup %14805 }
 0x3ef   : > { %v719_v17 = vmul.f32 %v14806_v13, %v14802_v3  ;;  %v14597_v13 = vld [vmem:[%s17501_s3 + $0x20] sm:$0xff]  }
 0x3f2   : > { %v14808_v14 = vpop.eup %14807 }
 0x3f3   : > { %v721_v18 = vmul.f32 %v14808_v14, %v14804_v5 }
 0x3f5   : > { %v722_v21 = vpack.c.bf16 %v721_v18, %v719_v17  ;;  %v14598_v18 = vld [vmem:[%s17501_s3 + $0x28] sm:$0xff]  }
 0x3f7   : > { %13219 = vmatmul.mubr.msk.bf16.vlgmr.msra.gmra.mrb[12].mxu1 %vm699_vm5, %v722_v21  ;;  %v14600_v21 = vld [vmem:[%s17501_s3 + $0xa8] sm:$0xff]  }
 0x3f8   : > { %13231 = vmatpush3.bf16.msra.mxu1 %v14589_v19  ;;  %13234 = vmatprep.mubr.msk.bf16.mxu1 %vm15154_vm0, %v15153_v1  ;;  %v14599_v19 = vld [vmem:[%s17501_s3 + $0xa0] sm:$0xff]  }
 0x3f9   : > { %13232 = vmatprep.subr.bf16.mxu1 %v15153_v1 }
 0x3fc   : > { %13233 = vmatpush3.bf16.msra.mxu1 %v14590_v22 }
 0x3ff   : > { %13235 = vmatmul.mubr.msk.bf16.vlgmr.msra.gmra.mrb[16].mxu1 %vm458_vm2, %v15319_v20 }
 0x400   : > { %13250 = vmatprep.mubr.msk.f32.mxu1 %vm609_vm3, %v844_v23 }
 0x4ca   : > { %v761_v24 = vpop.f32.mrb[12].mxu1 }
 0x4cb   : > { %v13220_v25 = vpop.f32.mrb[13].mxu1 }
 0x4cc   : > { %v764_v26 = vpop.f32.mrb[14].mxu1 }
 0x4cd   : > { %v768_v28 = vpack.c.bf16 %v764_v26, %v761_v24  ;;  %v13221_v29 = vpop.f32.mrb[15].mxu1 }
 0x4cf   : > { %13272 = vmatmul.mubr.msk.bf16.vlgmr.msra.gmra.mrb[16].mxu0 %vm609_vm3, %v768_v28  ;;  %v11862_v28 = vld [vmem:[%s17502_s4 + $0x2] ss:$0 sm:$0xff] }
 0x4d0   : > { %13284 = vmatpush3.bf16.msra.mxu0 %v14593_v27  ;;  %13287 = vmatprep.mubr.msk.bf16.mxu0 %vm15154_vm0, %v15153_v1 }
 0x4d1   : > { %13285 = vmatprep.subr.bf16.mxu0 %v15153_v1 }
 0x4d2   : > { %v896_v31 = vpop.f32.mrb[16].mxu1 }
 0x4d3   : > { %v13236_v32 = vpop.f32.mrb[17].mxu1 }
 0x4d4   : > { %v899_v33 = vpop.f32.mrb[18].mxu1  ;;  %13286 = vmatpush3.bf16.msra.mxu0 %v14594_v30 }
 0x4d5   : > { %v14391_v34 = vpack.c.bf16 %v899_v33, %v896_v31  ;;  %v13237_v35 = vpop.f32.mrb[19].mxu1 }
 0x4d7   : > { %14393 = vmatprep.subr.msk.bf16.mxu1 %vm15369_vm4, %v14391_v34  ;;  %13288 = vmatmul.mubr.msk.bf16.vlgmr.msra.gmra.mrb[20].mxu0 %vm458_vm2, %v15319_v20 }
 0x4d8   : > { %14396 = vmatpush3.bf16.xpose.msk.msra.mxu1 %vm15369_vm4, %v14391_v34 }
 0x4d9   : > { %13253 = vmatprep.subr.bf16.mxu1 %v15153_v1 }
 0x4df   : > { %13251 = vmatmul.mubr.msk.f32.vlgmr.msra.gmra.mrb[10].mxu1 %vm609_vm3, %v15374_v45 }
 0x4e0   : > { %13254 = vmatpush3.bf16.msra.mxu1 %v1068_v52  ;;  %13255 = vmatprep.mubr.msk.bf16.mxu1 %vm15154_vm0, %v15153_v1 }
 0x4e1   : > { %13259 = vmatprep.subr.bf16.mxu1 %v15153_v1 }
 0x5a2   : > { %v15445_v36 = vpop.f32.mrb[16].mxu0 }
 0x5a3   : > { %v13273_v37 = vpop.f32.mrb[17].mxu0 }
 0x5a4   : > { %v15447_v38 = vpop.f32.mrb[18].mxu0 }
 0x5a5   : > { %v13274_v39 = vpop.f32.mrb[19].mxu0 }
 0x5aa   : > { %v1361_v40 = vpop.f32.mrb[20].mxu0 }
 0x5ab   : > { %v13289_v41 = vpop.f32.mrb[21].mxu0 }
 0x5ac   : > { %v1364_v42 = vpop.f32.mrb[22].mxu0 }
 0x5ad   : > { %v14397_v44 = vpack.c.bf16 %v1364_v42, %v1361_v40  ;;  %v13290_v45 = vpop.f32.mrb[23].mxu0 }
 0x5af   : > { %14399 = vmatprep.subr.msk.bf16.mxu0 %vm15369_vm4, %v14397_v44 }
 0x5b0   : > { %14402 = vmatpush3.bf16.xpose.msk.msra.mxu0 %vm15369_vm4, %v14397_v44 }
 0x5b1   : > { %13306 = vmatprep.subr.bf16.mxu0 %v15153_v1 }
 0x5b2   : > { %v13252_v46 = vpop.f32.mrb[10].mxu1 }
 0x5b3   : > { %v1034_v47 = vpop.f32.mrb[11].mxu1  ;;  %v1044_v48 = vmul.f32 0.35355338, %v13252_v46 }
 0x5b4   : > { %v1043_v49 = vmul.f32 0.35355338, %v1034_v47 }
 0x5b5   : > { %v1048_v50 = vsel %vm699_vm5, %v1044_v48, -inf }
 0x5b6   : > { %1049 = vmax.xlane.f32.xlu1 %v1048_v50  ;;  %v1045_v51 = vsel %vm699_vm5, %v1043_v49, -inf }
 0x5b7   : > { %1046 = vmax.xlane.f32.xlu0 %v1045_v51 }
 0x643   : > { %v1050_v52 = vpop.xlane.xlu1 %1049 }
 0x644   : > { %v1052_v53 = vsub.f32 %v1044_v48, %v1050_v52  ;;  %v1047_v54 = vpop.xlane.xlu0 %1046 }
 0x645   : > { %v1051_v55 = vsub.f32 %v1043_v49, %v1047_v54 }
 0x646   : > { %v1055_v56 = vmul.f32 1.442695, %v1052_v53 }
 0x647   : > { %v1053_v57 = vmul.f32 1.442695, %v1051_v55 }
 0x648   : > { %14809 = vpow2.f32 %v1055_v56 }
 0x649   : > { %14811 = vpow2.f32 %v1053_v57  ;;  %v14605_v57 = vld [vmem:[%s17501_s3 + $0xe0] sm:$0xff]  }
 0x652   : > { %v14810_v58 = vpop.eup %14809 }
 0x653   : > { %v14812_v59 = vpop.eup %14811  ;;  %v1060_v60 = vsel %vm699_vm5, %v14810_v58, 0.0 }
 0x654   : > { %1061 = vadd.xlane.f32.xlu1 %v1060_v60  ;;  %v1057_v61 = vsel %vm699_vm5, %v14812_v59, 0.0 }
 0x655   : > { %1058 = vadd.xlane.f32.xlu0 %v1057_v61 }
 0x6e1   : > { %v1062_v62 = vpop.xlane.xlu1 %1061 }
 0x6e2   : > { %14813 = vrcp.f32 %v1062_v62  ;;  %v1059_v63 = vpop.xlane.xlu0 %1058 }
 0x6e3   : > { %14815 = vrcp.f32 %v1059_v63 }
 0x6ec   : > { %v14814_v0 = vpop.eup %14813 }
 0x6ed   : > { %v14816_v3 = vpop.eup %14815  ;;  %v1066_v4 = vmul.f32 %v14814_v0, %v14810_v58  ;;  %v1593_v58 = vsel %vm609_vm3, %v14605_v57, 0 }
 0x6ee   : > { %v1064_v5 = vmul.f32 %v14816_v3, %v14812_v59  ;;  %v14606_v59 = vld [vmem:[%s17501_s3 + $0xe8] sm:$0xff]  }
 0x6ef   : > { %v1596_v60 = vsel %vm609_vm3, %v14606_v59, 0 }
 0x6f0   : > { %v1067_v6 = vpack.c.bf16 %v1066_v4, %v1064_v5  ;;  %v14601_v4 = vld [vmem:[%s17501_s3 + $0x30] sm:$0xff]  }
 0x6f2   : > { %13256 = vmatmul.mubr.msk.bf16.vlgmr.msra.gmra.mrb[20].mxu1 %vm699_vm5, %v1067_v6  ;;  %v14602_v6 = vld [vmem:[%s17501_s3 + $0x38] sm:$0xff]  }
 0x6f3   : > { %13260 = vmatpush3.bf16.xpose.msra.mxu1 %v1128_v7  ;;  %13263 = vmatprep.mubr.msk.bf16.mxu1 %vm15154_vm0, %v15153_v1  ;;  %v14603_v7 = vld [vmem:[%s17501_s3 + $0x70] sm:$0xff]  }
 0x6f4   : > { %13261 = vmatprep.subr.bf16.mxu1 %v15153_v1 }
 0x6fb   : > { %13262 = vmatpush3.bf16.xpose.msra.mxu1 %v1131_v9 }
 0x6fc   : > { %13275 = vmatprep.subr.bf16.mxu1 %v15153_v1 }
 0x7c5   : > { %v1106_v10 = vpop.f32.mrb[20].mxu1 }
 0x7c6   : > { %v13257_v11 = vpop.f32.mrb[21].mxu1 }
 0x7c7   : > { %v1109_v12 = vpop.f32.mrb[22].mxu1 }
 0x7c8   : > { %v1113_v14 = vpack.c.bf16 %v1109_v12, %v1106_v10  ;;  %v13258_v17 = vpop.f32.mrb[23].mxu1  ;;  %v14607_v12 = vld [vmem:[%s17501_s3 + $0xb0] sm:$0xff]  }
 0x7c9   : > { %v11897_v17 = vld [vmem:[%s17502_s4 + $0x3] ss:$0 sm:$0xff] }
 0x7ca   : > { %13264 = vmatmul.mubr.msk.bf16.vlgmr.msra.gmra.mrb[24].mxu1 %vm609_vm3, %v1113_v14 }
 0x7cb   : > { %13276 = vmatpush3.bf16.msra.mxu1 %v14597_v13  ;;  %13279 = vmatprep.mubr.msk.bf16.mxu1 %vm15154_vm0, %v15153_v1 }
 0x7cc   : > { %13277 = vmatprep.subr.bf16.mxu1 %v15153_v1 }
 0x7cf   : > { %13278 = vmatpush3.bf16.msra.mxu1 %v14598_v18  ;;  %v14608_v18 = vld [vmem:[%s17501_s3 + $0xb8] sm:$0xff]  }
 0x7d0   : > { %13291 = vmatprep.subr.bf16.mxu1 %v15153_v1 }
 0x7d2   : > { %13280 = vmatmul.mubr.msk.bf16.vlgmr.msra.gmra.mrb[28].mxu1 %vm458_vm2, %v15319_v20 }
 0x7d3   : > { %13292 = vmatpush3.bf16.msra.mxu1 %v14599_v19  ;;  %13295 = vmatprep.mubr.msk.bf16.mxu1 %vm15154_vm0, %v15153_v1 }
 0x7d4   : > { %13293 = vmatprep.subr.bf16.mxu1 %v15153_v1 }
 0x7d7   : > { %13294 = vmatpush3.bf16.msra.mxu1 %v14600_v21 }
 0x7d8   : > { %13312 = vmatprep.subr.bf16.mxu1 %v15153_v1 }
 0x7da   : > { %13296 = vmatmul.mubr.msk.bf16.vlgmr.msra.gmra.mrb[32].mxu1 %vm458_vm2, %v15319_v20 }
 0x7db   : > { %13316 = vmatprep.mubr.msk.bf16.mxu1 %vm15154_vm0, %v15153_v1 }
 0x7e0   : > { %13313 = vmatpush3.bf16.xpose.msra.mxu1 %v1593_v58  ;;  %v14609_v58 = vld [vmem:[%s17501_s3 + $0xf0] sm:$0xff]  }
 0x7e1   : > { %13314 = vmatprep.subr.bf16.mxu1 %v15153_v1  ;;  %v2000_v59 = vsel %vm609_vm3, %v14609_v58, 0 }
 0x7e8   : > { %13315 = vmatpush3.bf16.xpose.msra.mxu1 %v1596_v60  ;;  %v14610_v60 = vld [vmem:[%s17501_s3 + $0xf8] sm:$0xff]  }
 0x7e9   : > { %13336 = vmatprep.subr.bf16.mxu1 %v15153_v1 }
 0x89d   : > { %v1167_v22 = vpop.f32.mrb[24].mxu1 }
 0x89e   : > { %v13265_v23 = vpop.f32.mrb[25].mxu1  ;;  %v15499_v24 = vadd.f32 %v15445_v36, %v1167_v22 }
 0x89f   : > { %v1170_v25 = vpop.f32.mrb[26].mxu1 }
 0x8a0   : > { %v13266_v26 = vpop.f32.mrb[27].mxu1  ;;  %v15502_v27 = vadd.f32 %v15447_v38, %v1170_v25 }
 0x8a5   : > { %v1308_v29 = vpop.f32.mrb[28].mxu1 }
 0x8a6   : > { %v1309_v30 = vadd.f32 %v11862_v28, %v1308_v29  ;;  %v13281_v31 = vpop.f32.mrb[29].mxu1 }
 0x8a7   : > { %v1311_v32 = vpop.f32.mrb[30].mxu1 }
 0x8a8   : > { %v1312_v33 = vadd.f32 %v11862_v28, %v1311_v32  ;;  %v13282_v34 = vpop.f32.mrb[31].mxu1  ;;  %13303 = vmatprep.mubr.msk.f32.mxu0 %vm609_vm3, %v1309_v30 }
 0x8aa   : > { %13304 = vmatmul.mubr.msk.f32.vlgmr.msra.gmra.mrb[24].mxu0 %vm609_vm3, %v1312_v33 }
 0x8ab   : > { %13308 = vmatprep.mubr.msk.bf16.mxu0 %vm15154_vm0, %v15153_v1 }
 0x8ad   : > { %v1414_v35 = vpop.f32.mrb[32].mxu1 }
 0x8ae   : > { %v13297_v36 = vpop.f32.mrb[33].mxu1 }
 0x8af   : > { %v1417_v37 = vpop.f32.mrb[34].mxu1 }
 0x8b0   : > { %v1533_v38 = vpack.c.bf16 %v1417_v37, %v1414_v35  ;;  %v13298_v39 = vpop.f32.mrb[35].mxu1 }
 0x8b2   : > { %13307 = vmatpush3.bf16.msra.mxu0 %v1533_v38 }
 0x8b3   : > { %13320 = vmatprep.subr.bf16.mxu0 %v15153_v1 }
 0x97d   : > { %v13305_v40 = vpop.f32.mrb[24].mxu0 }
 0x97e   : > { %v1499_v41 = vpop.f32.mrb[25].mxu0  ;;  %v1509_v42 = vmul.f32 0.35355338, %v13305_v40 }
 0x97f   : > { %v1508_v44 = vmul.f32 0.35355338, %v1499_v41 }
 0x980   : > { %v1513_v45 = vsel %vm699_vm5, %v1509_v42, -inf }
 0x981   : > { %1514 = vmax.xlane.f32.xlu1 %v1513_v45  ;;  %v1510_v46 = vsel %vm699_vm5, %v1508_v44, -inf }
 0x982   : > { %1511 = vmax.xlane.f32.xlu0 %v1510_v46 }
 0xa0e   : > { %v1515_v47 = vpop.xlane.xlu1 %1514 }
 0xa0f   : > { %v1517_v48 = vsub.f32 %v1509_v42, %v1515_v47  ;;  %v1512_v49 = vpop.xlane.xlu0 %1511 }
 0xa10   : > { %v1516_v50 = vsub.f32 %v1508_v44, %v1512_v49 }
 0xa11   : > { %v1520_v51 = vmul.f32 1.442695, %v1517_v48 }
 0xa12   : > { %v1518_v52 = vmul.f32 1.442695, %v1516_v50 }
 0xa13   : > { %14817 = vpow2.f32 %v1520_v51 }
 0xa14   : > { %14819 = vpow2.f32 %v1518_v52 }
 0xa1d   : > { %v14818_v53 = vpop.eup %14817 }
 0xa1e   : > { %v14820_v54 = vpop.eup %14819  ;;  %v1525_v55 = vsel %vm699_vm5, %v14818_v53, 0.0 }
 0xa1f   : > { %1526 = vadd.xlane.f32.xlu1 %v1525_v55  ;;  %v1522_v56 = vsel %vm699_vm5, %v14820_v54, 0.0 }
 0xa20   : > { %1523 = vadd.xlane.f32.xlu0 %v1522_v56 }
 0xaac   : > { %v1527_v61 = vpop.xlane.xlu1 %1526 }
 0xaad   : > { %14821 = vrcp.f32 %v1527_v61  ;;  %v1524_v62 = vpop.xlane.xlu0 %1523  ;;  %v2003_v61 = vsel %vm609_vm3, %v14610_v60, 0  ;;  %v14613_v60 = vld [vmem:[%s17505_s7] sm:$0xff]  }
 0xaae   : > { %14823 = vrcp.f32 %v1524_v62 }
 0xab7   : > { %v14822_v63 = vpop.eup %14821 }
 0xab8   : > { %v14824_v0 = vpop.eup %14823  ;;  %v1531_v2 = vmul.f32 %v14822_v63, %v14818_v53 }
 0xab9   : > { %v1529_v3 = vmul.f32 %v14824_v0, %v14820_v54 }
 0xabb   : > { %v1532_v5 = vpack.c.bf16 %v1531_v2, %v1529_v3 }
 0xabd   : > { %13309 = vmatmul.mubr.msk.bf16.vlgmr.msra.gmra.mrb[28].mxu0 %vm699_vm5, %v1532_v5 }
 0xabe   : > { %13321 = vmatpush3.bf16.msra.mxu0 %v14601_v4  ;;  %13324 = vmatprep.mubr.msk.bf16.mxu0 %vm15154_vm0, %v15153_v1 }
 0xabf   : > { %13322 = vmatprep.subr.bf16.mxu0 %v15153_v1 }
 0xac2   : > { %13323 = vmatpush3.bf16.msra.mxu0 %v14602_v6 }
 0xac3   : > { %13328 = vmatprep.subr.bf16.mxu0 %v15153_v1 }
 0xac5   : > { %13325 = vmatmul.mubr.msk.bf16.vlgmr.msra.gmra.mrb[32].mxu0 %vm458_vm2, %v15319_v20 }
 0xac6   : > { %13329 = vmatpush3.bf16.msra.mxu0 %v14603_v7  ;;  %13332 = vmatprep.mubr.msk.bf16.mxu0 %vm15154_vm0, %v15153_v1 }
 0xac7   : > { %13330 = vmatprep.subr.bf16.mxu0 %v15153_v1 }
 0xaca   : > { %13331 = vmatpush3.bf16.msra.mxu0 %v14604_v8 }
 0xacd   : > { %13333 = vmatmul.mubr.msk.bf16.vlgmr.msra.gmra.mrb[36].mxu0 %vm458_vm2, %v15319_v20 }
 0xb90   : > { %v1571_v9 = vpop.f32.mrb[28].mxu0 }
 0xb91   : > { %v13310_v10 = vpop.f32.mrb[29].mxu0 }
 0xb92   : > { %v1574_v11 = vpop.f32.mrb[30].mxu0 }
 0xb93   : > { %v1578_v13 = vpack.c.bf16 %v1574_v11, %v1571_v9  ;;  %v13311_v14 = vpop.f32.mrb[31].mxu0  ;;  %v2048_v11 = vlaneseq }
 0xb94   : > { %v15612_v14 = vld [vmem:[%s17503_s5] sm:$0xff] }
 0xb95   : > { %13317 = vmatmul.mubr.msk.bf16.vlgmr.msra.gmra.mrb[36].mxu1 %vm609_vm3, %v1578_v13 }
 0xb96   : > { %13337 = vmatpush3.bf16.msra.mxu1 %v14607_v12  ;;  %13340 = vmatprep.mubr.msk.bf16.mxu1 %vm15154_vm0, %v15153_v1  ;;  %v15604_v12 = vshrl.u32 %v2048_v11, 7 }
 0xb97   : > { %13338 = vmatprep.subr.bf16.mxu1 %v15153_v1 }
 0xb98   : > { %v1715_v19 = vpop.f32.mrb[32].mxu0  ;;  %v15607_v13 = vsub.s32 0, %v15604_v12 }
 0xb99   : > { %v1716_v21 = vadd.f32 %v11897_v17, %v1715_v19  ;;  %v13326_v22 = vpop.f32.mrb[33].mxu0 }
 0xb9a   : > { %v1718_v23 = vpop.f32.mrb[34].mxu0  ;;  %13339 = vmatpush3.bf16.msra.mxu1 %v14608_v18 }
 0xb9b   : > { %v13327_v25 = vpop.f32.mrb[35].mxu0  ;;  %13348 = vmatprep.mubr.msk.f32.mxu0 %vm609_vm3, %v1716_v21  ;;  %13351 = vmatprep.subr.bf16.mxu1 %v15153_v1  ;;  %v1719_v32 = vadd.f32 %v11897_v17, %v1718_v23  ;;  %v2051_v17 = vrot.slane %v15612_v14, %v15607_v13 }
 0xb9d   : > { %13341 = vmatmul.mubr.msk.bf16.vlgmr.msra.gmra.mrb[40].mxu1 %vm458_vm2, %v15319_v20 }
 0xb9e   : > { %13353 = vmatprep.mubr.msk.bf16.mxu1 %vm15154_vm0, %v15153_v1 }
 0xba0   : > { %v1768_v26 = vpop.f32.mrb[36].mxu0 }
 0xba1   : > { %v13334_v28 = vpop.f32.mrb[37].mxu0 }
 0xba2   : > { %v1771_v29 = vpop.f32.mrb[38].mxu0 }
 0xba3   : > { %v14403_v30 = vpack.c.bf16 %v1771_v29, %v1768_v26  ;;  %v13335_v31 = vpop.f32.mrb[39].mxu0 }
 0xba5   : > { %14405 = vmatprep.subr.msk.bf16.mxu0 %vm15369_vm4, %v14403_v30 }
 0xba6   : > { %14408 = vmatpush3.bf16.xpose.msk.msra.mxu0 %vm15369_vm4, %v14403_v30 }
 0xba7   : > { %13357 = vmatprep.subr.bf16.mxu0 %v15153_v1 }
 0xbad   : > { %13349 = vmatmul.mubr.msk.f32.vlgmr.msra.gmra.mrb[26].mxu0 %vm609_vm3, %v1719_v32 }
 0xbae   : > { %13361 = vmatprep.mubr.msk.bf16.mxu0 %vm15154_vm0, %v15153_v1  ;;  %13358 = vmatpush3.bf16.xpose.msra.mxu0 %v2000_v59 }
 0xbaf   : > { %13359 = vmatprep.subr.bf16.mxu0 %v15153_v1 }
 0xbb6   : > { %13360 = vmatpush3.bf16.xpose.msra.mxu0 %v2003_v61  ;;  %v14614_v61 = vld [vmem:[%s17505_s7 + $0x8] sm:$0xff]  }
 0xbb7   : > { %13381 = vmatprep.subr.bf16.mxu0 %v15153_v1 }
 0xc68   : > { %v1632_v20 = vpop.f32.mrb[36].mxu1 }
 0xc69   : > { %v15578_v33 = vadd.f32 %v1632_v20, %v15499_v24  ;;  %v13318_v34 = vpop.f32.mrb[37].mxu1 }
 0xc6a   : > { %v1635_v35 = vpop.f32.mrb[38].mxu1 }
 0xc6b   : > { %v15581_v36 = vadd.f32 %v1635_v35, %v15502_v27  ;;  %v13319_v37 = vpop.f32.mrb[39].mxu1 }
 0xc70   : > { %v1821_v38 = vpop.f32.mrb[40].mxu1 }
 0xc71   : > { %v13342_v39 = vpop.f32.mrb[41].mxu1 }
 0xc72   : > { %v1824_v40 = vpop.f32.mrb[42].mxu1 }
 0xc73   : > { %v1940_v41 = vpack.c.bf16 %v1824_v40, %v1821_v38  ;;  %v13343_v42 = vpop.f32.mrb[43].mxu1 }
 0xc75   : > { %13352 = vmatpush3.bf16.msra.mxu1 %v1940_v41  ;;  %v14612_v41 = vld [vmem:[%s17504_s6 + $0x8] sm:$0xff]  }
 0xc76   : > { %13365 = vmatprep.subr.bf16.mxu1 %v15153_v1 }
 0xc80   : > { %v13350_v44 = vpop.f32.mrb[26].mxu0 }
 0xc81   : > { %v1906_v45 = vpop.f32.mrb[27].mxu0  ;;  %v1916_v46 = vmul.f32 0.35355338, %v13350_v44 }
 0xc82   : > { %v1915_v47 = vmul.f32 0.35355338, %v1906_v45 }
 0xc83   : > { %v1920_v24 = vsel %vm699_vm5, %v1916_v46, -inf }
 0xc84   : > { %1921 = vmax.xlane.f32.xlu1 %v1920_v24  ;;  %v1917_v48 = vsel %vm699_vm5, %v1915_v47, -inf }
 0xc85   : > { %1918 = vmax.xlane.f32.xlu0 %v1917_v48  ;;  %v15633_v48 = vsub.s32 1, %v15604_v12 }
 0xd11   : > { %v1922_v27 = vpop.xlane.xlu1 %1921 }
 0xd12   : > { %v1924_v49 = vsub.f32 %v1916_v46, %v1922_v27  ;;  %v1919_v50 = vpop.xlane.xlu0 %1918  ;;  %v2086_v27 = vrot.slane %v15612_v14, %v15633_v48 }
 0xd13   : > { %v1923_v51 = vsub.f32 %v1915_v47, %v1919_v50 }
 0xd14   : > { %v1927_v52 = vmul.f32 1.442695, %v1924_v49  ;;  %v15638_v49 = vsub.s32 2, %v15604_v12 }
 0xd15   : > { %v1925_v53 = vmul.f32 1.442695, %v1923_v51 }
 0xd16   : > { %14825 = vpow2.f32 %v1927_v52 }
 0xd17   : > { %14827 = vpow2.f32 %v1925_v53 }
 0xd20   : > { %v14826_v54 = vpop.eup %14825 }
 0xd21   : > { %v14828_v55 = vpop.eup %14827  ;;  %v1932_v56 = vsel %vm699_vm5, %v14826_v54, 0.0 }
 0xd22   : > { %1933 = vadd.xlane.f32.xlu1 %v1932_v56  ;;  %v1929_v57 = vsel %vm699_vm5, %v14828_v55, 0.0 }
 0xd23   : > { %1930 = vadd.xlane.f32.xlu0 %v1929_v57 }
 0xdaf   : > { %v1934_v62 = vpop.xlane.xlu1 %1933 }
 0xdb0   : > { %14829 = vrcp.f32 %v1934_v62  ;;  %v1931_v63 = vpop.xlane.xlu0 %1930  ;;  %v15654_v62 = vsub.s32 3, %v15604_v12 }
 0xdb1   : > { %14831 = vrcp.f32 %v1931_v63 }
 0xdb2   : > { %v2103_v63 = vrot.slane %v15612_v14, %v15654_v62 }
 0xdba   : > { %v14830_v0 = vpop.eup %14829 }
 0xdbb   : > { %v14832_v2 = vpop.eup %14831  ;;  %v1938_v3 = vmul.f32 %v14830_v0, %v14826_v54 }
 0xdbc   : > { %v1936_v4 = vmul.f32 %v14832_v2, %v14828_v55  ;;  %v2092_v55 = vrot.slane %v15612_v14, %v15638_v49 }
 0xdbe   : > { %v1939_v5 = vpack.c.bf16 %v1938_v3, %v1936_v4 }
 0xdc0   : > { %13354 = vmatmul.mubr.msk.bf16.vlgmr.msra.gmra.mrb[44].mxu1 %vm699_vm5, %v1939_v5 }
 0xdc1   : > { %13369 = vmatprep.mubr.msk.bf16.mxu1 %vm15154_vm0, %v15153_v1 }
 0xe93   : > { %v1978_v6 = vpop.f32.mrb[44].mxu1 }
 0xe94   : > { %v13355_v7 = vpop.f32.mrb[45].mxu1 }
 0xe95   : > { %v1981_v8 = vpop.f32.mrb[46].mxu1 }
 0xe96   : > { %v1985_v9 = vpack.c.bf16 %v1981_v8, %v1978_v6  ;;  %v13356_v10 = vpop.f32.mrb[47].mxu1 }
 0xe98   : > { %13362 = vmatmul.mubr.msk.bf16.vlgmr.msra.gmra.mrb[40].mxu0 %vm609_vm3, %v1985_v9 }
 0xe99   : > { %13385 = vmatprep.mubr.msk.bf16.mxu0 %vm15154_vm0, %v15153_v1 }
 0xf6b   : > { %v2039_v18 = vpop.f32.mrb[40].mxu0 }
 0xf6c   : > { %v2046_v19 = vadd.f32 %v2039_v18, %v15578_v33  ;;  %v13363_v21 = vpop.f32.mrb[41].mxu0 }
 0xf6d   : > { %v2042_v22 = vpop.f32.mrb[42].mxu0 }
 0xf6e   : > { %v2047_v23 = vadd.f32 %v2042_v22, %v15581_v36  ;;  %v13364_v25 = vpop.f32.mrb[43].mxu0  ;;  %v2052_v26 = vadd.f32 %v2051_v17, %v2046_v19 }
 0xf6f   : > { %v15662_v25 = vsub.s32 4, %v15604_v12 }
 0xf70   : > { %v2054_v28 = vadd.f32 %v2052_v26, %v15307_v15  ;;  %v2053_v29 = vadd.f32 %v2051_v17, %v2047_v23 }
 0xf71   : > { %v2178_v26 = vrot.slane %v15612_v14, %v15662_v25 }
 0xf72   : > { %v2056_v30 = vsel %vm458_vm2, %v2054_v28, 0.0  ;;  %v2055_v31 = vadd.f32 %v2053_v29, %v15309_v16  ;;  %v14611_v16 = vld [vmem:[%s17504_s6] sm:$0xff]  }
 0xf73   : > { %2057 = vadd.xlane.f32.xlu0 %v2056_v30  ;;  %13366 = vmatpush3.bf16.msra.mxu1 %v14611_v16 }
 0xf74   : > { %v2059_v32 = vsel %vm458_vm2, %v2055_v31, 0.0  ;;  %13367 = vmatprep.subr.bf16.mxu1 %v15153_v1 }
 0xf75   : > { %2060 = vadd.xlane.f32.xlu1 %v2059_v32 }
 0xf77   : > { %13368 = vmatpush3.bf16.msra.mxu1 %v14612_v41 }
 0xf78   : > { %13373 = vmatprep.subr.bf16.mxu1 %v15153_v1 }
0x1000   : > { %v2058_v20 = vpop.xlane.xlu0 %2057 }
0x1001   : > { %v2063_v34 = vmul.f32 0.03125, %v2058_v20 }
0x1002   : > { %v2061_v33 = vpop.xlane.xlu1 %2060 }
0x1003   : > { %v2065_v35 = vsub.f32 %v2054_v28, %v2063_v34  ;;  %v2064_v37 = vmul.f32 0.03125, %v2061_v33 }
0x1005   : > { %v2066_v38 = vsub.f32 %v2055_v31, %v2064_v37  ;;  %v2067_v36 = vmul.f32 %v2065_v35, %v2065_v35 }
0x1007   : > { %v2069_v39 = vsel %vm458_vm2, %v2067_v36, 0.0  ;;  %v2068_v40 = vmul.f32 %v2066_v38, %v2066_v38 }
0x1008   : > { %2070 = vadd.xlane.f32.xlu0 %v2069_v39 }
0x1009   : > { %v2072_v15 = vsel %vm458_vm2, %v2068_v40, 0.0 }
0x100a   : > { %2073 = vadd.xlane.f32.xlu1 %v2072_v15 }
0x1095   : > { %v2071_v42 = vpop.xlane.xlu0 %2070 }
0x1096   : > { %v2075_v44 = vmul.f32 0.03125, %v2071_v42 }
0x1097   : > { %v2074_v45 = vpop.xlane.xlu1 %2073 }
0x1098   : > { %v2077_v46 = vadd.f32 1e-06, %v2075_v44  ;;  %v2076_v47 = vmul.f32 0.03125, %v2074_v45 }
0x109a   : > { %14833 = vrsqrt.f32 %v2077_v46  ;;  %v2078_v24 = vadd.f32 1e-06, %v2076_v47  ;;  %v14615_v46 = vld [vmem:[%s17501_s3 + $0x100] sm:$0xff]  }
0x109b   : > { %v14616_v47 = vld [vmem:[%s17501_s3 + $0x140] sm:$0xff]   ;;  %13382 = vmatpush3.bf16.msra.mxu0 %v14615_v46 }
0x109c   : > { %14835 = vrsqrt.f32 %v2078_v24  ;;  %13383 = vmatprep.subr.bf16.mxu0 %v15153_v1  ;;  %v14617_v24 = vld [vmem:[%s17501_s3 + $0x108] sm:$0xff]  }
0x109f   : > { %13384 = vmatpush3.bf16.msra.mxu0 %v14617_v24 }
0x10a0   : > { %13397 = vmatprep.subr.bf16.mxu0 %v15153_v1 }
0x10a4   : > { %v14834_v50 = vpop.eup %14833 }
0x10a5   : > { %v2081_v51 = vmul.f32 %v14834_v50, %v2065_v35 }
0x10a6   : > { %v14836_v52 = vpop.eup %14835 }
0x10a7   : > { %v2087_v53 = vmul.f32 %v2086_v27, %v2081_v51  ;;  %v2082_v54 = vmul.f32 %v14836_v52, %v2066_v38 }
0x10a9   : > { %v2088_v56 = vmul.f32 %v2086_v27, %v2082_v54  ;;  %v2093_v57 = vadd.f32 %v2092_v55, %v2087_v53  ;;  %v14618_v27 = vld [vmem:[%s17501_s3 + $0x148] sm:$0xff]  }
0x10ab   : > { %v2094_v58 = vadd.f32 %v2092_v55, %v2088_v56  ;;  %v15686_v56 = vsub.s32 5, %v15604_v12 }
0x10ad   : > { %v2095_v59 = vpack.c.bf16 %v2094_v58, %v2093_v57 }
0x10af   : > { %13370 = vmatmul.mubr.msk.bf16.vlgmr.msra.gmra.mrb[48].mxu1 %vm458_vm2, %v2095_v59 }
0x10b0   : > { %13377 = vmatprep.mubr.msk.bf16.mxu1 %vm15154_vm0, %v15153_v1  ;;  %13374 = vmatpush3.bf16.msra.mxu1 %v14613_v60 }
0x10b1   : > { %13375 = vmatprep.subr.bf16.mxu1 %v15153_v1 }
0x10b4   : > { %13376 = vmatpush3.bf16.msra.mxu1 %v14614_v61 }
0x10b5   : > { %13389 = vmatprep.subr.bf16.mxu1 %v15153_v1 }
0x1182   : > { %v2153_v0 = vpop.f32.mrb[48].mxu1 }
0x1183   : > { %v2154_v2 = vadd.f32 %v2153_v0, %v2103_v63  ;;  %v13371_v3 = vpop.f32.mrb[49].mxu1 }
0x1184   : > { %v2156_v4 = vpop.f32.mrb[50].mxu1 }
0x1185   : > { %v2162_v5 = vmul.f32 0.70710677, %v2154_v2  ;;  %v2157_v6 = vadd.f32 %v2156_v4, %v2103_v63  ;;  %v13372_v7 = vpop.f32.mrb[51].mxu1  ;;  %v2160_v17 = vmul.f32 0.5, %v2154_v2 }
0x1186   : > { %v14621_v7 = vld [vmem:[%s17501_s3 + $0x110] sm:$0xff]  }
0x1187   : > { %14837 = verf.f32 %v2162_v5  ;;  %v2163_v8 = vmul.f32 0.70710677, %v2157_v6  ;;  %v2161_v18 = vmul.f32 0.5, %v2157_v6  ;;  %v14619_v6 = vld [vmem:[%s17501_s3 + $0x180] sm:$0xff]  }
0x1189   : > { %14839 = verf.f32 %v2163_v8  ;;  %v14622_v8 = vld [vmem:[%s17501_s3 + $0x118] sm:$0xff]  }
0x1191   : > { %v14838_v9 = vpop.eup %14837 }
0x1192   : > { %v2166_v10 = vadd.f32 1.0, %v14838_v9  ;;  %v14623_v9 = vld [vmem:[%s17501_s3 + $0x190] sm:$0xff]  }
0x1193   : > { %v14840_v11 = vpop.eup %14839 }
0x1194   : > { %v2167_v19 = vadd.f32 1.0, %v14840_v11  ;;  %v2168_v21 = vmul.f32 %v2166_v10, %v2160_v17  ;;  %v14624_v10 = vld [vmem:[%s17501_s3 + $0x198] sm:$0xff]   ;;  %v11939_v11 = vld [vmem:[%s17502_s4 + $0x4] ss:$0 sm:$0xff] }
0x1196   : > { %v2169_v22 = vmul.f32 %v2167_v19, %v2161_v18 }
0x1198   : > { %v2170_v23 = vpack.c.bf16 %v2169_v22, %v2168_v21 }
0x119a   : > { %13378 = vmatmul.mubr.msk.bf16.vlgmr.msra.gmra.mrb[52].mxu1 %vm458_vm2, %v2170_v23 }
0x119b   : > { %13393 = vmatprep.mubr.msk.bf16.mxu1 %vm15154_vm0, %v15153_v1  ;;  %13390 = vmatpush3.bf16.msra.mxu1 %v14616_v47 }
0x119c   : > { %13391 = vmatprep.subr.bf16.mxu1 %v15153_v1 }
0x119f   : > { %13392 = vmatpush3.bf16.msra.mxu1 %v14618_v27 }
0x126d   : > { %v2228_v28 = vpop.f32.mrb[52].mxu1 }
0x126e   : > { %v2229_v29 = vadd.f32 %v2228_v28, %v2178_v26  ;;  %v13379_v30 = vpop.f32.mrb[53].mxu1 }
0x126f   : > { %v2231_v31 = vpop.f32.mrb[54].mxu1 }
0x1270   : > { %v2232_v32 = vadd.f32 %v2231_v31, %v2178_v26  ;;  %v13380_v20 = vpop.f32.mrb[55].mxu1  ;;  %v2235_v34 = vadd.f32 %v2229_v29, %v2093_v57  ;;  %v2266_v57 = vrot.slane %v15612_v14, %v15686_v56 }
0x1272   : > { %v2237_v33 = vsel %vm458_vm2, %v2235_v34, 0.0  ;;  %v2236_v35 = vadd.f32 %v2232_v32, %v2094_v58  ;;  %v15691_v58 = vsub.s32 6, %v15604_v12 }
0x1273   : > { %2238 = vadd.xlane.f32.xlu0 %v2237_v33 }
0x1274   : > { %v2240_v37 = vsel %vm458_vm2, %v2236_v35, 0.0  ;;  %v2272_v63 = vrot.slane %v15612_v14, %v15691_v58  ;;  %v14620_v14 = vld [vmem:[%s17501_s3 + $0x188] sm:$0xff]  }
0x1275   : > { %2241 = vadd.xlane.f32.xlu1 %v2240_v37 }
0x1300   : > { %v2239_v38 = vpop.xlane.xlu0 %2238 }
0x1301   : > { %v2243_v36 = vmul.f32 0.03125, %v2239_v38 }
0x1302   : > { %v2242_v39 = vpop.xlane.xlu1 %2241 }
0x1303   : > { %v2245_v40 = vsub.f32 %v2235_v34, %v2243_v36  ;;  %v2244_v15 = vmul.f32 0.03125, %v2242_v39  ;;  %v11971_v36 = vld [vmem:[%s17502_s4 + $0x5] ss:$0 sm:$0xff] }
0x1305   : > { %v2246_v16 = vsub.f32 %v2236_v35, %v2244_v15  ;;  %v2247_v41 = vmul.f32 %v2245_v40, %v2245_v40 }
0x1307   : > { %v2249_v42 = vsel %vm458_vm2, %v2247_v41, 0.0  ;;  %v2248_v44 = vmul.f32 %v2246_v16, %v2246_v16 }
0x1308   : > { %2250 = vadd.xlane.f32.xlu0 %v2249_v42 }
0x1309   : > { %v2252_v45 = vsel %vm458_vm2, %v2248_v44, 0.0 }
0x130a   : > { %2253 = vadd.xlane.f32.xlu1 %v2252_v45 }
0x1395   : > { %v2251_v50 = vpop.xlane.xlu0 %2250 }
0x1396   : > { %v2255_v51 = vmul.f32 0.03125, %v2251_v50 }
0x1397   : > { %v2254_v52 = vpop.xlane.xlu1 %2253 }
0x1398   : > { %v2257_v53 = vadd.f32 1e-06, %v2255_v51  ;;  %v2256_v54 = vmul.f32 0.03125, %v2254_v52 }
0x139a   : > { %14841 = vrsqrt.f32 %v2257_v53  ;;  %v2258_v55 = vadd.f32 1e-06, %v2256_v54 }
0x139c   : > { %14843 = vrsqrt.f32 %v2258_v55 }
0x13a4   : > { %v14842_v59 = vpop.eup %14841 }
0x13a5   : > { %v2261_v60 = vmul.f32 %v14842_v59, %v2245_v40 }
0x13a6   : > { %v14844_v61 = vpop.eup %14843 }
0x13a7   : > { %v2267_v0 = vmul.f32 %v2266_v57, %v2261_v60  ;;  %v2262_v2 = vmul.f32 %v14844_v61, %v2246_v16 }
0x13a9   : > { %v2268_v3 = vmul.f32 %v2266_v57, %v2262_v2  ;;  %v15695_v4 = vadd.f32 %v2272_v63, %v2267_v0 }
0x13ab   : > { %v15697_v5 = vadd.f32 %v2272_v63, %v2268_v3 }
0x13ad   : > { %v15704_v12 = vpack.c.bf16 %v15697_v5, %v15695_v4 }
0x13af   : > { %13386 = vmatmul.mubr.msk.bf16.vlgmr.msra.gmra.mrb[44].mxu0 %vm458_vm2, %v15704_v12  ;;  %13394 = vmatmul.mubr.msk.bf16.vlgmr.msra.gmra.mrb[56].mxu1 %vm458_vm2, %v15704_v12 }
0x13b0   : > { %13398 = vmatpush3.bf16.msra.mxu0 %v14619_v6  ;;  %13401 = vmatprep.mubr.msk.bf16.mxu0 %vm15154_vm0, %v15153_v1 }
0x13b1   : > { %13399 = vmatprep.subr.bf16.mxu0 %v15153_v1 }
0x13b4   : > { %13400 = vmatpush3.bf16.msra.mxu0 %v14620_v14 }
0x13b5   : > { %13418 = vmatprep.subr.bf16.mxu0 %v15153_v1 }
0x13b7   : > { %13402 = vmatmul.mubr.msk.bf16.vlgmr.msra.gmra.mrb[48].mxu0 %vm458_vm2, %v15704_v12 }
0x13b8   : > { %13419 = vmatpush3.bf16.msra.mxu0 %v14621_v7  ;;  %13422 = vmatprep.mubr.msk.bf16.mxu0 %vm15154_vm0, %v15153_v1 }
0x13b9   : > { %13420 = vmatprep.subr.bf16.mxu0 %v15153_v1 }
0x13bc   : > { %13421 = vmatpush3.bf16.msra.mxu0 %v14622_v8 }
0x13bd   : > { %13434 = vmatprep.subr.bf16.mxu0 %v15153_v1 }
0x13bf   : > { %13423 = vmatmul.mubr.msk.bf16.vlgmr.msra.gmra.mrb[52].mxu0 %vm458_vm2, %v15704_v12 }
0x13c0   : > { %13435 = vmatpush3.bf16.msra.mxu0 %v14623_v9  ;;  %13438 = vmatprep.mubr.msk.bf16.mxu0 %vm15154_vm0, %v15153_v1  ;;  %v14625_v9 = vld [vmem:[%s17501_s3 + $0x150] sm:$0xff]  }
0x13c1   : > { %13436 = vmatprep.subr.bf16.mxu0 %v15153_v1 }
0x13c4   : > { %13437 = vmatpush3.bf16.msra.mxu0 %v14624_v10 }
0x13c5   : > { %13449 = vmatprep.subr.bf16.mxu0 %v15153_v1 }
0x13c7   : > { %13439 = vmatmul.mubr.msk.bf16.vlgmr.msra.gmra.mrb[56].mxu0 %vm458_vm2, %v15704_v12 }
0x13c8   : > { %13451 = vmatprep.mubr.msk.bf16.mxu0 %vm15154_vm0, %v15153_v1 }
0x1482   : > { %v2355_v17 = vpop.f32.mrb[44].mxu0  ;;  %v2408_v18 = vpop.f32.mrb[56].mxu1 }
0x1483   : > { %v2356_v19 = vadd.f32 %v11939_v11, %v2355_v17  ;;  %v13387_v21 = vpop.f32.mrb[45].mxu0  ;;  %v13395_v22 = vpop.f32.mrb[57].mxu1 }
0x1484   : > { %v2358_v23 = vpop.f32.mrb[46].mxu0  ;;  %v2411_v26 = vpop.f32.mrb[58].mxu1 }
0x1485   : > { %v14409_v28 = vpack.c.bf16 %v2411_v26, %v2408_v18  ;;  %v13388_v29 = vpop.f32.mrb[47].mxu0  ;;  %v13396_v30 = vpop.f32.mrb[59].mxu1  ;;  %13409 = vmatprep.mubr.msk.f32.mxu1 %vm609_vm3, %v2356_v19  ;;  %v2359_v34 = vadd.f32 %v11939_v11, %v2358_v23  ;;  %v14626_v11 = vld [vmem:[%s17501_s3 + $0x158] sm:$0xff]  }
0x1487   : > { %14411 = vmatprep.subr.msk.bf16.mxu1 %vm15369_vm4, %v14409_v28 }
0x1488   : > { %14414 = vmatpush3.bf16.xpose.msk.msra.mxu1 %vm15369_vm4, %v14409_v28 }
0x1489   : > { %13412 = vmatprep.subr.bf16.mxu1 %v15153_v1 }
0x148a   : > { %v2461_v31 = vpop.f32.mrb[48].mxu0 }
0x148b   : > { %v13403_v32 = vpop.f32.mrb[49].mxu0 }
0x148c   : > { %v2464_v20 = vpop.f32.mrb[50].mxu0 }
0x148d   : > { %v2580_v33 = vpack.c.bf16 %v2464_v20, %v2461_v31  ;;  %v13404_v35 = vpop.f32.mrb[51].mxu0 }
0x148f   : > { %13410 = vmatmul.mubr.msk.f32.vlgmr.msra.gmra.mrb[60].mxu1 %vm609_vm3, %v2359_v34 }
0x1490   : > { %13413 = vmatpush3.bf16.msra.mxu1 %v2580_v33  ;;  %13414 = vmatprep.mubr.msk.bf16.mxu1 %vm15154_vm0, %v15153_v1 }
0x1491   : > { %13426 = vmatprep.subr.bf16.mxu1 %v15153_v1 }
0x1492   : > { %v2700_v37 = vpop.f32.mrb[52].mxu0 }
0x1493   : > { %v13424_v38 = vpop.f32.mrb[53].mxu0  ;;  %v2701_v17 = vadd.f32 %v11971_v36, %v2700_v37 }
0x1494   : > { %v2703_v39 = vpop.f32.mrb[54].mxu0 }
0x1495   : > { %v15761_v40 = vadd.f32 %v11971_v36, %v2703_v39  ;;  %v13425_v15 = vpop.f32.mrb[55].mxu0 }
0x149a   : > { %v2806_v16 = vpop.f32.mrb[56].mxu0 }
0x149b   : > { %v13440_v41 = vpop.f32.mrb[57].mxu0 }
0x149c   : > { %v2809_v42 = vpop.f32.mrb[58].mxu0 }
0x149d   : > { %v2925_v44 = vpack.c.bf16 %v2809_v42, %v2806_v16  ;;  %v13441_v45 = vpop.f32.mrb[59].mxu0 }
0x149f   : > { %13450 = vmatpush3.bf16.msra.mxu0 %v2925_v44 }
0x14a0   : > { %13463 = vmatprep.subr.bf16.mxu0 %v15153_v1 }
0x1562   : > { %v13411_v46 = vpop.f32.mrb[60].mxu1 }
0x1563   : > { %v2556_v47 = vmul.f32 0.35355338, %v13411_v46  ;;  %v2546_v24 = vpop.f32.mrb[61].mxu1  ;;  %v14631_v46 = vld [vmem:[%s17501_s3 + $0x1d0] sm:$0xff]  }
0x1564   : > { %v2555_v27 = vmul.f32 0.35355338, %v2546_v24  ;;  %v14632_v24 = vld [vmem:[%s17501_s3 + $0x1d8] sm:$0xff]  }
0x1565   : > { %v2560_v50 = vsel %vm699_vm5, %v2556_v47, -inf }
0x1566   : > { %2561 = vmax.xlane.f32.xlu1 %v2560_v50  ;;  %v2557_v51 = vsel %vm699_vm5, %v2555_v27, -inf }
0x1567   : > { %2558 = vmax.xlane.f32.xlu0 %v2557_v51 }
0x15f3   : > { %v2562_v52 = vpop.xlane.xlu1 %2561 }
0x15f4   : > { %v2564_v53 = vsub.f32 %v2556_v47, %v2562_v52  ;;  %v2559_v54 = vpop.xlane.xlu0 %2558  ;;  %v2985_v47 = vsel %vm609_vm3, %v14631_v46, 0 }
0x15f5   : > { %v2563_v55 = vsub.f32 %v2555_v27, %v2559_v54  ;;  %v2988_v27 = vsel %vm609_vm3, %v14632_v24, 0 }
0x15f6   : > { %v2567_v57 = vmul.f32 1.442695, %v2564_v53  ;;  %v14627_v53 = vld [vmem:[%s17501_s3 + $0x1c0] sm:$0xff]  }
0x15f7   : > { %v2565_v59 = vmul.f32 1.442695, %v2563_v55 }
0x15f8   : > { %14845 = vpow2.f32 %v2567_v57 }
0x15f9   : > { %14847 = vpow2.f32 %v2565_v59 }
0x1602   : > { %v14846_v60 = vpop.eup %14845 }
0x1603   : > { %v14848_v61 = vpop.eup %14847  ;;  %v2572_v63 = vsel %vm699_vm5, %v14846_v60, 0.0 }
0x1604   : > { %2573 = vadd.xlane.f32.xlu1 %v2572_v63  ;;  %v2569_v0 = vsel %vm699_vm5, %v14848_v61, 0.0 }
0x1605   : > { %2570 = vadd.xlane.f32.xlu0 %v2569_v0  ;;  %v14629_v0 = vld [vmem:[%s17501_s3 + $0x160] sm:$0xff]  }
0x1691   : > { %v2574_v2 = vpop.xlane.xlu1 %2573 }
0x1692   : > { %14849 = vrcp.f32 %v2574_v2  ;;  %v2571_v3 = vpop.xlane.xlu0 %2570  ;;  %v14630_v2 = vld [vmem:[%s17501_s3 + $0x168] sm:$0xff]  }
0x1693   : > { %14851 = vrcp.f32 %v2571_v3 }
0x169c   : > { %v14850_v6 = vpop.eup %14849 }
0x169d   : > { %v14852_v14 = vpop.eup %14851  ;;  %v2578_v7 = vmul.f32 %v14850_v6, %v14846_v60  ;;  %v3045_v60 = vsel %vm609_vm3, %v14627_v53, 0 }
0x169e   : > { %v2576_v8 = vmul.f32 %v14852_v14, %v14848_v61  ;;  %v14628_v61 = vld [vmem:[%s17501_s3 + $0x1c8] sm:$0xff]  }
0x169f   : > { %v3048_v63 = vsel %vm609_vm3, %v14628_v61, 0 }
0x16a0   : > { %v2579_v10 = vpack.c.bf16 %v2578_v7, %v2576_v8  ;;  %v14633_v7 = vld [vmem:[%s17501_s3 + $0x120] sm:$0xff]  }
0x16a2   : > { %13415 = vmatmul.mubr.msk.bf16.vlgmr.msra.gmra.mrb[64].mxu1 %vm699_vm5, %v2579_v10  ;;  %v14634_v10 = vld [vmem:[%s17501_s3 + $0x128] sm:$0xff]  }
0x16a3   : > { %13427 = vmatpush3.bf16.msra.mxu1 %v14625_v9  ;;  %13430 = vmatprep.mubr.msk.bf16.mxu1 %vm15154_vm0, %v15153_v1 }
0x16a4   : > { %13428 = vmatprep.subr.bf16.mxu1 %v15153_v1 }
0x16a7   : > { %13429 = vmatpush3.bf16.msra.mxu1 %v14626_v11  ;;  %v14635_v11 = vld [vmem:[%s17501_s3 + $0x1a0] sm:$0xff]  }
0x16aa   : > { %13431 = vmatmul.mubr.msk.bf16.vlgmr.msra.gmra.mrb[68].mxu1 %vm458_vm2, %v15704_v12 }
0x16ab   : > { %13446 = vmatprep.mubr.msk.f32.mxu1 %vm609_vm3, %v2701_v17  ;;  %v14636_v17 = vld [vmem:[%s17501_s3 + $0x1a8] sm:$0xff]  }
0x1775   : > { %v15781_v18 = vpop.f32.mrb[64].mxu1 }
0x1776   : > { %v13416_v19 = vpop.f32.mrb[65].mxu1 }
0x1777   : > { %v15783_v21 = vpop.f32.mrb[66].mxu1 }
0x1778   : > { %v2625_v22 = vpack.c.bf16 %v15783_v21, %v15781_v18  ;;  %v13417_v23 = vpop.f32.mrb[67].mxu1 }
0x177d   : > { %v2753_v26 = vpop.f32.mrb[68].mxu1 }
0x177e   : > { %v13432_v28 = vpop.f32.mrb[69].mxu1 }
0x177f   : > { %v2756_v29 = vpop.f32.mrb[70].mxu1 }
0x1780   : > { %v14415_v30 = vpack.c.bf16 %v2756_v29, %v2753_v26  ;;  %v13433_v31 = vpop.f32.mrb[71].mxu1 }
0x1782   : > { %14417 = vmatprep.subr.msk.bf16.mxu1 %vm15369_vm4, %v14415_v30 }
0x1783   : > { %14420 = vmatpush3.bf16.xpose.msk.msra.mxu1 %vm15369_vm4, %v14415_v30 }
0x1784   : > { %13455 = vmatprep.subr.bf16.mxu1 %v15153_v1 }
0x178a   : > { %13447 = vmatmul.mubr.msk.f32.vlgmr.msra.gmra.mrb[62].mxu1 %vm609_vm3, %v15761_v40 }
0x178b   : > { %13459 = vmatprep.mubr.msk.bf16.mxu1 %vm15154_vm0, %v15153_v1  ;;  %13456 = vmatpush3.bf16.xpose.msra.mxu1 %v2985_v47 }
0x178c   : > { %13457 = vmatprep.subr.bf16.mxu1 %v15153_v1 }
0x1793   : > { %13458 = vmatpush3.bf16.xpose.msra.mxu1 %v2988_v27 }
0x1794   : > { %13471 = vmatprep.subr.bf16.mxu1 %v15153_v1 }
0x185d   : > { %v13448_v32 = vpop.f32.mrb[62].mxu1 }
0x185e   : > { %v2901_v20 = vmul.f32 0.35355338, %v13448_v32  ;;  %v2891_v34 = vpop.f32.mrb[63].mxu1 }
0x185f   : > { %v2900_v33 = vmul.f32 0.35355338, %v2891_v34 }
0x1860   : > { %v2905_v35 = vsel %vm699_vm5, %v2901_v20, -inf }
0x1861   : > { %2906 = vmax.xlane.f32.xlu1 %v2905_v35  ;;  %v2902_v37 = vsel %vm699_vm5, %v2900_v33, -inf }
0x1862   : > { %2903 = vmax.xlane.f32.xlu0 %v2902_v37  ;;  %v12009_v37 = vld [vmem:[%s17502_s4 + $0x6] ss:$0 sm:$0xff] }
0x18ee   : > { %v2907_v38 = vpop.xlane.xlu1 %2906 }
0x18ef   : > { %v2909_v36 = vsub.f32 %v2901_v20, %v2907_v38  ;;  %v2904_v39 = vpop.xlane.xlu0 %2903 }
0x18f0   : > { %v2908_v15 = vsub.f32 %v2900_v33, %v2904_v39 }
0x18f1   : > { %v2912_v16 = vmul.f32 1.442695, %v2909_v36 }
0x18f2   : > { %v2910_v41 = vmul.f32 1.442695, %v2908_v15 }
0x18f3   : > { %14853 = vpow2.f32 %v2912_v16 }
0x18f4   : > { %14855 = vpow2.f32 %v2910_v41 }
0x18fd   : > { %v14854_v40 = vpop.eup %14853 }
0x18fe   : > { %v14856_v42 = vpop.eup %14855  ;;  %v2917_v44 = vsel %vm699_vm5, %v14854_v40, 0.0 }
0x18ff   : > { %2918 = vadd.xlane.f32.xlu1 %v2917_v44  ;;  %v2914_v45 = vsel %vm699_vm5, %v14856_v42, 0.0 }
0x1900   : > { %2915 = vadd.xlane.f32.xlu0 %v2914_v45 }
0x198c   : > { %v2919_v50 = vpop.xlane.xlu1 %2918 }
0x198d   : > { %14857 = vrcp.f32 %v2919_v50  ;;  %v2916_v51 = vpop.xlane.xlu0 %2915 }
0x198e   : > { %14859 = vrcp.f32 %v2916_v51 }
0x1997   : > { %v14858_v52 = vpop.eup %14857 }
0x1998   : > { %v14860_v54 = vpop.eup %14859  ;;  %v2923_v55 = vmul.f32 %v14858_v52, %v14854_v40 }
0x1999   : > { %v2921_v57 = vmul.f32 %v14860_v54, %v14856_v42 }
0x199b   : > { %v2924_v59 = vpack.c.bf16 %v2923_v55, %v2921_v57 }
0x199d   : > { %13452 = vmatmul.mubr.msk.bf16.vlgmr.msra.gmra.mrb[60].mxu0 %vm699_vm5, %v2924_v59 }
0x199e   : > { %13464 = vmatpush3.bf16.xpose.msra.mxu0 %v3045_v60  ;;  %13467 = vmatprep.mubr.msk.bf16.mxu0 %vm15154_vm0, %v15153_v1 }
0x199f   : > { %13465 = vmatprep.subr.bf16.mxu0 %v15153_v1 }
0x19a6   : > { %13466 = vmatpush3.bf16.xpose.msra.mxu0 %v3048_v63 }
0x19a7   : > { %13479 = vmatprep.subr.bf16.mxu0 %v15153_v1 }
0x19ad   : > { %13468 = vmatmul.mubr.msk.bf16.vlgmr.msra.gmra.mrb[64].mxu0 %vm609_vm3, %v2625_v22 }
0x19ae   : > { %13480 = vmatpush3.bf16.msra.mxu0 %v14629_v0  ;;  %13483 = vmatprep.mubr.msk.bf16.mxu0 %vm15154_vm0, %v15153_v1 }
0x19af   : > { %13481 = vmatprep.subr.bf16.mxu0 %v15153_v1 }
0x19b2   : > { %13482 = vmatpush3.bf16.msra.mxu0 %v14630_v2 }
0x19b5   : > { %13484 = vmatmul.mubr.msk.bf16.vlgmr.msra.gmra.mrb[68].mxu0 %vm458_vm2, %v15704_v12 }
0x1a70   : > { %v2963_v3 = vpop.f32.mrb[60].mxu0 }
0x1a71   : > { %v13453_v6 = vpop.f32.mrb[61].mxu0 }
0x1a72   : > { %v2966_v14 = vpop.f32.mrb[62].mxu0 }
0x1a73   : > { %v2970_v8 = vpack.c.bf16 %v2966_v14, %v2963_v3  ;;  %v13454_v9 = vpop.f32.mrb[63].mxu0  ;;  %v14641_v3 = vld [vmem:[%s17501_s3 + $0x1e0] sm:$0xff]   ;;  %v14642_v14 = vld [vmem:[%s17501_s3 + $0x1e8] sm:$0xff]  }
0x1a74   : > { %v3450_v6 = vsel %vm609_vm3, %v14641_v3, 0 }
0x1a75   : > { %13460 = vmatmul.mubr.msk.bf16.vlgmr.msra.gmra.mrb[72].mxu1 %vm609_vm3, %v2970_v8 }
0x1a76   : > { %13472 = vmatpush3.bf16.msra.mxu1 %v14633_v7  ;;  %13475 = vmatprep.mubr.msk.bf16.mxu1 %vm15154_vm0, %v15153_v1  ;;  %v3453_v7 = vsel %vm609_vm3, %v14642_v14, 0 }
0x1a77   : > { %13473 = vmatprep.subr.bf16.mxu1 %v15153_v1 }
0x1a7a   : > { %13474 = vmatpush3.bf16.msra.mxu1 %v14634_v10 }
0x1a7b   : > { %13487 = vmatprep.subr.bf16.mxu1 %v15153_v1 }
0x1a7d   : > { %13476 = vmatmul.mubr.msk.bf16.vlgmr.msra.gmra.mrb[76].mxu1 %vm458_vm2, %v15704_v12 }
0x1a7e   : > { %13488 = vmatpush3.bf16.msra.mxu1 %v14635_v11  ;;  %13491 = vmatprep.mubr.msk.bf16.mxu1 %vm15154_vm0, %v15153_v1 }
0x1a7f   : > { %13489 = vmatprep.subr.bf16.mxu1 %v15153_v1 }
0x1a80   : > { %v3084_v18 = vpop.f32.mrb[64].mxu0 }
0x1a81   : > { %v13469_v19 = vpop.f32.mrb[65].mxu0 }
0x1a82   : > { %v3087_v21 = vpop.f32.mrb[66].mxu0  ;;  %13490 = vmatpush3.bf16.msra.mxu1 %v14636_v17  ;;  %v14637_v19 = vld [vmem:[%s17501_s3 + $0x130] sm:$0xff]  }
0x1a83   : > { %v13470_v22 = vpop.f32.mrb[67].mxu0  ;;  %13508 = vmatprep.subr.bf16.mxu1 %v15153_v1 }
0x1a84   : > { %v14638_v22 = vld [vmem:[%s17501_s3 + $0x138] sm:$0xff]  }
0x1a85   : > { %13492 = vmatmul.mubr.msk.bf16.vlgmr.msra.gmra.mrb[80].mxu1 %vm458_vm2, %v15704_v12 }
0x1a86   : > { %13512 = vmatprep.mubr.msk.bf16.mxu1 %vm15154_vm0, %v15153_v1 }
0x1a88   : > { %v3218_v23 = vpop.f32.mrb[68].mxu0 }
0x1a89   : > { %v13485_v26 = vpop.f32.mrb[69].mxu0 }
0x1a8a   : > { %v3221_v28 = vpop.f32.mrb[70].mxu0  ;;  %v14640_v26 = vld [vmem:[%s17501_s3 + $0x178] sm:$0xff]  }
0x1a8b   : > { %v14421_v29 = vpack.c.bf16 %v3221_v28, %v3218_v23  ;;  %v13486_v30 = vpop.f32.mrb[71].mxu0  ;;  %13509 = vmatpush3.bf16.xpose.msra.mxu1 %v3450_v6  ;;  %v14639_v23 = vld [vmem:[%s17501_s3 + $0x170] sm:$0xff]  }
0x1a8c   : > { %13510 = vmatprep.subr.bf16.mxu1 %v15153_v1 }
0x1a8d   : > { %14423 = vmatprep.subr.msk.bf16.mxu0 %vm15369_vm4, %v14421_v29 }
0x1a8e   : > { %14426 = vmatpush3.bf16.xpose.msk.msra.mxu0 %vm15369_vm4, %v14421_v29 }
0x1a8f   : > { %13502 = vmatprep.subr.bf16.mxu0 %v15153_v1 }
0x1a93   : > { %13511 = vmatpush3.bf16.xpose.msra.mxu1 %v3453_v7 }
0x1a94   : > { %13532 = vmatprep.subr.bf16.mxu1 %v15153_v1 }
0x1b48   : > { %v3024_v31 = vpop.f32.mrb[72].mxu1 }
0x1b49   : > { %v15867_v32 = vadd.f32 %v3084_v18, %v3024_v31  ;;  %v13461_v20 = vpop.f32.mrb[73].mxu1  ;;  %v14643_v31 = vld [vmem:[%s17501_s3 + $0x1b0] sm:$0xff]  }
0x1b4a   : > { %v3027_v34 = vpop.f32.mrb[74].mxu1 }
0x1b4b   : > { %v15869_v33 = vadd.f32 %v3087_v21, %v3027_v34  ;;  %v13462_v35 = vpop.f32.mrb[75].mxu1 }
0x1b4c   : > { %v12044_v35 = vld [vmem:[%s17502_s4 + $0x7] ss:$0 sm:$0xff] }
0x1b50   : > { %v3165_v38 = vpop.f32.mrb[76].mxu1 }
0x1b51   : > { %v3166_v36 = vadd.f32 %v12009_v37, %v3165_v38  ;;  %v13477_v39 = vpop.f32.mrb[77].mxu1 }
0x1b52   : > { %v3168_v15 = vpop.f32.mrb[78].mxu1 }
0x1b53   : > { %v3169_v16 = vadd.f32 %v12009_v37, %v3168_v15  ;;  %v13478_v41 = vpop.f32.mrb[79].mxu1  ;;  %13499 = vmatprep.mubr.msk.f32.mxu0 %vm609_vm3, %v3166_v36  ;;  %v14644_v37 = vld [vmem:[%s17501_s3 + $0x1b8] sm:$0xff]  }
0x1b55   : > { %13500 = vmatmul.mubr.msk.f32.vlgmr.msra.gmra.mrb[72].mxu0 %vm609_vm3, %v3169_v16 }
0x1b56   : > { %13504 = vmatprep.mubr.msk.bf16.mxu0 %vm15154_vm0, %v15153_v1 }
0x1b58   : > { %v3271_v40 = vpop.f32.mrb[80].mxu1 }
0x1b59   : > { %v13493_v42 = vpop.f32.mrb[81].mxu1 }
0x1b5a   : > { %v3274_v44 = vpop.f32.mrb[82].mxu1 }
0x1b5b   : > { %v3390_v45 = vpack.c.bf16 %v3274_v44, %v3271_v40  ;;  %v13494_v46 = vpop.f32.mrb[83].mxu1 }
0x1b5d   : > { %13503 = vmatpush3.bf16.msra.mxu0 %v3390_v45 }
0x1b5e   : > { %13516 = vmatprep.subr.bf16.mxu0 %v15153_v1 }
0x1c28   : > { %v13501_v47 = vpop.f32.mrb[72].mxu0 }
0x1c29   : > { %v3366_v24 = vmul.f32 0.35355338, %v13501_v47  ;;  %v3356_v27 = vpop.f32.mrb[73].mxu0 }
0x1c2a   : > { %v3365_v50 = vmul.f32 0.35355338, %v3356_v27 }
0x1c2b   : > { %v3370_v51 = vsel %vm699_vm5, %v3366_v24, -inf }
0x1c2c   : > { %3371 = vmax.xlane.f32.xlu1 %v3370_v51  ;;  %v3367_v52 = vsel %vm699_vm5, %v3365_v50, -inf }
0x1c2d   : > { %3368 = vmax.xlane.f32.xlu0 %v3367_v52 }
0x1cb9   : > { %v3372_v53 = vpop.xlane.xlu1 %3371 }
0x1cba   : > { %v3374_v54 = vsub.f32 %v3366_v24, %v3372_v53  ;;  %v3369_v55 = vpop.xlane.xlu0 %3368 }
0x1cbb   : > { %v3373_v57 = vsub.f32 %v3365_v50, %v3369_v55 }
0x1cbc   : > { %v3377_v59 = vmul.f32 1.442695, %v3374_v54 }
0x1cbd   : > { %v3375_v60 = vmul.f32 1.442695, %v3373_v57 }
0x1cbe   : > { %14861 = vpow2.f32 %v3377_v59 }
0x1cbf   : > { %14863 = vpow2.f32 %v3375_v60 }
0x1cc8   : > { %v14862_v61 = vpop.eup %14861 }
0x1cc9   : > { %v14864_v63 = vpop.eup %14863  ;;  %v3382_v0 = vsel %vm699_vm5, %v14862_v61, 0.0 }
0x1cca   : > { %3383 = vadd.xlane.f32.xlu1 %v3382_v0  ;;  %v3379_v2 = vsel %vm699_vm5, %v14864_v63, 0.0 }
0x1ccb   : > { %3380 = vadd.xlane.f32.xlu0 %v3379_v2 }
0x1d57   : > { %v3384_v8 = vpop.xlane.xlu1 %3383 }
0x1d58   : > { %14865 = vrcp.f32 %v3384_v8  ;;  %v3381_v9 = vpop.xlane.xlu0 %3380 }
0x1d59   : > { %14867 = vrcp.f32 %v3381_v9 }
0x1d62   : > { %v14866_v10 = vpop.eup %14865 }
0x1d63   : > { %v14868_v11 = vpop.eup %14867  ;;  %v3388_v17 = vmul.f32 %v14866_v10, %v14862_v61 }
0x1d64   : > { %v3386_v18 = vmul.f32 %v14868_v11, %v14864_v63 }
0x1d66   : > { %v3389_v21 = vpack.c.bf16 %v3388_v17, %v3386_v18  ;;  %v14645_v17 = vld [vmem:[%s17501_s3 + $0x1f0] sm:$0xff]  }
0x1d67   : > { %v3857_v18 = vsel %vm609_vm3, %v14645_v17, 0 }
0x1d68   : > { %13505 = vmatmul.mubr.msk.bf16.vlgmr.msra.gmra.mrb[76].mxu0 %vm699_vm5, %v3389_v21 }
0x1d69   : > { %13517 = vmatpush3.bf16.msra.mxu0 %v14637_v19  ;;  %13520 = vmatprep.mubr.msk.bf16.mxu0 %vm15154_vm0, %v15153_v1  ;;  %v14646_v19 = vld [vmem:[%s17501_s3 + $0x1f8] sm:$0xff]  }
0x1d6a   : > { %13518 = vmatprep.subr.bf16.mxu0 %v15153_v1  ;;  %v3860_v21 = vsel %vm609_vm3, %v14646_v19, 0 }
0x1d6d   : > { %13519 = vmatpush3.bf16.msra.mxu0 %v14638_v22 }
0x1d6e   : > { %13524 = vmatprep.subr.bf16.mxu0 %v15153_v1 }
0x1d70   : > { %13521 = vmatmul.mubr.msk.bf16.vlgmr.msra.gmra.mrb[80].mxu0 %vm458_vm2, %v15704_v12 }
0x1d71   : > { %13525 = vmatpush3.bf16.msra.mxu0 %v14639_v23  ;;  %13528 = vmatprep.mubr.msk.bf16.mxu0 %vm15154_vm0, %v15153_v1 }
0x1d72   : > { %13526 = vmatprep.subr.bf16.mxu0 %v15153_v1 }
0x1d75   : > { %13527 = vmatpush3.bf16.msra.mxu0 %v14640_v26 }
0x1d78   : > { %13529 = vmatmul.mubr.msk.bf16.vlgmr.msra.gmra.mrb[84].mxu0 %vm458_vm2, %v15704_v12 }
0x1e3b   : > { %v3428_v28 = vpop.f32.mrb[76].mxu0 }
0x1e3c   : > { %v13506_v29 = vpop.f32.mrb[77].mxu0 }
0x1e3d   : > { %v3431_v30 = vpop.f32.mrb[78].mxu0 }
0x1e3e   : > { %v3435_v20 = vpack.c.bf16 %v3431_v30, %v3428_v28  ;;  %v13507_v34 = vpop.f32.mrb[79].mxu0 }
0x1e40   : > { %13513 = vmatmul.mubr.msk.bf16.vlgmr.msra.gmra.mrb[84].mxu1 %vm609_vm3, %v3435_v20 }
0x1e41   : > { %13533 = vmatpush3.bf16.msra.mxu1 %v14643_v31  ;;  %13536 = vmatprep.mubr.msk.bf16.mxu1 %vm15154_vm0, %v15153_v1 }
0x1e42   : > { %13534 = vmatprep.subr.bf16.mxu1 %v15153_v1 }
0x1e43   : > { %v3572_v38 = vpop.f32.mrb[80].mxu0 }
0x1e44   : > { %v3573_v36 = vadd.f32 %v12044_v35, %v3572_v38  ;;  %v13522_v39 = vpop.f32.mrb[81].mxu0 }
0x1e45   : > { %v3575_v15 = vpop.f32.mrb[82].mxu0  ;;  %13535 = vmatpush3.bf16.msra.mxu1 %v14644_v37 }
0x1e46   : > { %v13523_v16 = vpop.f32.mrb[83].mxu0  ;;  %13544 = vmatprep.mubr.msk.f32.mxu0 %vm609_vm3, %v3573_v36  ;;  %13547 = vmatprep.subr.bf16.mxu1 %v15153_v1  ;;  %v3576_v46 = vadd.f32 %v12044_v35, %v3575_v15  ;;  %v15974_v36 = vld [vmem:[%s17503_s5 + $0x8] sm:$0xff] }
0x1e47   : > { %v3908_v39 = vrot.slane %v15974_v36, %v15607_v13 }
0x1e48   : > { %13537 = vmatmul.mubr.msk.bf16.vlgmr.msra.gmra.mrb[88].mxu1 %vm458_vm2, %v15704_v12 }
0x1e49   : > { %13549 = vmatprep.mubr.msk.bf16.mxu1 %vm15154_vm0, %v15153_v1 }
0x1e4b   : > { %v3625_v41 = vpop.f32.mrb[84].mxu0 }
0x1e4c   : > { %v13530_v40 = vpop.f32.mrb[85].mxu0 }
0x1e4d   : > { %v3628_v42 = vpop.f32.mrb[86].mxu0 }
0x1e4e   : > { %v14427_v44 = vpack.c.bf16 %v3628_v42, %v3625_v41  ;;  %v13531_v45 = vpop.f32.mrb[87].mxu0 }
0x1e50   : > { %14429 = vmatprep.subr.msk.bf16.mxu0 %vm15369_vm4, %v14427_v44 }
0x1e51   : > { %14432 = vmatpush3.bf16.xpose.msk.msra.mxu0 %vm15369_vm4, %v14427_v44 }
0x1e52   : > { %13553 = vmatprep.subr.bf16.mxu0 %v15153_v1 }
0x1e58   : > { %13545 = vmatmul.mubr.msk.f32.vlgmr.msra.gmra.mrb[74].mxu0 %vm609_vm3, %v3576_v46 }
0x1e59   : > { %13557 = vmatprep.mubr.msk.bf16.mxu0 %vm15154_vm0, %v15153_v1  ;;  %13554 = vmatpush3.bf16.xpose.msra.mxu0 %v3857_v18 }
0x1e5a   : > { %13555 = vmatprep.subr.bf16.mxu0 %v15153_v1 }
0x1e61   : > { %13556 = vmatpush3.bf16.xpose.msra.mxu0 %v3860_v21 }
0x1e62   : > { %13577 = vmatprep.subr.bf16.mxu0 %v15153_v1 }
0x1f13   : > { %v3489_v12 = vpop.f32.mrb[84].mxu1 }
0x1f14   : > { %v15945_v47 = vadd.f32 %v3489_v12, %v15867_v32  ;;  %v13514_v24 = vpop.f32.mrb[85].mxu1 }
0x1f15   : > { %v3492_v27 = vpop.f32.mrb[86].mxu1 }
0x1f16   : > { %v15948_v50 = vadd.f32 %v3492_v27, %v15869_v33  ;;  %v13515_v51 = vpop.f32.mrb[87].mxu1 }
0x1f1b   : > { %v3678_v52 = vpop.f32.mrb[88].mxu1 }
0x1f1c   : > { %v13538_v53 = vpop.f32.mrb[89].mxu1 }
0x1f1d   : > { %v3681_v54 = vpop.f32.mrb[90].mxu1 }
0x1f1e   : > { %v3797_v55 = vpack.c.bf16 %v3681_v54, %v3678_v52  ;;  %v13539_v57 = vpop.f32.mrb[91].mxu1 }
0x1f20   : > { %13548 = vmatpush3.bf16.msra.mxu1 %v3797_v55 }
0x1f21   : > { %13561 = vmatprep.subr.bf16.mxu1 %v15153_v1 }
0x1f2b   : > { %v13546_v59 = vpop.f32.mrb[74].mxu0 }
0x1f2c   : > { %v3773_v60 = vmul.f32 0.35355338, %v13546_v59  ;;  %v3763_v61 = vpop.f32.mrb[75].mxu0 }
0x1f2d   : > { %v3772_v63 = vmul.f32 0.35355338, %v3763_v61  ;;  %v14648_v61 = vld [vmem:[%s17504_s6 + $0x18] sm:$0xff]  }
0x1f2e   : > { %v3777_v32 = vsel %vm699_vm5, %v3773_v60, -inf }
0x1f2f   : > { %3778 = vmax.xlane.f32.xlu1 %v3777_v32  ;;  %v3774_v0 = vsel %vm699_vm5, %v3772_v63, -inf }
0x1f30   : > { %3775 = vmax.xlane.f32.xlu0 %v3774_v0 }
0x1fbc   : > { %v3779_v33 = vpop.xlane.xlu1 %3778 }
0x1fbd   : > { %v3781_v2 = vsub.f32 %v3773_v60, %v3779_v33  ;;  %v3776_v3 = vpop.xlane.xlu0 %3775 }
0x1fbe   : > { %v3780_v6 = vsub.f32 %v3772_v63, %v3776_v3 }
0x1fbf   : > { %v3784_v14 = vmul.f32 1.442695, %v3781_v2 }
0x1fc0   : > { %v3782_v7 = vmul.f32 1.442695, %v3780_v6  ;;  %v3942_v6 = vrot.slane %v15974_v36, %v15633_v48 }
0x1fc1   : > { %14869 = vpow2.f32 %v3784_v14 }
0x1fc2   : > { %14871 = vpow2.f32 %v3782_v7 }
0x1fcb   : > { %v14870_v8 = vpop.eup %14869 }
0x1fcc   : > { %v14872_v9 = vpop.eup %14871  ;;  %v3789_v10 = vsel %vm699_vm5, %v14870_v8, 0.0 }
0x1fcd   : > { %3790 = vadd.xlane.f32.xlu1 %v3789_v10  ;;  %v3786_v11 = vsel %vm699_vm5, %v14872_v9, 0.0 }
0x1fce   : > { %3787 = vadd.xlane.f32.xlu0 %v3786_v11  ;;  %v3948_v11 = vrot.slane %v15974_v36, %v15638_v49 }
0x205a   : > { %v3791_v22 = vpop.xlane.xlu1 %3790 }
0x205b   : > { %14873 = vrcp.f32 %v3791_v22  ;;  %v3788_v23 = vpop.xlane.xlu0 %3787  ;;  %v14649_v22 = vld [vmem:[%s17505_s7 + $0x10] sm:$0xff]  }
0x205c   : > { %14875 = vrcp.f32 %v3788_v23  ;;  %v14650_v23 = vld [vmem:[%s17505_s7 + $0x18] sm:$0xff]  }
0x2065   : > { %v14874_v26 = vpop.eup %14873 }
0x2066   : > { %v14876_v28 = vpop.eup %14875  ;;  %v3795_v29 = vmul.f32 %v14874_v26, %v14870_v8  ;;  %v3960_v26 = vrot.slane %v15974_v36, %v15654_v62 }
0x2067   : > { %v3793_v30 = vmul.f32 %v14876_v28, %v14872_v9 }
0x2069   : > { %v3796_v31 = vpack.c.bf16 %v3795_v29, %v3793_v30 }
0x206b   : > { %13550 = vmatmul.mubr.msk.bf16.vlgmr.msra.gmra.mrb[92].mxu1 %vm699_vm5, %v3796_v31 }
0x206c   : > { %13565 = vmatprep.mubr.msk.bf16.mxu1 %vm15154_vm0, %v15153_v1 }
0x213e   : > { %v3835_v20 = vpop.f32.mrb[92].mxu1 }
0x213f   : > { %v13551_v34 = vpop.f32.mrb[93].mxu1 }
0x2140   : > { %v3838_v35 = vpop.f32.mrb[94].mxu1 }
0x2141   : > { %v3842_v37 = vpack.c.bf16 %v3838_v35, %v3835_v20  ;;  %v13552_v38 = vpop.f32.mrb[95].mxu1 }
0x2143   : > { %13558 = vmatmul.mubr.msk.bf16.vlgmr.msra.gmra.mrb[88].mxu0 %vm609_vm3, %v3842_v37 }
0x2144   : > { %13581 = vmatprep.mubr.msk.bf16.mxu0 %vm15154_vm0, %v15153_v1 }
0x2216   : > { %v3896_v15 = vpop.f32.mrb[88].mxu0 }
0x2217   : > { %v3903_v16 = vadd.f32 %v3896_v15, %v15945_v47  ;;  %v13559_v41 = vpop.f32.mrb[89].mxu0 }
0x2218   : > { %v3899_v40 = vpop.f32.mrb[90].mxu0 }
0x2219   : > { %v3909_v42 = vadd.f32 %v3908_v39, %v3903_v16  ;;  %v3904_v44 = vadd.f32 %v3899_v40, %v15948_v50  ;;  %v13560_v45 = vpop.f32.mrb[91].mxu0 }
0x221b   : > { %v3910_v46 = vadd.f32 %v3908_v39, %v3904_v44  ;;  %v3911_v12 = vadd.f32 %v3909_v42, %v15695_v4 }
0x221d   : > { %v3913_v24 = vsel %vm458_vm2, %v3911_v12, 0.0  ;;  %v3912_v27 = vadd.f32 %v3910_v46, %v15697_v5  ;;  %v14647_v5 = vld [vmem:[%s17504_s6 + $0x10] sm:$0xff]   ;;  %v4036_v46 = vrot.slane %v15974_v36, %v15662_v25 }
0x221e   : > { %3914 = vadd.xlane.f32.xlu0 %v3913_v24  ;;  %13562 = vmatpush3.bf16.msra.mxu1 %v14647_v5 }
0x221f   : > { %v3916_v51 = vsel %vm458_vm2, %v3912_v27, 0.0  ;;  %13563 = vmatprep.subr.bf16.mxu1 %v15153_v1 }
0x2220   : > { %3917 = vadd.xlane.f32.xlu1 %v3916_v51 }
0x2222   : > { %13564 = vmatpush3.bf16.msra.mxu1 %v14648_v61 }
0x2223   : > { %13569 = vmatprep.subr.bf16.mxu1 %v15153_v1 }
0x22ab   : > { %v3915_v52 = vpop.xlane.xlu0 %3914 }
0x22ac   : > { %v3919_v53 = vmul.f32 0.03125, %v3915_v52 }
0x22ad   : > { %v3918_v47 = vpop.xlane.xlu1 %3917 }
0x22ae   : > { %v3921_v54 = vsub.f32 %v3911_v12, %v3919_v53  ;;  %v3920_v55 = vmul.f32 0.03125, %v3918_v47 }
0x22b0   : > { %v3922_v57 = vsub.f32 %v3912_v27, %v3920_v55  ;;  %v3923_v59 = vmul.f32 %v3921_v54, %v3921_v54 }
0x22b2   : > { %v3925_v50 = vsel %vm458_vm2, %v3923_v59, 0.0  ;;  %v3924_v60 = vmul.f32 %v3922_v57, %v3922_v57 }
0x22b3   : > { %3926 = vadd.xlane.f32.xlu0 %v3925_v50 }
0x22b4   : > { %v3928_v4 = vsel %vm458_vm2, %v3924_v60, 0.0 }
0x22b5   : > { %3929 = vadd.xlane.f32.xlu1 %v3928_v4 }
0x2340   : > { %v3927_v63 = vpop.xlane.xlu0 %3926 }
0x2341   : > { %v3931_v32 = vmul.f32 0.03125, %v3927_v63 }
0x2342   : > { %v3930_v0 = vpop.xlane.xlu1 %3929 }
0x2343   : > { %v3933_v33 = vadd.f32 1e-06, %v3931_v32  ;;  %v3932_v2 = vmul.f32 0.03125, %v3930_v0 }
0x2345   : > { %14877 = vrsqrt.f32 %v3933_v33  ;;  %v3934_v3 = vadd.f32 1e-06, %v3932_v2  ;;  %v14651_v2 = vld [vmem:[%s17506_s8] sm:$0xff]  }
0x2346   : > { %13578 = vmatpush3.bf16.msra.mxu0 %v14651_v2  ;;  %v14661_v2 = vld [vmem:[%s17501_s3 + $0x90] sm:$0xff]  }
0x2347   : > { %14879 = vrsqrt.f32 %v3934_v3  ;;  %v14652_v3 = vld [vmem:[%s17501_s3] sm:$0xff]   ;;  %13579 = vmatprep.subr.bf16.mxu0 %v15153_v1 }
0x234f   : > { %v14878_v14 = vpop.eup %14877 }
0x2350   : > { %v3937_v7 = vmul.f32 %v14878_v14, %v3921_v54  ;;  %v14654_v14 = vld [vmem:[%s17501_s3 + $0x8] sm:$0xff]  }
0x2351   : > { %v14880_v8 = vpop.eup %14879 }
0x2352   : > { %v3943_v9 = vmul.f32 %v3942_v6, %v3937_v7  ;;  %v3938_v10 = vmul.f32 %v14880_v8, %v3922_v57 }
0x2354   : > { %v3944_v17 = vmul.f32 %v3942_v6, %v3938_v10  ;;  %v3949_v18 = vadd.f32 %v3948_v11, %v3943_v9  ;;  %v14653_v6 = vld [vmem:[%s17506_s8 + $0x8] sm:$0xff]  }
0x2355   : > { %13580 = vmatpush3.bf16.msra.mxu0 %v14653_v6  ;;  %v14662_v6 = vld [vmem:[%s17501_s3 + $0x98] sm:$0xff]  }
0x2356   : > { %v3950_v19 = vadd.f32 %v3948_v11, %v3944_v17  ;;  %13593 = vmatprep.subr.bf16.mxu0 %v15153_v1 }
0x2358   : > { %v3951_v21 = vpack.c.bf16 %v3950_v19, %v3949_v18 }
0x235a   : > { %13566 = vmatmul.mubr.msk.bf16.vlgmr.msra.gmra.mrb[96].mxu1 %vm458_vm2, %v3951_v21 }
0x235b   : > { %13573 = vmatprep.mubr.msk.bf16.mxu1 %vm15154_vm0, %v15153_v1  ;;  %13570 = vmatpush3.bf16.msra.mxu1 %v14649_v22 }
0x235c   : > { %13571 = vmatprep.subr.bf16.mxu1 %v15153_v1 }
0x235f   : > { %13572 = vmatpush3.bf16.msra.mxu1 %v14650_v23  ;;  %v4130_v23 = vrot.slane %v15974_v36, %v15691_v58 }
0x2360   : > { %13585 = vmatprep.subr.bf16.mxu1 %v15153_v1 }
0x242d   : > { %v4010_v28 = vpop.f32.mrb[96].mxu1 }
0x242e   : > { %v4011_v29 = vadd.f32 %v4010_v28, %v3960_v26  ;;  %v13567_v30 = vpop.f32.mrb[97].mxu1 }
0x242f   : > { %v4013_v31 = vpop.f32.mrb[98].mxu1 }
0x2430   : > { %v4019_v20 = vmul.f32 0.70710677, %v4011_v29  ;;  %v4014_v34 = vadd.f32 %v4013_v31, %v3960_v26  ;;  %v13568_v35 = vpop.f32.mrb[99].mxu1  ;;  %v4017_v16 = vmul.f32 0.5, %v4011_v29 }
0x2432   : > { %14881 = verf.f32 %v4019_v20  ;;  %v4020_v37 = vmul.f32 0.70710677, %v4014_v34  ;;  %v4018_v41 = vmul.f32 0.5, %v4014_v34  ;;  %v14655_v20 = vld [vmem:[%s17501_s3 + $0x40] sm:$0xff]  }
0x2433   : > { %v14656_v34 = vld [vmem:[%s17501_s3 + $0x80] sm:$0xff]  }
0x2434   : > { %14883 = verf.f32 %v4020_v37  ;;  %v14658_v37 = vld [vmem:[%s17501_s3 + $0x88] sm:$0xff]  }
0x243c   : > { %v14882_v38 = vpop.eup %14881 }
0x243d   : > { %v4023_v39 = vadd.f32 1.0, %v14882_v38  ;;  %v12093_v38 = vld [vmem:[%s17502_s4] ss:$0 sm:$0xff] }
0x243e   : > { %v14884_v15 = vpop.eup %14883 }
0x243f   : > { %v4024_v40 = vadd.f32 1.0, %v14884_v15  ;;  %v4025_v42 = vmul.f32 %v4023_v39, %v4017_v16 }
0x2441   : > { %v4026_v44 = vmul.f32 %v4024_v40, %v4018_v41 }
0x2443   : > { %v4027_v45 = vpack.c.bf16 %v4026_v44, %v4025_v42 }
0x2445   : > { %13574 = vmatmul.mubr.msk.bf16.vlgmr.msra.gmra.mrb[100].mxu1 %vm458_vm2, %v4027_v45 }
0x2446   : > { %13589 = vmatprep.mubr.msk.bf16.mxu1 %vm15154_vm0, %v15153_v1  ;;  %13586 = vmatpush3.bf16.msra.mxu1 %v14652_v3 }
0x2447   : > { %13587 = vmatprep.subr.bf16.mxu1 %v15153_v1 }
0x244a   : > { %13588 = vmatpush3.bf16.msra.mxu1 %v14654_v14 }
0x244b   : > { %13601 = vmatprep.subr.bf16.mxu1 %v15153_v1 }
0x2518   : > { %v4086_v12 = vpop.f32.mrb[100].mxu1 }
0x2519   : > { %v4087_v24 = vadd.f32 %v4086_v12, %v4036_v46  ;;  %v13575_v27 = vpop.f32.mrb[101].mxu1 }
0x251a   : > { %v4089_v51 = vpop.f32.mrb[102].mxu1 }
0x251b   : > { %v4090_v52 = vadd.f32 %v4089_v51, %v4036_v46  ;;  %v13576_v53 = vpop.f32.mrb[103].mxu1  ;;  %v4093_v47 = vadd.f32 %v4087_v24, %v3949_v18  ;;  %v4124_v18 = vrot.slane %v15974_v36, %v15686_v56  ;;  %v14657_v36 = vld [vmem:[%s17501_s3 + $0x48] sm:$0xff]  }
0x251d   : > { %v4095_v54 = vsel %vm458_vm2, %v4093_v47, 0.0  ;;  %v4094_v55 = vadd.f32 %v4090_v52, %v3950_v19 }
0x251e   : > { %4096 = vadd.xlane.f32.xlu0 %v4095_v54 }
0x251f   : > { %v4098_v57 = vsel %vm458_vm2, %v4094_v55, 0.0 }
0x2520   : > { %4099 = vadd.xlane.f32.xlu1 %v4098_v57 }
0x25ab   : > { %v4097_v59 = vpop.xlane.xlu0 %4096 }
0x25ac   : > { %v4101_v50 = vmul.f32 0.03125, %v4097_v59 }
0x25ad   : > { %v4100_v60 = vpop.xlane.xlu1 %4099 }
0x25ae   : > { %v4103_v4 = vsub.f32 %v4093_v47, %v4101_v50  ;;  %v4102_v5 = vmul.f32 0.03125, %v4100_v60 }
0x25b0   : > { %v4104_v61 = vsub.f32 %v4094_v55, %v4102_v5  ;;  %v4105_v63 = vmul.f32 %v4103_v4, %v4103_v4 }
0x25b2   : > { %v4107_v32 = vsel %vm458_vm2, %v4105_v63, 0.0  ;;  %v4106_v0 = vmul.f32 %v4104_v61, %v4104_v61  ;;  %v14659_v63 = vld [vmem:[%s17501_s3 + $0x10] sm:$0xff]  }
0x25b3   : > { %4108 = vadd.xlane.f32.xlu0 %v4107_v32 }
0x25b4   : > { %v4110_v33 = vsel %vm458_vm2, %v4106_v0, 0.0  ;;  %v14660_v0 = vld [vmem:[%s17501_s3 + $0x18] sm:$0xff]  }
0x25b5   : > { %4111 = vadd.xlane.f32.xlu1 %v4110_v33 }
0x2640   : > { %v4109_v7 = vpop.xlane.xlu0 %4108 }
0x2641   : > { %v4113_v8 = vmul.f32 0.03125, %v4109_v7 }
0x2642   : > { %v4112_v9 = vpop.xlane.xlu1 %4111 }
0x2643   : > { %v4115_v10 = vadd.f32 1e-06, %v4113_v8  ;;  %v4114_v11 = vmul.f32 0.03125, %v4112_v9 }
0x2645   : > { %14885 = vrsqrt.f32 %v4115_v10  ;;  %v4116_v17 = vadd.f32 1e-06, %v4114_v11 }
0x2647   : > { %14887 = vrsqrt.f32 %v4116_v17 }
0x264f   : > { %v14886_v19 = vpop.eup %14885 }
0x2650   : > { %v4119_v21 = vmul.f32 %v14886_v19, %v4103_v4  ;;  %v12125_v19 = vld [vmem:[%s17502_s4 + $0x1] ss:$0 sm:$0xff] }
0x2651   : > { %v14888_v22 = vpop.eup %14887 }
0x2652   : > { %v4125_v26 = vmul.f32 %v4124_v18, %v4119_v21  ;;  %v4120_v28 = vmul.f32 %v14888_v22, %v4104_v61 }
0x2654   : > { %v4126_v29 = vmul.f32 %v4124_v18, %v4120_v28  ;;  %v16040_v30 = vadd.f32 %v4130_v23, %v4125_v26 }
0x2656   : > { %v16042_v31 = vadd.f32 %v4130_v23, %v4126_v29 }
0x2658   : > { %v16052_v35 = vpack.c.bf16 %v16042_v31, %v16040_v30 }
0x265a   : > { %13582 = vmatmul.mubr.msk.bf16.vlgmr.msra.gmra.mrb[92].mxu0 %vm458_vm2, %v16052_v35  ;;  %13590 = vmatmul.mubr.msk.bf16.vlgmr.msra.gmra.mrb[104].mxu1 %vm458_vm2, %v16052_v35 }
0x265b   : > { %13594 = vmatpush3.bf16.msra.mxu0 %v14655_v20  ;;  %13602 = vmatpush3.bf16.msra.mxu1 %v14656_v34 }
0x265c   : > { %13595 = vmatprep.subr.bf16.mxu0 %v15153_v1  ;;  %13603 = vmatprep.subr.bf16.mxu1 %v15153_v1 }
0x265d   : > { %13597 = vmatprep.mubr.msk.bf16.mxu0 %vm15154_vm0, %v15153_v1  ;;  %13605 = vmatprep.mubr.msk.bf16.mxu1 %vm15154_vm0, %v15153_v1 }
0x265f   : > { %13596 = vmatpush3.bf16.msra.mxu0 %v14657_v36  ;;  %13604 = vmatpush3.bf16.msra.mxu1 %v14658_v37 }
0x2660   : > { %13616 = vmatprep.subr.bf16.mxu1 %v15153_v1 }
0x2662   : > { %13598 = vmatmul.mubr.msk.bf16.vlgmr.msra.gmra.mrb[96].mxu0 %vm458_vm2, %v16052_v35  ;;  %13606 = vmatmul.mubr.msk.bf16.vlgmr.msra.gmra.mrb[108].mxu1 %vm458_vm2, %v16052_v35 }
0x2663   : > { %13618 = vmatprep.mubr.msk.bf16.mxu1 %vm15154_vm0, %v15153_v1 }
0x272d   : > { %v4187_v39 = vpop.f32.mrb[92].mxu0  ;;  %v4278_v15 = vpop.f32.mrb[104].mxu1 }
0x272e   : > { %v12079_v16 = vmul.f32 -1.442695, %v4187_v39  ;;  %v4279_v41 = vadd.f32 %v12093_v38, %v4278_v15  ;;  %v13583_v40 = vpop.f32.mrb[93].mxu0  ;;  %v13591_v42 = vpop.f32.mrb[105].mxu1 }
0x272f   : > { %v4190_v44 = vpop.f32.mrb[94].mxu0  ;;  %v4281_v45 = vpop.f32.mrb[106].mxu1 }
0x2730   : > { %14889 = vpow2.f32 %v12079_v16  ;;  %v12080_v46 = vmul.f32 -1.442695, %v4190_v44  ;;  %v13584_v12 = vpop.f32.mrb[95].mxu0  ;;  %v13592_v24 = vpop.f32.mrb[107].mxu1  ;;  %13613 = vmatprep.mubr.msk.f32.mxu0 %vm609_vm3, %v4279_v41  ;;  %v4282_v32 = vadd.f32 %v12093_v38, %v4281_v45 }
0x2732   : > { %14891 = vpow2.f32 %v12080_v46 }
0x2735   : > { %v4331_v27 = vpop.f32.mrb[96].mxu0  ;;  %v4384_v51 = vpop.f32.mrb[108].mxu1 }
0x2736   : > { %v13599_v52 = vpop.f32.mrb[97].mxu0  ;;  %v13607_v53 = vpop.f32.mrb[109].mxu1 }
0x2737   : > { %v4334_v47 = vpop.f32.mrb[98].mxu0  ;;  %v4387_v54 = vpop.f32.mrb[110].mxu1  ;;  %v14663_v52 = vld [vmem:[%s17501_s3 + $0x50] sm:$0xff]  }
0x2738   : > { %v14433_v55 = vpack.c.bf16 %v4334_v47, %v4331_v27  ;;  %v4503_v57 = vpack.c.bf16 %v4387_v54, %v4384_v51  ;;  %v13600_v59 = vpop.f32.mrb[99].mxu0  ;;  %v13608_v50 = vpop.f32.mrb[111].mxu1  ;;  %v14664_v47 = vld [vmem:[%s17501_s3 + $0x58] sm:$0xff]  }
0x273a   : > { %v14890_v60 = vpop.eup %14889  ;;  %14435 = vmatprep.subr.msk.bf16.mxu0 %vm15369_vm4, %v14433_v55  ;;  %13617 = vmatpush3.bf16.msra.mxu1 %v4503_v57 }
0x273b   : > { %v4200_v4 = vadd.f32 1.0, %v14890_v60  ;;  %14438 = vmatpush3.bf16.xpose.msk.msra.mxu0 %vm15369_vm4, %v14433_v55  ;;  %13630 = vmatprep.subr.bf16.mxu1 %v15153_v1 }
0x273c   : > { %v14892_v5 = vpop.eup %14891  ;;  %13622 = vmatprep.subr.bf16.mxu0 %v15153_v1 }
0x273d   : > { %14893 = vrcp.f32 %v4200_v4  ;;  %v4201_v61 = vadd.f32 1.0, %v14892_v5 }
0x273f   : > { %14895 = vrcp.f32 %v4201_v61 }
0x2742   : > { %13614 = vmatmul.mubr.msk.f32.vlgmr.msra.gmra.mrb[100].mxu0 %vm609_vm3, %v4282_v32 }
0x2743   : > { %13623 = vmatpush3.bf16.msra.mxu0 %v14659_v63  ;;  %13626 = vmatprep.mubr.msk.bf16.mxu0 %vm15154_vm0, %v15153_v1 }
0x2744   : > { %13624 = vmatprep.subr.bf16.mxu0 %v15153_v1 }
0x2747   : > { %v14894_v33 = vpop.eup %14893  ;;  %13625 = vmatpush3.bf16.msra.mxu0 %v14660_v0 }
0x2748   : > { %4206 = vst.msk [vmem:[%s16103_s24] sm:$0xff] %vm699_vm5, %v14894_v33  ;;  %13638 = vmatprep.subr.bf16.mxu0 %v15153_v1 }
0x2749   : > { %v14896_v3 = vpop.eup %14895 }
0x274a   : > { %4207 = vst.msk [vmem:[%s16103_s24 + $0x8] sm:$0xff] %vm699_vm5, %v14896_v3  ;;  %13627 = vmatmul.mubr.msk.bf16.vlgmr.msra.gmra.mrb[104].mxu0 %vm458_vm2, %v16052_v35 }
0x274b   : > { %13639 = vmatpush3.bf16.msra.mxu0 %v14661_v2  ;;  %13642 = vmatprep.mubr.msk.bf16.mxu0 %vm15154_vm0, %v15153_v1 }
0x274c   : > { %13640 = vmatprep.subr.bf16.mxu0 %v15153_v1 }
0x274f   : > { %13641 = vmatpush3.bf16.msra.mxu0 %v14662_v6 }
0x2750   : > { %13659 = vmatprep.subr.bf16.mxu0 %v15153_v1 }
0x2752   : > { %13643 = vmatmul.mubr.msk.bf16.vlgmr.msra.gmra.mrb[108].mxu0 %vm458_vm2, %v16052_v35 }
0x2753   : > { %13663 = vmatprep.mubr.msk.bf16.mxu0 %vm15154_vm0, %v15153_v1 }
0x2815   : > { %v13615_v14 = vpop.f32.mrb[100].mxu0 }
0x2816   : > { %v4479_v7 = vmul.f32 0.35355338, %v13615_v14  ;;  %v4469_v8 = vpop.f32.mrb[101].mxu0 }
0x2817   : > { %v4478_v9 = vmul.f32 0.35355338, %v4469_v8 }
0x2818   : > { %v4483_v10 = vsel %vm699_vm5, %v4479_v7, -inf }
0x2819   : > { %4484 = vmax.xlane.f32.xlu1 %v4483_v10  ;;  %v4480_v11 = vsel %vm699_vm5, %v4478_v9, -inf }
0x281a   : > { %4481 = vmax.xlane.f32.xlu0 %v4480_v11 }
0x281d   : > { %v4618_v17 = vpop.f32.mrb[104].mxu0 }
0x281e   : > { %v13628_v18 = vpop.f32.mrb[105].mxu0  ;;  %v4619_v54 = vadd.f32 %v12125_v19, %v4618_v17 }
0x281f   : > { %v4621_v21 = vpop.f32.mrb[106].mxu0 }
0x2820   : > { %v4622_v22 = vadd.f32 %v12125_v19, %v4621_v21  ;;  %v13629_v23 = vpop.f32.mrb[107].mxu0 }
0x2821   : > { %v14669_v23 = vld [vmem:[%s17501_s3 + $0xd0] sm:$0xff]  }
0x2825   : > { %v4724_v26 = vpop.f32.mrb[108].mxu0 }
0x2826   : > { %v13644_v28 = vpop.f32.mrb[109].mxu0 }
0x2827   : > { %v4727_v29 = vpop.f32.mrb[110].mxu0  ;;  %v14670_v28 = vld [vmem:[%s17501_s3 + $0xd8] sm:$0xff]  }
0x2828   : > { %v4843_v20 = vpack.c.bf16 %v4727_v29, %v4724_v26  ;;  %v13645_v34 = vpop.f32.mrb[111].mxu0  ;;  %v4903_v26 = vsel %vm609_vm3, %v14669_v23, 0  ;;  %v4906_v29 = vsel %vm609_vm3, %v14670_v28, 0 }
0x2829   : > { %13660 = vmatpush3.bf16.xpose.msra.mxu0 %v4903_v26 }
0x282a   : > { %13661 = vmatprep.subr.bf16.mxu0 %v15153_v1 }
0x2831   : > { %13662 = vmatpush3.bf16.xpose.msra.mxu0 %v4906_v29 }
0x2832   : > { %13675 = vmatprep.subr.bf16.mxu0 %v15153_v1 }
0x28a6   : > { %v4485_v36 = vpop.xlane.xlu1 %4484 }
0x28a7   : > { %v4487_v37 = vsub.f32 %v4479_v7, %v4485_v36  ;;  %v4482_v38 = vpop.xlane.xlu0 %4481 }
0x28a8   : > { %v4486_v39 = vsub.f32 %v4478_v9, %v4482_v38 }
0x28a9   : > { %v4490_v15 = vmul.f32 1.442695, %v4487_v37  ;;  %v14665_v37 = vld [vmem:[%s17501_s3 + $0xc0] sm:$0xff]  }
0x28aa   : > { %v4488_v16 = vmul.f32 1.442695, %v4486_v39 }
0x28ab   : > { %14897 = vpow2.f32 %v4490_v15 }
0x28ac   : > { %14899 = vpow2.f32 %v4488_v16 }
0x28b5   : > { %v14898_v41 = vpop.eup %14897 }
0x28b6   : > { %v14900_v40 = vpop.eup %14899  ;;  %v4495_v42 = vsel %vm699_vm5, %v14898_v41, 0.0 }
0x28b7   : > { %4496 = vadd.xlane.f32.xlu1 %v4495_v42  ;;  %v4492_v44 = vsel %vm699_vm5, %v14900_v40, 0.0 }
0x28b8   : > { %4493 = vadd.xlane.f32.xlu0 %v4492_v44  ;;  %v14667_v44 = vld [vmem:[%s17501_s3 + $0x60] sm:$0xff]  }
0x2944   : > { %v4497_v45 = vpop.xlane.xlu1 %4496 }
0x2945   : > { %14901 = vrcp.f32 %v4497_v45  ;;  %v4494_v46 = vpop.xlane.xlu0 %4493  ;;  %v14668_v45 = vld [vmem:[%s17501_s3 + $0x68] sm:$0xff]  }
0x2946   : > { %14903 = vrcp.f32 %v4494_v46 }
0x294f   : > { %v14902_v12 = vpop.eup %14901 }
0x2950   : > { %v14904_v24 = vpop.eup %14903  ;;  %v4501_v27 = vmul.f32 %v14902_v12, %v14898_v41  ;;  %v4963_v41 = vsel %vm609_vm3, %v14665_v37, 0 }
0x2951   : > { %v4499_v51 = vmul.f32 %v14904_v24, %v14900_v40  ;;  %v14666_v40 = vld [vmem:[%s17501_s3 + $0xc8] sm:$0xff]  }
0x2952   : > { %v4966_v42 = vsel %vm609_vm3, %v14666_v40, 0 }
0x2953   : > { %v4502_v53 = vpack.c.bf16 %v4501_v27, %v4499_v51  ;;  %v14671_v27 = vld [vmem:[%s17501_s3 + $0x20] sm:$0xff]  }
0x2955   : > { %13619 = vmatmul.mubr.msk.bf16.vlgmr.msra.gmra.mrb[112].mxu1 %vm699_vm5, %v4502_v53  ;;  %v14672_v53 = vld [vmem:[%s17501_s3 + $0x28] sm:$0xff]  }
0x2956   : > { %13631 = vmatpush3.bf16.msra.mxu1 %v14663_v52  ;;  %13634 = vmatprep.mubr.msk.bf16.mxu1 %vm15154_vm0, %v15153_v1 }
0x2957   : > { %13632 = vmatprep.subr.bf16.mxu1 %v15153_v1 }
0x295a   : > { %13633 = vmatpush3.bf16.msra.mxu1 %v14664_v47  ;;  %v14673_v47 = vld [vmem:[%s17501_s3 + $0xa0] sm:$0xff]  }
0x295d   : > { %13635 = vmatmul.mubr.msk.bf16.vlgmr.msra.gmra.mrb[116].mxu1 %vm458_vm2, %v16052_v35 }
0x295e   : > { %13650 = vmatprep.mubr.msk.f32.mxu1 %vm609_vm3, %v4619_v54  ;;  %v14674_v54 = vld [vmem:[%s17501_s3 + $0xa8] sm:$0xff]  }
0x2a28   : > { %v16143_v55 = vpop.f32.mrb[112].mxu1 }
0x2a29   : > { %v13620_v57 = vpop.f32.mrb[113].mxu1 }
0x2a2a   : > { %v16145_v59 = vpop.f32.mrb[114].mxu1 }
0x2a2b   : > { %v4548_v50 = vpack.c.bf16 %v16145_v59, %v16143_v55  ;;  %v13621_v60 = vpop.f32.mrb[115].mxu1 }
0x2a30   : > { %v4671_v4 = vpop.f32.mrb[116].mxu1 }
0x2a31   : > { %v13636_v5 = vpop.f32.mrb[117].mxu1 }
0x2a32   : > { %v4674_v61 = vpop.f32.mrb[118].mxu1 }
0x2a33   : > { %v14439_v63 = vpack.c.bf16 %v4674_v61, %v4671_v4  ;;  %v13637_v32 = vpop.f32.mrb[119].mxu1 }
0x2a35   : > { %14441 = vmatprep.subr.msk.bf16.mxu1 %vm15369_vm4, %v14439_v63 }
0x2a36   : > { %14444 = vmatpush3.bf16.xpose.msk.msra.mxu1 %vm15369_vm4, %v14439_v63 }
0x2a37   : > { %13653 = vmatprep.subr.bf16.mxu1 %v15153_v1 }
0x2a3d   : > { %13651 = vmatmul.mubr.msk.f32.vlgmr.msra.gmra.mrb[120].mxu1 %vm609_vm3, %v4622_v22 }
0x2a3e   : > { %13654 = vmatpush3.bf16.msra.mxu1 %v4843_v20  ;;  %13655 = vmatprep.mubr.msk.bf16.mxu1 %vm15154_vm0, %v15153_v1 }
0x2a3f   : > { %13667 = vmatprep.subr.bf16.mxu1 %v15153_v1 }
0x2b10   : > { %v13652_v0 = vpop.f32.mrb[120].mxu1 }
0x2b11   : > { %v4819_v33 = vmul.f32 0.35355338, %v13652_v0  ;;  %v4809_v2 = vpop.f32.mrb[121].mxu1 }
0x2b12   : > { %v4818_v3 = vmul.f32 0.35355338, %v4809_v2 }
0x2b13   : > { %v4823_v6 = vsel %vm699_vm5, %v4819_v33, -inf }
0x2b14   : > { %4824 = vmax.xlane.f32.xlu1 %v4823_v6  ;;  %v4820_v14 = vsel %vm699_vm5, %v4818_v3, -inf }
0x2b15   : > { %4821 = vmax.xlane.f32.xlu0 %v4820_v14  ;;  %v12163_v14 = vld [vmem:[%s17502_s4 + $0x2] ss:$0 sm:$0xff] }
0x2ba1   : > { %v4825_v7 = vpop.xlane.xlu1 %4824 }
0x2ba2   : > { %v4827_v8 = vsub.f32 %v4819_v33, %v4825_v7  ;;  %v4822_v9 = vpop.xlane.xlu0 %4821 }
0x2ba3   : > { %v4826_v10 = vsub.f32 %v4818_v3, %v4822_v9 }
0x2ba4   : > { %v4830_v11 = vmul.f32 1.442695, %v4827_v8 }
0x2ba5   : > { %v4828_v17 = vmul.f32 1.442695, %v4826_v10 }
0x2ba6   : > { %14905 = vpow2.f32 %v4830_v11 }
0x2ba7   : > { %14907 = vpow2.f32 %v4828_v17 }
0x2bb0   : > { %v14906_v18 = vpop.eup %14905 }
0x2bb1   : > { %v14908_v19 = vpop.eup %14907  ;;  %v4835_v21 = vsel %vm699_vm5, %v14906_v18, 0.0 }
0x2bb2   : > { %4836 = vadd.xlane.f32.xlu1 %v4835_v21  ;;  %v4832_v22 = vsel %vm699_vm5, %v14908_v19, 0.0 }
0x2bb3   : > { %4833 = vadd.xlane.f32.xlu0 %v4832_v22 }
0x2c3f   : > { %v4837_v20 = vpop.xlane.xlu1 %4836 }
0x2c40   : > { %14909 = vrcp.f32 %v4837_v20  ;;  %v4834_v34 = vpop.xlane.xlu0 %4833 }
0x2c41   : > { %14911 = vrcp.f32 %v4834_v34 }
0x2c4a   : > { %v14910_v36 = vpop.eup %14909 }
0x2c4b   : > { %v14912_v38 = vpop.eup %14911  ;;  %v4841_v39 = vmul.f32 %v14910_v36, %v14906_v18 }
0x2c4c   : > { %v4839_v15 = vmul.f32 %v14912_v38, %v14908_v19 }
0x2c4e   : > { %v4842_v16 = vpack.c.bf16 %v4841_v39, %v4839_v15 }
0x2c50   : > { %13656 = vmatmul.mubr.msk.bf16.vlgmr.msra.gmra.mrb[124].mxu1 %vm699_vm5, %v4842_v16 }
0x2c51   : > { %13668 = vmatpush3.bf16.xpose.msra.mxu1 %v4963_v41  ;;  %13671 = vmatprep.mubr.msk.bf16.mxu1 %vm15154_vm0, %v15153_v1 }
0x2c52   : > { %13669 = vmatprep.subr.bf16.mxu1 %v15153_v1 }
0x2c59   : > { %13670 = vmatpush3.bf16.xpose.msra.mxu1 %v4966_v42 }
0x2c5a   : > { %13683 = vmatprep.subr.bf16.mxu1 %v15153_v1 }
0x2c60   : > { %13672 = vmatmul.mubr.msk.bf16.vlgmr.msra.gmra.mrb[128].mxu1 %vm609_vm3, %v4548_v50 }
0x2c61   : > { %13684 = vmatpush3.bf16.msra.mxu1 %v14667_v44  ;;  %13687 = vmatprep.mubr.msk.bf16.mxu1 %vm15154_vm0, %v15153_v1 }
0x2c62   : > { %13685 = vmatprep.subr.bf16.mxu1 %v15153_v1 }
0x2c65   : > { %13686 = vmatpush3.bf16.msra.mxu1 %v14668_v45 }
0x2c68   : > { %13688 = vmatmul.mubr.msk.bf16.vlgmr.msra.gmra.mrb[132].mxu1 %vm458_vm2, %v16052_v35 }
0x2d23   : > { %v4881_v46 = vpop.f32.mrb[124].mxu1 }
0x2d24   : > { %v13657_v12 = vpop.f32.mrb[125].mxu1 }
0x2d25   : > { %v4884_v24 = vpop.f32.mrb[126].mxu1 }
0x2d26   : > { %v4888_v51 = vpack.c.bf16 %v4884_v24, %v4881_v46  ;;  %v13658_v52 = vpop.f32.mrb[127].mxu1  ;;  %v14679_v46 = vld [vmem:[%s17501_s3 + $0xe0] sm:$0xff]   ;;  %v14680_v24 = vld [vmem:[%s17501_s3 + $0xe8] sm:$0xff]  }
0x2d27   : > { %v5363_v12 = vsel %vm609_vm3, %v14679_v46, 0 }
0x2d28   : > { %13664 = vmatmul.mubr.msk.bf16.vlgmr.msra.gmra.mrb[112].mxu0 %vm609_vm3, %v4888_v51 }
0x2d29   : > { %13676 = vmatpush3.bf16.msra.mxu0 %v14671_v27  ;;  %13679 = vmatprep.mubr.msk.bf16.mxu0 %vm15154_vm0, %v15153_v1  ;;  %v5366_v27 = vsel %vm609_vm3, %v14680_v24, 0 }
0x2d2a   : > { %13677 = vmatprep.subr.bf16.mxu0 %v15153_v1 }
0x2d2d   : > { %13678 = vmatpush3.bf16.msra.mxu0 %v14672_v53 }
0x2d2e   : > { %13691 = vmatprep.subr.bf16.mxu0 %v15153_v1 }
0x2d30   : > { %13680 = vmatmul.mubr.msk.bf16.vlgmr.msra.gmra.mrb[116].mxu0 %vm458_vm2, %v16052_v35 }
0x2d31   : > { %13692 = vmatpush3.bf16.msra.mxu0 %v14673_v47  ;;  %13695 = vmatprep.mubr.msk.bf16.mxu0 %vm15154_vm0, %v15153_v1 }
0x2d32   : > { %13693 = vmatprep.subr.bf16.mxu0 %v15153_v1 }
0x2d33   : > { %v5002_v55 = vpop.f32.mrb[128].mxu1 }
0x2d34   : > { %v13673_v57 = vpop.f32.mrb[129].mxu1 }
0x2d35   : > { %v5005_v59 = vpop.f32.mrb[130].mxu1  ;;  %13694 = vmatpush3.bf16.msra.mxu0 %v14674_v54  ;;  %v14675_v57 = vld [vmem:[%s17501_s3 + $0x30] sm:$0xff]  }
0x2d36   : > { %v13674_v50 = vpop.f32.mrb[131].mxu1  ;;  %13706 = vmatprep.subr.bf16.mxu0 %v15153_v1 }
0x2d37   : > { %v14676_v50 = vld [vmem:[%s17501_s3 + $0x38] sm:$0xff]  }
0x2d38   : > { %13696 = vmatmul.mubr.msk.bf16.vlgmr.msra.gmra.mrb[120].mxu0 %vm458_vm2, %v16052_v35 }
0x2d39   : > { %13708 = vmatprep.mubr.msk.bf16.mxu0 %vm15154_vm0, %v15153_v1 }
0x2d3b   : > { %v5131_v60 = vpop.f32.mrb[132].mxu1 }
0x2d3c   : > { %v13689_v4 = vpop.f32.mrb[133].mxu1 }
0x2d3d   : > { %v5134_v5 = vpop.f32.mrb[134].mxu1  ;;  %v14678_v4 = vld [vmem:[%s17501_s3 + $0x78] sm:$0xff]  }
0x2d3e   : > { %v14445_v61 = vpack.c.bf16 %v5134_v5, %v5131_v60  ;;  %v13690_v63 = vpop.f32.mrb[135].mxu1  ;;  %v14677_v60 = vld [vmem:[%s17501_s3 + $0x70] sm:$0xff]  }
0x2d40   : > { %14447 = vmatprep.subr.msk.bf16.mxu1 %vm15369_vm4, %v14445_v61 }
0x2d41   : > { %14450 = vmatpush3.bf16.xpose.msk.msra.mxu1 %vm15369_vm4, %v14445_v61 }
0x2d42   : > { %13712 = vmatprep.subr.bf16.mxu1 %v15153_v1 }
0x2dfb   : > { %v4942_v32 = vpop.f32.mrb[112].mxu0 }
0x2dfc   : > { %v16232_v0 = vadd.f32 %v5002_v55, %v4942_v32  ;;  %v13665_v33 = vpop.f32.mrb[113].mxu0  ;;  %v14681_v32 = vld [vmem:[%s17501_s3 + $0xb0] sm:$0xff]  }
0x2dfd   : > { %v4945_v2 = vpop.f32.mrb[114].mxu0 }
0x2dfe   : > { %v16234_v3 = vadd.f32 %v5005_v59, %v4945_v2  ;;  %v13666_v6 = vpop.f32.mrb[115].mxu0 }
0x2dff   : > { %v12198_v6 = vld [vmem:[%s17502_s4 + $0x3] ss:$0 sm:$0xff] }
0x2e03   : > { %v5078_v7 = vpop.f32.mrb[116].mxu0 }
0x2e04   : > { %v5079_v8 = vadd.f32 %v12163_v14, %v5078_v7  ;;  %v13681_v9 = vpop.f32.mrb[117].mxu0 }
0x2e05   : > { %v5081_v10 = vpop.f32.mrb[118].mxu0 }
0x2e06   : > { %v5082_v11 = vadd.f32 %v12163_v14, %v5081_v10  ;;  %v13682_v17 = vpop.f32.mrb[119].mxu0  ;;  %13703 = vmatprep.mubr.msk.f32.mxu1 %vm609_vm3, %v5079_v8  ;;  %v14682_v14 = vld [vmem:[%s17501_s3 + $0xb8] sm:$0xff]  }
0x2e08   : > { %13704 = vmatmul.mubr.msk.f32.vlgmr.msra.gmra.mrb[122].mxu1 %vm609_vm3, %v5082_v11 }
0x2e09   : > { %13716 = vmatprep.mubr.msk.bf16.mxu1 %vm15154_vm0, %v15153_v1  ;;  %13713 = vmatpush3.bf16.xpose.msra.mxu1 %v5363_v12 }
0x2e0a   : > { %13714 = vmatprep.subr.bf16.mxu1 %v15153_v1 }
0x2e0b   : > { %v5184_v18 = vpop.f32.mrb[120].mxu0 }
0x2e0c   : > { %v13697_v19 = vpop.f32.mrb[121].mxu0 }
0x2e0d   : > { %v5187_v21 = vpop.f32.mrb[122].mxu0 }
0x2e0e   : > { %v5303_v22 = vpack.c.bf16 %v5187_v21, %v5184_v18  ;;  %v13698_v23 = vpop.f32.mrb[123].mxu0 }
0x2e10   : > { %13707 = vmatpush3.bf16.msra.mxu0 %v5303_v22 }
0x2e11   : > { %13720 = vmatprep.subr.bf16.mxu0 %v15153_v1  ;;  %13715 = vmatpush3.bf16.xpose.msra.mxu1 %v5366_v27 }
0x2e12   : > { %13736 = vmatprep.subr.bf16.mxu1 %v15153_v1 }
0x2edb   : > { %v13705_v26 = vpop.f32.mrb[122].mxu1 }
0x2edc   : > { %v5279_v28 = vmul.f32 0.35355338, %v13705_v26  ;;  %v5269_v29 = vpop.f32.mrb[123].mxu1 }
0x2edd   : > { %v5278_v20 = vmul.f32 0.35355338, %v5269_v29 }
0x2ede   : > { %v5283_v34 = vsel %vm699_vm5, %v5279_v28, -inf }
0x2edf   : > { %5284 = vmax.xlane.f32.xlu1 %v5283_v34  ;;  %v5280_v36 = vsel %vm699_vm5, %v5278_v20, -inf }
0x2ee0   : > { %5281 = vmax.xlane.f32.xlu0 %v5280_v36 }
0x2f6c   : > { %v5285_v37 = vpop.xlane.xlu1 %5284 }
0x2f6d   : > { %v5287_v38 = vsub.f32 %v5279_v28, %v5285_v37  ;;  %v5282_v39 = vpop.xlane.xlu0 %5281 }
0x2f6e   : > { %v5286_v15 = vsub.f32 %v5278_v20, %v5282_v39 }
0x2f6f   : > { %v5290_v16 = vmul.f32 1.442695, %v5287_v38 }
0x2f70   : > { %v5288_v41 = vmul.f32 1.442695, %v5286_v15 }
0x2f71   : > { %14913 = vpow2.f32 %v5290_v16 }
0x2f72   : > { %14915 = vpow2.f32 %v5288_v41 }
0x2f7b   : > { %v14914_v40 = vpop.eup %14913 }
0x2f7c   : > { %v14916_v42 = vpop.eup %14915  ;;  %v5295_v44 = vsel %vm699_vm5, %v14914_v40, 0.0 }
0x2f7d   : > { %5296 = vadd.xlane.f32.xlu1 %v5295_v44  ;;  %v5292_v45 = vsel %vm699_vm5, %v14916_v42, 0.0 }
0x2f7e   : > { %5293 = vadd.xlane.f32.xlu0 %v5292_v45 }
0x300a   : > { %v5297_v51 = vpop.xlane.xlu1 %5296 }
0x300b   : > { %14917 = vrcp.f32 %v5297_v51  ;;  %v5294_v52 = vpop.xlane.xlu0 %5293 }
0x300c   : > { %14919 = vrcp.f32 %v5294_v52 }
0x3015   : > { %v14918_v53 = vpop.eup %14917 }
0x3016   : > { %v14920_v47 = vpop.eup %14919  ;;  %v5301_v54 = vmul.f32 %v14918_v53, %v14914_v40 }
0x3017   : > { %v5299_v55 = vmul.f32 %v14920_v47, %v14916_v42 }
0x3019   : > { %v5302_v59 = vpack.c.bf16 %v5301_v54, %v5299_v55  ;;  %v14683_v54 = vld [vmem:[%s17501_s3 + $0xf0] sm:$0xff]  }
0x301a   : > { %v5765_v55 = vsel %vm609_vm3, %v14683_v54, 0 }
0x301b   : > { %13709 = vmatmul.mubr.msk.bf16.vlgmr.msra.gmra.mrb[124].mxu0 %vm699_vm5, %v5302_v59 }
0x301c   : > { %13721 = vmatpush3.bf16.msra.mxu0 %v14675_v57  ;;  %13724 = vmatprep.mubr.msk.bf16.mxu0 %vm15154_vm0, %v15153_v1  ;;  %v14684_v57 = vld [vmem:[%s17501_s3 + $0xf8] sm:$0xff]  }
0x301d   : > { %13722 = vmatprep.subr.bf16.mxu0 %v15153_v1  ;;  %v5768_v59 = vsel %vm609_vm3, %v14684_v57, 0 }
0x3020   : > { %13723 = vmatpush3.bf16.msra.mxu0 %v14676_v50 }
0x3021   : > { %13728 = vmatprep.subr.bf16.mxu0 %v15153_v1 }
0x3023   : > { %13725 = vmatmul.mubr.msk.bf16.vlgmr.msra.gmra.mrb[128].mxu0 %vm458_vm2, %v16052_v35 }
0x3024   : > { %13729 = vmatpush3.bf16.msra.mxu0 %v14677_v60  ;;  %13732 = vmatprep.mubr.msk.bf16.mxu0 %vm15154_vm0, %v15153_v1 }
0x3025   : > { %13730 = vmatprep.subr.bf16.mxu0 %v15153_v1 }
0x3028   : > { %13731 = vmatpush3.bf16.msra.mxu0 %v14678_v4 }
0x302b   : > { %13733 = vmatmul.mubr.msk.bf16.vlgmr.msra.gmra.mrb[132].mxu0 %vm458_vm2, %v16052_v35 }
0x30ee   : > { %v5341_v5 = vpop.f32.mrb[124].mxu0 }
0x30ef   : > { %v13710_v61 = vpop.f32.mrb[125].mxu0 }
0x30f0   : > { %v5344_v63 = vpop.f32.mrb[126].mxu0 }
0x30f1   : > { %v5348_v33 = vpack.c.bf16 %v5344_v63, %v5341_v5  ;;  %v13711_v2 = vpop.f32.mrb[127].mxu0 }
0x30f3   : > { %13717 = vmatmul.mubr.msk.bf16.vlgmr.msra.gmra.mrb[136].mxu1 %vm609_vm3, %v5348_v33 }
0x30f4   : > { %13737 = vmatpush3.bf16.msra.mxu1 %v14681_v32  ;;  %13740 = vmatprep.mubr.msk.bf16.mxu1 %vm15154_vm0, %v15153_v1 }
0x30f5   : > { %13738 = vmatprep.subr.bf16.mxu1 %v15153_v1 }
0x30f6   : > { %v5480_v7 = vpop.f32.mrb[128].mxu0 }
0x30f7   : > { %v5481_v8 = vadd.f32 %v12198_v6, %v5480_v7  ;;  %v13726_v9 = vpop.f32.mrb[129].mxu0 }
0x30f8   : > { %v5483_v10 = vpop.f32.mrb[130].mxu0  ;;  %13739 = vmatpush3.bf16.msra.mxu1 %v14682_v14 }
0x30f9   : > { %v13727_v11 = vpop.f32.mrb[131].mxu0  ;;  %13748 = vmatprep.mubr.msk.f32.mxu0 %vm609_vm3, %v5481_v8  ;;  %13757 = vmatprep.subr.bf16.mxu1 %v15153_v1  ;;  %v5484_v23 = vadd.f32 %v12198_v6, %v5483_v10  ;;  %v16339_v8 = vld [vmem:[%s17503_s5] sm:$0xff] }
0x30fa   : > { %v5816_v9 = vrot.slane %v16339_v8, %v15607_v13 }
0x30fb   : > { %13741 = vmatmul.mubr.msk.bf16.vlgmr.msra.gmra.mrb[140].mxu1 %vm458_vm2, %v16052_v35 }
0x30fc   : > { %13761 = vmatprep.mubr.msk.bf16.mxu1 %vm15154_vm0, %v15153_v1 }
0x30fe   : > { %v5533_v17 = vpop.f32.mrb[132].mxu0 }
0x30ff   : > { %v13734_v18 = vpop.f32.mrb[133].mxu0 }
0x3100   : > { %v5536_v19 = vpop.f32.mrb[134].mxu0 }
0x3101   : > { %v14451_v21 = vpack.c.bf16 %v5536_v19, %v5533_v17  ;;  %v13735_v22 = vpop.f32.mrb[135].mxu0  ;;  %13758 = vmatpush3.bf16.xpose.msra.mxu1 %v5765_v55 }
0x3102   : > { %13759 = vmatprep.subr.bf16.mxu1 %v15153_v1 }
0x3103   : > { %14453 = vmatprep.subr.msk.bf16.mxu0 %vm15369_vm4, %v14451_v21 }
0x3104   : > { %14456 = vmatpush3.bf16.xpose.msk.msra.mxu0 %vm15369_vm4, %v14451_v21 }
0x3105   : > { %13751 = vmatprep.subr.bf16.mxu0 %v15153_v1 }
0x3109   : > { %13760 = vmatpush3.bf16.xpose.msra.mxu1 %v5768_v59 }
0x310a   : > { %13781 = vmatprep.subr.bf16.mxu1 %v15153_v1 }
0x310b   : > { %13749 = vmatmul.mubr.msk.f32.vlgmr.msra.gmra.mrb[102].mxu0 %vm609_vm3, %v5484_v23 }
0x310c   : > { %13753 = vmatprep.mubr.msk.bf16.mxu0 %vm15154_vm0, %v15153_v1 }
0x31c6   : > { %v5402_v35 = vpop.f32.mrb[136].mxu1 }
0x31c7   : > { %v16310_v26 = vadd.f32 %v5402_v35, %v16232_v0  ;;  %v13718_v28 = vpop.f32.mrb[137].mxu1 }
0x31c8   : > { %v5405_v29 = vpop.f32.mrb[138].mxu1 }
0x31c9   : > { %v16313_v20 = vadd.f32 %v5405_v29, %v16234_v3  ;;  %v13719_v34 = vpop.f32.mrb[139].mxu1 }
0x31ce   : > { %v5586_v36 = vpop.f32.mrb[140].mxu1 }
0x31cf   : > { %v13742_v37 = vpop.f32.mrb[141].mxu1 }
0x31d0   : > { %v5589_v38 = vpop.f32.mrb[142].mxu1 }
0x31d1   : > { %v5705_v39 = vpack.c.bf16 %v5589_v38, %v5586_v36  ;;  %v13743_v15 = vpop.f32.mrb[143].mxu1 }
0x31d3   : > { %13752 = vmatpush3.bf16.msra.mxu0 %v5705_v39 }
0x31d4   : > { %13765 = vmatprep.subr.bf16.mxu0 %v15153_v1 }
0x31de   : > { %v13750_v16 = vpop.f32.mrb[102].mxu0 }
0x31df   : > { %v5681_v41 = vmul.f32 0.35355338, %v13750_v16  ;;  %v5671_v40 = vpop.f32.mrb[103].mxu0 }
0x31e0   : > { %v5680_v42 = vmul.f32 0.35355338, %v5671_v40  ;;  %v14686_v40 = vld [vmem:[%s17504_s6 + $0x8] sm:$0xff]  }
0x31e1   : > { %v5685_v0 = vsel %vm699_vm5, %v5681_v41, -inf }
0x31e2   : > { %5686 = vmax.xlane.f32.xlu1 %v5685_v0  ;;  %v5682_v44 = vsel %vm699_vm5, %v5680_v42, -inf }
0x31e3   : > { %5683 = vmax.xlane.f32.xlu0 %v5682_v44 }
0x326f   : > { %v5687_v3 = vpop.xlane.xlu1 %5686 }
0x3270   : > { %v5689_v45 = vsub.f32 %v5681_v41, %v5687_v3  ;;  %v5684_v46 = vpop.xlane.xlu0 %5683 }
0x3271   : > { %v5688_v12 = vsub.f32 %v5680_v42, %v5684_v46 }
0x3272   : > { %v5692_v24 = vmul.f32 1.442695, %v5689_v45 }
0x3273   : > { %v5690_v27 = vmul.f32 1.442695, %v5688_v12  ;;  %v5850_v12 = vrot.slane %v16339_v8, %v15633_v48 }
0x3274   : > { %14921 = vpow2.f32 %v5692_v24 }
0x3275   : > { %14923 = vpow2.f32 %v5690_v27 }
0x327e   : > { %v14922_v51 = vpop.eup %14921 }
0x327f   : > { %v14924_v52 = vpop.eup %14923  ;;  %v5697_v53 = vsel %vm699_vm5, %v14922_v51, 0.0 }
0x3280   : > { %5698 = vadd.xlane.f32.xlu1 %v5697_v53  ;;  %v5694_v47 = vsel %vm699_vm5, %v14924_v52, 0.0 }
0x3281   : > { %5695 = vadd.xlane.f32.xlu0 %v5694_v47  ;;  %v5856_v47 = vrot.slane %v16339_v8, %v15638_v49 }
0x330d   : > { %v5699_v50 = vpop.xlane.xlu1 %5698 }
0x330e   : > { %14925 = vrcp.f32 %v5699_v50  ;;  %v5696_v60 = vpop.xlane.xlu0 %5695  ;;  %v14687_v50 = vld [vmem:[%s17505_s7] sm:$0xff]  }
0x330f   : > { %14927 = vrcp.f32 %v5696_v60  ;;  %v14688_v60 = vld [vmem:[%s17505_s7 + $0x8] sm:$0xff]  }
0x3318   : > { %v14926_v4 = vpop.eup %14925 }
0x3319   : > { %v14928_v5 = vpop.eup %14927  ;;  %v5703_v61 = vmul.f32 %v14926_v4, %v14922_v51  ;;  %v5867_v4 = vrot.slane %v16339_v8, %v15654_v62 }
0x331a   : > { %v5701_v63 = vmul.f32 %v14928_v5, %v14924_v52 }
0x331c   : > { %v5704_v32 = vpack.c.bf16 %v5703_v61, %v5701_v63 }
0x331e   : > { %13754 = vmatmul.mubr.msk.bf16.vlgmr.msra.gmra.mrb[136].mxu0 %vm699_vm5, %v5704_v32 }
0x331f   : > { %13769 = vmatprep.mubr.msk.bf16.mxu0 %vm15154_vm0, %v15153_v1 }
0x33f1   : > { %v5743_v33 = vpop.f32.mrb[136].mxu0 }
0x33f2   : > { %v13755_v2 = vpop.f32.mrb[137].mxu0 }
0x33f3   : > { %v5746_v6 = vpop.f32.mrb[138].mxu0 }
0x33f4   : > { %v5750_v14 = vpack.c.bf16 %v5746_v6, %v5743_v33  ;;  %v13756_v7 = vpop.f32.mrb[139].mxu0 }
0x33f6   : > { %13762 = vmatmul.mubr.msk.bf16.vlgmr.msra.gmra.mrb[144].mxu1 %vm609_vm3, %v5750_v14 }
0x33f7   : > { %13785 = vmatprep.mubr.msk.bf16.mxu1 %vm15154_vm0, %v15153_v1 }
0x34c9   : > { %v5804_v10 = vpop.f32.mrb[144].mxu1 }
0x34ca   : > { %v5811_v11 = vadd.f32 %v5804_v10, %v16310_v26  ;;  %v13763_v17 = vpop.f32.mrb[145].mxu1 }
0x34cb   : > { %v5807_v18 = vpop.f32.mrb[146].mxu1 }
0x34cc   : > { %v5817_v19 = vadd.f32 %v5816_v9, %v5811_v11  ;;  %v5812_v21 = vadd.f32 %v5807_v18, %v16313_v20  ;;  %v13764_v22 = vpop.f32.mrb[147].mxu1 }
0x34ce   : > { %v5818_v23 = vadd.f32 %v5816_v9, %v5812_v21  ;;  %v5819_v35 = vadd.f32 %v5817_v19, %v16040_v30 }
0x34d0   : > { %v5821_v28 = vsel %vm458_vm2, %v5819_v35, 0.0  ;;  %v5820_v29 = vadd.f32 %v5818_v23, %v16042_v31  ;;  %v14685_v31 = vld [vmem:[%s17504_s6] sm:$0xff]   ;;  %v5942_v23 = vrot.slane %v16339_v8, %v15662_v25 }
0x34d1   : > { %5822 = vadd.xlane.f32.xlu0 %v5821_v28  ;;  %13766 = vmatpush3.bf16.msra.mxu0 %v14685_v31 }
0x34d2   : > { %v5824_v34 = vsel %vm458_vm2, %v5820_v29, 0.0  ;;  %13767 = vmatprep.subr.bf16.mxu0 %v15153_v1 }
0x34d3   : > { %5825 = vadd.xlane.f32.xlu1 %v5824_v34 }
0x34d5   : > { %13768 = vmatpush3.bf16.msra.mxu0 %v14686_v40 }
0x34d6   : > { %13773 = vmatprep.subr.bf16.mxu0 %v15153_v1 }
0x355e   : > { %v5823_v36 = vpop.xlane.xlu0 %5822 }
0x355f   : > { %v5827_v37 = vmul.f32 0.03125, %v5823_v36 }
0x3560   : > { %v5826_v26 = vpop.xlane.xlu1 %5825 }
0x3561   : > { %v5829_v38 = vsub.f32 %v5819_v35, %v5827_v37  ;;  %v5828_v39 = vmul.f32 0.03125, %v5826_v26 }
0x3563   : > { %v5830_v15 = vsub.f32 %v5820_v29, %v5828_v39  ;;  %v5831_v16 = vmul.f32 %v5829_v38, %v5829_v38 }
0x3565   : > { %v5833_v20 = vsel %vm458_vm2, %v5831_v16, 0.0  ;;  %v5832_v41 = vmul.f32 %v5830_v15, %v5830_v15 }
0x3566   : > { %5834 = vadd.xlane.f32.xlu0 %v5833_v20 }
0x3567   : > { %v5836_v30 = vsel %vm458_vm2, %v5832_v41, 0.0 }
0x3568   : > { %5837 = vadd.xlane.f32.xlu1 %v5836_v30 }
0x35f3   : > { %v5835_v42 = vpop.xlane.xlu0 %5834 }
0x35f4   : > { %v5839_v0 = vmul.f32 0.03125, %v5835_v42 }
0x35f5   : > { %v5838_v44 = vpop.xlane.xlu1 %5837 }
0x35f6   : > { %v5841_v3 = vadd.f32 1e-06, %v5839_v0  ;;  %v5840_v45 = vmul.f32 0.03125, %v5838_v44 }
0x35f8   : > { %14929 = vrsqrt.f32 %v5841_v3  ;;  %v5842_v46 = vadd.f32 1e-06, %v5840_v45  ;;  %v14689_v45 = vld [vmem:[%s17501_s3 + $0x100] sm:$0xff]  }
0x35f9   : > { %13782 = vmatpush3.bf16.msra.mxu1 %v14689_v45 }
0x35fa   : > { %14931 = vrsqrt.f32 %v5842_v46  ;;  %v14690_v46 = vld [vmem:[%s17501_s3 + $0x140] sm:$0xff]   ;;  %13783 = vmatprep.subr.bf16.mxu1 %v15153_v1 }
0x3602   : > { %v14930_v24 = vpop.eup %14929 }
0x3603   : > { %v5845_v27 = vmul.f32 %v14930_v24, %v5829_v38  ;;  %v14692_v24 = vld [vmem:[%s17501_s3 + $0x148] sm:$0xff]  }
0x3604   : > { %v14932_v51 = vpop.eup %14931 }
0x3605   : > { %v5851_v52 = vmul.f32 %v5850_v12, %v5845_v27  ;;  %v5846_v53 = vmul.f32 %v14932_v51, %v5830_v15 }
0x3607   : > { %v5852_v54 = vmul.f32 %v5850_v12, %v5846_v53  ;;  %v5857_v55 = vadd.f32 %v5856_v47, %v5851_v52  ;;  %v14691_v12 = vld [vmem:[%s17501_s3 + $0x108] sm:$0xff]  }
0x3608   : > { %13784 = vmatpush3.bf16.msra.mxu1 %v14691_v12 }
0x3609   : > { %v5858_v57 = vadd.f32 %v5856_v47, %v5852_v54  ;;  %13797 = vmatprep.subr.bf16.mxu1 %v15153_v1 }
0x360b   : > { %v5859_v59 = vpack.c.bf16 %v5858_v57, %v5857_v55 }
0x360d   : > { %13770 = vmatmul.mubr.msk.bf16.vlgmr.msra.gmra.mrb[140].mxu0 %vm458_vm2, %v5859_v59 }
0x360e   : > { %13777 = vmatprep.mubr.msk.bf16.mxu0 %vm15154_vm0, %v15153_v1  ;;  %13774 = vmatpush3.bf16.msra.mxu0 %v14687_v50 }
0x360f   : > { %13775 = vmatprep.subr.bf16.mxu0 %v15153_v1 }
0x3612   : > { %13776 = vmatpush3.bf16.msra.mxu0 %v14688_v60  ;;  %v6036_v60 = vrot.slane %v16339_v8, %v15691_v58 }
0x3613   : > { %13789 = vmatprep.subr.bf16.mxu0 %v15153_v1 }
0x36e0   : > { %v5917_v5 = vpop.f32.mrb[140].mxu0 }
0x36e1   : > { %v5918_v61 = vadd.f32 %v5917_v5, %v5867_v4  ;;  %v13771_v63 = vpop.f32.mrb[141].mxu0 }
0x36e2   : > { %v5920_v32 = vpop.f32.mrb[142].mxu0 }
0x36e3   : > { %v5926_v33 = vmul.f32 0.70710677, %v5918_v61  ;;  %v5921_v2 = vadd.f32 %v5920_v32, %v5867_v4  ;;  %v13772_v6 = vpop.f32.mrb[143].mxu0  ;;  %v5924_v11 = vmul.f32 0.5, %v5918_v61 }
0x36e4   : > { %v12240_v6 = vld [vmem:[%s17502_s4 + $0x4] ss:$0 sm:$0xff] }
0x36e5   : > { %14933 = verf.f32 %v5926_v33  ;;  %v5927_v14 = vmul.f32 0.70710677, %v5921_v2  ;;  %v5925_v17 = vmul.f32 0.5, %v5921_v2  ;;  %v14693_v33 = vld [vmem:[%s17501_s3 + $0x180] sm:$0xff]  }
0x36e7   : > { %14935 = verf.f32 %v5927_v14 }
0x36ef   : > { %v14934_v7 = vpop.eup %14933 }
0x36f0   : > { %v5930_v9 = vadd.f32 1.0, %v14934_v7 }
0x36f1   : > { %v14936_v10 = vpop.eup %14935 }
0x36f2   : > { %v5931_v18 = vadd.f32 1.0, %v14936_v10  ;;  %v5932_v19 = vmul.f32 %v5930_v9, %v5924_v11 }
0x36f4   : > { %v5933_v21 = vmul.f32 %v5931_v18, %v5925_v17 }
0x36f6   : > { %v5934_v22 = vpack.c.bf16 %v5933_v21, %v5932_v19 }
0x36f8   : > { %13778 = vmatmul.mubr.msk.bf16.vlgmr.msra.gmra.mrb[144].mxu0 %vm458_vm2, %v5934_v22 }
0x36f9   : > { %13793 = vmatprep.mubr.msk.bf16.mxu0 %vm15154_vm0, %v15153_v1  ;;  %13790 = vmatpush3.bf16.msra.mxu0 %v14690_v46 }
0x36fa   : > { %13791 = vmatprep.subr.bf16.mxu0 %v15153_v1 }
0x36fd   : > { %13792 = vmatpush3.bf16.msra.mxu0 %v14692_v24 }
0x37cb   : > { %v5992_v35 = vpop.f32.mrb[144].mxu0 }
0x37cc   : > { %v5993_v28 = vadd.f32 %v5992_v35, %v5942_v23  ;;  %v13779_v29 = vpop.f32.mrb[145].mxu0 }
0x37cd   : > { %v5995_v34 = vpop.f32.mrb[146].mxu0  ;;  %v14695_v29 = vld [vmem:[%s17501_s3 + $0x110] sm:$0xff]  }
0x37ce   : > { %v5996_v36 = vadd.f32 %v5995_v34, %v5942_v23  ;;  %v13780_v37 = vpop.f32.mrb[147].mxu0  ;;  %v5999_v26 = vadd.f32 %v5993_v28, %v5857_v55  ;;  %v6030_v55 = vrot.slane %v16339_v8, %v15686_v56  ;;  %v14694_v8 = vld [vmem:[%s17501_s3 + $0x188] sm:$0xff]  }
0x37d0   : > { %v6001_v38 = vsel %vm458_vm2, %v5999_v26, 0.0  ;;  %v6000_v39 = vadd.f32 %v5996_v36, %v5858_v57 }
0x37d1   : > { %6002 = vadd.xlane.f32.xlu0 %v6001_v38  ;;  %v14697_v38 = vld [vmem:[%s17501_s3 + $0x190] sm:$0xff]  }
0x37d2   : > { %v6004_v15 = vsel %vm458_vm2, %v6000_v39, 0.0 }
0x37d3   : > { %6005 = vadd.xlane.f32.xlu1 %v6004_v15 }
0x385e   : > { %v6003_v16 = vpop.xlane.xlu0 %6002 }
0x385f   : > { %v6007_v20 = vmul.f32 0.03125, %v6003_v16 }
0x3860   : > { %v6006_v41 = vpop.xlane.xlu1 %6005 }
0x3861   : > { %v6009_v30 = vsub.f32 %v5999_v26, %v6007_v20  ;;  %v6008_v31 = vmul.f32 0.03125, %v6006_v41  ;;  %v14696_v26 = vld [vmem:[%s17501_s3 + $0x118] sm:$0xff]  }
0x3863   : > { %v6010_v40 = vsub.f32 %v6000_v39, %v6008_v31  ;;  %v6011_v42 = vmul.f32 %v6009_v30, %v6009_v30  ;;  %v14698_v39 = vld [vmem:[%s17501_s3 + $0x198] sm:$0xff]  }
0x3865   : > { %v6013_v0 = vsel %vm458_vm2, %v6011_v42, 0.0  ;;  %v6012_v44 = vmul.f32 %v6010_v40, %v6010_v40 }
0x3866   : > { %6014 = vadd.xlane.f32.xlu0 %v6013_v0  ;;  %v12272_v0 = vld [vmem:[%s17502_s4 + $0x5] ss:$0 sm:$0xff] }
0x3867   : > { %v6016_v3 = vsel %vm458_vm2, %v6012_v44, 0.0 }
0x3868   : > { %6017 = vadd.xlane.f32.xlu1 %v6016_v3 }
0x38f3   : > { %v6015_v27 = vpop.xlane.xlu0 %6014 }
0x38f4   : > { %v6019_v51 = vmul.f32 0.03125, %v6015_v27 }
0x38f5   : > { %v6018_v52 = vpop.xlane.xlu1 %6017 }
0x38f6   : > { %v6021_v53 = vadd.f32 1e-06, %v6019_v51  ;;  %v6020_v47 = vmul.f32 0.03125, %v6018_v52 }
0x38f8   : > { %14937 = vrsqrt.f32 %v6021_v53  ;;  %v6022_v54 = vadd.f32 1e-06, %v6020_v47 }
0x38fa   : > { %14939 = vrsqrt.f32 %v6022_v54 }
0x3902   : > { %v14938_v57 = vpop.eup %14937 }
0x3903   : > { %v6025_v59 = vmul.f32 %v14938_v57, %v6009_v30 }
0x3904   : > { %v14940_v50 = vpop.eup %14939 }
0x3905   : > { %v6031_v4 = vmul.f32 %v6030_v55, %v6025_v59  ;;  %v6026_v5 = vmul.f32 %v14940_v50, %v6010_v40 }
0x3907   : > { %v6032_v61 = vmul.f32 %v6030_v55, %v6026_v5  ;;  %v16404_v63 = vadd.f32 %v6036_v60, %v6031_v4 }
0x3909   : > { %v16406_v32 = vadd.f32 %v6036_v60, %v6032_v61 }
0x390b   : > { %v16413_v2 = vpack.c.bf16 %v16406_v32, %v16404_v63 }
0x390d   : > { %13786 = vmatmul.mubr.msk.bf16.vlgmr.msra.gmra.mrb[148].mxu1 %vm458_vm2, %v16413_v2  ;;  %13794 = vmatmul.mubr.msk.bf16.vlgmr.msra.gmra.mrb[148].mxu0 %vm458_vm2, %v16413_v2 }
0x390e   : > { %13798 = vmatpush3.bf16.msra.mxu1 %v14693_v33  ;;  %13801 = vmatprep.mubr.msk.bf16.mxu1 %vm15154_vm0, %v15153_v1 }
0x390f   : > { %13799 = vmatprep.subr.bf16.mxu1 %v15153_v1 }
0x3912   : > { %13800 = vmatpush3.bf16.msra.mxu1 %v14694_v8 }
0x3913   : > { %13812 = vmatprep.subr.bf16.mxu1 %v15153_v1 }
0x3915   : > { %13802 = vmatmul.mubr.msk.bf16.vlgmr.msra.gmra.mrb[152].mxu1 %vm458_vm2, %v16413_v2 }
0x3916   : > { %13814 = vmatprep.mubr.msk.bf16.mxu1 %vm15154_vm0, %v15153_v1 }
0x39e0   : > { %v6113_v14 = vpop.f32.mrb[148].mxu1  ;;  %v6166_v7 = vpop.f32.mrb[148].mxu0 }
0x39e1   : > { %v6114_v9 = vadd.f32 %v12240_v6, %v6113_v14  ;;  %v13787_v10 = vpop.f32.mrb[149].mxu1  ;;  %v13795_v11 = vpop.f32.mrb[149].mxu0 }
0x39e2   : > { %v6116_v17 = vpop.f32.mrb[150].mxu1  ;;  %v6169_v18 = vpop.f32.mrb[150].mxu0  ;;  %v14700_v10 = vld [vmem:[%s17501_s3 + $0x158] sm:$0xff]  }
0x39e3   : > { %v14457_v19 = vpack.c.bf16 %v6169_v18, %v6166_v7  ;;  %v13788_v21 = vpop.f32.mrb[151].mxu1  ;;  %v13796_v22 = vpop.f32.mrb[151].mxu0  ;;  %13809 = vmatprep.mubr.msk.f32.mxu0 %vm609_vm3, %v6114_v9  ;;  %v6117_v34 = vadd.f32 %v12240_v6, %v6116_v17  ;;  %v14699_v7 = vld [vmem:[%s17501_s3 + $0x150] sm:$0xff]  }
0x39e5   : > { %14459 = vmatprep.subr.msk.bf16.mxu0 %vm15369_vm4, %v14457_v19 }
0x39e6   : > { %14462 = vmatpush3.bf16.xpose.msk.msra.mxu0 %vm15369_vm4, %v14457_v19 }
0x39e7   : > { %13818 = vmatprep.subr.bf16.mxu0 %v15153_v1 }
0x39e8   : > { %v6219_v23 = vpop.f32.mrb[152].mxu1 }
0x39e9   : > { %v13803_v35 = vpop.f32.mrb[153].mxu1 }
0x39ea   : > { %v6222_v28 = vpop.f32.mrb[154].mxu1 }
0x39eb   : > { %v6338_v36 = vpack.c.bf16 %v6222_v28, %v6219_v23  ;;  %v13804_v37 = vpop.f32.mrb[155].mxu1 }
0x39ed   : > { %13810 = vmatmul.mubr.msk.f32.vlgmr.msra.gmra.mrb[152].mxu0 %vm609_vm3, %v6117_v34  ;;  %13813 = vmatpush3.bf16.msra.mxu1 %v6338_v36 }
0x39ee   : > { %13819 = vmatpush3.bf16.msra.mxu0 %v14695_v29  ;;  %13822 = vmatprep.mubr.msk.bf16.mxu0 %vm15154_vm0, %v15153_v1 }
0x39ef   : > { %13820 = vmatprep.subr.bf16.mxu0 %v15153_v1  ;;  %13826 = vmatprep.subr.bf16.mxu1 %v15153_v1 }
0x39f2   : > { %13821 = vmatpush3.bf16.msra.mxu0 %v14696_v26 }
0x39f3   : > { %13834 = vmatprep.subr.bf16.mxu0 %v15153_v1 }
0x39f5   : > { %13823 = vmatmul.mubr.msk.bf16.vlgmr.msra.gmra.mrb[156].mxu0 %vm458_vm2, %v16413_v2 }
0x39f6   : > { %13835 = vmatpush3.bf16.msra.mxu0 %v14697_v38  ;;  %13838 = vmatprep.mubr.msk.bf16.mxu0 %vm15154_vm0, %v15153_v1 }
0x39f7   : > { %13836 = vmatprep.subr.bf16.mxu0 %v15153_v1 }
0x39fa   : > { %13837 = vmatpush3.bf16.msra.mxu0 %v14698_v39 }
0x39fb   : > { %13855 = vmatprep.subr.bf16.mxu0 %v15153_v1 }
0x39fd   : > { %13839 = vmatmul.mubr.msk.bf16.vlgmr.msra.gmra.mrb[160].mxu0 %vm458_vm2, %v16413_v2 }
0x39fe   : > { %13859 = vmatprep.mubr.msk.bf16.mxu0 %vm15154_vm0, %v15153_v1 }
0x3ac0   : > { %v13811_v15 = vpop.f32.mrb[152].mxu0 }
0x3ac1   : > { %v6314_v16 = vmul.f32 0.35355338, %v13811_v15  ;;  %v6304_v20 = vpop.f32.mrb[153].mxu0 }
0x3ac2   : > { %v6313_v41 = vmul.f32 0.35355338, %v6304_v20 }
0x3ac3   : > { %v6318_v30 = vsel %vm699_vm5, %v6314_v16, -inf }
0x3ac4   : > { %6319 = vmax.xlane.f32.xlu1 %v6318_v30  ;;  %v6315_v31 = vsel %vm699_vm5, %v6313_v41, -inf }
0x3ac5   : > { %6316 = vmax.xlane.f32.xlu0 %v6315_v31 }
0x3ac8   : > { %v6453_v40 = vpop.f32.mrb[156].mxu0 }
0x3ac9   : > { %v13824_v42 = vpop.f32.mrb[157].mxu0  ;;  %v6454_v11 = vadd.f32 %v12272_v0, %v6453_v40 }
0x3aca   : > { %v6456_v44 = vpop.f32.mrb[158].mxu0 }
0x3acb   : > { %v6457_v3 = vadd.f32 %v12272_v0, %v6456_v44  ;;  %v13825_v45 = vpop.f32.mrb[159].mxu0 }
0x3acc   : > { %v14705_v45 = vld [vmem:[%s17501_s3 + $0x1d0] sm:$0xff]  }
0x3ad0   : > { %v6559_v46 = vpop.f32.mrb[160].mxu0 }
0x3ad1   : > { %v13840_v12 = vpop.f32.mrb[161].mxu0 }
0x3ad2   : > { %v6562_v24 = vpop.f32.mrb[162].mxu0  ;;  %v14706_v12 = vld [vmem:[%s17501_s3 + $0x1d8] sm:$0xff]  }
0x3ad3   : > { %v6678_v27 = vpack.c.bf16 %v6562_v24, %v6559_v46  ;;  %v13841_v51 = vpop.f32.mrb[163].mxu0  ;;  %v6738_v46 = vsel %vm609_vm3, %v14705_v45, 0  ;;  %v6741_v24 = vsel %vm609_vm3, %v14706_v12, 0 }
0x3ad4   : > { %13856 = vmatpush3.bf16.xpose.msra.mxu0 %v6738_v46 }
0x3ad5   : > { %13857 = vmatprep.subr.bf16.mxu0 %v15153_v1 }
0x3adc   : > { %13858 = vmatpush3.bf16.xpose.msra.mxu0 %v6741_v24 }
0x3add   : > { %13871 = vmatprep.subr.bf16.mxu0 %v15153_v1 }
0x3b51   : > { %v6320_v52 = vpop.xlane.xlu1 %6319 }
0x3b52   : > { %v6322_v53 = vsub.f32 %v6314_v16, %v6320_v52  ;;  %v6317_v47 = vpop.xlane.xlu0 %6316 }
0x3b53   : > { %v6321_v54 = vsub.f32 %v6313_v41, %v6317_v47 }
0x3b54   : > { %v6325_v55 = vmul.f32 1.442695, %v6322_v53  ;;  %v14701_v53 = vld [vmem:[%s17501_s3 + $0x1c0] sm:$0xff]  }
0x3b55   : > { %v6323_v57 = vmul.f32 1.442695, %v6321_v54 }
0x3b56   : > { %14941 = vpow2.f32 %v6325_v55 }
0x3b57   : > { %14943 = vpow2.f32 %v6323_v57 }
0x3b60   : > { %v14942_v59 = vpop.eup %14941 }
0x3b61   : > { %v14944_v50 = vpop.eup %14943  ;;  %v6330_v60 = vsel %vm699_vm5, %v14942_v59, 0.0 }
0x3b62   : > { %6331 = vadd.xlane.f32.xlu1 %v6330_v60  ;;  %v6327_v4 = vsel %vm699_vm5, %v14944_v50, 0.0 }
0x3b63   : > { %6328 = vadd.xlane.f32.xlu0 %v6327_v4  ;;  %v14703_v4 = vld [vmem:[%s17501_s3 + $0x160] sm:$0xff]  }
0x3bef   : > { %v6332_v5 = vpop.xlane.xlu1 %6331 }
0x3bf0   : > { %14945 = vrcp.f32 %v6332_v5  ;;  %v6329_v61 = vpop.xlane.xlu0 %6328  ;;  %v14704_v5 = vld [vmem:[%s17501_s3 + $0x168] sm:$0xff]  }
0x3bf1   : > { %14947 = vrcp.f32 %v6329_v61 }
0x3bfa   : > { %v14946_v33 = vpop.eup %14945 }
0x3bfb   : > { %v14948_v8 = vpop.eup %14947  ;;  %v6336_v6 = vmul.f32 %v14946_v33, %v14942_v59  ;;  %v6798_v59 = vsel %vm609_vm3, %v14701_v53, 0 }
0x3bfc   : > { %v6334_v14 = vmul.f32 %v14948_v8, %v14944_v50  ;;  %v14702_v50 = vld [vmem:[%s17501_s3 + $0x1c8] sm:$0xff]  }
0x3bfd   : > { %v6801_v60 = vsel %vm609_vm3, %v14702_v50, 0 }
0x3bfe   : > { %v6337_v9 = vpack.c.bf16 %v6336_v6, %v6334_v14  ;;  %v14707_v6 = vld [vmem:[%s17501_s3 + $0x120] sm:$0xff]  }
0x3c00   : > { %13815 = vmatmul.mubr.msk.bf16.vlgmr.msra.gmra.mrb[156].mxu1 %vm699_vm5, %v6337_v9  ;;  %v14708_v9 = vld [vmem:[%s17501_s3 + $0x128] sm:$0xff]  }
0x3c01   : > { %13827 = vmatpush3.bf16.msra.mxu1 %v14699_v7  ;;  %13830 = vmatprep.mubr.msk.bf16.mxu1 %vm15154_vm0, %v15153_v1 }
0x3c02   : > { %13828 = vmatprep.subr.bf16.mxu1 %v15153_v1 }
0x3c05   : > { %13829 = vmatpush3.bf16.msra.mxu1 %v14700_v10  ;;  %v14709_v10 = vld [vmem:[%s17501_s3 + $0x1a0] sm:$0xff]  }
0x3c08   : > { %13831 = vmatmul.mubr.msk.bf16.vlgmr.msra.gmra.mrb[160].mxu1 %vm458_vm2, %v16413_v2 }
0x3c09   : > { %13846 = vmatprep.mubr.msk.f32.mxu1 %vm609_vm3, %v6454_v11  ;;  %v14710_v11 = vld [vmem:[%s17501_s3 + $0x1a8] sm:$0xff]  }
0x3cd3   : > { %v16487_v17 = vpop.f32.mrb[156].mxu1 }
0x3cd4   : > { %v13816_v18 = vpop.f32.mrb[157].mxu1 }
0x3cd5   : > { %v16489_v19 = vpop.f32.mrb[158].mxu1 }
0x3cd6   : > { %v6383_v21 = vpack.c.bf16 %v16489_v19, %v16487_v17  ;;  %v13817_v22 = vpop.f32.mrb[159].mxu1 }
0x3cdb   : > { %v6506_v23 = vpop.f32.mrb[160].mxu1 }
0x3cdc   : > { %v13832_v35 = vpop.f32.mrb[161].mxu1 }
0x3cdd   : > { %v6509_v28 = vpop.f32.mrb[162].mxu1 }
0x3cde   : > { %v14463_v29 = vpack.c.bf16 %v6509_v28, %v6506_v23  ;;  %v13833_v34 = vpop.f32.mrb[163].mxu1 }
0x3ce0   : > { %14465 = vmatprep.subr.msk.bf16.mxu1 %vm15369_vm4, %v14463_v29 }
0x3ce1   : > { %14468 = vmatpush3.bf16.xpose.msk.msra.mxu1 %vm15369_vm4, %v14463_v29 }
0x3ce2   : > { %13849 = vmatprep.subr.bf16.mxu1 %v15153_v1 }
0x3ce8   : > { %13847 = vmatmul.mubr.msk.f32.vlgmr.msra.gmra.mrb[164].mxu1 %vm609_vm3, %v6457_v3 }
0x3ce9   : > { %13850 = vmatpush3.bf16.msra.mxu1 %v6678_v27  ;;  %13851 = vmatprep.mubr.msk.bf16.mxu1 %vm15154_vm0, %v15153_v1 }
0x3cea   : > { %13863 = vmatprep.subr.bf16.mxu1 %v15153_v1 }
0x3dbb   : > { %v13848_v36 = vpop.f32.mrb[164].mxu1 }
0x3dbc   : > { %v6654_v37 = vmul.f32 0.35355338, %v13848_v36  ;;  %v6644_v26 = vpop.f32.mrb[165].mxu1 }
0x3dbd   : > { %v6653_v38 = vmul.f32 0.35355338, %v6644_v26 }
0x3dbe   : > { %v6658_v39 = vsel %vm699_vm5, %v6654_v37, -inf }
0x3dbf   : > { %6659 = vmax.xlane.f32.xlu1 %v6658_v39  ;;  %v6655_v15 = vsel %vm699_vm5, %v6653_v38, -inf }
0x3dc0   : > { %6656 = vmax.xlane.f32.xlu0 %v6655_v15  ;;  %v12310_v15 = vld [vmem:[%s17502_s4 + $0x6] ss:$0 sm:$0xff] }
0x3e4c   : > { %v6660_v16 = vpop.xlane.xlu1 %6659 }
0x3e4d   : > { %v6662_v20 = vsub.f32 %v6654_v37, %v6660_v16  ;;  %v6657_v41 = vpop.xlane.xlu0 %6656 }
0x3e4e   : > { %v6661_v30 = vsub.f32 %v6653_v38, %v6657_v41 }
0x3e4f   : > { %v6665_v31 = vmul.f32 1.442695, %v6662_v20 }
0x3e50   : > { %v6663_v40 = vmul.f32 1.442695, %v6661_v30 }
0x3e51   : > { %14949 = vpow2.f32 %v6665_v31 }
0x3e52   : > { %14951 = vpow2.f32 %v6663_v40 }
0x3e5b   : > { %v14950_v42 = vpop.eup %14949 }
0x3e5c   : > { %v14952_v0 = vpop.eup %14951  ;;  %v6670_v44 = vsel %vm699_vm5, %v14950_v42, 0.0 }
0x3e5d   : > { %6671 = vadd.xlane.f32.xlu1 %v6670_v44  ;;  %v6667_v3 = vsel %vm699_vm5, %v14952_v0, 0.0 }
0x3e5e   : > { %6668 = vadd.xlane.f32.xlu0 %v6667_v3 }
0x3eea   : > { %v6672_v27 = vpop.xlane.xlu1 %6671 }
0x3eeb   : > { %14953 = vrcp.f32 %v6672_v27  ;;  %v6669_v51 = vpop.xlane.xlu0 %6668 }
0x3eec   : > { %14955 = vrcp.f32 %v6669_v51 }
0x3ef5   : > { %v14954_v52 = vpop.eup %14953 }
0x3ef6   : > { %v14956_v47 = vpop.eup %14955  ;;  %v6676_v54 = vmul.f32 %v14954_v52, %v14950_v42 }
0x3ef7   : > { %v6674_v55 = vmul.f32 %v14956_v47, %v14952_v0 }
0x3ef9   : > { %v6677_v57 = vpack.c.bf16 %v6676_v54, %v6674_v55 }
0x3efb   : > { %13852 = vmatmul.mubr.msk.bf16.vlgmr.msra.gmra.mrb[168].mxu1 %vm699_vm5, %v6677_v57 }
0x3efc   : > { %13864 = vmatpush3.bf16.xpose.msra.mxu1 %v6798_v59  ;;  %13867 = vmatprep.mubr.msk.bf16.mxu1 %vm15154_vm0, %v15153_v1 }
0x3efd   : > { %13865 = vmatprep.subr.bf16.mxu1 %v15153_v1 }
0x3f04   : > { %13866 = vmatpush3.bf16.xpose.msra.mxu1 %v6801_v60 }
0x3f05   : > { %13879 = vmatprep.subr.bf16.mxu1 %v15153_v1 }
0x3f0b   : > { %13868 = vmatmul.mubr.msk.bf16.vlgmr.msra.gmra.mrb[172].mxu1 %vm609_vm3, %v6383_v21 }
0x3f0c   : > { %13880 = vmatpush3.bf16.msra.mxu1 %v14703_v4  ;;  %13883 = vmatprep.mubr.msk.bf16.mxu1 %vm15154_vm0, %v15153_v1 }
0x3f0d   : > { %13881 = vmatprep.subr.bf16.mxu1 %v15153_v1 }
0x3f10   : > { %13882 = vmatpush3.bf16.msra.mxu1 %v14704_v5 }
0x3f13   : > { %13884 = vmatmul.mubr.msk.bf16.vlgmr.msra.gmra.mrb[176].mxu1 %vm458_vm2, %v16413_v2 }
0x3fce   : > { %v6716_v61 = vpop.f32.mrb[168].mxu1 }
0x3fcf   : > { %v13853_v33 = vpop.f32.mrb[169].mxu1 }
0x3fd0   : > { %v6719_v8 = vpop.f32.mrb[170].mxu1 }
0x3fd1   : > { %v6723_v14 = vpack.c.bf16 %v6719_v8, %v6716_v61  ;;  %v13854_v7 = vpop.f32.mrb[171].mxu1  ;;  %v14715_v61 = vld [vmem:[%s17501_s3 + $0x1e0] sm:$0xff]   ;;  %v14716_v8 = vld [vmem:[%s17501_s3 + $0x1e8] sm:$0xff]  }
0x3fd2   : > { %v7198_v33 = vsel %vm609_vm3, %v14715_v61, 0 }
0x3fd3   : > { %13860 = vmatmul.mubr.msk.bf16.vlgmr.msra.gmra.mrb[164].mxu0 %vm609_vm3, %v6723_v14 }
0x3fd4   : > { %13872 = vmatpush3.bf16.msra.mxu0 %v14707_v6  ;;  %13875 = vmatprep.mubr.msk.bf16.mxu0 %vm15154_vm0, %v15153_v1  ;;  %v7201_v6 = vsel %vm609_vm3, %v14716_v8, 0 }
0x3fd5   : > { %13873 = vmatprep.subr.bf16.mxu0 %v15153_v1 }
0x3fd8   : > { %13874 = vmatpush3.bf16.msra.mxu0 %v14708_v9 }
0x3fd9   : > { %13887 = vmatprep.subr.bf16.mxu0 %v15153_v1 }
0x3fdb   : > { %13876 = vmatmul.mubr.msk.bf16.vlgmr.msra.gmra.mrb[168].mxu0 %vm458_vm2, %v16413_v2 }
0x3fdc   : > { %13888 = vmatpush3.bf16.msra.mxu0 %v14709_v10  ;;  %13891 = vmatprep.mubr.msk.bf16.mxu0 %vm15154_vm0, %v15153_v1 }
0x3fdd   : > { %13889 = vmatprep.subr.bf16.mxu0 %v15153_v1 }
0x3fde   : > { %v6837_v17 = vpop.f32.mrb[172].mxu1 }
0x3fdf   : > { %v13869_v18 = vpop.f32.mrb[173].mxu1 }
0x3fe0   : > { %v6840_v19 = vpop.f32.mrb[174].mxu1  ;;  %13890 = vmatpush3.bf16.msra.mxu0 %v14710_v11  ;;  %v14711_v18 = vld [vmem:[%s17501_s3 + $0x130] sm:$0xff]  }
0x3fe1   : > { %v13870_v21 = vpop.f32.mrb[175].mxu1  ;;  %13902 = vmatprep.subr.bf16.mxu0 %v15153_v1 }
0x3fe2   : > { %v14712_v21 = vld [vmem:[%s17501_s3 + $0x138] sm:$0xff]  }
0x3fe3   : > { %13892 = vmatmul.mubr.msk.bf16.vlgmr.msra.gmra.mrb[172].mxu0 %vm458_vm2, %v16413_v2 }
0x3fe4   : > { %13904 = vmatprep.mubr.msk.bf16.mxu0 %vm15154_vm0, %v15153_v1 }
0x3fe6   : > { %v6966_v22 = vpop.f32.mrb[176].mxu1 }
0x3fe7   : > { %v13885_v23 = vpop.f32.mrb[177].mxu1 }
0x3fe8   : > { %v6969_v35 = vpop.f32.mrb[178].mxu1  ;;  %v14714_v23 = vld [vmem:[%s17501_s3 + $0x178] sm:$0xff]  }
0x3fe9   : > { %v14469_v28 = vpack.c.bf16 %v6969_v35, %v6966_v22  ;;  %v13886_v29 = vpop.f32.mrb[179].mxu1  ;;  %v14713_v22 = vld [vmem:[%s17501_s3 + $0x170] sm:$0xff]  }
0x3feb   : > { %14471 = vmatprep.subr.msk.bf16.mxu1 %vm15369_vm4, %v14469_v28 }
0x3fec   : > { %14474 = vmatpush3.bf16.xpose.msk.msra.mxu1 %vm15369_vm4, %v14469_v28 }
0x3fed   : > { %13908 = vmatprep.subr.bf16.mxu1 %v15153_v1 }
0x40a6   : > { %v6777_v34 = vpop.f32.mrb[164].mxu0 }
0x40a7   : > { %v16576_v36 = vadd.f32 %v6837_v17, %v6777_v34  ;;  %v13861_v37 = vpop.f32.mrb[165].mxu0  ;;  %v14717_v34 = vld [vmem:[%s17501_s3 + $0x1b0] sm:$0xff]  }
0x40a8   : > { %v6780_v26 = vpop.f32.mrb[166].mxu0 }
0x40a9   : > { %v16578_v38 = vadd.f32 %v6840_v19, %v6780_v26  ;;  %v13862_v39 = vpop.f32.mrb[167].mxu0 }
0x40aa   : > { %v12345_v39 = vld [vmem:[%s17502_s4 + $0x7] ss:$0 sm:$0xff] }
0x40ae   : > { %v6913_v16 = vpop.f32.mrb[168].mxu0 }
0x40af   : > { %v6914_v20 = vadd.f32 %v12310_v15, %v6913_v16  ;;  %v13877_v41 = vpop.f32.mrb[169].mxu0 }
0x40b0   : > { %v6916_v30 = vpop.f32.mrb[170].mxu0 }
0x40b1   : > { %v6917_v31 = vadd.f32 %v12310_v15, %v6916_v30  ;;  %v13878_v40 = vpop.f32.mrb[171].mxu0  ;;  %13899 = vmatprep.mubr.msk.f32.mxu1 %vm609_vm3, %v6914_v20  ;;  %v14718_v15 = vld [vmem:[%s17501_s3 + $0x1b8] sm:$0xff]  }
0x40b3   : > { %13900 = vmatmul.mubr.msk.f32.vlgmr.msra.gmra.mrb[166].mxu1 %vm609_vm3, %v6917_v31 }
0x40b4   : > { %13912 = vmatprep.mubr.msk.bf16.mxu1 %vm15154_vm0, %v15153_v1  ;;  %13909 = vmatpush3.bf16.xpose.msra.mxu1 %v7198_v33 }
0x40b5   : > { %13910 = vmatprep.subr.bf16.mxu1 %v15153_v1 }
0x40b6   : > { %v7019_v42 = vpop.f32.mrb[172].mxu0 }
0x40b7   : > { %v13893_v0 = vpop.f32.mrb[173].mxu0 }
0x40b8   : > { %v7022_v44 = vpop.f32.mrb[174].mxu0 }
0x40b9   : > { %v7138_v3 = vpack.c.bf16 %v7022_v44, %v7019_v42  ;;  %v13894_v45 = vpop.f32.mrb[175].mxu0 }
0x40bb   : > { %13903 = vmatpush3.bf16.msra.mxu0 %v7138_v3 }
0x40bc   : > { %13916 = vmatprep.subr.bf16.mxu0 %v15153_v1  ;;  %13911 = vmatpush3.bf16.xpose.msra.mxu1 %v7201_v6 }
0x40bd   : > { %13932 = vmatprep.subr.bf16.mxu1 %v15153_v1 }
0x4186   : > { %v13901_v46 = vpop.f32.mrb[166].mxu1 }
0x4187   : > { %v7114_v12 = vmul.f32 0.35355338, %v13901_v46  ;;  %v7104_v24 = vpop.f32.mrb[167].mxu1 }
0x4188   : > { %v7113_v27 = vmul.f32 0.35355338, %v7104_v24 }
0x4189   : > { %v7118_v51 = vsel %vm699_vm5, %v7114_v12, -inf }
0x418a   : > { %7119 = vmax.xlane.f32.xlu1 %v7118_v51  ;;  %v7115_v52 = vsel %vm699_vm5, %v7113_v27, -inf }
0x418b   : > { %7116 = vmax.xlane.f32.xlu0 %v7115_v52 }
0x4217   : > { %v7120_v53 = vpop.xlane.xlu1 %7119 }
0x4218   : > { %v7122_v47 = vsub.f32 %v7114_v12, %v7120_v53  ;;  %v7117_v54 = vpop.xlane.xlu0 %7116 }
0x4219   : > { %v7121_v55 = vsub.f32 %v7113_v27, %v7117_v54 }
0x421a   : > { %v7125_v57 = vmul.f32 1.442695, %v7122_v47 }
0x421b   : > { %v7123_v59 = vmul.f32 1.442695, %v7121_v55 }
0x421c   : > { %14957 = vpow2.f32 %v7125_v57 }
0x421d   : > { %14959 = vpow2.f32 %v7123_v59 }
0x4226   : > { %v14958_v50 = vpop.eup %14957 }
0x4227   : > { %v14960_v60 = vpop.eup %14959  ;;  %v7130_v4 = vsel %vm699_vm5, %v14958_v50, 0.0 }
0x4228   : > { %7131 = vadd.xlane.f32.xlu1 %v7130_v4  ;;  %v7127_v5 = vsel %vm699_vm5, %v14960_v60, 0.0 }
0x4229   : > { %7128 = vadd.xlane.f32.xlu0 %v7127_v5 }
0x42b5   : > { %v7132_v14 = vpop.xlane.xlu1 %7131 }
0x42b6   : > { %14961 = vrcp.f32 %v7132_v14  ;;  %v7129_v7 = vpop.xlane.xlu0 %7128 }
0x42b7   : > { %14963 = vrcp.f32 %v7129_v7 }
0x42c0   : > { %v14962_v9 = vpop.eup %14961 }
0x42c1   : > { %v14964_v10 = vpop.eup %14963  ;;  %v7136_v11 = vmul.f32 %v14962_v9, %v14958_v50 }
0x42c2   : > { %v7134_v17 = vmul.f32 %v14964_v10, %v14960_v60 }
0x42c4   : > { %v7137_v19 = vpack.c.bf16 %v7136_v11, %v7134_v17  ;;  %v14719_v11 = vld [vmem:[%s17501_s3 + $0x1f0] sm:$0xff]  }
0x42c5   : > { %v7600_v17 = vsel %vm609_vm3, %v14719_v11, 0 }
0x42c6   : > { %13905 = vmatmul.mubr.msk.bf16.vlgmr.msra.gmra.mrb[176].mxu0 %vm699_vm5, %v7137_v19 }
0x42c7   : > { %13917 = vmatpush3.bf16.msra.mxu0 %v14711_v18  ;;  %13920 = vmatprep.mubr.msk.bf16.mxu0 %vm15154_vm0, %v15153_v1  ;;  %v14720_v18 = vld [vmem:[%s17501_s3 + $0x1f8] sm:$0xff]  }
0x42c8   : > { %13918 = vmatprep.subr.bf16.mxu0 %v15153_v1  ;;  %v7603_v19 = vsel %vm609_vm3, %v14720_v18, 0 }
0x42cb   : > { %13919 = vmatpush3.bf16.msra.mxu0 %v14712_v21 }
0x42cc   : > { %13924 = vmatprep.subr.bf16.mxu0 %v15153_v1 }
0x42ce   : > { %13921 = vmatmul.mubr.msk.bf16.vlgmr.msra.gmra.mrb[180].mxu0 %vm458_vm2, %v16413_v2 }
0x42cf   : > { %13925 = vmatpush3.bf16.msra.mxu0 %v14713_v22  ;;  %13928 = vmatprep.mubr.msk.bf16.mxu0 %vm15154_vm0, %v15153_v1 }
0x42d0   : > { %13926 = vmatprep.subr.bf16.mxu0 %v15153_v1 }
0x42d3   : > { %13927 = vmatpush3.bf16.msra.mxu0 %v14714_v23 }
0x42d6   : > { %13929 = vmatmul.mubr.msk.bf16.vlgmr.msra.gmra.mrb[184].mxu0 %vm458_vm2, %v16413_v2 }
0x4399   : > { %v7176_v35 = vpop.f32.mrb[176].mxu0 }
0x439a   : > { %v13906_v28 = vpop.f32.mrb[177].mxu0 }
0x439b   : > { %v7179_v29 = vpop.f32.mrb[178].mxu0 }
0x439c   : > { %v7183_v37 = vpack.c.bf16 %v7179_v29, %v7176_v35  ;;  %v13907_v26 = vpop.f32.mrb[179].mxu0 }
0x439e   : > { %13913 = vmatmul.mubr.msk.bf16.vlgmr.msra.gmra.mrb[180].mxu1 %vm609_vm3, %v7183_v37 }
0x439f   : > { %13933 = vmatpush3.bf16.msra.mxu1 %v14717_v34  ;;  %13936 = vmatprep.mubr.msk.bf16.mxu1 %vm15154_vm0, %v15153_v1 }
0x43a0   : > { %13934 = vmatprep.subr.bf16.mxu1 %v15153_v1 }
0x43a1   : > { %v7315_v16 = vpop.f32.mrb[180].mxu0 }
0x43a2   : > { %v7316_v20 = vadd.f32 %v12345_v39, %v7315_v16  ;;  %v13922_v41 = vpop.f32.mrb[181].mxu0 }
0x43a3   : > { %v7318_v30 = vpop.f32.mrb[182].mxu0  ;;  %13935 = vmatpush3.bf16.msra.mxu1 %v14718_v15 }
0x43a4   : > { %v13923_v31 = vpop.f32.mrb[183].mxu0  ;;  %13944 = vmatprep.mubr.msk.f32.mxu0 %vm609_vm3, %v7316_v20  ;;  %13953 = vmatprep.subr.bf16.mxu1 %v15153_v1  ;;  %v7319_v45 = vadd.f32 %v12345_v39, %v7318_v30  ;;  %v16683_v20 = vld [vmem:[%s17503_s5 + $0x8] sm:$0xff] }
0x43a5   : > { %v7651_v41 = vrot.slane %v16683_v20, %v15607_v13 }
0x43a6   : > { %13937 = vmatmul.mubr.msk.bf16.vlgmr.msra.gmra.mrb[184].mxu1 %vm458_vm2, %v16413_v2 }
0x43a7   : > { %13957 = vmatprep.mubr.msk.bf16.mxu1 %vm15154_vm0, %v15153_v1 }
0x43a9   : > { %v7368_v40 = vpop.f32.mrb[184].mxu0 }
0x43aa   : > { %v13930_v42 = vpop.f32.mrb[185].mxu0 }
0x43ab   : > { %v7371_v0 = vpop.f32.mrb[186].mxu0 }
0x43ac   : > { %v14475_v44 = vpack.c.bf16 %v7371_v0, %v7368_v40  ;;  %v13931_v3 = vpop.f32.mrb[187].mxu0  ;;  %13954 = vmatpush3.bf16.xpose.msra.mxu1 %v7600_v17 }
0x43ad   : > { %13955 = vmatprep.subr.bf16.mxu1 %v15153_v1 }
0x43ae   : > { %14477 = vmatprep.subr.msk.bf16.mxu0 %vm15369_vm4, %v14475_v44 }
0x43af   : > { %14480 = vmatpush3.bf16.xpose.msk.msra.mxu0 %vm15369_vm4, %v14475_v44 }
0x43b0   : > { %13947 = vmatprep.subr.bf16.mxu0 %v15153_v1 }
0x43b4   : > { %13956 = vmatpush3.bf16.xpose.msra.mxu1 %v7603_v19 }
0x43b5   : > { %13977 = vmatprep.subr.bf16.mxu1 %v15153_v1 }
0x43b6   : > { %13945 = vmatmul.mubr.msk.f32.vlgmr.msra.gmra.mrb[154].mxu0 %vm609_vm3, %v7319_v45 }
0x43b7   : > { %13949 = vmatprep.mubr.msk.bf16.mxu0 %vm15154_vm0, %v15153_v1 }
0x4471   : > { %v7237_v2 = vpop.f32.mrb[180].mxu1 }
0x4472   : > { %v16654_v46 = vadd.f32 %v7237_v2, %v16576_v36  ;;  %v13914_v12 = vpop.f32.mrb[181].mxu1 }
0x4473   : > { %v7240_v24 = vpop.f32.mrb[182].mxu1 }
0x4474   : > { %v16657_v27 = vadd.f32 %v7240_v24, %v16578_v38  ;;  %v13915_v51 = vpop.f32.mrb[183].mxu1 }
0x4479   : > { %v7421_v52 = vpop.f32.mrb[184].mxu1 }
0x447a   : > { %v13938_v53 = vpop.f32.mrb[185].mxu1 }
0x447b   : > { %v7424_v47 = vpop.f32.mrb[186].mxu1 }
0x447c   : > { %v7540_v54 = vpack.c.bf16 %v7424_v47, %v7421_v52  ;;  %v13939_v55 = vpop.f32.mrb[187].mxu1 }
0x447e   : > { %13948 = vmatpush3.bf16.msra.mxu0 %v7540_v54 }
0x447f   : > { %13961 = vmatprep.subr.bf16.mxu0 %v15153_v1 }
0x4489   : > { %v13946_v57 = vpop.f32.mrb[154].mxu0 }
0x448a   : > { %v7516_v59 = vmul.f32 0.35355338, %v13946_v57  ;;  %v7506_v50 = vpop.f32.mrb[155].mxu0 }
0x448b   : > { %v7515_v60 = vmul.f32 0.35355338, %v7506_v50  ;;  %v14722_v50 = vld [vmem:[%s17504_s6 + $0x18] sm:$0xff]  }
0x448c   : > { %v7520_v36 = vsel %vm699_vm5, %v7516_v59, -inf }
0x448d   : > { %7521 = vmax.xlane.f32.xlu1 %v7520_v36  ;;  %v7517_v4 = vsel %vm699_vm5, %v7515_v60, -inf }
0x448e   : > { %7518 = vmax.xlane.f32.xlu0 %v7517_v4 }
0x451a   : > { %v7522_v38 = vpop.xlane.xlu1 %7521 }
0x451b   : > { %v7524_v5 = vsub.f32 %v7516_v59, %v7522_v38  ;;  %v7519_v61 = vpop.xlane.xlu0 %7518 }
0x451c   : > { %v7523_v33 = vsub.f32 %v7515_v60, %v7519_v61 }
0x451d   : > { %v7527_v8 = vmul.f32 1.442695, %v7524_v5 }
0x451e   : > { %v7525_v6 = vmul.f32 1.442695, %v7523_v33  ;;  %v7685_v33 = vrot.slane %v16683_v20, %v15633_v48 }
0x451f   : > { %14965 = vpow2.f32 %v7527_v8 }
0x4520   : > { %14967 = vpow2.f32 %v7525_v6 }
0x4529   : > { %v14966_v14 = vpop.eup %14965 }
0x452a   : > { %v14968_v7 = vpop.eup %14967  ;;  %v7532_v9 = vsel %vm699_vm5, %v14966_v14, 0.0 }
0x452b   : > { %7533 = vadd.xlane.f32.xlu1 %v7532_v9  ;;  %v7529_v10 = vsel %vm699_vm5, %v14968_v7, 0.0 }
0x452c   : > { %7530 = vadd.xlane.f32.xlu0 %v7529_v10  ;;  %v7691_v10 = vrot.slane %v16683_v20, %v15638_v49 }
0x45b8   : > { %v7534_v21 = vpop.xlane.xlu1 %7533 }
0x45b9   : > { %14969 = vrcp.f32 %v7534_v21  ;;  %v7531_v22 = vpop.xlane.xlu0 %7530  ;;  %v14723_v21 = vld [vmem:[%s17505_s7 + $0x10] sm:$0xff]  }
0x45ba   : > { %14971 = vrcp.f32 %v7531_v22  ;;  %v14724_v22 = vld [vmem:[%s17505_s7 + $0x18] sm:$0xff]  }
0x45c3   : > { %v14970_v23 = vpop.eup %14969 }
0x45c4   : > { %v14972_v35 = vpop.eup %14971  ;;  %v7538_v28 = vmul.f32 %v14970_v23, %v14966_v14  ;;  %v7702_v23 = vrot.slane %v16683_v20, %v15654_v62 }
0x45c5   : > { %v7536_v29 = vmul.f32 %v14972_v35, %v14968_v7 }
0x45c7   : > { %v7539_v34 = vpack.c.bf16 %v7538_v28, %v7536_v29 }
0x45c9   : > { %13950 = vmatmul.mubr.msk.bf16.vlgmr.msra.gmra.mrb[188].mxu0 %vm699_vm5, %v7539_v34 }
0x45ca   : > { %13965 = vmatprep.mubr.msk.bf16.mxu0 %vm15154_vm0, %v15153_v1 }
0x469c   : > { %v7578_v37 = vpop.f32.mrb[188].mxu0 }
0x469d   : > { %v13951_v26 = vpop.f32.mrb[189].mxu0 }
0x469e   : > { %v7581_v39 = vpop.f32.mrb[190].mxu0 }
0x469f   : > { %v7585_v15 = vpack.c.bf16 %v7581_v39, %v7578_v37  ;;  %v13952_v16 = vpop.f32.mrb[191].mxu0 }
0x46a1   : > { %13958 = vmatmul.mubr.msk.bf16.vlgmr.msra.gmra.mrb[188].mxu1 %vm609_vm3, %v7585_v15 }
0x46a2   : > { %13981 = vmatprep.mubr.msk.bf16.mxu1 %vm15154_vm0, %v15153_v1 }
0x4774   : > { %v7639_v30 = vpop.f32.mrb[188].mxu1 }
0x4775   : > { %v7646_v31 = vadd.f32 %v7639_v30, %v16654_v46  ;;  %v13959_v40 = vpop.f32.mrb[189].mxu1 }
0x4776   : > { %v7642_v42 = vpop.f32.mrb[190].mxu1 }
0x4777   : > { %v7652_v0 = vadd.f32 %v7651_v41, %v7646_v31  ;;  %v7647_v44 = vadd.f32 %v7642_v42, %v16657_v27  ;;  %v13960_v3 = vpop.f32.mrb[191].mxu1 }
0x4779   : > { %v7653_v45 = vadd.f32 %v7651_v41, %v7647_v44  ;;  %v7654_v2 = vadd.f32 %v7652_v0, %v16404_v63 }
0x477b   : > { %v7656_v12 = vsel %vm458_vm2, %v7654_v2, 0.0  ;;  %v7655_v24 = vadd.f32 %v7653_v45, %v16406_v32  ;;  %v14721_v32 = vld [vmem:[%s17504_s6 + $0x10] sm:$0xff]   ;;  %v7777_v45 = vrot.slane %v16683_v20, %v15662_v25 }
0x477c   : > { %7657 = vadd.xlane.f32.xlu0 %v7656_v12  ;;  %13962 = vmatpush3.bf16.msra.mxu0 %v14721_v32 }
0x477d   : > { %v7659_v51 = vsel %vm458_vm2, %v7655_v24, 0.0  ;;  %13963 = vmatprep.subr.bf16.mxu0 %v15153_v1 }
0x477e   : > { %7660 = vadd.xlane.f32.xlu1 %v7659_v51 }
0x4780   : > { %13964 = vmatpush3.bf16.msra.mxu0 %v14722_v50 }
0x4781   : > { %13969 = vmatprep.subr.bf16.mxu0 %v15153_v1 }
0x4809   : > { %v7658_v52 = vpop.xlane.xlu0 %7657 }
0x480a   : > { %v7662_v53 = vmul.f32 0.03125, %v7658_v52 }
0x480b   : > { %v7661_v46 = vpop.xlane.xlu1 %7660 }
0x480c   : > { %v7664_v47 = vsub.f32 %v7654_v2, %v7662_v53  ;;  %v7663_v54 = vmul.f32 0.03125, %v7661_v46 }
0x480e   : > { %v7665_v55 = vsub.f32 %v7655_v24, %v7663_v54  ;;  %v7666_v57 = vmul.f32 %v7664_v47, %v7664_v47 }
0x4810   : > { %v7668_v27 = vsel %vm458_vm2, %v7666_v57, 0.0  ;;  %v7667_v59 = vmul.f32 %v7665_v55, %v7665_v55 }
0x4811   : > { %7669 = vadd.xlane.f32.xlu0 %v7668_v27 }
0x4812   : > { %v7671_v63 = vsel %vm458_vm2, %v7667_v59, 0.0 }
0x4813   : > { %7672 = vadd.xlane.f32.xlu1 %v7671_v63 }
0x489e   : > { %v7670_v60 = vpop.xlane.xlu0 %7669 }
0x489f   : > { %v7674_v36 = vmul.f32 0.03125, %v7670_v60 }
0x48a0   : > { %v7673_v4 = vpop.xlane.xlu1 %7672 }
0x48a1   : > { %v7676_v38 = vadd.f32 1e-06, %v7674_v36  ;;  %v7675_v5 = vmul.f32 0.03125, %v7673_v4 }
0x48a3   : > { %14973 = vrsqrt.f32 %v7676_v38  ;;  %v7677_v61 = vadd.f32 1e-06, %v7675_v5  ;;  %v14725_v5 = vld [vmem:[%s17506_s8] sm:$0xff]  }
0x48a4   : > { %13978 = vmatpush3.bf16.msra.mxu1 %v14725_v5 }
0x48a5   : > { %14975 = vrsqrt.f32 %v7677_v61  ;;  %v14726_v61 = vld [vmem:[%s17501_s3] sm:$0xff]   ;;  %13979 = vmatprep.subr.bf16.mxu1 %v15153_v1 }
0x48ad   : > { %v14974_v8 = vpop.eup %14973 }
0x48ae   : > { %v7680_v6 = vmul.f32 %v14974_v8, %v7664_v47  ;;  %v14728_v8 = vld [vmem:[%s17501_s3 + $0x8] sm:$0xff]  }
0x48af   : > { %v14976_v14 = vpop.eup %14975 }
0x48b0   : > { %v7686_v7 = vmul.f32 %v7685_v33, %v7680_v6  ;;  %v7681_v9 = vmul.f32 %v14976_v14, %v7665_v55 }
0x48b2   : > { %v7687_v11 = vmul.f32 %v7685_v33, %v7681_v9  ;;  %v7692_v17 = vadd.f32 %v7691_v10, %v7686_v7  ;;  %v14727_v33 = vld [vmem:[%s17506_s8 + $0x8] sm:$0xff]  }
0x48b3   : > { %13980 = vmatpush3.bf16.msra.mxu1 %v14727_v33  ;;  %v12428_v33 = vld [vmem:[%s17502_s4 + $0x1] ss:$0 sm:$0xff] }
0x48b4   : > { %v7693_v18 = vadd.f32 %v7691_v10, %v7687_v11  ;;  %13993 = vmatprep.subr.bf16.mxu1 %v15153_v1 }
0x48b6   : > { %v7694_v19 = vpack.c.bf16 %v7693_v18, %v7692_v17 }
0x48b8   : > { %13966 = vmatmul.mubr.msk.bf16.vlgmr.msra.gmra.mrb[192].mxu0 %vm458_vm2, %v7694_v19 }
0x48b9   : > { %13973 = vmatprep.mubr.msk.bf16.mxu0 %vm15154_vm0, %v15153_v1  ;;  %13970 = vmatpush3.bf16.msra.mxu0 %v14723_v21 }
0x48ba   : > { %13971 = vmatprep.subr.bf16.mxu0 %v15153_v1 }
0x48bd   : > { %13972 = vmatpush3.bf16.msra.mxu0 %v14724_v22  ;;  %v7871_v22 = vrot.slane %v16683_v20, %v15691_v58 }
0x48be   : > { %13985 = vmatprep.subr.bf16.mxu0 %v15153_v1 }
0x498b   : > { %v7752_v35 = vpop.f32.mrb[192].mxu0 }
0x498c   : > { %v7753_v28 = vadd.f32 %v7752_v35, %v7702_v23  ;;  %v13967_v29 = vpop.f32.mrb[193].mxu0 }
0x498d   : > { %v7755_v34 = vpop.f32.mrb[194].mxu0 }
0x498e   : > { %v7761_v37 = vmul.f32 0.70710677, %v7753_v28  ;;  %v7756_v26 = vadd.f32 %v7755_v34, %v7702_v23  ;;  %v13968_v39 = vpop.f32.mrb[195].mxu0  ;;  %v7759_v31 = vmul.f32 0.5, %v7753_v28 }
0x4990   : > { %14977 = verf.f32 %v7761_v37  ;;  %v7762_v15 = vmul.f32 0.70710677, %v7756_v26  ;;  %v7760_v40 = vmul.f32 0.5, %v7756_v26  ;;  %v14729_v37 = vld [vmem:[%s17501_s3 + $0x40] sm:$0xff]  }
0x4991   : > { %v14730_v26 = vld [vmem:[%s17501_s3 + $0x80] sm:$0xff]  }
0x4992   : > { %14979 = verf.f32 %v7762_v15  ;;  %v14732_v15 = vld [vmem:[%s17501_s3 + $0x88] sm:$0xff]  }
0x499a   : > { %v14978_v16 = vpop.eup %14977 }
0x499b   : > { %v7765_v41 = vadd.f32 1.0, %v14978_v16  ;;  %v14733_v16 = vld [vmem:[%s17501_s3 + $0x10] sm:$0xff]  }
0x499c   : > { %v14980_v30 = vpop.eup %14979 }
0x499d   : > { %v7766_v42 = vadd.f32 1.0, %v14980_v30  ;;  %v7767_v0 = vmul.f32 %v7765_v41, %v7759_v31  ;;  %v14734_v41 = vld [vmem:[%s17501_s3 + $0x18] sm:$0xff]   ;;  %v14735_v30 = vld [vmem:[%s17501_s3 + $0x90] sm:$0xff]  }
0x499e   : > { %v14736_v31 = vld [vmem:[%s17501_s3 + $0x98] sm:$0xff]  }
0x499f   : > { %v7768_v44 = vmul.f32 %v7766_v42, %v7760_v40  ;;  %v12396_v40 = vld [vmem:[%s17502_s4] ss:$0 sm:$0xff] }
0x49a1   : > { %v7769_v3 = vpack.c.bf16 %v7768_v44, %v7767_v0 }
0x49a3   : > { %13974 = vmatmul.mubr.msk.bf16.vlgmr.msra.gmra.mrb[196].mxu0 %vm458_vm2, %v7769_v3 }
0x49a4   : > { %13989 = vmatprep.mubr.msk.bf16.mxu0 %vm15154_vm0, %v15153_v1  ;;  %13986 = vmatpush3.bf16.msra.mxu0 %v14726_v61 }
0x49a5   : > { %13987 = vmatprep.subr.bf16.mxu0 %v15153_v1 }
0x49a8   : > { %13988 = vmatpush3.bf16.msra.mxu0 %v14728_v8 }
0x49a9   : > { %14001 = vmatprep.subr.bf16.mxu0 %v15153_v1 }
0x4a76   : > { %v7827_v2 = vpop.f32.mrb[196].mxu0 }
0x4a77   : > { %v7828_v12 = vadd.f32 %v7827_v2, %v7777_v45  ;;  %v13975_v24 = vpop.f32.mrb[197].mxu0 }
0x4a78   : > { %v7830_v51 = vpop.f32.mrb[198].mxu0 }
0x4a79   : > { %v7831_v52 = vadd.f32 %v7830_v51, %v7777_v45  ;;  %v13976_v53 = vpop.f32.mrb[199].mxu0  ;;  %v7834_v46 = vadd.f32 %v7828_v12, %v7692_v17  ;;  %v7865_v17 = vrot.slane %v16683_v20, %v15686_v56  ;;  %v14731_v20 = vld [vmem:[%s17501_s3 + $0x48] sm:$0xff]  }
0x4a7b   : > { %v7836_v47 = vsel %vm458_vm2, %v7834_v46, 0.0  ;;  %v7835_v54 = vadd.f32 %v7831_v52, %v7693_v18 }
0x4a7c   : > { %7837 = vadd.xlane.f32.xlu0 %v7836_v47 }
0x4a7d   : > { %v7839_v55 = vsel %vm458_vm2, %v7835_v54, 0.0 }
0x4a7e   : > { %7840 = vadd.xlane.f32.xlu1 %v7839_v55 }
0x4b09   : > { %v7838_v57 = vpop.xlane.xlu0 %7837 }
0x4b0a   : > { %v7842_v27 = vmul.f32 0.03125, %v7838_v57 }
0x4b0b   : > { %v7841_v59 = vpop.xlane.xlu1 %7840 }
0x4b0c   : > { %v7844_v63 = vsub.f32 %v7834_v46, %v7842_v27  ;;  %v7843_v32 = vmul.f32 0.03125, %v7841_v59 }
0x4b0e   : > { %v7845_v50 = vsub.f32 %v7835_v54, %v7843_v32  ;;  %v7846_v60 = vmul.f32 %v7844_v63, %v7844_v63 }
0x4b10   : > { %v7848_v36 = vsel %vm458_vm2, %v7846_v60, 0.0  ;;  %v7847_v4 = vmul.f32 %v7845_v50, %v7845_v50 }
0x4b11   : > { %7849 = vadd.xlane.f32.xlu0 %v7848_v36 }
0x4b12   : > { %v7851_v38 = vsel %vm458_vm2, %v7847_v4, 0.0 }
0x4b13   : > { %7852 = vadd.xlane.f32.xlu1 %v7851_v38 }
0x4b9e   : > { %v7850_v6 = vpop.xlane.xlu0 %7849 }
0x4b9f   : > { %v7854_v14 = vmul.f32 0.03125, %v7850_v6 }
0x4ba0   : > { %v7853_v7 = vpop.xlane.xlu1 %7852 }
0x4ba1   : > { %v7856_v9 = vadd.f32 1e-06, %v7854_v14  ;;  %v7855_v10 = vmul.f32 0.03125, %v7853_v7 }
0x4ba3   : > { %14981 = vrsqrt.f32 %v7856_v9  ;;  %v7857_v11 = vadd.f32 1e-06, %v7855_v10 }
0x4ba5   : > { %14983 = vrsqrt.f32 %v7857_v11 }
0x4bad   : > { %v14982_v18 = vpop.eup %14981 }
0x4bae   : > { %v7860_v19 = vmul.f32 %v14982_v18, %v7844_v63 }
0x4baf   : > { %v14984_v21 = vpop.eup %14983 }
0x4bb0   : > { %v7866_v23 = vmul.f32 %v7865_v17, %v7860_v19  ;;  %v7861_v35 = vmul.f32 %v14984_v21, %v7845_v50 }
0x4bb2   : > { %v7867_v28 = vmul.f32 %v7865_v17, %v7861_v35  ;;  %v16749_v29 = vadd.f32 %v7871_v22, %v7866_v23 }
0x4bb4   : > { %v16751_v34 = vadd.f32 %v7871_v22, %v7867_v28 }
0x4bb6   : > { %v16761_v39 = vpack.c.bf16 %v16751_v34, %v16749_v29 }
0x4bb8   : > { %13982 = vmatmul.mubr.msk.bf16.vlgmr.msra.gmra.mrb[192].mxu1 %vm458_vm2, %v16761_v39  ;;  %13990 = vmatmul.mubr.msk.bf16.vlgmr.msra.gmra.mrb[200].mxu0 %vm458_vm2, %v16761_v39 }
0x4bb9   : > { %13994 = vmatpush3.bf16.msra.mxu1 %v14729_v37  ;;  %14002 = vmatpush3.bf16.msra.mxu0 %v14730_v26 }
0x4bba   : > { %13995 = vmatprep.subr.bf16.mxu1 %v15153_v1  ;;  %14003 = vmatprep.subr.bf16.mxu0 %v15153_v1 }
0x4bbb   : > { %13997 = vmatprep.mubr.msk.bf16.mxu1 %vm15154_vm0, %v15153_v1  ;;  %14005 = vmatprep.mubr.msk.bf16.mxu0 %vm15154_vm0, %v15153_v1 }
0x4bbd   : > { %13996 = vmatpush3.bf16.msra.mxu1 %v14731_v20  ;;  %14004 = vmatpush3.bf16.msra.mxu0 %v14732_v15 }
0x4bbe   : > { %14022 = vmatprep.subr.bf16.mxu0 %v15153_v1 }
0x4bc0   : > { %13998 = vmatmul.mubr.msk.bf16.vlgmr.msra.gmra.mrb[196].mxu1 %vm458_vm2, %v16761_v39  ;;  %14006 = vmatmul.mubr.msk.bf16.vlgmr.msra.gmra.mrb[204].mxu0 %vm458_vm2, %v16761_v39 }
0x4bc1   : > { %14023 = vmatpush3.bf16.msra.mxu0 %v14733_v16  ;;  %14026 = vmatprep.mubr.msk.bf16.mxu0 %vm15154_vm0, %v15153_v1 }
0x4bc2   : > { %14024 = vmatprep.subr.bf16.mxu0 %v15153_v1 }
0x4bc5   : > { %14025 = vmatpush3.bf16.msra.mxu0 %v14734_v41 }
0x4bc6   : > { %14038 = vmatprep.subr.bf16.mxu0 %v15153_v1 }
0x4bc8   : > { %14027 = vmatmul.mubr.msk.bf16.vlgmr.msra.gmra.mrb[208].mxu0 %vm458_vm2, %v16761_v39 }
0x4bc9   : > { %14039 = vmatpush3.bf16.msra.mxu0 %v14735_v30  ;;  %14042 = vmatprep.mubr.msk.bf16.mxu0 %vm15154_vm0, %v15153_v1 }
0x4bca   : > { %14040 = vmatprep.subr.bf16.mxu0 %v15153_v1 }
0x4bcd   : > { %14041 = vmatpush3.bf16.msra.mxu0 %v14736_v31 }
0x4bce   : > { %14053 = vmatprep.subr.bf16.mxu0 %v15153_v1 }
0x4bd0   : > { %14043 = vmatmul.mubr.msk.bf16.vlgmr.msra.gmra.mrb[212].mxu0 %vm458_vm2, %v16761_v39 }
0x4bd1   : > { %14055 = vmatprep.mubr.msk.bf16.mxu0 %vm15154_vm0, %v15153_v1 }
0x4c8b   : > { %v7928_v42 = vpop.f32.mrb[192].mxu1  ;;  %v8020_v0 = vpop.f32.mrb[200].mxu0 }
0x4c8c   : > { %v12380_v44 = vmul.f32 -1.442695, %v7928_v42  ;;  %v8021_v3 = vadd.f32 %v12396_v40, %v8020_v0  ;;  %v13983_v45 = vpop.f32.mrb[193].mxu1  ;;  %v13991_v2 = vpop.f32.mrb[201].mxu0 }
0x4c8d   : > { %v7931_v12 = vpop.f32.mrb[194].mxu1  ;;  %v8023_v24 = vpop.f32.mrb[202].mxu0 }
0x4c8e   : > { %14985 = vpow2.f32 %v12380_v44  ;;  %v12381_v51 = vmul.f32 -1.442695, %v7931_v12  ;;  %v13984_v52 = vpop.f32.mrb[195].mxu1  ;;  %v13992_v53 = vpop.f32.mrb[203].mxu0  ;;  %14013 = vmatprep.mubr.msk.f32.mxu1 %vm609_vm3, %v8021_v3  ;;  %v8024_v6 = vadd.f32 %v12396_v40, %v8023_v24 }
0x4c8f   : > { %v14737_v52 = vld [vmem:[%s17501_s3 + $0x50] sm:$0xff]  }
0x4c90   : > { %14987 = vpow2.f32 %v12381_v51 }
0x4c93   : > { %v8073_v46 = vpop.f32.mrb[196].mxu1  ;;  %v8126_v47 = vpop.f32.mrb[204].mxu0 }
0x4c94   : > { %v13999_v54 = vpop.f32.mrb[197].mxu1  ;;  %v14007_v55 = vpop.f32.mrb[205].mxu0 }
0x4c95   : > { %v8076_v57 = vpop.f32.mrb[198].mxu1  ;;  %v8129_v27 = vpop.f32.mrb[206].mxu0 }
0x4c96   : > { %v14481_v59 = vpack.c.bf16 %v8076_v57, %v8073_v46  ;;  %v8245_v63 = vpack.c.bf16 %v8129_v27, %v8126_v47  ;;  %v14000_v32 = vpop.f32.mrb[199].mxu1  ;;  %v14008_v50 = vpop.f32.mrb[207].mxu0  ;;  %v14738_v46 = vld [vmem:[%s17501_s3 + $0x58] sm:$0xff]  }
0x4c98   : > { %v14986_v60 = vpop.eup %14985  ;;  %14483 = vmatprep.subr.msk.bf16.mxu1 %vm15369_vm4, %v14481_v59 }
0x4c99   : > { %v7941_v36 = vadd.f32 1.0, %v14986_v60  ;;  %14486 = vmatpush3.bf16.xpose.msk.msra.mxu1 %vm15369_vm4, %v14481_v59 }
0x4c9a   : > { %v14988_v4 = vpop.eup %14987  ;;  %14016 = vmatprep.subr.bf16.mxu1 %v15153_v1 }
0x4c9b   : > { %14989 = vrcp.f32 %v7941_v36  ;;  %v7942_v38 = vadd.f32 1.0, %v14988_v4  ;;  %v8360_v5 = vpop.f32.mrb[208].mxu0 }
0x4c9c   : > { %v14028_v61 = vpop.f32.mrb[209].mxu0  ;;  %v8361_v47 = vadd.f32 %v12428_v33, %v8360_v5 }
0x4c9d   : > { %14991 = vrcp.f32 %v7942_v38  ;;  %v8363_v8 = vpop.f32.mrb[210].mxu0 }
0x4c9e   : > { %v16822_v14 = vadd.f32 %v12428_v33, %v8363_v8  ;;  %v14029_v7 = vpop.f32.mrb[211].mxu0 }
0x4ca0   : > { %14014 = vmatmul.mubr.msk.f32.vlgmr.msra.gmra.mrb[200].mxu1 %vm609_vm3, %v8024_v6 }
0x4ca1   : > { %14017 = vmatpush3.bf16.msra.mxu1 %v8245_v63  ;;  %14018 = vmatprep.mubr.msk.bf16.mxu1 %vm15154_vm0, %v15153_v1 }
0x4ca2   : > { %14030 = vmatprep.subr.bf16.mxu1 %v15153_v1 }
0x4ca3   : > { %v8466_v9 = vpop.f32.mrb[212].mxu0 }
0x4ca4   : > { %v14044_v10 = vpop.f32.mrb[213].mxu0 }
0x4ca5   : > { %v14990_v11 = vpop.eup %14989  ;;  %v8469_v17 = vpop.f32.mrb[214].mxu0 }
0x4ca6   : > { %12382 = vst.msk [vmem:[%s16103_s24 + $0x10] sm:$0xff] %vm699_vm5, %v14990_v11  ;;  %v8585_v18 = vpack.c.bf16 %v8469_v17, %v8466_v9  ;;  %v14045_v19 = vpop.f32.mrb[215].mxu0 }
0x4ca7   : > { %v14992_v21 = vpop.eup %14991 }
0x4ca8   : > { %12383 = vst.msk [vmem:[%s16103_s24 + $0x18] sm:$0xff] %vm699_vm5, %v14992_v21  ;;  %14054 = vmatpush3.bf16.msra.mxu0 %v8585_v18 }
0x4ca9   : > { %14067 = vmatprep.subr.bf16.mxu0 %v15153_v1 }
0x4d73   : > { %v14015_v22 = vpop.f32.mrb[200].mxu1 }
0x4d74   : > { %v8221_v23 = vmul.f32 0.35355338, %v14015_v22  ;;  %v8211_v35 = vpop.f32.mrb[201].mxu1  ;;  %v14743_v22 = vld [vmem:[%s17501_s3 + $0xd0] sm:$0xff]  }
0x4d75   : > { %v8220_v28 = vmul.f32 0.35355338, %v8211_v35  ;;  %v14744_v35 = vld [vmem:[%s17501_s3 + $0xd8] sm:$0xff]  }
0x4d76   : > { %v8225_v37 = vsel %vm699_vm5, %v8221_v23, -inf }
0x4d77   : > { %8226 = vmax.xlane.f32.xlu1 %v8225_v37  ;;  %v8222_v26 = vsel %vm699_vm5, %v8220_v28, -inf }
0x4d78   : > { %8223 = vmax.xlane.f32.xlu0 %v8222_v26 }
0x4e04   : > { %v8227_v20 = vpop.xlane.xlu1 %8226 }
0x4e05   : > { %v8229_v15 = vsub.f32 %v8221_v23, %v8227_v20  ;;  %v8224_v16 = vpop.xlane.xlu0 %8223  ;;  %v8645_v23 = vsel %vm609_vm3, %v14743_v22, 0 }
0x4e06   : > { %v8228_v41 = vsub.f32 %v8220_v28, %v8224_v16  ;;  %v8648_v28 = vsel %vm609_vm3, %v14744_v35, 0 }
0x4e07   : > { %v8232_v30 = vmul.f32 1.442695, %v8229_v15  ;;  %v14739_v15 = vld [vmem:[%s17501_s3 + $0xc0] sm:$0xff]  }
0x4e08   : > { %v8230_v31 = vmul.f32 1.442695, %v8228_v41 }
0x4e09   : > { %14993 = vpow2.f32 %v8232_v30 }
0x4e0a   : > { %14995 = vpow2.f32 %v8230_v31 }
0x4e13   : > { %v14994_v40 = vpop.eup %14993 }
0x4e14   : > { %v14996_v42 = vpop.eup %14995  ;;  %v8237_v0 = vsel %vm699_vm5, %v14994_v40, 0.0 }
0x4e15   : > { %8238 = vadd.xlane.f32.xlu1 %v8237_v0  ;;  %v8234_v44 = vsel %vm699_vm5, %v14996_v42, 0.0 }
0x4e16   : > { %8235 = vadd.xlane.f32.xlu0 %v8234_v44  ;;  %v14741_v44 = vld [vmem:[%s17501_s3 + $0x60] sm:$0xff]  }
0x4ea2   : > { %v8239_v3 = vpop.xlane.xlu1 %8238 }
0x4ea3   : > { %14997 = vrcp.f32 %v8239_v3  ;;  %v8236_v45 = vpop.xlane.xlu0 %8235  ;;  %v14742_v3 = vld [vmem:[%s17501_s3 + $0x68] sm:$0xff]  }
0x4ea4   : > { %14999 = vrcp.f32 %v8236_v45 }
0x4ead   : > { %v14998_v2 = vpop.eup %14997 }
0x4eae   : > { %v15000_v12 = vpop.eup %14999  ;;  %v8243_v24 = vmul.f32 %v14998_v2, %v14994_v40  ;;  %v8705_v40 = vsel %vm609_vm3, %v14739_v15, 0 }
0x4eaf   : > { %v8241_v51 = vmul.f32 %v15000_v12, %v14996_v42  ;;  %v14740_v42 = vld [vmem:[%s17501_s3 + $0xc8] sm:$0xff]  }
0x4eb0   : > { %v8708_v0 = vsel %vm609_vm3, %v14740_v42, 0 }
0x4eb1   : > { %v8244_v53 = vpack.c.bf16 %v8243_v24, %v8241_v51  ;;  %v14745_v24 = vld [vmem:[%s17501_s3 + $0x20] sm:$0xff]  }
0x4eb3   : > { %14019 = vmatmul.mubr.msk.bf16.vlgmr.msra.gmra.mrb[204].mxu1 %vm699_vm5, %v8244_v53  ;;  %v14746_v53 = vld [vmem:[%s17501_s3 + $0x28] sm:$0xff]  }
0x4eb4   : > { %14031 = vmatpush3.bf16.msra.mxu1 %v14737_v52  ;;  %14034 = vmatprep.mubr.msk.bf16.mxu1 %vm15154_vm0, %v15153_v1 }
0x4eb5   : > { %14032 = vmatprep.subr.bf16.mxu1 %v15153_v1 }
0x4eb8   : > { %14033 = vmatpush3.bf16.msra.mxu1 %v14738_v46  ;;  %v14747_v46 = vld [vmem:[%s17501_s3 + $0xa0] sm:$0xff]  }
0x4ebb   : > { %14035 = vmatmul.mubr.msk.bf16.vlgmr.msra.gmra.mrb[208].mxu1 %vm458_vm2, %v16761_v39 }
0x4ebc   : > { %14050 = vmatprep.mubr.msk.f32.mxu1 %vm609_vm3, %v8361_v47  ;;  %v14748_v47 = vld [vmem:[%s17501_s3 + $0xa8] sm:$0xff]  }
0x4f86   : > { %v16850_v54 = vpop.f32.mrb[204].mxu1 }
0x4f87   : > { %v14020_v55 = vpop.f32.mrb[205].mxu1 }
0x4f88   : > { %v16852_v57 = vpop.f32.mrb[206].mxu1 }
0x4f89   : > { %v8290_v27 = vpack.c.bf16 %v16852_v57, %v16850_v54  ;;  %v14021_v59 = vpop.f32.mrb[207].mxu1 }
0x4f8e   : > { %v8413_v63 = vpop.f32.mrb[208].mxu1 }
0x4f8f   : > { %v14036_v32 = vpop.f32.mrb[209].mxu1 }
0x4f90   : > { %v8416_v50 = vpop.f32.mrb[210].mxu1 }
0x4f91   : > { %v14487_v60 = vpack.c.bf16 %v8416_v50, %v8413_v63  ;;  %v14037_v36 = vpop.f32.mrb[211].mxu1 }
0x4f93   : > { %14489 = vmatprep.subr.msk.bf16.mxu1 %vm15369_vm4, %v14487_v60 }
0x4f94   : > { %14492 = vmatpush3.bf16.xpose.msk.msra.mxu1 %vm15369_vm4, %v14487_v60 }
0x4f95   : > { %14059 = vmatprep.subr.bf16.mxu1 %v15153_v1 }
0x4f9b   : > { %14051 = vmatmul.mubr.msk.f32.vlgmr.msra.gmra.mrb[202].mxu1 %vm609_vm3, %v16822_v14 }
0x4f9c   : > { %14063 = vmatprep.mubr.msk.bf16.mxu1 %vm15154_vm0, %v15153_v1  ;;  %14060 = vmatpush3.bf16.xpose.msra.mxu1 %v8645_v23 }
0x4f9d   : > { %14061 = vmatprep.subr.bf16.mxu1 %v15153_v1 }
0x4fa4   : > { %14062 = vmatpush3.bf16.xpose.msra.mxu1 %v8648_v28 }
0x4fa5   : > { %14075 = vmatprep.subr.bf16.mxu1 %v15153_v1 }
0x506e   : > { %v14052_v4 = vpop.f32.mrb[202].mxu1 }
0x506f   : > { %v8561_v38 = vmul.f32 0.35355338, %v14052_v4  ;;  %v8551_v5 = vpop.f32.mrb[203].mxu1 }
0x5070   : > { %v8560_v61 = vmul.f32 0.35355338, %v8551_v5 }
0x5071   : > { %v8565_v33 = vsel %vm699_vm5, %v8561_v38, -inf }
0x5072   : > { %8566 = vmax.xlane.f32.xlu1 %v8565_v33  ;;  %v8562_v8 = vsel %vm699_vm5, %v8560_v61, -inf }
0x5073   : > { %8563 = vmax.xlane.f32.xlu0 %v8562_v8  ;;  %v12466_v8 = vld [vmem:[%s17502_s4 + $0x2] ss:$0 sm:$0xff] }
0x50ff   : > { %v8567_v6 = vpop.xlane.xlu1 %8566 }
0x5100   : > { %v8569_v7 = vsub.f32 %v8561_v38, %v8567_v6  ;;  %v8564_v9 = vpop.xlane.xlu0 %8563 }
0x5101   : > { %v8568_v10 = vsub.f32 %v8560_v61, %v8564_v9 }
0x5102   : > { %v8572_v11 = vmul.f32 1.442695, %v8569_v7 }
0x5103   : > { %v8570_v17 = vmul.f32 1.442695, %v8568_v10 }
0x5104   : > { %15001 = vpow2.f32 %v8572_v11 }
0x5105   : > { %15003 = vpow2.f32 %v8570_v17 }
0x510e   : > { %v15002_v14 = vpop.eup %15001 }
0x510f   : > { %v15004_v18 = vpop.eup %15003  ;;  %v8577_v19 = vsel %vm699_vm5, %v15002_v14, 0.0 }
0x5110   : > { %8578 = vadd.xlane.f32.xlu1 %v8577_v19  ;;  %v8574_v21 = vsel %vm699_vm5, %v15004_v18, 0.0 }
0x5111   : > { %8575 = vadd.xlane.f32.xlu0 %v8574_v21 }
0x519d   : > { %v8579_v37 = vpop.xlane.xlu1 %8578 }
0x519e   : > { %15005 = vrcp.f32 %v8579_v37  ;;  %v8576_v26 = vpop.xlane.xlu0 %8575 }
0x519f   : > { %15007 = vrcp.f32 %v8576_v26 }
0x51a8   : > { %v15006_v20 = vpop.eup %15005 }
0x51a9   : > { %v15008_v16 = vpop.eup %15007  ;;  %v8583_v41 = vmul.f32 %v15006_v20, %v15002_v14 }
0x51aa   : > { %v8581_v30 = vmul.f32 %v15008_v16, %v15004_v18 }
0x51ac   : > { %v8584_v31 = vpack.c.bf16 %v8583_v41, %v8581_v30 }
0x51ae   : > { %14056 = vmatmul.mubr.msk.bf16.vlgmr.msra.gmra.mrb[216].mxu0 %vm699_vm5, %v8584_v31 }
0x51af   : > { %14068 = vmatpush3.bf16.xpose.msra.mxu0 %v8705_v40  ;;  %14071 = vmatprep.mubr.msk.bf16.mxu0 %vm15154_vm0, %v15153_v1 }
0x51b0   : > { %14069 = vmatprep.subr.bf16.mxu0 %v15153_v1 }
0x51b7   : > { %14070 = vmatpush3.bf16.xpose.msra.mxu0 %v8708_v0 }
0x51b8   : > { %14083 = vmatprep.subr.bf16.mxu0 %v15153_v1 }
0x51be   : > { %14072 = vmatmul.mubr.msk.bf16.vlgmr.msra.gmra.mrb[220].mxu0 %vm609_vm3, %v8290_v27 }
0x51bf   : > { %14084 = vmatpush3.bf16.msra.mxu0 %v14741_v44  ;;  %14087 = vmatprep.mubr.msk.bf16.mxu0 %vm15154_vm0, %v15153_v1 }
0x51c0   : > { %14085 = vmatprep.subr.bf16.mxu0 %v15153_v1 }
0x51c3   : > { %14086 = vmatpush3.bf16.msra.mxu0 %v14742_v3 }
0x51c6   : > { %14088 = vmatmul.mubr.msk.bf16.vlgmr.msra.gmra.mrb[224].mxu0 %vm458_vm2, %v16761_v39 }
0x5281   : > { %v8623_v45 = vpop.f32.mrb[216].mxu0 }
0x5282   : > { %v14057_v2 = vpop.f32.mrb[217].mxu0 }
0x5283   : > { %v8626_v12 = vpop.f32.mrb[218].mxu0 }
0x5284   : > { %v8630_v51 = vpack.c.bf16 %v8626_v12, %v8623_v45  ;;  %v14058_v52 = vpop.f32.mrb[219].mxu0  ;;  %v14753_v45 = vld [vmem:[%s17501_s3 + $0xe0] sm:$0xff]   ;;  %v14754_v12 = vld [vmem:[%s17501_s3 + $0xe8] sm:$0xff]  }
0x5285   : > { %v9105_v2 = vsel %vm609_vm3, %v14753_v45, 0 }
0x5286   : > { %14064 = vmatmul.mubr.msk.bf16.vlgmr.msra.gmra.mrb[212].mxu1 %vm609_vm3, %v8630_v51 }
0x5287   : > { %14076 = vmatpush3.bf16.msra.mxu1 %v14745_v24  ;;  %14079 = vmatprep.mubr.msk.bf16.mxu1 %vm15154_vm0, %v15153_v1  ;;  %v9108_v24 = vsel %vm609_vm3, %v14754_v12, 0 }
0x5288   : > { %14077 = vmatprep.subr.bf16.mxu1 %v15153_v1 }
0x528b   : > { %14078 = vmatpush3.bf16.msra.mxu1 %v14746_v53 }
0x528c   : > { %14091 = vmatprep.subr.bf16.mxu1 %v15153_v1 }
0x528e   : > { %14080 = vmatmul.mubr.msk.bf16.vlgmr.msra.gmra.mrb[216].mxu1 %vm458_vm2, %v16761_v39 }
0x528f   : > { %14092 = vmatpush3.bf16.msra.mxu1 %v14747_v46  ;;  %14095 = vmatprep.mubr.msk.bf16.mxu1 %vm15154_vm0, %v15153_v1 }
0x5290   : > { %14093 = vmatprep.subr.bf16.mxu1 %v15153_v1 }
0x5291   : > { %v8744_v54 = vpop.f32.mrb[220].mxu0 }
0x5292   : > { %v14073_v55 = vpop.f32.mrb[221].mxu0 }
0x5293   : > { %v8747_v57 = vpop.f32.mrb[222].mxu0  ;;  %14094 = vmatpush3.bf16.msra.mxu1 %v14748_v47  ;;  %v14749_v55 = vld [vmem:[%s17501_s3 + $0x30] sm:$0xff]  }
0x5294   : > { %v14074_v27 = vpop.f32.mrb[223].mxu0  ;;  %14112 = vmatprep.subr.bf16.mxu1 %v15153_v1 }
0x5295   : > { %v14750_v27 = vld [vmem:[%s17501_s3 + $0x38] sm:$0xff]  }
0x5296   : > { %14096 = vmatmul.mubr.msk.bf16.vlgmr.msra.gmra.mrb[220].mxu1 %vm458_vm2, %v16761_v39 }
0x5297   : > { %14116 = vmatprep.mubr.msk.bf16.mxu1 %vm15154_vm0, %v15153_v1 }
0x5299   : > { %v8873_v59 = vpop.f32.mrb[224].mxu0 }
0x529a   : > { %v14089_v63 = vpop.f32.mrb[225].mxu0 }
0x529b   : > { %v8876_v32 = vpop.f32.mrb[226].mxu0  ;;  %v14752_v63 = vld [vmem:[%s17501_s3 + $0x78] sm:$0xff]  }
0x529c   : > { %v14493_v50 = vpack.c.bf16 %v8876_v32, %v8873_v59  ;;  %v14090_v60 = vpop.f32.mrb[227].mxu0  ;;  %14113 = vmatpush3.bf16.xpose.msra.mxu1 %v9105_v2  ;;  %v14751_v59 = vld [vmem:[%s17501_s3 + $0x70] sm:$0xff]  }
0x529d   : > { %14114 = vmatprep.subr.bf16.mxu1 %v15153_v1 }
0x529e   : > { %14495 = vmatprep.subr.msk.bf16.mxu0 %vm15369_vm4, %v14493_v50 }
0x529f   : > { %14498 = vmatpush3.bf16.xpose.msk.msra.mxu0 %vm15369_vm4, %v14493_v50 }
0x52a0   : > { %14106 = vmatprep.subr.bf16.mxu0 %v15153_v1 }
0x52a4   : > { %14115 = vmatpush3.bf16.xpose.msra.mxu1 %v9108_v24 }
0x52a5   : > { %14136 = vmatprep.subr.bf16.mxu1 %v15153_v1 }
0x5359   : > { %v8684_v36 = vpop.f32.mrb[212].mxu1 }
0x535a   : > { %v16936_v4 = vadd.f32 %v8744_v54, %v8684_v36  ;;  %v14065_v38 = vpop.f32.mrb[213].mxu1  ;;  %v14755_v36 = vld [vmem:[%s17501_s3 + $0xb0] sm:$0xff]  }
0x535b   : > { %v8687_v5 = vpop.f32.mrb[214].mxu1 }
0x535c   : > { %v16938_v61 = vadd.f32 %v8747_v57, %v8687_v5  ;;  %v14066_v33 = vpop.f32.mrb[215].mxu1 }
0x535d   : > { %v12501_v33 = vld [vmem:[%s17502_s4 + $0x3] ss:$0 sm:$0xff] }
0x5361   : > { %v8820_v6 = vpop.f32.mrb[216].mxu1 }
0x5362   : > { %v8821_v7 = vadd.f32 %v12466_v8, %v8820_v6  ;;  %v14081_v9 = vpop.f32.mrb[217].mxu1 }
0x5363   : > { %v8823_v10 = vpop.f32.mrb[218].mxu1 }
0x5364   : > { %v8824_v11 = vadd.f32 %v12466_v8, %v8823_v10  ;;  %v14082_v17 = vpop.f32.mrb[219].mxu1  ;;  %14103 = vmatprep.mubr.msk.f32.mxu0 %vm609_vm3, %v8821_v7  ;;  %v14756_v8 = vld [vmem:[%s17501_s3 + $0xb8] sm:$0xff]  }
0x5366   : > { %14104 = vmatmul.mubr.msk.f32.vlgmr.msra.gmra.mrb[228].mxu0 %vm609_vm3, %v8824_v11 }
0x5367   : > { %14108 = vmatprep.mubr.msk.bf16.mxu0 %vm15154_vm0, %v15153_v1 }
0x5369   : > { %v8926_v14 = vpop.f32.mrb[220].mxu1 }
0x536a   : > { %v14097_v18 = vpop.f32.mrb[221].mxu1 }
0x536b   : > { %v8929_v19 = vpop.f32.mrb[222].mxu1 }
0x536c   : > { %v9045_v21 = vpack.c.bf16 %v8929_v19, %v8926_v14  ;;  %v14098_v22 = vpop.f32.mrb[223].mxu1 }
0x536e   : > { %14107 = vmatpush3.bf16.msra.mxu0 %v9045_v21 }
0x536f   : > { %14120 = vmatprep.subr.bf16.mxu0 %v15153_v1 }
0x5439   : > { %v14105_v23 = vpop.f32.mrb[228].mxu0 }
0x543a   : > { %v9021_v35 = vmul.f32 0.35355338, %v14105_v23  ;;  %v9011_v28 = vpop.f32.mrb[229].mxu0 }
0x543b   : > { %v9020_v37 = vmul.f32 0.35355338, %v9011_v28 }
0x543c   : > { %v9025_v26 = vsel %vm699_vm5, %v9021_v35, -inf }
0x543d   : > { %9026 = vmax.xlane.f32.xlu1 %v9025_v26  ;;  %v9022_v20 = vsel %vm699_vm5, %v9020_v37, -inf }
0x543e   : > { %9023 = vmax.xlane.f32.xlu0 %v9022_v20 }
0x54ca   : > { %v9027_v15 = vpop.xlane.xlu1 %9026 }
0x54cb   : > { %v9029_v16 = vsub.f32 %v9021_v35, %v9027_v15  ;;  %v9024_v41 = vpop.xlane.xlu0 %9023 }
0x54cc   : > { %v9028_v30 = vsub.f32 %v9020_v37, %v9024_v41 }
0x54cd   : > { %v9032_v31 = vmul.f32 1.442695, %v9029_v16 }
0x54ce   : > { %v9030_v40 = vmul.f32 1.442695, %v9028_v30 }
0x54cf   : > { %15009 = vpow2.f32 %v9032_v31 }
0x54d0   : > { %15011 = vpow2.f32 %v9030_v40 }
0x54d9   : > { %v15010_v42 = vpop.eup %15009 }
0x54da   : > { %v15012_v0 = vpop.eup %15011  ;;  %v9037_v44 = vsel %vm699_vm5, %v15010_v42, 0.0 }
0x54db   : > { %9038 = vadd.xlane.f32.xlu1 %v9037_v44  ;;  %v9034_v3 = vsel %vm699_vm5, %v15012_v0, 0.0 }
0x54dc   : > { %9035 = vadd.xlane.f32.xlu0 %v9034_v3 }
0x5568   : > { %v9039_v51 = vpop.xlane.xlu1 %9038 }
0x5569   : > { %15013 = vrcp.f32 %v9039_v51  ;;  %v9036_v52 = vpop.xlane.xlu0 %9035 }
0x556a   : > { %15015 = vrcp.f32 %v9036_v52 }
0x5573   : > { %v15014_v53 = vpop.eup %15013 }
0x5574   : > { %v15016_v46 = vpop.eup %15015  ;;  %v9043_v47 = vmul.f32 %v15014_v53, %v15010_v42 }
0x5575   : > { %v9041_v54 = vmul.f32 %v15016_v46, %v15012_v0 }
0x5577   : > { %v9044_v57 = vpack.c.bf16 %v9043_v47, %v9041_v54  ;;  %v14757_v47 = vld [vmem:[%s17501_s3 + $0xf0] sm:$0xff]  }
0x5578   : > { %v9507_v54 = vsel %vm609_vm3, %v14757_v47, 0 }
0x5579   : > { %14109 = vmatmul.mubr.msk.bf16.vlgmr.msra.gmra.mrb[232].mxu0 %vm699_vm5, %v9044_v57 }
0x557a   : > { %14121 = vmatpush3.bf16.msra.mxu0 %v14749_v55  ;;  %14124 = vmatprep.mubr.msk.bf16.mxu0 %vm15154_vm0, %v15153_v1  ;;  %v14758_v55 = vld [vmem:[%s17501_s3 + $0xf8] sm:$0xff]  }
0x557b   : > { %14122 = vmatprep.subr.bf16.mxu0 %v15153_v1  ;;  %v9510_v57 = vsel %vm609_vm3, %v14758_v55, 0 }
0x557e   : > { %14123 = vmatpush3.bf16.msra.mxu0 %v14750_v27 }
0x557f   : > { %14128 = vmatprep.subr.bf16.mxu0 %v15153_v1 }
0x5581   : > { %14125 = vmatmul.mubr.msk.bf16.vlgmr.msra.gmra.mrb[236].mxu0 %vm458_vm2, %v16761_v39 }
0x5582   : > { %14129 = vmatpush3.bf16.msra.mxu0 %v14751_v59  ;;  %14132 = vmatprep.mubr.msk.bf16.mxu0 %vm15154_vm0, %v15153_v1 }
0x5583   : > { %14130 = vmatprep.subr.bf16.mxu0 %v15153_v1 }
0x5586   : > { %14131 = vmatpush3.bf16.msra.mxu0 %v14752_v63 }
0x5589   : > { %14133 = vmatmul.mubr.msk.bf16.vlgmr.msra.gmra.mrb[240].mxu0 %vm458_vm2, %v16761_v39 }
0x564c   : > { %v9083_v32 = vpop.f32.mrb[232].mxu0 }
0x564d   : > { %v14110_v50 = vpop.f32.mrb[233].mxu0 }
0x564e   : > { %v9086_v60 = vpop.f32.mrb[234].mxu0 }
0x564f   : > { %v9090_v38 = vpack.c.bf16 %v9086_v60, %v9083_v32  ;;  %v14111_v5 = vpop.f32.mrb[235].mxu0 }
0x5651   : > { %14117 = vmatmul.mubr.msk.bf16.vlgmr.msra.gmra.mrb[224].mxu1 %vm609_vm3, %v9090_v38 }
0x5652   : > { %14137 = vmatpush3.bf16.msra.mxu1 %v14755_v36  ;;  %14140 = vmatprep.mubr.msk.bf16.mxu1 %vm15154_vm0, %v15153_v1 }
0x5653   : > { %14138 = vmatprep.subr.bf16.mxu1 %v15153_v1 }
0x5654   : > { %v9222_v6 = vpop.f32.mrb[236].mxu0 }
0x5655   : > { %v9223_v7 = vadd.f32 %v12501_v33, %v9222_v6  ;;  %v14126_v9 = vpop.f32.mrb[237].mxu0 }
0x5656   : > { %v9225_v10 = vpop.f32.mrb[238].mxu0  ;;  %14139 = vmatpush3.bf16.msra.mxu1 %v14756_v8 }
0x5657   : > { %v14127_v11 = vpop.f32.mrb[239].mxu0  ;;  %14148 = vmatprep.mubr.msk.f32.mxu0 %vm609_vm3, %v9223_v7  ;;  %14151 = vmatprep.subr.bf16.mxu1 %v15153_v1  ;;  %v9226_v22 = vadd.f32 %v12501_v33, %v9225_v10  ;;  %v17043_v7 = vld [vmem:[%s17503_s5] sm:$0xff] }
0x5658   : > { %v9558_v9 = vrot.slane %v17043_v7, %v15607_v13 }
0x5659   : > { %14141 = vmatmul.mubr.msk.bf16.vlgmr.msra.gmra.mrb[228].mxu1 %vm458_vm2, %v16761_v39 }
0x565a   : > { %14153 = vmatprep.mubr.msk.bf16.mxu1 %vm15154_vm0, %v15153_v1 }
0x565c   : > { %v9275_v17 = vpop.f32.mrb[240].mxu0 }
0x565d   : > { %v14134_v14 = vpop.f32.mrb[241].mxu0 }
0x565e   : > { %v9278_v18 = vpop.f32.mrb[242].mxu0 }
0x565f   : > { %v14499_v19 = vpack.c.bf16 %v9278_v18, %v9275_v17  ;;  %v14135_v21 = vpop.f32.mrb[243].mxu0 }
0x5661   : > { %14501 = vmatprep.subr.msk.bf16.mxu0 %vm15369_vm4, %v14499_v19 }
0x5662   : > { %14504 = vmatpush3.bf16.xpose.msk.msra.mxu0 %vm15369_vm4, %v14499_v19 }
0x5663   : > { %14157 = vmatprep.subr.bf16.mxu0 %v15153_v1 }
0x5669   : > { %14149 = vmatmul.mubr.msk.f32.vlgmr.msra.gmra.mrb[230].mxu0 %vm609_vm3, %v9226_v22 }
0x566a   : > { %14161 = vmatprep.mubr.msk.bf16.mxu0 %vm15154_vm0, %v15153_v1  ;;  %14158 = vmatpush3.bf16.xpose.msra.mxu0 %v9507_v54 }
0x566b   : > { %14159 = vmatprep.subr.bf16.mxu0 %v15153_v1 }
0x5672   : > { %14160 = vmatpush3.bf16.xpose.msra.mxu0 %v9510_v57 }
0x5673   : > { %14181 = vmatprep.subr.bf16.mxu0 %v15153_v1 }
0x5724   : > { %v9144_v39 = vpop.f32.mrb[224].mxu1 }
0x5725   : > { %v17014_v23 = vadd.f32 %v9144_v39, %v16936_v4  ;;  %v14118_v35 = vpop.f32.mrb[225].mxu1 }
0x5726   : > { %v9147_v28 = vpop.f32.mrb[226].mxu1 }
0x5727   : > { %v17017_v37 = vadd.f32 %v9147_v28, %v16938_v61  ;;  %v14119_v26 = vpop.f32.mrb[227].mxu1 }
0x572c   : > { %v9328_v20 = vpop.f32.mrb[228].mxu1 }
0x572d   : > { %v14142_v15 = vpop.f32.mrb[229].mxu1 }
0x572e   : > { %v9331_v16 = vpop.f32.mrb[230].mxu1 }
0x572f   : > { %v9447_v41 = vpack.c.bf16 %v9331_v16, %v9328_v20  ;;  %v14143_v30 = vpop.f32.mrb[231].mxu1 }
0x5731   : > { %14152 = vmatpush3.bf16.msra.mxu1 %v9447_v41 }
0x5732   : > { %14165 = vmatprep.subr.bf16.mxu1 %v15153_v1 }
0x573c   : > { %v14150_v31 = vpop.f32.mrb[230].mxu0 }
0x573d   : > { %v9423_v40 = vmul.f32 0.35355338, %v14150_v31  ;;  %v9413_v42 = vpop.f32.mrb[231].mxu0 }
0x573e   : > { %v9422_v0 = vmul.f32 0.35355338, %v9413_v42  ;;  %v14760_v42 = vld [vmem:[%s17504_s6 + $0x8] sm:$0xff]  }
0x573f   : > { %v9427_v4 = vsel %vm699_vm5, %v9423_v40, -inf }
0x5740   : > { %9428 = vmax.xlane.f32.xlu1 %v9427_v4  ;;  %v9424_v44 = vsel %vm699_vm5, %v9422_v0, -inf }
0x5741   : > { %9425 = vmax.xlane.f32.xlu0 %v9424_v44 }
0x57cd   : > { %v9429_v61 = vpop.xlane.xlu1 %9428 }
0x57ce   : > { %v9431_v3 = vsub.f32 %v9423_v40, %v9429_v61  ;;  %v9426_v45 = vpop.xlane.xlu0 %9425 }
0x57cf   : > { %v9430_v2 = vsub.f32 %v9422_v0, %v9426_v45 }
0x57d0   : > { %v9434_v12 = vmul.f32 1.442695, %v9431_v3 }
0x57d1   : > { %v9432_v24 = vmul.f32 1.442695, %v9430_v2  ;;  %v9592_v2 = vrot.slane %v17043_v7, %v15633_v48 }
0x57d2   : > { %15017 = vpow2.f32 %v9434_v12 }
0x57d3   : > { %15019 = vpow2.f32 %v9432_v24 }
0x57dc   : > { %v15018_v51 = vpop.eup %15017 }
0x57dd   : > { %v15020_v52 = vpop.eup %15019  ;;  %v9439_v53 = vsel %vm699_vm5, %v15018_v51, 0.0 }
0x57de   : > { %9440 = vadd.xlane.f32.xlu1 %v9439_v53  ;;  %v9436_v46 = vsel %vm699_vm5, %v15020_v52, 0.0 }
0x57df   : > { %9437 = vadd.xlane.f32.xlu0 %v9436_v46  ;;  %v9598_v46 = vrot.slane %v17043_v7, %v15638_v49 }
0x586b   : > { %v9441_v27 = vpop.xlane.xlu1 %9440 }
0x586c   : > { %15021 = vrcp.f32 %v9441_v27  ;;  %v9438_v59 = vpop.xlane.xlu0 %9437  ;;  %v14761_v27 = vld [vmem:[%s17505_s7] sm:$0xff]  }
0x586d   : > { %15023 = vrcp.f32 %v9438_v59  ;;  %v14762_v59 = vld [vmem:[%s17505_s7 + $0x8] sm:$0xff]  }
0x5876   : > { %v15022_v63 = vpop.eup %15021 }
0x5877   : > { %v15024_v32 = vpop.eup %15023  ;;  %v9445_v50 = vmul.f32 %v15022_v63, %v15018_v51  ;;  %v9609_v63 = vrot.slane %v17043_v7, %v15654_v62 }
0x5878   : > { %v9443_v60 = vmul.f32 %v15024_v32, %v15020_v52 }
0x587a   : > { %v9446_v36 = vpack.c.bf16 %v9445_v50, %v9443_v60 }
0x587c   : > { %14154 = vmatmul.mubr.msk.bf16.vlgmr.msra.gmra.mrb[232].mxu1 %vm699_vm5, %v9446_v36 }
0x587d   : > { %14169 = vmatprep.mubr.msk.bf16.mxu1 %vm15154_vm0, %v15153_v1 }
0x594f   : > { %v9485_v38 = vpop.f32.mrb[232].mxu1 }
0x5950   : > { %v14155_v5 = vpop.f32.mrb[233].mxu1 }
0x5951   : > { %v9488_v33 = vpop.f32.mrb[234].mxu1 }
0x5952   : > { %v9492_v8 = vpack.c.bf16 %v9488_v33, %v9485_v38  ;;  %v14156_v6 = vpop.f32.mrb[235].mxu1 }
0x5954   : > { %14162 = vmatmul.mubr.msk.bf16.vlgmr.msra.gmra.mrb[244].mxu0 %vm609_vm3, %v9492_v8 }
0x5955   : > { %14185 = vmatprep.mubr.msk.bf16.mxu0 %vm15154_vm0, %v15153_v1 }
0x5a27   : > { %v9546_v10 = vpop.f32.mrb[244].mxu0 }
0x5a28   : > { %v9553_v11 = vadd.f32 %v9546_v10, %v17014_v23  ;;  %v14163_v17 = vpop.f32.mrb[245].mxu0 }
0x5a29   : > { %v9549_v14 = vpop.f32.mrb[246].mxu0 }
0x5a2a   : > { %v9559_v18 = vadd.f32 %v9558_v9, %v9553_v11  ;;  %v9554_v19 = vadd.f32 %v9549_v14, %v17017_v37  ;;  %v14164_v21 = vpop.f32.mrb[247].mxu0 }
0x5a2c   : > { %v9560_v22 = vadd.f32 %v9558_v9, %v9554_v19  ;;  %v9561_v39 = vadd.f32 %v9559_v18, %v16749_v29 }
0x5a2e   : > { %v9563_v35 = vsel %vm458_vm2, %v9561_v39, 0.0  ;;  %v9562_v28 = vadd.f32 %v9560_v22, %v16751_v34  ;;  %v14759_v34 = vld [vmem:[%s17504_s6] sm:$0xff]   ;;  %v9684_v22 = vrot.slane %v17043_v7, %v15662_v25 }
0x5a2f   : > { %9564 = vadd.xlane.f32.xlu0 %v9563_v35  ;;  %14166 = vmatpush3.bf16.msra.mxu1 %v14759_v34 }
0x5a30   : > { %v9566_v26 = vsel %vm458_vm2, %v9562_v28, 0.0  ;;  %14167 = vmatprep.subr.bf16.mxu1 %v15153_v1 }
0x5a31   : > { %9567 = vadd.xlane.f32.xlu1 %v9566_v26 }
0x5a33   : > { %14168 = vmatpush3.bf16.msra.mxu1 %v14760_v42 }
0x5a34   : > { %14173 = vmatprep.subr.bf16.mxu1 %v15153_v1 }
0x5abc   : > { %v9565_v20 = vpop.xlane.xlu0 %9564 }
0x5abd   : > { %v9569_v15 = vmul.f32 0.03125, %v9565_v20 }
0x5abe   : > { %v9568_v23 = vpop.xlane.xlu1 %9567 }
0x5abf   : > { %v9571_v16 = vsub.f32 %v9561_v39, %v9569_v15  ;;  %v9570_v41 = vmul.f32 0.03125, %v9568_v23 }
0x5ac1   : > { %v9572_v30 = vsub.f32 %v9562_v28, %v9570_v41  ;;  %v9573_v31 = vmul.f32 %v9571_v16, %v9571_v16 }
0x5ac3   : > { %v9575_v37 = vsel %vm458_vm2, %v9573_v31, 0.0  ;;  %v9574_v40 = vmul.f32 %v9572_v30, %v9572_v30 }
0x5ac4   : > { %9576 = vadd.xlane.f32.xlu0 %v9575_v37 }
0x5ac5   : > { %v9578_v29 = vsel %vm458_vm2, %v9574_v40, 0.0 }
0x5ac6   : > { %9579 = vadd.xlane.f32.xlu1 %v9578_v29 }
0x5b51   : > { %v9577_v0 = vpop.xlane.xlu0 %9576 }
0x5b52   : > { %v9581_v4 = vmul.f32 0.03125, %v9577_v0 }
0x5b53   : > { %v9580_v44 = vpop.xlane.xlu1 %9579 }
0x5b54   : > { %v9583_v61 = vadd.f32 1e-06, %v9581_v4  ;;  %v9582_v3 = vmul.f32 0.03125, %v9580_v44 }
0x5b56   : > { %15025 = vrsqrt.f32 %v9583_v61  ;;  %v9584_v45 = vadd.f32 1e-06, %v9582_v3  ;;  %v14763_v3 = vld [vmem:[%s17501_s3 + $0x100] sm:$0xff]  }
0x5b57   : > { %14182 = vmatpush3.bf16.msra.mxu0 %v14763_v3 }
0x5b58   : > { %15027 = vrsqrt.f32 %v9584_v45  ;;  %v14764_v45 = vld [vmem:[%s17501_s3 + $0x140] sm:$0xff]   ;;  %14183 = vmatprep.subr.bf16.mxu0 %v15153_v1 }
0x5b60   : > { %v15026_v12 = vpop.eup %15025 }
0x5b61   : > { %v9587_v24 = vmul.f32 %v15026_v12, %v9571_v16  ;;  %v14766_v12 = vld [vmem:[%s17501_s3 + $0x148] sm:$0xff]  }
0x5b62   : > { %v15028_v51 = vpop.eup %15027 }
0x5b63   : > { %v9593_v52 = vmul.f32 %v9592_v2, %v9587_v24  ;;  %v9588_v53 = vmul.f32 %v15028_v51, %v9572_v30 }
0x5b65   : > { %v9594_v47 = vmul.f32 %v9592_v2, %v9588_v53  ;;  %v9599_v54 = vadd.f32 %v9598_v46, %v9593_v52  ;;  %v14765_v2 = vld [vmem:[%s17501_s3 + $0x108] sm:$0xff]  }
0x5b66   : > { %14184 = vmatpush3.bf16.msra.mxu0 %v14765_v2 }
0x5b67   : > { %v9600_v55 = vadd.f32 %v9598_v46, %v9594_v47  ;;  %14197 = vmatprep.subr.bf16.mxu0 %v15153_v1 }
0x5b69   : > { %v9601_v57 = vpack.c.bf16 %v9600_v55, %v9599_v54 }
0x5b6b   : > { %14170 = vmatmul.mubr.msk.bf16.vlgmr.msra.gmra.mrb[236].mxu1 %vm458_vm2, %v9601_v57 }
0x5b6c   : > { %14177 = vmatprep.mubr.msk.bf16.mxu1 %vm15154_vm0, %v15153_v1  ;;  %14174 = vmatpush3.bf16.msra.mxu1 %v14761_v27 }
0x5b6d   : > { %14175 = vmatprep.subr.bf16.mxu1 %v15153_v1 }
0x5b70   : > { %14176 = vmatpush3.bf16.msra.mxu1 %v14762_v59  ;;  %v9778_v59 = vrot.slane %v17043_v7, %v15691_v58 }
0x5b71   : > { %14189 = vmatprep.subr.bf16.mxu1 %v15153_v1 }
0x5c3e   : > { %v9659_v32 = vpop.f32.mrb[236].mxu1 }
0x5c3f   : > { %v9660_v50 = vadd.f32 %v9659_v32, %v9609_v63  ;;  %v14171_v60 = vpop.f32.mrb[237].mxu1 }
0x5c40   : > { %v9662_v36 = vpop.f32.mrb[238].mxu1 }
0x5c41   : > { %v9668_v38 = vmul.f32 0.70710677, %v9660_v50  ;;  %v9663_v5 = vadd.f32 %v9662_v36, %v9609_v63  ;;  %v14172_v33 = vpop.f32.mrb[239].mxu1  ;;  %v9666_v11 = vmul.f32 0.5, %v9660_v50 }
0x5c42   : > { %v14769_v33 = vld [vmem:[%s17501_s3 + $0x110] sm:$0xff]  }
0x5c43   : > { %15029 = verf.f32 %v9668_v38  ;;  %v9669_v8 = vmul.f32 0.70710677, %v9663_v5  ;;  %v9667_v17 = vmul.f32 0.5, %v9663_v5  ;;  %v14767_v38 = vld [vmem:[%s17501_s3 + $0x180] sm:$0xff]  }
0x5c45   : > { %15031 = verf.f32 %v9669_v8  ;;  %v14770_v8 = vld [vmem:[%s17501_s3 + $0x118] sm:$0xff]  }
0x5c4d   : > { %v15030_v6 = vpop.eup %15029 }
0x5c4e   : > { %v9672_v9 = vadd.f32 1.0, %v15030_v6  ;;  %v14771_v6 = vld [vmem:[%s17501_s3 + $0x190] sm:$0xff]  }
0x5c4f   : > { %v15032_v10 = vpop.eup %15031 }
0x5c50   : > { %v9673_v14 = vadd.f32 1.0, %v15032_v10  ;;  %v9674_v18 = vmul.f32 %v9672_v9, %v9666_v11  ;;  %v14772_v9 = vld [vmem:[%s17501_s3 + $0x198] sm:$0xff]   ;;  %v12543_v10 = vld [vmem:[%s17502_s4 + $0x4] ss:$0 sm:$0xff] }
0x5c52   : > { %v9675_v19 = vmul.f32 %v9673_v14, %v9667_v17 }
0x5c54   : > { %v9676_v21 = vpack.c.bf16 %v9675_v19, %v9674_v18 }
0x5c56   : > { %14178 = vmatmul.mubr.msk.bf16.vlgmr.msra.gmra.mrb[240].mxu1 %vm458_vm2, %v9676_v21 }
0x5c57   : > { %14193 = vmatprep.mubr.msk.bf16.mxu1 %vm15154_vm0, %v15153_v1  ;;  %14190 = vmatpush3.bf16.msra.mxu1 %v14764_v45 }
0x5c58   : > { %14191 = vmatprep.subr.bf16.mxu1 %v15153_v1 }
0x5c5b   : > { %14192 = vmatpush3.bf16.msra.mxu1 %v14766_v12 }
0x5d29   : > { %v9734_v39 = vpop.f32.mrb[240].mxu1 }
0x5d2a   : > { %v9735_v35 = vadd.f32 %v9734_v39, %v9684_v22  ;;  %v14179_v28 = vpop.f32.mrb[241].mxu1 }
0x5d2b   : > { %v9737_v26 = vpop.f32.mrb[242].mxu1 }
0x5d2c   : > { %v9741_v20 = vadd.f32 %v9735_v35, %v9599_v54  ;;  %v9738_v15 = vadd.f32 %v9737_v26, %v9684_v22  ;;  %v14180_v23 = vpop.f32.mrb[243].mxu1  ;;  %v9772_v54 = vrot.slane %v17043_v7, %v15686_v56  ;;  %v14768_v7 = vld [vmem:[%s17501_s3 + $0x188] sm:$0xff]  }
0x5d2e   : > { %v9742_v16 = vadd.f32 %v9738_v15, %v9600_v55  ;;  %v9743_v41 = vsel %vm458_vm2, %v9741_v20, 0.0 }
0x5d2f   : > { %9744 = vadd.xlane.f32.xlu0 %v9743_v41 }
0x5d30   : > { %v9746_v30 = vsel %vm458_vm2, %v9742_v16, 0.0 }
0x5d31   : > { %9747 = vadd.xlane.f32.xlu1 %v9746_v30 }
0x5dbc   : > { %v9745_v31 = vpop.xlane.xlu0 %9744 }
0x5dbd   : > { %v9749_v37 = vmul.f32 0.03125, %v9745_v31 }
0x5dbe   : > { %v9748_v40 = vpop.xlane.xlu1 %9747 }
0x5dbf   : > { %v9751_v29 = vsub.f32 %v9741_v20, %v9749_v37  ;;  %v9750_v34 = vmul.f32 0.03125, %v9748_v40  ;;  %v12575_v37 = vld [vmem:[%s17502_s4 + $0x5] ss:$0 sm:$0xff] }
0x5dc1   : > { %v9752_v42 = vsub.f32 %v9742_v16, %v9750_v34  ;;  %v9753_v0 = vmul.f32 %v9751_v29, %v9751_v29 }
0x5dc3   : > { %v9755_v4 = vsel %vm458_vm2, %v9753_v0, 0.0  ;;  %v9754_v44 = vmul.f32 %v9752_v42, %v9752_v42 }
0x5dc4   : > { %9756 = vadd.xlane.f32.xlu0 %v9755_v4 }
0x5dc5   : > { %v9758_v61 = vsel %vm458_vm2, %v9754_v44, 0.0 }
0x5dc6   : > { %9759 = vadd.xlane.f32.xlu1 %v9758_v61 }
0x5e51   : > { %v9757_v24 = vpop.xlane.xlu0 %9756 }
0x5e52   : > { %v9761_v51 = vmul.f32 0.03125, %v9757_v24 }
0x5e53   : > { %v9760_v52 = vpop.xlane.xlu1 %9759 }
0x5e54   : > { %v9763_v53 = vadd.f32 1e-06, %v9761_v51  ;;  %v9762_v46 = vmul.f32 0.03125, %v9760_v52 }
0x5e56   : > { %15033 = vrsqrt.f32 %v9763_v53  ;;  %v9764_v47 = vadd.f32 1e-06, %v9762_v46 }
0x5e58   : > { %15035 = vrsqrt.f32 %v9764_v47 }
0x5e60   : > { %v15034_v55 = vpop.eup %15033 }
0x5e61   : > { %v9767_v57 = vmul.f32 %v15034_v55, %v9751_v29 }
0x5e62   : > { %v15036_v27 = vpop.eup %15035 }
0x5e63   : > { %v9773_v63 = vmul.f32 %v9772_v54, %v9767_v57  ;;  %v9768_v32 = vmul.f32 %v15036_v27, %v9752_v42 }
0x5e65   : > { %v9774_v50 = vmul.f32 %v9772_v54, %v9768_v32  ;;  %v17108_v60 = vadd.f32 %v9778_v59, %v9773_v63 }
0x5e67   : > { %v17110_v36 = vadd.f32 %v9778_v59, %v9774_v50 }
0x5e69   : > { %v17117_v5 = vpack.c.bf16 %v17110_v36, %v17108_v60 }
0x5e6b   : > { %14186 = vmatmul.mubr.msk.bf16.vlgmr.msra.gmra.mrb[248].mxu0 %vm458_vm2, %v17117_v5  ;;  %14194 = vmatmul.mubr.msk.bf16.vlgmr.msra.gmra.mrb[244].mxu1 %vm458_vm2, %v17117_v5 }
0x5e6c   : > { %14198 = vmatpush3.bf16.msra.mxu0 %v14767_v38  ;;  %14201 = vmatprep.mubr.msk.bf16.mxu0 %vm15154_vm0, %v15153_v1 }
0x5e6d   : > { %14199 = vmatprep.subr.bf16.mxu0 %v15153_v1 }
0x5e70   : > { %14200 = vmatpush3.bf16.msra.mxu0 %v14768_v7 }
0x5e71   : > { %14218 = vmatprep.subr.bf16.mxu0 %v15153_v1 }
0x5e73   : > { %14202 = vmatmul.mubr.msk.bf16.vlgmr.msra.gmra.mrb[252].mxu0 %vm458_vm2, %v17117_v5 }
0x5e74   : > { %14219 = vmatpush3.bf16.msra.mxu0 %v14769_v33  ;;  %14222 = vmatprep.mubr.msk.bf16.mxu0 %vm15154_vm0, %v15153_v1 }
0x5e75   : > { %14220 = vmatprep.subr.bf16.mxu0 %v15153_v1 }
0x5e78   : > { %14221 = vmatpush3.bf16.msra.mxu0 %v14770_v8 }
0x5e79   : > { %14234 = vmatprep.subr.bf16.mxu0 %v15153_v1 }
0x5e7b   : > { %14223 = vmatmul.mubr.msk.bf16.vlgmr.msra.gmra.mrb[0].mxu0 %vm458_vm2, %v17117_v5 }
0x5e7c   : > { %14235 = vmatpush3.bf16.msra.mxu0 %v14771_v6  ;;  %14238 = vmatprep.mubr.msk.bf16.mxu0 %vm15154_vm0, %v15153_v1  ;;  %v14773_v6 = vld [vmem:[%s17501_s3 + $0x150] sm:$0xff]  }
0x5e7d   : > { %14236 = vmatprep.subr.bf16.mxu0 %v15153_v1 }
0x5e80   : > { %14237 = vmatpush3.bf16.msra.mxu0 %v14772_v9 }
0x5e81   : > { %14249 = vmatprep.subr.bf16.mxu0 %v15153_v1 }
0x5e83   : > { %14239 = vmatmul.mubr.msk.bf16.vlgmr.msra.gmra.mrb[4].mxu0 %vm458_vm2, %v17117_v5 }
0x5e84   : > { %14251 = vmatprep.mubr.msk.bf16.mxu0 %vm15154_vm0, %v15153_v1 }
0x5f3e   : > { %v9855_v11 = vpop.f32.mrb[248].mxu0  ;;  %v9908_v17 = vpop.f32.mrb[244].mxu1 }
0x5f3f   : > { %v9856_v14 = vadd.f32 %v12543_v10, %v9855_v11  ;;  %v14187_v18 = vpop.f32.mrb[249].mxu0  ;;  %v14195_v19 = vpop.f32.mrb[245].mxu1 }
0x5f40   : > { %v9858_v21 = vpop.f32.mrb[250].mxu0  ;;  %v9911_v22 = vpop.f32.mrb[246].mxu1 }
0x5f41   : > { %v14505_v39 = vpack.c.bf16 %v9911_v22, %v9908_v17  ;;  %v14188_v35 = vpop.f32.mrb[251].mxu0  ;;  %v14196_v28 = vpop.f32.mrb[247].mxu1  ;;  %14209 = vmatprep.mubr.msk.f32.mxu1 %vm609_vm3, %v9856_v14  ;;  %v9859_v23 = vadd.f32 %v12543_v10, %v9858_v21  ;;  %v14774_v10 = vld [vmem:[%s17501_s3 + $0x158] sm:$0xff]  }
0x5f43   : > { %14507 = vmatprep.subr.msk.bf16.mxu1 %vm15369_vm4, %v14505_v39 }
0x5f44   : > { %14510 = vmatpush3.bf16.xpose.msk.msra.mxu1 %vm15369_vm4, %v14505_v39 }
0x5f45   : > { %14212 = vmatprep.subr.bf16.mxu1 %v15153_v1 }
0x5f46   : > { %v9961_v26 = vpop.f32.mrb[252].mxu0 }
0x5f47   : > { %v14203_v20 = vpop.f32.mrb[253].mxu0 }
0x5f48   : > { %v9964_v15 = vpop.f32.mrb[254].mxu0 }
0x5f49   : > { %v10080_v16 = vpack.c.bf16 %v9964_v15, %v9961_v26  ;;  %v14204_v41 = vpop.f32.mrb[255].mxu0 }
0x5f4b   : > { %14210 = vmatmul.mubr.msk.f32.vlgmr.msra.gmra.mrb[248].mxu1 %vm609_vm3, %v9859_v23 }
0x5f4c   : > { %14213 = vmatpush3.bf16.msra.mxu1 %v10080_v16  ;;  %14214 = vmatprep.mubr.msk.bf16.mxu1 %vm15154_vm0, %v15153_v1 }
0x5f4d   : > { %14226 = vmatprep.subr.bf16.mxu1 %v15153_v1 }
0x5f4e   : > { %v10195_v30 = vpop.f32.mrb[0].mxu0 }
0x5f4f   : > { %v14224_v31 = vpop.f32.mrb[1].mxu0  ;;  %v10196_v11 = vadd.f32 %v12575_v37, %v10195_v30 }
0x5f50   : > { %v10198_v40 = vpop.f32.mrb[2].mxu0 }
0x5f51   : > { %v17174_v29 = vadd.f32 %v12575_v37, %v10198_v40  ;;  %v14225_v34 = vpop.f32.mrb[3].mxu0 }
0x5f56   : > { %v10301_v42 = vpop.f32.mrb[4].mxu0 }
0x5f57   : > { %v14240_v0 = vpop.f32.mrb[5].mxu0 }
0x5f58   : > { %v10304_v4 = vpop.f32.mrb[6].mxu0 }
0x5f59   : > { %v10420_v44 = vpack.c.bf16 %v10304_v4, %v10301_v42  ;;  %v14241_v61 = vpop.f32.mrb[7].mxu0 }
0x5f5b   : > { %14250 = vmatpush3.bf16.msra.mxu0 %v10420_v44 }
0x5f5c   : > { %14263 = vmatprep.subr.bf16.mxu0 %v15153_v1 }
0x601e   : > { %v14211_v3 = vpop.f32.mrb[248].mxu1 }
0x601f   : > { %v10056_v45 = vmul.f32 0.35355338, %v14211_v3  ;;  %v10046_v2 = vpop.f32.mrb[249].mxu1  ;;  %v14779_v3 = vld [vmem:[%s17501_s3 + $0x1d0] sm:$0xff]  }
0x6020   : > { %v10055_v12 = vmul.f32 0.35355338, %v10046_v2  ;;  %v14780_v2 = vld [vmem:[%s17501_s3 + $0x1d8] sm:$0xff]  }
0x6021   : > { %v10060_v24 = vsel %vm699_vm5, %v10056_v45, -inf }
0x6022   : > { %10061 = vmax.xlane.f32.xlu1 %v10060_v24  ;;  %v10057_v51 = vsel %vm699_vm5, %v10055_v12, -inf }
0x6023   : > { %10058 = vmax.xlane.f32.xlu0 %v10057_v51 }
0x60af   : > { %v10062_v52 = vpop.xlane.xlu1 %10061 }
0x60b0   : > { %v10064_v53 = vsub.f32 %v10056_v45, %v10062_v52  ;;  %v10059_v46 = vpop.xlane.xlu0 %10058  ;;  %v10480_v45 = vsel %vm609_vm3, %v14779_v3, 0 }
0x60b1   : > { %v10063_v47 = vsub.f32 %v10055_v12, %v10059_v46  ;;  %v10483_v12 = vsel %vm609_vm3, %v14780_v2, 0 }
0x60b2   : > { %v10067_v54 = vmul.f32 1.442695, %v10064_v53  ;;  %v14775_v53 = vld [vmem:[%s17501_s3 + $0x1c0] sm:$0xff]  }
0x60b3   : > { %v10065_v55 = vmul.f32 1.442695, %v10063_v47 }
0x60b4   : > { %15037 = vpow2.f32 %v10067_v54 }
0x60b5   : > { %15039 = vpow2.f32 %v10065_v55 }
0x60be   : > { %v15038_v57 = vpop.eup %15037 }
0x60bf   : > { %v15040_v27 = vpop.eup %15039  ;;  %v10072_v59 = vsel %vm699_vm5, %v15038_v57, 0.0 }
0x60c0   : > { %10073 = vadd.xlane.f32.xlu1 %v10072_v59  ;;  %v10069_v63 = vsel %vm699_vm5, %v15040_v27, 0.0 }
0x60c1   : > { %10070 = vadd.xlane.f32.xlu0 %v10069_v63  ;;  %v14777_v63 = vld [vmem:[%s17501_s3 + $0x160] sm:$0xff]  }
0x614d   : > { %v10074_v32 = vpop.xlane.xlu1 %10073 }
0x614e   : > { %15041 = vrcp.f32 %v10074_v32  ;;  %v10071_v50 = vpop.xlane.xlu0 %10070  ;;  %v14778_v32 = vld [vmem:[%s17501_s3 + $0x168] sm:$0xff]  }
0x614f   : > { %15043 = vrcp.f32 %v10071_v50 }
0x6158   : > { %v15042_v38 = vpop.eup %15041 }
0x6159   : > { %v15044_v7 = vpop.eup %15043  ;;  %v10078_v33 = vmul.f32 %v15042_v38, %v15038_v57  ;;  %v10540_v57 = vsel %vm609_vm3, %v14775_v53, 0 }
0x615a   : > { %v10076_v8 = vmul.f32 %v15044_v7, %v15040_v27  ;;  %v14776_v27 = vld [vmem:[%s17501_s3 + $0x1c8] sm:$0xff]  }
0x615b   : > { %v10543_v59 = vsel %vm609_vm3, %v14776_v27, 0 }
0x615c   : > { %v10079_v9 = vpack.c.bf16 %v10078_v33, %v10076_v8  ;;  %v14781_v33 = vld [vmem:[%s17501_s3 + $0x120] sm:$0xff]  }
0x615e   : > { %14215 = vmatmul.mubr.msk.bf16.vlgmr.msra.gmra.mrb[252].mxu1 %vm699_vm5, %v10079_v9  ;;  %v14782_v9 = vld [vmem:[%s17501_s3 + $0x128] sm:$0xff]  }
0x615f   : > { %14227 = vmatpush3.bf16.msra.mxu1 %v14773_v6  ;;  %14230 = vmatprep.mubr.msk.bf16.mxu1 %vm15154_vm0, %v15153_v1 }
0x6160   : > { %14228 = vmatprep.subr.bf16.mxu1 %v15153_v1 }
0x6163   : > { %14229 = vmatpush3.bf16.msra.mxu1 %v14774_v10  ;;  %v14783_v10 = vld [vmem:[%s17501_s3 + $0x1a0] sm:$0xff]  }
0x6166   : > { %14231 = vmatmul.mubr.msk.bf16.vlgmr.msra.gmra.mrb[0].mxu1 %vm458_vm2, %v17117_v5 }
0x6167   : > { %14246 = vmatprep.mubr.msk.f32.mxu1 %vm609_vm3, %v10196_v11  ;;  %v14784_v11 = vld [vmem:[%s17501_s3 + $0x1a8] sm:$0xff]  }
0x6231   : > { %v17194_v17 = vpop.f32.mrb[252].mxu1 }
0x6232   : > { %v14216_v14 = vpop.f32.mrb[253].mxu1 }
0x6233   : > { %v17196_v18 = vpop.f32.mrb[254].mxu1 }
0x6234   : > { %v10125_v19 = vpack.c.bf16 %v17196_v18, %v17194_v17  ;;  %v14217_v21 = vpop.f32.mrb[255].mxu1 }
0x6239   : > { %v10248_v22 = vpop.f32.mrb[0].mxu1 }
0x623a   : > { %v14232_v39 = vpop.f32.mrb[1].mxu1 }
0x623b   : > { %v10251_v35 = vpop.f32.mrb[2].mxu1 }
0x623c   : > { %v14511_v28 = vpack.c.bf16 %v10251_v35, %v10248_v22  ;;  %v14233_v26 = vpop.f32.mrb[3].mxu1 }
0x623e   : > { %14513 = vmatprep.subr.msk.bf16.mxu1 %vm15369_vm4, %v14511_v28 }
0x623f   : > { %14516 = vmatpush3.bf16.xpose.msk.msra.mxu1 %vm15369_vm4, %v14511_v28 }
0x6240   : > { %14255 = vmatprep.subr.bf16.mxu1 %v15153_v1 }
0x6246   : > { %14247 = vmatmul.mubr.msk.f32.vlgmr.msra.gmra.mrb[250].mxu1 %vm609_vm3, %v17174_v29 }
0x6247   : > { %14259 = vmatprep.mubr.msk.bf16.mxu1 %vm15154_vm0, %v15153_v1  ;;  %14256 = vmatpush3.bf16.xpose.msra.mxu1 %v10480_v45 }
0x6248   : > { %14257 = vmatprep.subr.bf16.mxu1 %v15153_v1 }
0x624f   : > { %14258 = vmatpush3.bf16.xpose.msra.mxu1 %v10483_v12 }
0x6250   : > { %14271 = vmatprep.subr.bf16.mxu1 %v15153_v1 }
0x6319   : > { %v14248_v20 = vpop.f32.mrb[250].mxu1 }
0x631a   : > { %v10396_v15 = vmul.f32 0.35355338, %v14248_v20  ;;  %v10386_v23 = vpop.f32.mrb[251].mxu1 }
0x631b   : > { %v10395_v16 = vmul.f32 0.35355338, %v10386_v23 }
0x631c   : > { %v10400_v41 = vsel %vm699_vm5, %v10396_v15, -inf }
0x631d   : > { %10401 = vmax.xlane.f32.xlu1 %v10400_v41  ;;  %v10397_v30 = vsel %vm699_vm5, %v10395_v16, -inf }
0x631e   : > { %10398 = vmax.xlane.f32.xlu0 %v10397_v30  ;;  %v12613_v30 = vld [vmem:[%s17502_s4 + $0x6] ss:$0 sm:$0xff] }
0x63aa   : > { %v10402_v31 = vpop.xlane.xlu1 %10401 }
0x63ab   : > { %v10404_v37 = vsub.f32 %v10396_v15, %v10402_v31  ;;  %v10399_v40 = vpop.xlane.xlu0 %10398 }
0x63ac   : > { %v10403_v34 = vsub.f32 %v10395_v16, %v10399_v40 }
0x63ad   : > { %v10407_v42 = vmul.f32 1.442695, %v10404_v37 }
0x63ae   : > { %v10405_v0 = vmul.f32 1.442695, %v10403_v34 }
0x63af   : > { %15045 = vpow2.f32 %v10407_v42 }
0x63b0   : > { %15047 = vpow2.f32 %v10405_v0 }
0x63b9   : > { %v15046_v29 = vpop.eup %15045 }
0x63ba   : > { %v15048_v4 = vpop.eup %15047  ;;  %v10412_v44 = vsel %vm699_vm5, %v15046_v29, 0.0 }
0x63bb   : > { %10413 = vadd.xlane.f32.xlu1 %v10412_v44  ;;  %v10409_v61 = vsel %vm699_vm5, %v15048_v4, 0.0 }
0x63bc   : > { %10410 = vadd.xlane.f32.xlu0 %v10409_v61 }
0x6448   : > { %v10414_v24 = vpop.xlane.xlu1 %10413 }
0x6449   : > { %15049 = vrcp.f32 %v10414_v24  ;;  %v10411_v51 = vpop.xlane.xlu0 %10410 }
0x644a   : > { %15051 = vrcp.f32 %v10411_v51 }
0x6453   : > { %v15050_v52 = vpop.eup %15049 }
0x6454   : > { %v15052_v46 = vpop.eup %15051  ;;  %v10418_v47 = vmul.f32 %v15050_v52, %v15046_v29 }
0x6455   : > { %v10416_v54 = vmul.f32 %v15052_v46, %v15048_v4 }
0x6457   : > { %v10419_v55 = vpack.c.bf16 %v10418_v47, %v10416_v54 }
0x6459   : > { %14252 = vmatmul.mubr.msk.bf16.vlgmr.msra.gmra.mrb[8].mxu0 %vm699_vm5, %v10419_v55 }
0x645a   : > { %14264 = vmatpush3.bf16.xpose.msra.mxu0 %v10540_v57  ;;  %14267 = vmatprep.mubr.msk.bf16.mxu0 %vm15154_vm0, %v15153_v1 }
0x645b   : > { %14265 = vmatprep.subr.bf16.mxu0 %v15153_v1 }
0x6462   : > { %14266 = vmatpush3.bf16.xpose.msra.mxu0 %v10543_v59 }
0x6463   : > { %14279 = vmatprep.subr.bf16.mxu0 %v15153_v1 }
0x6469   : > { %14268 = vmatmul.mubr.msk.bf16.vlgmr.msra.gmra.mrb[12].mxu0 %vm609_vm3, %v10125_v19 }
0x646a   : > { %14280 = vmatpush3.bf16.msra.mxu0 %v14777_v63  ;;  %14283 = vmatprep.mubr.msk.bf16.mxu0 %vm15154_vm0, %v15153_v1 }
0x646b   : > { %14281 = vmatprep.subr.bf16.mxu0 %v15153_v1 }
0x646e   : > { %14282 = vmatpush3.bf16.msra.mxu0 %v14778_v32 }
0x6471   : > { %14284 = vmatmul.mubr.msk.bf16.vlgmr.msra.gmra.mrb[16].mxu0 %vm458_vm2, %v17117_v5 }
0x652c   : > { %v10458_v50 = vpop.f32.mrb[8].mxu0 }
0x652d   : > { %v14253_v38 = vpop.f32.mrb[9].mxu0 }
0x652e   : > { %v10461_v7 = vpop.f32.mrb[10].mxu0 }
0x652f   : > { %v10465_v8 = vpack.c.bf16 %v10461_v7, %v10458_v50  ;;  %v14254_v6 = vpop.f32.mrb[11].mxu0  ;;  %v14789_v50 = vld [vmem:[%s17501_s3 + $0x1e0] sm:$0xff]   ;;  %v14790_v7 = vld [vmem:[%s17501_s3 + $0x1e8] sm:$0xff]  }
0x6530   : > { %v10940_v38 = vsel %vm609_vm3, %v14789_v50, 0 }
0x6531   : > { %14260 = vmatmul.mubr.msk.bf16.vlgmr.msra.gmra.mrb[4].mxu1 %vm609_vm3, %v10465_v8 }
0x6532   : > { %14272 = vmatpush3.bf16.msra.mxu1 %v14781_v33  ;;  %14275 = vmatprep.mubr.msk.bf16.mxu1 %vm15154_vm0, %v15153_v1  ;;  %v10943_v33 = vsel %vm609_vm3, %v14790_v7, 0 }
0x6533   : > { %14273 = vmatprep.subr.bf16.mxu1 %v15153_v1 }
0x6536   : > { %14274 = vmatpush3.bf16.msra.mxu1 %v14782_v9 }
0x6537   : > { %14287 = vmatprep.subr.bf16.mxu1 %v15153_v1 }
0x6539   : > { %14276 = vmatmul.mubr.msk.bf16.vlgmr.msra.gmra.mrb[12].mxu1 %vm458_vm2, %v17117_v5 }
0x653a   : > { %14288 = vmatpush3.bf16.msra.mxu1 %v14783_v10  ;;  %14291 = vmatprep.mubr.msk.bf16.mxu1 %vm15154_vm0, %v15153_v1 }
0x653b   : > { %14289 = vmatprep.subr.bf16.mxu1 %v15153_v1 }
0x653c   : > { %v10579_v17 = vpop.f32.mrb[12].mxu0 }
0x653d   : > { %v14269_v14 = vpop.f32.mrb[13].mxu0 }
0x653e   : > { %v10582_v18 = vpop.f32.mrb[14].mxu0  ;;  %14290 = vmatpush3.bf16.msra.mxu1 %v14784_v11  ;;  %v14785_v14 = vld [vmem:[%s17501_s3 + $0x130] sm:$0xff]  }
0x653f   : > { %v14270_v19 = vpop.f32.mrb[15].mxu0  ;;  %14308 = vmatprep.subr.bf16.mxu1 %v15153_v1 }
0x6540   : > { %v14786_v19 = vld [vmem:[%s17501_s3 + $0x138] sm:$0xff]  }
0x6541   : > { %14292 = vmatmul.mubr.msk.bf16.vlgmr.msra.gmra.mrb[16].mxu1 %vm458_vm2, %v17117_v5 }
0x6542   : > { %14312 = vmatprep.mubr.msk.bf16.mxu1 %vm15154_vm0, %v15153_v1 }
0x6544   : > { %v10708_v21 = vpop.f32.mrb[16].mxu0 }
0x6545   : > { %v14285_v22 = vpop.f32.mrb[17].mxu0 }
0x6546   : > { %v10711_v39 = vpop.f32.mrb[18].mxu0  ;;  %v14788_v22 = vld [vmem:[%s17501_s3 + $0x178] sm:$0xff]  }
0x6547   : > { %v14517_v35 = vpack.c.bf16 %v10711_v39, %v10708_v21  ;;  %v14286_v28 = vpop.f32.mrb[19].mxu0  ;;  %14309 = vmatpush3.bf16.xpose.msra.mxu1 %v10940_v38  ;;  %v14787_v21 = vld [vmem:[%s17501_s3 + $0x170] sm:$0xff]  }
0x6548   : > { %14310 = vmatprep.subr.bf16.mxu1 %v15153_v1 }
0x6549   : > { %14519 = vmatprep.subr.msk.bf16.mxu0 %vm15369_vm4, %v14517_v35 }
0x654a   : > { %14522 = vmatpush3.bf16.xpose.msk.msra.mxu0 %vm15369_vm4, %v14517_v35 }
0x654b   : > { %14302 = vmatprep.subr.bf16.mxu0 %v15153_v1 }
0x654f   : > { %14311 = vmatpush3.bf16.xpose.msra.mxu1 %v10943_v33 }
0x6550   : > { %14332 = vmatprep.subr.bf16.mxu1 %v15153_v1 }
0x6604   : > { %v10519_v26 = vpop.f32.mrb[4].mxu1 }
0x6605   : > { %v17280_v20 = vadd.f32 %v10579_v17, %v10519_v26  ;;  %v14261_v15 = vpop.f32.mrb[5].mxu1  ;;  %v14791_v26 = vld [vmem:[%s17501_s3 + $0x1b0] sm:$0xff]  }
0x6606   : > { %v10522_v23 = vpop.f32.mrb[6].mxu1 }
0x6607   : > { %v17282_v16 = vadd.f32 %v10582_v18, %v10522_v23  ;;  %v14262_v41 = vpop.f32.mrb[7].mxu1 }
0x6608   : > { %v12648_v41 = vld [vmem:[%s17502_s4 + $0x7] ss:$0 sm:$0xff] }
0x660c   : > { %v10655_v31 = vpop.f32.mrb[12].mxu1 }
0x660d   : > { %v10656_v37 = vadd.f32 %v12613_v30, %v10655_v31  ;;  %v14277_v40 = vpop.f32.mrb[13].mxu1 }
0x660e   : > { %v10658_v34 = vpop.f32.mrb[14].mxu1 }
0x660f   : > { %v10659_v42 = vadd.f32 %v12613_v30, %v10658_v34  ;;  %v14278_v0 = vpop.f32.mrb[15].mxu1  ;;  %14299 = vmatprep.mubr.msk.f32.mxu0 %vm609_vm3, %v10656_v37  ;;  %v14792_v30 = vld [vmem:[%s17501_s3 + $0x1b8] sm:$0xff]  }
0x6611   : > { %14300 = vmatmul.mubr.msk.f32.vlgmr.msra.gmra.mrb[20].mxu0 %vm609_vm3, %v10659_v42 }
0x6612   : > { %14304 = vmatprep.mubr.msk.bf16.mxu0 %vm15154_vm0, %v15153_v1 }
0x6614   : > { %v10761_v29 = vpop.f32.mrb[16].mxu1 }
0x6615   : > { %v14293_v4 = vpop.f32.mrb[17].mxu1 }
0x6616   : > { %v10764_v44 = vpop.f32.mrb[18].mxu1 }
0x6617   : > { %v10880_v61 = vpack.c.bf16 %v10764_v44, %v10761_v29  ;;  %v14294_v3 = vpop.f32.mrb[19].mxu1 }
0x6619   : > { %14303 = vmatpush3.bf16.msra.mxu0 %v10880_v61 }
0x661a   : > { %14316 = vmatprep.subr.bf16.mxu0 %v15153_v1 }
0x66e4   : > { %v14301_v45 = vpop.f32.mrb[20].mxu0 }
0x66e5   : > { %v10856_v2 = vmul.f32 0.35355338, %v14301_v45  ;;  %v10846_v12 = vpop.f32.mrb[21].mxu0 }
0x66e6   : > { %v10855_v24 = vmul.f32 0.35355338, %v10846_v12 }
0x66e7   : > { %v10860_v51 = vsel %vm699_vm5, %v10856_v2, -inf }
0x66e8   : > { %10861 = vmax.xlane.f32.xlu1 %v10860_v51  ;;  %v10857_v52 = vsel %vm699_vm5, %v10855_v24, -inf }
0x66e9   : > { %10858 = vmax.xlane.f32.xlu0 %v10857_v52 }
0x6775   : > { %v10862_v53 = vpop.xlane.xlu1 %10861 }
0x6776   : > { %v10864_v46 = vsub.f32 %v10856_v2, %v10862_v53  ;;  %v10859_v47 = vpop.xlane.xlu0 %10858 }
0x6777   : > { %v10863_v54 = vsub.f32 %v10855_v24, %v10859_v47 }
0x6778   : > { %v10867_v55 = vmul.f32 1.442695, %v10864_v46 }
0x6779   : > { %v10865_v57 = vmul.f32 1.442695, %v10863_v54 }
0x677a   : > { %15053 = vpow2.f32 %v10867_v55 }
0x677b   : > { %15055 = vpow2.f32 %v10865_v57 }
0x6784   : > { %v15054_v27 = vpop.eup %15053 }
0x6785   : > { %v15056_v59 = vpop.eup %15055  ;;  %v10872_v63 = vsel %vm699_vm5, %v15054_v27, 0.0 }
0x6786   : > { %10873 = vadd.xlane.f32.xlu1 %v10872_v63  ;;  %v10869_v32 = vsel %vm699_vm5, %v15056_v59, 0.0 }
0x6787   : > { %10870 = vadd.xlane.f32.xlu0 %v10869_v32 }
0x6813   : > { %v10874_v8 = vpop.xlane.xlu1 %10873 }
0x6814   : > { %15057 = vrcp.f32 %v10874_v8  ;;  %v10871_v6 = vpop.xlane.xlu0 %10870 }
0x6815   : > { %15059 = vrcp.f32 %v10871_v6 }
0x681e   : > { %v15058_v9 = vpop.eup %15057 }
0x681f   : > { %v15060_v10 = vpop.eup %15059  ;;  %v10878_v11 = vmul.f32 %v15058_v9, %v15054_v27 }
0x6820   : > { %v10876_v17 = vmul.f32 %v15060_v10, %v15056_v59  ;;  %v14793_v10 = vld [vmem:[%s17501_s3 + $0x1f0] sm:$0xff]  }
0x6822   : > { %v10879_v18 = vpack.c.bf16 %v10878_v11, %v10876_v17  ;;  %v11342_v11 = vsel %vm609_vm3, %v14793_v10, 0  ;;  %v14794_v17 = vld [vmem:[%s17501_s3 + $0x1f8] sm:$0xff]  }
0x6824   : > { %14305 = vmatmul.mubr.msk.bf16.vlgmr.msra.gmra.mrb[28].mxu0 %vm699_vm5, %v10879_v18 }
0x6825   : > { %14317 = vmatpush3.bf16.msra.mxu0 %v14785_v14  ;;  %14320 = vmatprep.mubr.msk.bf16.mxu0 %vm15154_vm0, %v15153_v1  ;;  %v11345_v14 = vsel %vm609_vm3, %v14794_v17, 0 }
0x6826   : > { %14318 = vmatprep.subr.bf16.mxu0 %v15153_v1 }
0x6829   : > { %14319 = vmatpush3.bf16.msra.mxu0 %v14786_v19 }
0x682a   : > { %14324 = vmatprep.subr.bf16.mxu0 %v15153_v1 }
0x682c   : > { %14321 = vmatmul.mubr.msk.bf16.vlgmr.msra.gmra.mrb[32].mxu0 %vm458_vm2, %v17117_v5 }
0x682d   : > { %14325 = vmatpush3.bf16.msra.mxu0 %v14787_v21  ;;  %14328 = vmatprep.mubr.msk.bf16.mxu0 %vm15154_vm0, %v15153_v1 }
0x682e   : > { %14326 = vmatprep.subr.bf16.mxu0 %v15153_v1 }
0x6831   : > { %14327 = vmatpush3.bf16.msra.mxu0 %v14788_v22 }
0x6834   : > { %14329 = vmatmul.mubr.msk.bf16.vlgmr.msra.gmra.mrb[36].mxu0 %vm458_vm2, %v17117_v5 }
0x68f7   : > { %v10918_v39 = vpop.f32.mrb[28].mxu0 }
0x68f8   : > { %v14306_v35 = vpop.f32.mrb[29].mxu0 }
0x68f9   : > { %v10921_v28 = vpop.f32.mrb[30].mxu0 }
0x68fa   : > { %v10925_v15 = vpack.c.bf16 %v10921_v28, %v10918_v39  ;;  %v14307_v23 = vpop.f32.mrb[31].mxu0 }
0x68fc   : > { %14313 = vmatmul.mubr.msk.bf16.vlgmr.msra.gmra.mrb[8].mxu1 %vm609_vm3, %v10925_v15 }
0x68fd   : > { %14333 = vmatpush3.bf16.msra.mxu1 %v14791_v26  ;;  %14336 = vmatprep.mubr.msk.bf16.mxu1 %vm15154_vm0, %v15153_v1 }
0x68fe   : > { %14334 = vmatprep.subr.bf16.mxu1 %v15153_v1 }
0x68ff   : > { %v11057_v31 = vpop.f32.mrb[32].mxu0 }
0x6900   : > { %v11058_v37 = vadd.f32 %v12648_v41, %v11057_v31  ;;  %v14322_v40 = vpop.f32.mrb[33].mxu0  ;;  %v17387_v31 = vld [vmem:[%s17503_s5 + $0x8] sm:$0xff] }
0x6901   : > { %v11060_v34 = vpop.f32.mrb[34].mxu0  ;;  %14335 = vmatpush3.bf16.msra.mxu1 %v14792_v30  ;;  %v11444_v17 = vrot.slane %v17387_v31, %v15654_v62  ;;  %v11519_v62 = vrot.slane %v17387_v31, %v15662_v25 }
0x6902   : > { %v14323_v42 = vpop.f32.mrb[35].mxu0  ;;  %14344 = vmatprep.mubr.msk.f32.mxu0 %vm609_vm3, %v11058_v37  ;;  %14347 = vmatprep.subr.bf16.mxu1 %v15153_v1  ;;  %v11061_v3 = vadd.f32 %v12648_v41, %v11060_v34  ;;  %v11393_v37 = vrot.slane %v17387_v31, %v15607_v13 }
0x6904   : > { %14337 = vmatmul.mubr.msk.bf16.vlgmr.msra.gmra.mrb[20].mxu1 %vm458_vm2, %v17117_v5 }
0x6905   : > { %14349 = vmatprep.mubr.msk.bf16.mxu1 %vm15154_vm0, %v15153_v1 }
0x6907   : > { %v11110_v0 = vpop.f32.mrb[36].mxu0 }
0x6908   : > { %v14330_v29 = vpop.f32.mrb[37].mxu0 }
0x6909   : > { %v11113_v4 = vpop.f32.mrb[38].mxu0 }
0x690a   : > { %v14523_v44 = vpack.c.bf16 %v11113_v4, %v11110_v0  ;;  %v14331_v61 = vpop.f32.mrb[39].mxu0 }
0x690c   : > { %14525 = vmatprep.subr.msk.bf16.mxu0 %vm15369_vm4, %v14523_v44 }
0x690d   : > { %14528 = vmatpush3.bf16.xpose.msk.msra.mxu0 %vm15369_vm4, %v14523_v44 }
0x690e   : > { %14353 = vmatprep.subr.bf16.mxu0 %v15153_v1 }
0x6914   : > { %14345 = vmatmul.mubr.msk.f32.vlgmr.msra.gmra.mrb[22].mxu0 %vm609_vm3, %v11061_v3 }
0x6915   : > { %14357 = vmatprep.mubr.msk.bf16.mxu0 %vm15154_vm0, %v15153_v1  ;;  %14354 = vmatpush3.bf16.xpose.msra.mxu0 %v11342_v11 }
0x6916   : > { %14355 = vmatprep.subr.bf16.mxu0 %v15153_v1 }
0x691d   : > { %14356 = vmatpush3.bf16.xpose.msra.mxu0 %v11345_v14 }
0x691e   : > { %14377 = vmatprep.subr.bf16.mxu0 %v15153_v1 }
0x69cf   : > { %v10979_v5 = vpop.f32.mrb[8].mxu1 }
0x69d0   : > { %v17358_v45 = vadd.f32 %v10979_v5, %v17280_v20  ;;  %v14314_v2 = vpop.f32.mrb[9].mxu1 }
0x69d1   : > { %v10982_v12 = vpop.f32.mrb[10].mxu1 }
0x69d2   : > { %v17361_v24 = vadd.f32 %v10982_v12, %v17282_v16  ;;  %v14315_v51 = vpop.f32.mrb[11].mxu1 }
0x69d7   : > { %v11163_v43 = vpop.f32.mrb[20].mxu1 }
0x69d8   : > { %v14338_v52 = vpop.f32.mrb[21].mxu1 }
0x69d9   : > { %v11166_v53 = vpop.f32.mrb[22].mxu1 }
0x69da   : > { %v11282_v46 = vpack.c.bf16 %v11166_v53, %v11163_v43  ;;  %v14339_v47 = vpop.f32.mrb[23].mxu1 }
0x69dc   : > { %14348 = vmatpush3.bf16.msra.mxu1 %v11282_v46 }
0x69dd   : > { %14361 = vmatprep.subr.bf16.mxu1 %v15153_v1 }
0x69e7   : > { %v14346_v54 = vpop.f32.mrb[22].mxu0 }
0x69e8   : > { %v11258_v55 = vmul.f32 0.35355338, %v14346_v54  ;;  %v11248_v57 = vpop.f32.mrb[23].mxu0  ;;  %v14796_v54 = vld [vmem:[%s17504_s6 + $0x18] sm:$0xff]  }
0x69e9   : > { %v11257_v27 = vmul.f32 0.35355338, %v11248_v57 }
0x69ea   : > { %v11262_v20 = vsel %vm699_vm5, %v11258_v55, -inf }
0x69eb   : > { %11263 = vmax.xlane.f32.xlu1 %v11262_v20  ;;  %v11259_v59 = vsel %vm699_vm5, %v11257_v27, -inf }
0x69ec   : > { %11260 = vmax.xlane.f32.xlu0 %v11259_v59 }
0x6a78   : > { %v11264_v16 = vpop.xlane.xlu1 %11263 }
0x6a79   : > { %v11266_v63 = vsub.f32 %v11258_v55, %v11264_v16  ;;  %v11261_v32 = vpop.xlane.xlu0 %11260 }
0x6a7a   : > { %v11265_v50 = vsub.f32 %v11257_v27, %v11261_v32 }
0x6a7b   : > { %v11269_v38 = vmul.f32 1.442695, %v11266_v63  ;;  %v11427_v63 = vrot.slane %v17387_v31, %v15633_v48  ;;  %v14797_v48 = vld [vmem:[%s17505_s7 + $0x10] sm:$0xff]  }
0x6a7c   : > { %v11267_v7 = vmul.f32 1.442695, %v11265_v50 }
0x6a7d   : > { %15061 = vpow2.f32 %v11269_v38 }
0x6a7e   : > { %15063 = vpow2.f32 %v11267_v7  ;;  %v11433_v7 = vrot.slane %v17387_v31, %v15638_v49  ;;  %v14798_v49 = vld [vmem:[%s17505_s7 + $0x18] sm:$0xff]  }
0x6a87   : > { %v15062_v33 = vpop.eup %15061 }
0x6a88   : > { %v15064_v8 = vpop.eup %15063  ;;  %v11274_v6 = vsel %vm699_vm5, %v15062_v33, 0.0 }
0x6a89   : > { %11275 = vadd.xlane.f32.xlu1 %v11274_v6  ;;  %v11271_v9 = vsel %vm699_vm5, %v15064_v8, 0.0 }
0x6a8a   : > { %11272 = vadd.xlane.f32.xlu0 %v11271_v9 }
0x6b16   : > { %v11276_v18 = vpop.xlane.xlu1 %11275 }
0x6b17   : > { %15065 = vrcp.f32 %v11276_v18  ;;  %v11273_v19 = vpop.xlane.xlu0 %11272 }
0x6b18   : > { %15067 = vrcp.f32 %v11273_v19 }
0x6b21   : > { %v15066_v21 = vpop.eup %15065 }
0x6b22   : > { %v15068_v22 = vpop.eup %15067  ;;  %v11280_v39 = vmul.f32 %v15066_v21, %v15062_v33 }
0x6b23   : > { %v11278_v35 = vmul.f32 %v15068_v22, %v15064_v8 }
0x6b25   : > { %v11281_v28 = vpack.c.bf16 %v11280_v39, %v11278_v35 }
0x6b27   : > { %14350 = vmatmul.mubr.msk.bf16.vlgmr.msra.gmra.mrb[24].mxu1 %vm699_vm5, %v11281_v28 }
0x6b28   : > { %14365 = vmatprep.mubr.msk.bf16.mxu1 %vm15154_vm0, %v15153_v1 }
0x6bfa   : > { %v11320_v26 = vpop.f32.mrb[24].mxu1 }
0x6bfb   : > { %v14351_v15 = vpop.f32.mrb[25].mxu1 }
0x6bfc   : > { %v11323_v23 = vpop.f32.mrb[26].mxu1 }
0x6bfd   : > { %v11327_v41 = vpack.c.bf16 %v11323_v23, %v11320_v26  ;;  %v14352_v30 = vpop.f32.mrb[27].mxu1 }
0x6bff   : > { %14358 = vmatmul.mubr.msk.bf16.vlgmr.msra.gmra.mrb[24].mxu0 %vm609_vm3, %v11327_v41 }
0x6c00   : > { %14381 = vmatprep.mubr.msk.bf16.mxu0 %vm15154_vm0, %v15153_v1 }
0x6cd2   : > { %v11381_v40 = vpop.f32.mrb[24].mxu0 }
0x6cd3   : > { %v11388_v34 = vadd.f32 %v11381_v40, %v17358_v45  ;;  %v14359_v42 = vpop.f32.mrb[25].mxu0 }
0x6cd4   : > { %v11384_v0 = vpop.f32.mrb[26].mxu0 }
0x6cd5   : > { %v11394_v29 = vadd.f32 %v11393_v37, %v11388_v34  ;;  %v11389_v4 = vadd.f32 %v11384_v0, %v17361_v24  ;;  %v14360_v44 = vpop.f32.mrb[27].mxu0 }
0x6cd7   : > { %v11395_v61 = vadd.f32 %v11393_v37, %v11389_v4  ;;  %v11396_v3 = vadd.f32 %v11394_v29, %v17108_v60 }
0x6cd9   : > { %v11398_v5 = vsel %vm458_vm2, %v11396_v3, 0.0  ;;  %v11397_v2 = vadd.f32 %v11395_v61, %v17110_v36  ;;  %v14795_v36 = vld [vmem:[%s17504_s6 + $0x10] sm:$0xff]  }
0x6cda   : > { %11399 = vadd.xlane.f32.xlu0 %v11398_v5  ;;  %14362 = vmatpush3.bf16.msra.mxu1 %v14795_v36  ;;  %v14799_v36 = vld [vmem:[%s17506_s8] sm:$0xff]  }
0x6cdb   : > { %v11401_v12 = vsel %vm458_vm2, %v11397_v2, 0.0  ;;  %14363 = vmatprep.subr.bf16.mxu1 %v15153_v1  ;;  %14378 = vmatpush3.bf16.msra.mxu0 %v14799_v36 }
0x6cdc   : > { %11402 = vadd.xlane.f32.xlu1 %v11401_v12  ;;  %14379 = vmatprep.subr.bf16.mxu0 %v15153_v1 }
0x6cde   : > { %14364 = vmatpush3.bf16.msra.mxu1 %v14796_v54  ;;  %v14800_v54 = vld [vmem:[%s17506_s8 + $0x8] sm:$0xff]  }
0x6cdf   : > { %14369 = vmatprep.subr.bf16.mxu1 %v15153_v1  ;;  %14380 = vmatpush3.bf16.msra.mxu0 %v14800_v54 }
0x6d67   : > { %v11400_v13 = vpop.xlane.xlu0 %11399 }
0x6d68   : > { %v11404_v51 = vmul.f32 0.03125, %v11400_v13 }
0x6d69   : > { %v11403_v45 = vpop.xlane.xlu1 %11402 }
0x6d6a   : > { %v11406_v43 = vsub.f32 %v11396_v3, %v11404_v51  ;;  %v11405_v52 = vmul.f32 0.03125, %v11403_v45 }
0x6d6c   : > { %v11407_v53 = vsub.f32 %v11397_v2, %v11405_v52  ;;  %v11408_v46 = vmul.f32 %v11406_v43, %v11406_v43 }
0x6d6e   : > { %v11410_v24 = vsel %vm458_vm2, %v11408_v46, 0.0  ;;  %v11409_v47 = vmul.f32 %v11407_v53, %v11407_v53 }
0x6d6f   : > { %11411 = vadd.xlane.f32.xlu0 %v11410_v24 }
0x6d70   : > { %v11413_v60 = vsel %vm458_vm2, %v11409_v47, 0.0 }
0x6d71   : > { %11414 = vadd.xlane.f32.xlu1 %v11413_v60 }
0x6dfc   : > { %v11412_v55 = vpop.xlane.xlu0 %11411 }
0x6dfd   : > { %v11416_v57 = vmul.f32 0.03125, %v11412_v55 }
0x6dfe   : > { %v11415_v27 = vpop.xlane.xlu1 %11414 }
0x6dff   : > { %v11418_v20 = vadd.f32 1e-06, %v11416_v57  ;;  %v11417_v59 = vmul.f32 0.03125, %v11415_v27 }
0x6e01   : > { %15069 = vrsqrt.f32 %v11418_v20  ;;  %v11419_v16 = vadd.f32 1e-06, %v11417_v59 }
0x6e03   : > { %15071 = vrsqrt.f32 %v11419_v16 }
0x6e0b   : > { %v15070_v32 = vpop.eup %15069 }
0x6e0c   : > { %v11422_v50 = vmul.f32 %v15070_v32, %v11406_v43 }
0x6e0d   : > { %v15072_v38 = vpop.eup %15071 }
0x6e0e   : > { %v11428_v33 = vmul.f32 %v11427_v63, %v11422_v50  ;;  %v11423_v8 = vmul.f32 %v15072_v38, %v11407_v53 }
0x6e10   : > { %v11429_v6 = vmul.f32 %v11427_v63, %v11423_v8  ;;  %v11434_v9 = vadd.f32 %v11433_v7, %v11428_v33  ;;  %v11607_v63 = vrot.slane %v17387_v31, %v15686_v56 }
0x6e12   : > { %v11435_v10 = vadd.f32 %v11433_v7, %v11429_v6 }
0x6e14   : > { %v11436_v11 = vpack.c.bf16 %v11435_v10, %v11434_v9 }
0x6e16   : > { %14366 = vmatmul.mubr.msk.bf16.vlgmr.msra.gmra.mrb[28].mxu1 %vm458_vm2, %v11436_v11 }
0x6e17   : > { %14373 = vmatprep.mubr.msk.bf16.mxu1 %vm15154_vm0, %v15153_v1  ;;  %14370 = vmatpush3.bf16.msra.mxu1 %v14797_v48 }
0x6e18   : > { %14371 = vmatprep.subr.bf16.mxu1 %v15153_v1  ;;  %v11613_v1 = vrot.slane %v17387_v31, %v15691_v58 }
0x6e1b   : > { %14372 = vmatpush3.bf16.msra.mxu1 %v14798_v49 }
0x6ee9   : > { %v11494_v14 = vpop.f32.mrb[28].mxu1 }
0x6eea   : > { %v11495_v18 = vadd.f32 %v11494_v14, %v11444_v17  ;;  %v14367_v19 = vpop.f32.mrb[29].mxu1 }
0x6eeb   : > { %v11497_v21 = vpop.f32.mrb[30].mxu1 }
0x6eec   : > { %v11503_v22 = vmul.f32 0.70710677, %v11495_v18  ;;  %v11498_v39 = vadd.f32 %v11497_v21, %v11444_v17  ;;  %v14368_v35 = vpop.f32.mrb[31].mxu1  ;;  %v11501_v41 = vmul.f32 0.5, %v11495_v18 }
0x6eee   : > { %15073 = verf.f32 %v11503_v22  ;;  %v11504_v28 = vmul.f32 0.70710677, %v11498_v39  ;;  %v11502_v30 = vmul.f32 0.5, %v11498_v39 }
0x6ef0   : > { %15075 = verf.f32 %v11504_v28 }
0x6ef8   : > { %v15074_v26 = vpop.eup %15073 }
0x6ef9   : > { %v11507_v15 = vadd.f32 1.0, %v15074_v26 }
0x6efa   : > { %v15076_v23 = vpop.eup %15075 }
0x6efb   : > { %v11508_v37 = vadd.f32 1.0, %v15076_v23  ;;  %v11509_v40 = vmul.f32 %v11507_v15, %v11501_v41 }
0x6efd   : > { %v11510_v34 = vmul.f32 %v11508_v37, %v11502_v30 }
0x6eff   : > { %v11511_v42 = vpack.c.bf16 %v11510_v34, %v11509_v40 }
0x6f01   : > { %14374 = vmatmul.mubr.msk.bf16.vlgmr.msra.gmra.mrb[32].mxu1 %vm458_vm2, %v11511_v42 }
0x6fd4   : > { %v11569_v0 = vpop.f32.mrb[32].mxu1 }
0x6fd5   : > { %v11570_v29 = vadd.f32 %v11569_v0, %v11519_v62  ;;  %v14375_v4 = vpop.f32.mrb[33].mxu1 }
0x6fd6   : > { %v11572_v44 = vpop.f32.mrb[34].mxu1 }
0x6fd7   : > { %v11576_v61 = vadd.f32 %v11570_v29, %v11434_v9  ;;  %v11573_v3 = vadd.f32 %v11572_v44, %v11519_v62  ;;  %v14376_v5 = vpop.f32.mrb[35].mxu1 }
0x6fd9   : > { %v11577_v2 = vadd.f32 %v11573_v3, %v11435_v10  ;;  %v11578_v12 = vsel %vm458_vm2, %v11576_v61, 0.0 }
0x6fda   : > { %11579 = vadd.xlane.f32.xlu0 %v11578_v12 }
0x6fdb   : > { %v11581_v13 = vsel %vm458_vm2, %v11577_v2, 0.0 }
0x6fdc   : > { %11582 = vadd.xlane.f32.xlu1 %v11581_v13 }
0x7067   : > { %v11580_v51 = vpop.xlane.xlu0 %11579 }
0x7068   : > { %v11584_v45 = vmul.f32 0.03125, %v11580_v51 }
0x7069   : > { %v11583_v43 = vpop.xlane.xlu1 %11582 }
0x706a   : > { %v11586_v52 = vsub.f32 %v11576_v61, %v11584_v45  ;;  %v11585_v53 = vmul.f32 0.03125, %v11583_v43 }
0x706c   : > { %v11587_v25 = vsub.f32 %v11577_v2, %v11585_v53  ;;  %v11588_v46 = vmul.f32 %v11586_v52, %v11586_v52 }
0x706e   : > { %v11590_v24 = vsel %vm458_vm2, %v11588_v46, 0.0  ;;  %v11589_v47 = vmul.f32 %v11587_v25, %v11587_v25 }
0x706f   : > { %11591 = vadd.xlane.f32.xlu0 %v11590_v24 }
0x7070   : > { %v11593_v60 = vsel %vm458_vm2, %v11589_v47, 0.0 }
0x7071   : > { %11594 = vadd.xlane.f32.xlu1 %v11593_v60 }
0x70fc   : > { %v11592_v55 = vpop.xlane.xlu0 %11591 }
0x70fd   : > { %v11596_v57 = vmul.f32 0.03125, %v11592_v55 }
0x70fe   : > { %v11595_v27 = vpop.xlane.xlu1 %11594 }
0x70ff   : > { %v11598_v20 = vadd.f32 1e-06, %v11596_v57  ;;  %v11597_v59 = vmul.f32 0.03125, %v11595_v27 }
0x7101   : > { %15077 = vrsqrt.f32 %v11598_v20  ;;  %v11599_v16 = vadd.f32 1e-06, %v11597_v59 }
0x7103   : > { %15079 = vrsqrt.f32 %v11599_v16 }
0x710b   : > { %v15078_v32 = vpop.eup %15077 }
0x710c   : > { %v11602_v50 = vmul.f32 %v15078_v32, %v11586_v52 }
0x710d   : > { %v15080_v38 = vpop.eup %15079 }
0x710e   : > { %v11608_v7 = vmul.f32 %v11607_v63, %v11602_v50  ;;  %v11603_v33 = vmul.f32 %v15080_v38, %v11587_v25 }
0x7110   : > { %v11609_v8 = vmul.f32 %v11607_v63, %v11603_v33  ;;  %v11614_v6 = vadd.f32 %v11613_v1, %v11608_v7 }
0x7112   : > { %v11615_v9 = vadd.f32 %v11613_v1, %v11609_v8 }
0x7114   : > { %v11616_v10 = vpack.c.bf16 %v11615_v9, %v11614_v6 }
0x7116   : > { %14382 = vmatmul.mubr.msk.bf16.vlgmr.msra.gmra.mrb[40].mxu0 %vm458_vm2, %v11616_v10 }
0x71e9   : > { %v11670_v11 = vpop.f32.mrb[40].mxu0 }
0x71ea   : > { %v12683_v48 = vmul.f32 -1.442695, %v11670_v11  ;;  %v14383_v49 = vpop.f32.mrb[41].mxu0 }
0x71eb   : > { %v11673_v56 = vpop.f32.mrb[42].mxu0 }
0x71ec   : > { %15081 = vpow2.f32 %v12683_v48  ;;  %v12684_v17 = vmul.f32 -1.442695, %v11673_v56  ;;  %v14384_v14 = vpop.f32.mrb[43].mxu0 }
0x71ee   : > { %15083 = vpow2.f32 %v12684_v17 }
0x71f6   : > { %v15082_v58 = vpop.eup %15081 }
0x71f7   : > { %v11683_v31 = vadd.f32 1.0, %v15082_v58 }
0x71f8   : > { %v15084_v18 = vpop.eup %15083 }
0x71f9   : > { %15085 = vrcp.f32 %v11683_v31  ;;  %v11684_v19 = vadd.f32 1.0, %v15084_v18 }
0x71fb   : > { %15087 = vrcp.f32 %v11684_v19 }
0x7203   : > { %v15086_v21 = vpop.eup %15085 }
0x7204   : > { %12685 = vst.msk [vmem:[%s16103_s24 + $0x20] sm:$0xff] %vm699_vm5, %v15086_v21 }
0x7205   : > { %v15088_v22 = vpop.eup %15087 }
0x7206   : > { %12686 = vst.msk [vmem:[%s16103_s24 + $0x28] sm:$0xff] %vm699_vm5, %v15088_v22 }
0x7207   : > { %15102 = shalt.err (!%p15099_p3)
}
0x7208   : > { %s15103_s28 = scalar_lea.hbm %s17447_s25, 768  ;;  %s15107_s17 = scalar_lea.hbm %s17507_s9, 1536 }
0x7209   : > { %p15104_p4 = scmp.ne.s32.totalorder %s17447_s25, %s15103_s28  ;;  %p15108_p9 = scmp.lt.u32.totalorder %s17447_s25, %s17507_s9 }
0x720a   : > { %p15109_p10 = scmp.lt.u32.totalorder %s15107_s17, %s15103_s28  ;;  %p15111_p12 = scmp.lt.u32.totalorder %s15103_s28, %s17447_s25 }
0x720b   : > { %p15105_p7 = pnand %p15104_p4, %p15246_p5 }
0x720c   : > { %p15110_p11 = por %p15109_p10, %p15108_p9 }
0x720d   : > { %p15106_p8 = pneg %p15105_p7 }
0x720e   : > { %p15112_p13 = por %p15111_p12, %p15110_p11 }
0x7210   : > { %p15113_p0 = pnand %p15112_p13, %p15106_p8 }
0x7212   : > { %15116 = shalt.err (!%p15113_p0)
}
0x7213   : > { %s15156_s13 = smov 128   ;;  %s15157_s27 = smov 8  }
0x7214   : > { %14531 = dma.vmem_to_hbm [thread:$0]  (%p15246_p5), %s17449_s21, 768, %s17447_s25, %s17457_s26, %s15156_s13, %s15156_s13, %s15157_s27  }
0x7215 PF: > { %p14537_p1 = scmp.ge.s32.totalorder %s15151_s12, 2  ;;  %s11721_s29 = sand.u32 1, %s15139_s30  }
0x7216   : > { %s11722_s14 = scalar_lea.sflag [#allocation3], %s11721_s29 }
0x7217   : > { %p14534_p2 = pnand %p14537_p1, %p15250_p6 }
0x7219   : > { %15134 = dma.done.wait (!%p14534_p2), %s11722_s14, 768  }
0x721a   : > { %15136 = vsyncadd (!%p14534_p2), %s11722_s14, 4294966528  ;;  %p19_p3 = scmp.ge.s32.totalorder %s15233_s15, 4   ;;  %s17512_s30 = smov %s15143_s10 }
0x721b   : > { %s17513_s10 = smov %s15147_s11  ;;  %s17514_s11 = smov %s15244_s18 }
0x721c   : > { %s17515_s12 = smov %s15233_s15  ;;  %21 = sbr.rel (!%p19_p3) target bundleno = 3 (0x3), region = 134 }
0x7223   :  { %11727 = vsyncpa [#allocation3], 1 }
0x7224   :  { %11729 = vsyncpa [#allocation3 + $0x1], 1 }

</bundles_post_ra>
